<compile_context>
chip_gen: v5e
topology: v5e:2x2
jax: 0.10.0
libtpu: 0.0.40
codegen_flags: <defaults>
</compile_context>

<pallas_src>
import jax
import jax.numpy as jnp
import numpy as np
from jax.experimental import pallas as pl
from jax.experimental.pallas import tpu as pltpu


# ------------------------------ small helpers -------------------------------

def _log2(v):
    assert v > 0 and (v & (v - 1)) == 0, f"{v} is not a power of two"
    return v.bit_length() - 1


def _full_spec(shape):
    """BlockSpec covering the whole array (grid=(1,))."""
    zeros = (0,) * len(shape)
    return pl.BlockSpec(shape, lambda i: zeros)


# ------------------------------ Pallas kernel --------------------------------

def _pool_gather_matrix(n_batch, hw, a, b, order_sn):
    """0/1 f32 matrix G of shape (M_out, 9*M_in) such that
         G @ stack_k(A @ W_k) == conv3x3_pad1(A)[:, 2*ph+a, 2*pw+b, :]
    Rows are pooled output positions, columns are (tap k = 3*kh+kw, input row).
    Out-of-bounds taps hit no column -> zero (i.e. conv zero padding).
    Output row order: (n, ph, pw) if not order_sn else (ph, pw, n)."""
    H = W = hw
    PH = PW = hw // 2
    m_in = n_batch * H * W
    m_out = n_batch * PH * PW
    shape = (m_out, 9 * m_in)
    r = jax.lax.broadcasted_iota(jnp.int32, shape, 0)
    cc = jax.lax.broadcasted_iota(jnp.int32, shape, 1)

    # column decode: tap index + input (n, h, w)   (shift/and only -- all pow2)
    k = cc >> _log2(m_in)
    c = cc & (m_in - 1)
    kh = jnp.where(k >= 6, 2, jnp.where(k >= 3, 1, 0))
    kw = k - 3 * kh
    n_c = c >> _log2(H * W)
    rc = c & (H * W - 1)
    h = rc >> _log2(W)
    w = rc & (W - 1)

    # row decode: output (n, ph, pw)
    if order_sn:
        n_r = r & (n_batch - 1)
        s = r >> _log2(n_batch)
        ph = s >> _log2(PW)
        pw = s & (PW - 1)
    else:
        n_r = r >> _log2(PH * PW)
        rr = r & (PH * PW - 1)
        ph = rr >> _log2(PW)
        pw = rr & (PW - 1)

    hit = ((n_r == n_c)
           & (h == 2 * ph + (a - 1) + kh)
           & (w == 2 * pw + (b - 1) + kw))
    return jnp.where(hit, 1.0, 0.0)


def _conv_pool_relu_block(a_in, w_ref, b_ref, bstk_ref, n_batch, hw, order_sn):
    """3x3 conv (stride 1, pad 1) + 2x2 maxpool + bias + ReLU.

    a_in:     (n_batch*hw*hw, Cin) f32, rows ordered (n, h, w)
    w_ref:    (9, Cin, Cout) bf16, tap order k = 3*kh + kw
    b_ref:    (1, Cout) f32
    bstk_ref: VMEM scratch (9*n_batch*hw*hw, Cout) f32
    returns   (n_batch*(hw//2)**2, Cout) f32
    """
    m_in = n_batch * hw * hw
    a_bf = a_in.astype(jnp.bfloat16)

    # per-tap matmuls, stacked into VMEM scratch: rows [k*m_in, (k+1)*m_in) hold A @ W_k
    for k in range(9):
        bstk_ref[k * m_in:(k + 1) * m_in, :] = jnp.dot(
            a_bf, w_ref[k], preferred_element_type=jnp.float32)
    taps = bstk_ref[...]                                   # (9*m_in, Cout) f32

    # one gather-matmul per pool-window position, max over the 4 positions
    pooled = None
    for a in range(2):
        for b in range(2):
            g = _pool_gather_matrix(n_batch, hw, a, b, order_sn)
            o = jnp.dot(g, taps, preferred_element_type=jnp.float32)
            pooled = o if pooled is None else jnp.maximum(pooled, o)

    # bias hoisted out of the pool max (window-invariant), ReLU after pool
    return jnp.maximum(pooled + b_ref[...], 0.0)


def _simplenet_kernel(p_ref, w1_ref, b1_ref, w2_ref, b2_ref, w3_ref, b3_ref,
                      lw1_ref, lb1_ref, lw2_ref, lb2_ref, o_ref,
                      bstk2_ref, bstk3_ref, flat_ref):
    n = o_ref.shape[0]
    m1 = n * 8 * 8                            # rows of the pooled block-1 output

    # ---- block 1: conv(3->16, k3, s2, p1) + maxpool2 + ReLU ; 32 -> 16 -> 8 ----
    # patches rows are grouped by pool position (a,b): ONE matmul, then 4-way max.
    y1 = jnp.dot(p_ref[...].astype(jnp.bfloat16), w1_ref[...],
                 preferred_element_type=jnp.float32)                  # (4*m1, 16)
    pool1 = jnp.maximum(jnp.maximum(y1[0 * m1:1 * m1], y1[1 * m1:2 * m1]),
                        jnp.maximum(y1[2 * m1:3 * m1], y1[3 * m1:4 * m1]))
    a1 = jnp.maximum(pool1 + b1_ref[...], 0.0)                        # (m1, 16), rows (n,h,w)

    # ---- block 2: conv(16->32) + maxpool2 + ReLU ; 8 -> 8 -> 4 ----
    a2 = _conv_pool_relu_block(a1, w2_ref, b2_ref, bstk2_ref, n, 8, order_sn=False)

    # ---- block 3: conv(32->64) + maxpool2 + ReLU ; 4 -> 4 -> 2 ; rows (ph,pw,n) ----
    a3 = _conv_pool_relu_block(a2, w3_ref, b3_ref, bstk3_ref, n, 4, order_sn=True)

    # ---- flatten to (n, 256) with columns ordered (s=ph*2+pw, c): tiny one-hot
    #      gathers (no unaligned value slicing).  NCHW order is folded into lw1. ----
    for s in range(4):
        row = jax.lax.broadcasted_iota(jnp.int32, (n, 4 * n), 0)
        col = jax.lax.broadcasted_iota(jnp.int32, (n, 4 * n), 1)
        r_s = jnp.where(col == s * n + row, 1.0, 0.0)                 # (n, 4n) one-hot
        flat_ref[:, s * 64:(s + 1) * 64] = jnp.dot(
            r_s, a3, preferred_element_type=jnp.float32)              # (n, 64)

    # ---- dense head: lin1 + ReLU + lin2 + sigmoid (all fused, f32 elementwise) ----
    h = jnp.dot(flat_ref[...].astype(jnp.bfloat16), lw1_ref[...],
                preferred_element_type=jnp.float32) + lb1_ref[...]
    h = jnp.maximum(h, 0.0)                                           # (n, 256)
    y = jnp.sum(h * lw2_ref[...], axis=-1, keepdims=True) + lb2_ref[...]
    o_ref[...] = 1.0 / (1.0 + jnp.exp(-y))


# ------------------------------- JAX wrapper ----------------------------------

def im2col_block1(x_nchw):
    """im2col patches for conv1 (k3, s2, p1), grouped by 2x2 pool window.
    Returns (4*N*64, 27) f32; rows ordered (pool pos (a,b), n, ph, pw),
    columns ordered (kh, kw, cin).  Operates on the raw input only."""
    x = jnp.transpose(x_nchw, (0, 2, 3, 1))                 # NHWC
    x = jnp.pad(x, ((0, 0), (1, 1), (1, 1), (0, 0)))        # (N, 34, 34, 3)
    n = x.shape[0]
    cols = [x[:, kh:kh + 32:2, kw:kw + 32:2, :]             # (N, 16, 16, 3)
            for kh in range(3) for kw in range(3)]
    p = jnp.stack(cols, axis=3).reshape(n, 16, 16, 27)
    p = p.reshape(n, 8, 2, 8, 2, 27).transpose(2, 4, 0, 1, 3, 5)  # (a, b, n, ph, pw, K)
    return p.reshape(4 * n * 64, 27)


def simplenet_forward(x_nchw, params):
    n = x_nchw.shape[0]
    assert n & (n - 1) == 0, "batch size must be a power of two (in-kernel shift decodes)"
    patches = im2col_block1(x_nchw)

    args = (patches, params["w1m"], params["b1r"], params["w2s"], params["b2r"],
            params["w3s"], params["b3r"], params["lw1p"], params["lb1r"],
            params["lw2r"], params["lb2r"])

    out = pl.pallas_call(
        _simplenet_kernel,
        out_shape=jax.ShapeDtypeStruct((n, 1), jnp.float32),
        grid=(1,),
        in_specs=[_full_spec(a.shape) for a in args],
        out_specs=_full_spec((n, 1)),
        scratch_shapes=[
            pltpu.VMEM((9 * n * 64, 32), jnp.float32),   # block-2 stacked per-tap matmuls
            pltpu.VMEM((9 * n * 16, 64), jnp.float32),   # block-3 stacked per-tap matmuls
            pltpu.VMEM((n, 256), jnp.float32),           # flattened head input
        ],
        compiler_params=pltpu.CompilerParams(dimension_semantics=("arbitrary",)),
    )(*args)
    return out.reshape(n)


# --------------------------- deterministic parameters --------------------------

def torch_conv_w_to_taps(w_oihw):
    """(Cout, Cin, 3, 3) -> (9, Cin, Cout), tap order k = 3*kh + kw."""
    co, ci = w_oihw.shape[0], w_oihw.shape[1]
    return jnp.transpose(w_oihw, (2, 3, 1, 0)).reshape(9, ci, co)


def init_params(key):
    def u(k, shape, fan_in):
        bound = 1.0 / np.sqrt(fan_in)
        return jax.random.uniform(k, shape, jnp.float32, -bound, bound)

    ks = jax.random.split(key, 10)
    w1 = u(ks[0], (16, 3, 3, 3), 3 * 9);   b1 = u(ks[1], (16,), 3 * 9)
    w2 = u(ks[2], (32, 16, 3, 3), 16 * 9); b2 = u(ks[3], (32,), 16 * 9)
    w3 = u(ks[4], (64, 32, 3, 3), 32 * 9); b3 = u(ks[5], (64,), 32 * 9)
    lw1 = u(ks[6], (256, 256), 256);       lb1 = u(ks[7], (256,), 256)   # (in, out)
    lw2 = u(ks[8], (256, 1), 256);         lb2 = u(ks[9], (1,), 256)

    # Fold torch's NCHW flatten order (f = c*4 + s) into the lin1 weight so the kernel
    # can consume its native (s, c) column order directly.
    idx = np.arange(256)
    perm = jnp.asarray((idx % 64) * 4 + (idx // 64), dtype=jnp.int32)

    bf = jnp.bfloat16
    return dict(
        # torch-layout copies (for the pure-JAX reference)
        w1=w1, b1=b1, w2=w2, b2=b2, w3=w3, b3=b3,
        lw1=lw1, lb1=lb1, lw2=lw2, lb2=lb2,
        # kernel-layout copies (matmul operands bf16, elementwise operands f32)
        w1m=jnp.transpose(w1, (2, 3, 1, 0)).reshape(27, 16).astype(bf),
        w2s=torch_conv_w_to_taps(w2).astype(bf),
        w3s=torch_conv_w_to_taps(w3).astype(bf),
        lw1p=lw1[perm, :].astype(bf),
        lw2r=lw2.reshape(1, 256),                         # f32, used elementwise
        b1r=b1.reshape(1, -1), b2r=b2.reshape(1, -1), b3r=b3.reshape(1, -1),
        lb1r=lb1.reshape(1, -1), lb2r=lb2.reshape(1, 1),
    )


# ------------------------------ pure-JAX reference ------------------------------

def reference_forward(x, params):
    def conv(x, w, b, stride):
        y = jax.lax.conv_general_dilated(
            x, w, window_strides=(stride, stride), padding=((1, 1), (1, 1)),
            dimension_numbers=("NCHW", "OIHW", "NCHW"))
        return y + b[None, :, None, None]

    def mp(x):
        return jax.lax.reduce_window(x, -jnp.inf, jax.lax.max,
                                     (1, 1, 2, 2), (1, 1, 2, 2), "VALID")

    x = jax.nn.relu(mp(conv(x, params["w1"], params["b1"], 2)))
    x = jax.nn.relu(mp(conv(x, params["w2"], params["b2"], 1)))
    x = jax.nn.relu(mp(conv(x, params["w3"], params["b3"], 1)))
    x = x.reshape(x.shape[0], -1)
    x = jax.nn.relu(x @ params["lw1"] + params["lb1"])
    x = x @ params["lw2"] + params["lb2"]
    return jax.nn.sigmoid(x).reshape(-1)


# ------------------------------------ main --------------------------------------

if __name__ == "__main__":
    key = jax.random.PRNGKey(0)
    kp, kx = jax.random.split(key)
    params = init_params(kp)

    # input: batch=2, 3 channels, 32x32 (required so conv3 output flattens to 256)
    x = jax.random.normal(kx, (2, 3, 32, 32), jnp.float32)

    out = jax.jit(simplenet_forward)(x, params)
    out = jax.block_until_ready(out)
    assert out.shape == (2,)

    ref = reference_forward(x, params)
    np.testing.assert_allclose(np.asarray(out), np.asarray(ref), atol=2e-2, rtol=2e-2)

    print("KERNEL_OK")
</pallas_src>

<mosaic_0001>
module attributes {stable_mosaic.version = 11 : i64} {
  func.func @_simplenet_kernel(%arg0: i32, %arg1: memref<512x27xf32, #tpu.memory_space<vmem>>, %arg2: memref<27x16xbf16, #tpu.memory_space<vmem>>, %arg3: memref<1x16xf32, #tpu.memory_space<vmem>>, %arg4: memref<9x16x32xbf16, #tpu.memory_space<vmem>>, %arg5: memref<1x32xf32, #tpu.memory_space<vmem>>, %arg6: memref<9x32x64xbf16, #tpu.memory_space<vmem>>, %arg7: memref<1x64xf32, #tpu.memory_space<vmem>>, %arg8: memref<256x256xbf16, #tpu.memory_space<vmem>>, %arg9: memref<1x256xf32, #tpu.memory_space<vmem>>, %arg10: memref<1x256xf32, #tpu.memory_space<vmem>>, %arg11: memref<1x1xf32, #tpu.memory_space<vmem>>, %arg12: memref<2x1xf32, #tpu.memory_space<vmem>>, %arg13: memref<1152x32xf32, #tpu.memory_space<vmem>>, %arg14: memref<288x64xf32, #tpu.memory_space<vmem>>, %arg15: memref<2x256xf32, #tpu.memory_space<vmem>>) attributes {dimension_semantics = [#tpu.dimension_semantics<arbitrary>], iteration_bounds = array<i64: 1>, scalar_prefetch = 0 : i64, scratch_operands = 3 : i64, tpu.core_type = #tpu.core_type<tc>, window_params = [{pipeline_mode = #tpu.pipeline_mode<synchronous>, transform_indices = @transform_0, window_bounds = array<i64: 512, 27>}, {pipeline_mode = #tpu.pipeline_mode<synchronous>, transform_indices = @transform_1, window_bounds = array<i64: 27, 16>}, {pipeline_mode = #tpu.pipeline_mode<synchronous>, transform_indices = @transform_2, window_bounds = array<i64: 1, 16>}, {pipeline_mode = #tpu.pipeline_mode<synchronous>, transform_indices = @transform_3, window_bounds = array<i64: 9, 16, 32>}, {pipeline_mode = #tpu.pipeline_mode<synchronous>, transform_indices = @transform_4, window_bounds = array<i64: 1, 32>}, {pipeline_mode = #tpu.pipeline_mode<synchronous>, transform_indices = @transform_5, window_bounds = array<i64: 9, 32, 64>}, {pipeline_mode = #tpu.pipeline_mode<synchronous>, transform_indices = @transform_6, window_bounds = array<i64: 1, 64>}, {pipeline_mode = #tpu.pipeline_mode<synchronous>, transform_indices = @transform_7, window_bounds = array<i64: 256, 256>}, {pipeline_mode = #tpu.pipeline_mode<synchronous>, transform_indices = @transform_8, window_bounds = array<i64: 1, 256>}, {pipeline_mode = #tpu.pipeline_mode<synchronous>, transform_indices = @transform_9, window_bounds = array<i64: 1, 256>}, {pipeline_mode = #tpu.pipeline_mode<synchronous>, transform_indices = @transform_10, window_bounds = array<i64: 1, 1>}, {pipeline_mode = #tpu.pipeline_mode<synchronous>, transform_indices = @transform_11, window_bounds = array<i64: 2, 1>}]} {
    %c0 = arith.constant 0 : index
    %c0_0 = arith.constant 0 : index
    %0 = vector.load %arg1[%c0, %c0_0] : memref<512x27xf32, #tpu.memory_space<vmem>>, vector<512x27xf32>
    %1 = arith.truncf %0 : vector<512x27xf32> to vector<512x27xbf16>
    %c0_1 = arith.constant 0 : index
    %c0_2 = arith.constant 0 : index
    %2 = vector.load %arg2[%c0_1, %c0_2] : memref<27x16xbf16, #tpu.memory_space<vmem>>, vector<27x16xbf16>
    %cst = arith.constant dense<0.000000e+00> : vector<512x16xf32>
    %3 = tpu.matmul %1, %2, %cst {dimension_numbers = #tpu.dot_dimension_numbers<[1], [0], [0], [1], [0, 0, 1, 1], [], []>} : vector<512x27xbf16>, vector<27x16xbf16>, vector<512x16xf32> -> vector<512x16xf32>
    %4 = vector.extract_strided_slice %3 {offsets = [0, 0], sizes = [128, 16], strides = [1, 1]} : vector<512x16xf32> to vector<128x16xf32>
    %5 = vector.extract_strided_slice %3 {offsets = [128, 0], sizes = [128, 16], strides = [1, 1]} : vector<512x16xf32> to vector<128x16xf32>
    %6 = arith.maximumf %4, %5 : vector<128x16xf32>
    %7 = vector.extract_strided_slice %3 {offsets = [256, 0], sizes = [128, 16], strides = [1, 1]} : vector<512x16xf32> to vector<128x16xf32>
    %8 = vector.extract_strided_slice %3 {offsets = [384, 0], sizes = [128, 16], strides = [1, 1]} : vector<512x16xf32> to vector<128x16xf32>
    %9 = arith.maximumf %7, %8 : vector<128x16xf32>
    %10 = arith.maximumf %6, %9 : vector<128x16xf32>
    %c0_3 = arith.constant 0 : index
    %c0_4 = arith.constant 0 : index
    %11 = vector.load %arg3[%c0_3, %c0_4] : memref<1x16xf32, #tpu.memory_space<vmem>>, vector<1x16xf32>
    %12 = vector.broadcast %11 : vector<1x16xf32> to vector<128x16xf32>
    %13 = arith.addf %10, %12 : vector<128x16xf32>
    %cst_5 = arith.constant 0.000000e+00 : f32
    %14 = vector.broadcast %cst_5 : f32 to vector<128x16xf32>
    %15 = arith.maximumf %13, %14 : vector<128x16xf32>
    %16 = arith.truncf %15 : vector<128x16xf32> to vector<128x16xbf16>
    %c0_6 = arith.constant 0 : index
    %c0_7 = arith.constant 0 : index
    %c0_8 = arith.constant 0 : index
    %17 = vector.load %arg4[%c0_6, %c0_7, %c0_8] : memref<9x16x32xbf16, #tpu.memory_space<vmem>>, vector<1x16x32xbf16>
    %18 = vector.shape_cast %17 : vector<1x16x32xbf16> to vector<16x32xbf16>
    %cst_9 = arith.constant dense<0.000000e+00> : vector<128x32xf32>
    %19 = tpu.matmul %16, %18, %cst_9 {dimension_numbers = #tpu.dot_dimension_numbers<[1], [0], [0], [1], [0, 0, 1, 1], [], []>} : vector<128x16xbf16>, vector<16x32xbf16>, vector<128x32xf32> -> vector<128x32xf32>
    %c0_10 = arith.constant 0 : index
    %c0_11 = arith.constant 0 : index
    %20 = vector.load %arg13[%c0_10, %c0_11] : memref<1152x32xf32, #tpu.memory_space<vmem>>, vector<128x32xf32>
    tpu.vector_store %arg13[%c0_10, %c0_11], %19 {strides = array<i32>} : memref<1152x32xf32, #tpu.memory_space<vmem>>, vector<128x32xf32>,
    %c1 = arith.constant 1 : index
    %c0_12 = arith.constant 0 : index
    %c0_13 = arith.constant 0 : index
    %21 = vector.load %arg4[%c1, %c0_12, %c0_13] : memref<9x16x32xbf16, #tpu.memory_space<vmem>>, vector<1x16x32xbf16>
    %22 = vector.shape_cast %21 : vector<1x16x32xbf16> to vector<16x32xbf16>
    %cst_14 = arith.constant dense<0.000000e+00> : vector<128x32xf32>
    %23 = tpu.matmul %16, %22, %cst_14 {dimension_numbers = #tpu.dot_dimension_numbers<[1], [0], [0], [1], [0, 0, 1, 1], [], []>} : vector<128x16xbf16>, vector<16x32xbf16>, vector<128x32xf32> -> vector<128x32xf32>
    %c128 = arith.constant 128 : index
    %c0_15 = arith.constant 0 : index
    %24 = vector.load %arg13[%c128, %c0_15] : memref<1152x32xf32, #tpu.memory_space<vmem>>, vector<128x32xf32>
    tpu.vector_store %arg13[%c128, %c0_15], %23 {strides = array<i32>} : memref<1152x32xf32, #tpu.memory_space<vmem>>, vector<128x32xf32>,
    %c2 = arith.constant 2 : index
    %c0_16 = arith.constant 0 : index
    %c0_17 = arith.constant 0 : index
    %25 = vector.load %arg4[%c2, %c0_16, %c0_17] : memref<9x16x32xbf16, #tpu.memory_space<vmem>>, vector<1x16x32xbf16>
    %26 = vector.shape_cast %25 : vector<1x16x32xbf16> to vector<16x32xbf16>
    %cst_18 = arith.constant dense<0.000000e+00> : vector<128x32xf32>
    %27 = tpu.matmul %16, %26, %cst_18 {dimension_numbers = #tpu.dot_dimension_numbers<[1], [0], [0], [1], [0, 0, 1, 1], [], []>} : vector<128x16xbf16>, vector<16x32xbf16>, vector<128x32xf32> -> vector<128x32xf32>
    %c256 = arith.constant 256 : index
    %c0_19 = arith.constant 0 : index
    %28 = vector.load %arg13[%c256, %c0_19] : memref<1152x32xf32, #tpu.memory_space<vmem>>, vector<128x32xf32>
    tpu.vector_store %arg13[%c256, %c0_19], %27 {strides = array<i32>} : memref<1152x32xf32, #tpu.memory_space<vmem>>, vector<128x32xf32>,
    %c3 = arith.constant 3 : index
    %c0_20 = arith.constant 0 : index
    %c0_21 = arith.constant 0 : index
    %29 = vector.load %arg4[%c3, %c0_20, %c0_21] : memref<9x16x32xbf16, #tpu.memory_space<vmem>>, vector<1x16x32xbf16>
    %30 = vector.shape_cast %29 : vector<1x16x32xbf16> to vector<16x32xbf16>
    %cst_22 = arith.constant dense<0.000000e+00> : vector<128x32xf32>
    %31 = tpu.matmul %16, %30, %cst_22 {dimension_numbers = #tpu.dot_dimension_numbers<[1], [0], [0], [1], [0, 0, 1, 1], [], []>} : vector<128x16xbf16>, vector<16x32xbf16>, vector<128x32xf32> -> vector<128x32xf32>
    %c384 = arith.constant 384 : index
    %c0_23 = arith.constant 0 : index
    %32 = vector.load %arg13[%c384, %c0_23] : memref<1152x32xf32, #tpu.memory_space<vmem>>, vector<128x32xf32>
    tpu.vector_store %arg13[%c384, %c0_23], %31 {strides = array<i32>} : memref<1152x32xf32, #tpu.memory_space<vmem>>, vector<128x32xf32>,
    %c4 = arith.constant 4 : index
    %c0_24 = arith.constant 0 : index
    %c0_25 = arith.constant 0 : index
    %33 = vector.load %arg4[%c4, %c0_24, %c0_25] : memref<9x16x32xbf16, #tpu.memory_space<vmem>>, vector<1x16x32xbf16>
    %34 = vector.shape_cast %33 : vector<1x16x32xbf16> to vector<16x32xbf16>
    %cst_26 = arith.constant dense<0.000000e+00> : vector<128x32xf32>
    %35 = tpu.matmul %16, %34, %cst_26 {dimension_numbers = #tpu.dot_dimension_numbers<[1], [0], [0], [1], [0, 0, 1, 1], [], []>} : vector<128x16xbf16>, vector<16x32xbf16>, vector<128x32xf32> -> vector<128x32xf32>
    %c512 = arith.constant 512 : index
    %c0_27 = arith.constant 0 : index
    %36 = vector.load %arg13[%c512, %c0_27] : memref<1152x32xf32, #tpu.memory_space<vmem>>, vector<128x32xf32>
    tpu.vector_store %arg13[%c512, %c0_27], %35 {strides = array<i32>} : memref<1152x32xf32, #tpu.memory_space<vmem>>, vector<128x32xf32>,
    %c5 = arith.constant 5 : index
    %c0_28 = arith.constant 0 : index
    %c0_29 = arith.constant 0 : index
    %37 = vector.load %arg4[%c5, %c0_28, %c0_29] : memref<9x16x32xbf16, #tpu.memory_space<vmem>>, vector<1x16x32xbf16>
    %38 = vector.shape_cast %37 : vector<1x16x32xbf16> to vector<16x32xbf16>
    %cst_30 = arith.constant dense<0.000000e+00> : vector<128x32xf32>
    %39 = tpu.matmul %16, %38, %cst_30 {dimension_numbers = #tpu.dot_dimension_numbers<[1], [0], [0], [1], [0, 0, 1, 1], [], []>} : vector<128x16xbf16>, vector<16x32xbf16>, vector<128x32xf32> -> vector<128x32xf32>
    %c640 = arith.constant 640 : index
    %c0_31 = arith.constant 0 : index
    %40 = vector.load %arg13[%c640, %c0_31] : memref<1152x32xf32, #tpu.memory_space<vmem>>, vector<128x32xf32>
    tpu.vector_store %arg13[%c640, %c0_31], %39 {strides = array<i32>} : memref<1152x32xf32, #tpu.memory_space<vmem>>, vector<128x32xf32>,
    %c6 = arith.constant 6 : index
    %c0_32 = arith.constant 0 : index
    %c0_33 = arith.constant 0 : index
    %41 = vector.load %arg4[%c6, %c0_32, %c0_33] : memref<9x16x32xbf16, #tpu.memory_space<vmem>>, vector<1x16x32xbf16>
    %42 = vector.shape_cast %41 : vector<1x16x32xbf16> to vector<16x32xbf16>
    %cst_34 = arith.constant dense<0.000000e+00> : vector<128x32xf32>
    %43 = tpu.matmul %16, %42, %cst_34 {dimension_numbers = #tpu.dot_dimension_numbers<[1], [0], [0], [1], [0, 0, 1, 1], [], []>} : vector<128x16xbf16>, vector<16x32xbf16>, vector<128x32xf32> -> vector<128x32xf32>
    %c768 = arith.constant 768 : index
    %c0_35 = arith.constant 0 : index
    %44 = vector.load %arg13[%c768, %c0_35] : memref<1152x32xf32, #tpu.memory_space<vmem>>, vector<128x32xf32>
    tpu.vector_store %arg13[%c768, %c0_35], %43 {strides = array<i32>} : memref<1152x32xf32, #tpu.memory_space<vmem>>, vector<128x32xf32>,
    %c7 = arith.constant 7 : index
    %c0_36 = arith.constant 0 : index
    %c0_37 = arith.constant 0 : index
    %45 = vector.load %arg4[%c7, %c0_36, %c0_37] : memref<9x16x32xbf16, #tpu.memory_space<vmem>>, vector<1x16x32xbf16>
    %46 = vector.shape_cast %45 : vector<1x16x32xbf16> to vector<16x32xbf16>
    %cst_38 = arith.constant dense<0.000000e+00> : vector<128x32xf32>
    %47 = tpu.matmul %16, %46, %cst_38 {dimension_numbers = #tpu.dot_dimension_numbers<[1], [0], [0], [1], [0, 0, 1, 1], [], []>} : vector<128x16xbf16>, vector<16x32xbf16>, vector<128x32xf32> -> vector<128x32xf32>
    %c896 = arith.constant 896 : index
    %c0_39 = arith.constant 0 : index
    %48 = vector.load %arg13[%c896, %c0_39] : memref<1152x32xf32, #tpu.memory_space<vmem>>, vector<128x32xf32>
    tpu.vector_store %arg13[%c896, %c0_39], %47 {strides = array<i32>} : memref<1152x32xf32, #tpu.memory_space<vmem>>, vector<128x32xf32>,
    %c8 = arith.constant 8 : index
    %c0_40 = arith.constant 0 : index
    %c0_41 = arith.constant 0 : index
    %49 = vector.load %arg4[%c8, %c0_40, %c0_41] : memref<9x16x32xbf16, #tpu.memory_space<vmem>>, vector<1x16x32xbf16>
    %50 = vector.shape_cast %49 : vector<1x16x32xbf16> to vector<16x32xbf16>
    %cst_42 = arith.constant dense<0.000000e+00> : vector<128x32xf32>
    %51 = tpu.matmul %16, %50, %cst_42 {dimension_numbers = #tpu.dot_dimension_numbers<[1], [0], [0], [1], [0, 0, 1, 1], [], []>} : vector<128x16xbf16>, vector<16x32xbf16>, vector<128x32xf32> -> vector<128x32xf32>
    %c1024 = arith.constant 1024 : index
    %c0_43 = arith.constant 0 : index
    %52 = vector.load %arg13[%c1024, %c0_43] : memref<1152x32xf32, #tpu.memory_space<vmem>>, vector<128x32xf32>
    tpu.vector_store %arg13[%c1024, %c0_43], %51 {strides = array<i32>} : memref<1152x32xf32, #tpu.memory_space<vmem>>, vector<128x32xf32>,
    %c0_44 = arith.constant 0 : index
    %c0_45 = arith.constant 0 : index
    %53 = vector.load %arg13[%c0_44, %c0_45] : memref<1152x32xf32, #tpu.memory_space<vmem>>, vector<1152x32xf32>
    %54 = tpu.iota {dimensions = array<i32: 0>} : vector<32x1152xi32>
    %55 = tpu.iota {dimensions = array<i32: 1>} : vector<32x1152xi32>
    %c7_i32 = arith.constant 7 : i32
    %56 = vector.broadcast %c7_i32 : i32 to vector<32x1152xi32>
    %57 = arith.shrsi %55, %56 : vector<32x1152xi32>
    %c127_i32 = arith.constant 127 : i32
    %58 = vector.broadcast %c127_i32 : i32 to vector<32x1152xi32>
    %59 = arith.andi %55, %58 : vector<32x1152xi32>
    %c6_i32 = arith.constant 6 : i32
    %60 = vector.broadcast %c6_i32 : i32 to vector<32x1152xi32>
    %61 = arith.cmpi sge, %57, %60 : vector<32x1152xi32>
    %c3_i32 = arith.constant 3 : i32
    %62 = vector.broadcast %c3_i32 : i32 to vector<32x1152xi32>
    %63 = arith.cmpi sge, %57, %62 : vector<32x1152xi32>
    %c1_i32 = arith.constant 1 : i32
    %c0_i32 = arith.constant 0 : i32
    %64 = vector.broadcast %c1_i32 : i32 to vector<32x1152xi32>
    %65 = vector.broadcast %c0_i32 : i32 to vector<32x1152xi32>
    %66 = arith.select %63, %64, %65 : vector<32x1152xi1>, vector<32x1152xi32>
    %c2_i32 = arith.constant 2 : i32
    %67 = vector.broadcast %c2_i32 : i32 to vector<32x1152xi32>
    %68 = arith.select %61, %67, %66 : vector<32x1152xi1>, vector<32x1152xi32>
    %c3_i32_46 = arith.constant 3 : i32
    %69 = vector.broadcast %c3_i32_46 : i32 to vector<32x1152xi32>
    %70 = arith.muli %69, %68 : vector<32x1152xi32>
    %71 = arith.subi %57, %70 : vector<32x1152xi32>
    %c6_i32_47 = arith.constant 6 : i32
    %72 = vector.broadcast %c6_i32_47 : i32 to vector<32x1152xi32>
    %73 = arith.shrsi %59, %72 : vector<32x1152xi32>
    %c63_i32 = arith.constant 63 : i32
    %74 = vector.broadcast %c63_i32 : i32 to vector<32x1152xi32>
    %75 = arith.andi %59, %74 : vector<32x1152xi32>
    %c3_i32_48 = arith.constant 3 : i32
    %76 = vector.broadcast %c3_i32_48 : i32 to vector<32x1152xi32>
    %77 = arith.shrsi %75, %76 : vector<32x1152xi32>
    %c7_i32_49 = arith.constant 7 : i32
    %78 = vector.broadcast %c7_i32_49 : i32 to vector<32x1152xi32>
    %79 = arith.andi %75, %78 : vector<32x1152xi32>
    %c4_i32 = arith.constant 4 : i32
    %80 = vector.broadcast %c4_i32 : i32 to vector<32x1152xi32>
    %81 = arith.shrsi %54, %80 : vector<32x1152xi32>
    %c15_i32 = arith.constant 15 : i32
    %82 = vector.broadcast %c15_i32 : i32 to vector<32x1152xi32>
    %83 = arith.andi %54, %82 : vector<32x1152xi32>
    %c2_i32_50 = arith.constant 2 : i32
    %84 = vector.broadcast %c2_i32_50 : i32 to vector<32x1152xi32>
    %85 = arith.shrsi %83, %84 : vector<32x1152xi32>
    %c3_i32_51 = arith.constant 3 : i32
    %86 = vector.broadcast %c3_i32_51 : i32 to vector<32x1152xi32>
    %87 = arith.andi %83, %86 : vector<32x1152xi32>
    %88 = arith.cmpi eq, %81, %73 : vector<32x1152xi32>
    %c2_i32_52 = arith.constant 2 : i32
    %89 = vector.broadcast %c2_i32_52 : i32 to vector<32x1152xi32>
    %90 = arith.muli %89, %85 : vector<32x1152xi32>
    %c-1_i32 = arith.constant -1 : i32
    %91 = vector.broadcast %c-1_i32 : i32 to vector<32x1152xi32>
    %92 = arith.addi %90, %91 : vector<32x1152xi32>
    %93 = arith.addi %92, %68 : vector<32x1152xi32>
    %94 = arith.cmpi eq, %77, %93 : vector<32x1152xi32>
    %95 = arith.andi %88, %94 : vector<32x1152xi1>
    %c2_i32_53 = arith.constant 2 : i32
    %96 = vector.broadcast %c2_i32_53 : i32 to vector<32x1152xi32>
    %97 = arith.muli %96, %87 : vector<32x1152xi32>
    %c-1_i32_54 = arith.constant -1 : i32
    %98 = vector.broadcast %c-1_i32_54 : i32 to vector<32x1152xi32>
    %99 = arith.addi %97, %98 : vector<32x1152xi32>
    %100 = arith.addi %99, %71 : vector<32x1152xi32>
    %101 = arith.cmpi eq, %79, %100 : vector<32x1152xi32>
    %102 = arith.andi %95, %101 : vector<32x1152xi1>
    %cst_55 = arith.constant 1.000000e+00 : f32
    %cst_56 = arith.constant 0.000000e+00 : f32
    %103 = vector.broadcast %cst_55 : f32 to vector<32x1152xf32>
    %104 = vector.broadcast %cst_56 : f32 to vector<32x1152xf32>
    %105 = arith.select %102, %103, %104 : vector<32x1152xi1>, vector<32x1152xf32>
    %cst_57 = arith.constant dense<0.000000e+00> : vector<32x32xf32>
    %106 = tpu.matmul %105, %53, %cst_57 {dimension_numbers = #tpu.dot_dimension_numbers<[1], [0], [0], [1], [0, 0, 1, 1], [], []>} : vector<32x1152xf32>, vector<1152x32xf32>, vector<32x32xf32> -> vector<32x32xf32>
    %107 = tpu.iota {dimensions = array<i32: 0>} : vector<32x1152xi32>
    %108 = tpu.iota {dimensions = array<i32: 1>} : vector<32x1152xi32>
    %c7_i32_58 = arith.constant 7 : i32
    %109 = vector.broadcast %c7_i32_58 : i32 to vector<32x1152xi32>
    %110 = arith.shrsi %108, %109 : vector<32x1152xi32>
    %c127_i32_59 = arith.constant 127 : i32
    %111 = vector.broadcast %c127_i32_59 : i32 to vector<32x1152xi32>
    %112 = arith.andi %108, %111 : vector<32x1152xi32>
    %c6_i32_60 = arith.constant 6 : i32
    %113 = vector.broadcast %c6_i32_60 : i32 to vector<32x1152xi32>
    %114 = arith.cmpi sge, %110, %113 : vector<32x1152xi32>
    %c3_i32_61 = arith.constant 3 : i32
    %115 = vector.broadcast %c3_i32_61 : i32 to vector<32x1152xi32>
    %116 = arith.cmpi sge, %110, %115 : vector<32x1152xi32>
    %c1_i32_62 = arith.constant 1 : i32
    %c0_i32_63 = arith.constant 0 : i32
    %117 = vector.broadcast %c1_i32_62 : i32 to vector<32x1152xi32>
    %118 = vector.broadcast %c0_i32_63 : i32 to vector<32x1152xi32>
    %119 = arith.select %116, %117, %118 : vector<32x1152xi1>, vector<32x1152xi32>
    %c2_i32_64 = arith.constant 2 : i32
    %120 = vector.broadcast %c2_i32_64 : i32 to vector<32x1152xi32>
    %121 = arith.select %114, %120, %119 : vector<32x1152xi1>, vector<32x1152xi32>
    %c3_i32_65 = arith.constant 3 : i32
    %122 = vector.broadcast %c3_i32_65 : i32 to vector<32x1152xi32>
    %123 = arith.muli %122, %121 : vector<32x1152xi32>
    %124 = arith.subi %110, %123 : vector<32x1152xi32>
    %c6_i32_66 = arith.constant 6 : i32
    %125 = vector.broadcast %c6_i32_66 : i32 to vector<32x1152xi32>
    %126 = arith.shrsi %112, %125 : vector<32x1152xi32>
    %c63_i32_67 = arith.constant 63 : i32
    %127 = vector.broadcast %c63_i32_67 : i32 to vector<32x1152xi32>
    %128 = arith.andi %112, %127 : vector<32x1152xi32>
    %c3_i32_68 = arith.constant 3 : i32
    %129 = vector.broadcast %c3_i32_68 : i32 to vector<32x1152xi32>
    %130 = arith.shrsi %128, %129 : vector<32x1152xi32>
    %c7_i32_69 = arith.constant 7 : i32
    %131 = vector.broadcast %c7_i32_69 : i32 to vector<32x1152xi32>
    %132 = arith.andi %128, %131 : vector<32x1152xi32>
    %c4_i32_70 = arith.constant 4 : i32
    %133 = vector.broadcast %c4_i32_70 : i32 to vector<32x1152xi32>
    %134 = arith.shrsi %107, %133 : vector<32x1152xi32>
    %c15_i32_71 = arith.constant 15 : i32
    %135 = vector.broadcast %c15_i32_71 : i32 to vector<32x1152xi32>
    %136 = arith.andi %107, %135 : vector<32x1152xi32>
    %c2_i32_72 = arith.constant 2 : i32
    %137 = vector.broadcast %c2_i32_72 : i32 to vector<32x1152xi32>
    %138 = arith.shrsi %136, %137 : vector<32x1152xi32>
    %c3_i32_73 = arith.constant 3 : i32
    %139 = vector.broadcast %c3_i32_73 : i32 to vector<32x1152xi32>
    %140 = arith.andi %136, %139 : vector<32x1152xi32>
    %141 = arith.cmpi eq, %134, %126 : vector<32x1152xi32>
    %c2_i32_74 = arith.constant 2 : i32
    %142 = vector.broadcast %c2_i32_74 : i32 to vector<32x1152xi32>
    %143 = arith.muli %142, %138 : vector<32x1152xi32>
    %c-1_i32_75 = arith.constant -1 : i32
    %144 = vector.broadcast %c-1_i32_75 : i32 to vector<32x1152xi32>
    %145 = arith.addi %143, %144 : vector<32x1152xi32>
    %146 = arith.addi %145, %121 : vector<32x1152xi32>
    %147 = arith.cmpi eq, %130, %146 : vector<32x1152xi32>
    %148 = arith.andi %141, %147 : vector<32x1152xi1>
    %c2_i32_76 = arith.constant 2 : i32
    %149 = vector.broadcast %c2_i32_76 : i32 to vector<32x1152xi32>
    %150 = arith.muli %149, %140 : vector<32x1152xi32>
    %c0_i32_77 = arith.constant 0 : i32
    %151 = vector.broadcast %c0_i32_77 : i32 to vector<32x1152xi32>
    %152 = arith.addi %150, %151 : vector<32x1152xi32>
    %153 = arith.addi %152, %124 : vector<32x1152xi32>
    %154 = arith.cmpi eq, %132, %153 : vector<32x1152xi32>
    %155 = arith.andi %148, %154 : vector<32x1152xi1>
    %cst_78 = arith.constant 1.000000e+00 : f32
    %cst_79 = arith.constant 0.000000e+00 : f32
    %156 = vector.broadcast %cst_78 : f32 to vector<32x1152xf32>
    %157 = vector.broadcast %cst_79 : f32 to vector<32x1152xf32>
    %158 = arith.select %155, %156, %157 : vector<32x1152xi1>, vector<32x1152xf32>
    %cst_80 = arith.constant dense<0.000000e+00> : vector<32x32xf32>
    %159 = tpu.matmul %158, %53, %cst_80 {dimension_numbers = #tpu.dot_dimension_numbers<[1], [0], [0], [1], [0, 0, 1, 1], [], []>} : vector<32x1152xf32>, vector<1152x32xf32>, vector<32x32xf32> -> vector<32x32xf32>
    %160 = arith.maximumf %106, %159 : vector<32x32xf32>
    %161 = tpu.iota {dimensions = array<i32: 0>} : vector<32x1152xi32>
    %162 = tpu.iota {dimensions = array<i32: 1>} : vector<32x1152xi32>
    %c7_i32_81 = arith.constant 7 : i32
    %163 = vector.broadcast %c7_i32_81 : i32 to vector<32x1152xi32>
    %164 = arith.shrsi %162, %163 : vector<32x1152xi32>
    %c127_i32_82 = arith.constant 127 : i32
    %165 = vector.broadcast %c127_i32_82 : i32 to vector<32x1152xi32>
    %166 = arith.andi %162, %165 : vector<32x1152xi32>
    %c6_i32_83 = arith.constant 6 : i32
    %167 = vector.broadcast %c6_i32_83 : i32 to vector<32x1152xi32>
    %168 = arith.cmpi sge, %164, %167 : vector<32x1152xi32>
    %c3_i32_84 = arith.constant 3 : i32
    %169 = vector.broadcast %c3_i32_84 : i32 to vector<32x1152xi32>
    %170 = arith.cmpi sge, %164, %169 : vector<32x1152xi32>
    %c1_i32_85 = arith.constant 1 : i32
    %c0_i32_86 = arith.constant 0 : i32
    %171 = vector.broadcast %c1_i32_85 : i32 to vector<32x1152xi32>
    %172 = vector.broadcast %c0_i32_86 : i32 to vector<32x1152xi32>
    %173 = arith.select %170, %171, %172 : vector<32x1152xi1>, vector<32x1152xi32>
    %c2_i32_87 = arith.constant 2 : i32
    %174 = vector.broadcast %c2_i32_87 : i32 to vector<32x1152xi32>
    %175 = arith.select %168, %174, %173 : vector<32x1152xi1>, vector<32x1152xi32>
    %c3_i32_88 = arith.constant 3 : i32
    %176 = vector.broadcast %c3_i32_88 : i32 to vector<32x1152xi32>
    %177 = arith.muli %176, %175 : vector<32x1152xi32>
    %178 = arith.subi %164, %177 : vector<32x1152xi32>
    %c6_i32_89 = arith.constant 6 : i32
    %179 = vector.broadcast %c6_i32_89 : i32 to vector<32x1152xi32>
    %180 = arith.shrsi %166, %179 : vector<32x1152xi32>
    %c63_i32_90 = arith.constant 63 : i32
    %181 = vector.broadcast %c63_i32_90 : i32 to vector<32x1152xi32>
    %182 = arith.andi %166, %181 : vector<32x1152xi32>
    %c3_i32_91 = arith.constant 3 : i32
    %183 = vector.broadcast %c3_i32_91 : i32 to vector<32x1152xi32>
    %184 = arith.shrsi %182, %183 : vector<32x1152xi32>
    %c7_i32_92 = arith.constant 7 : i32
    %185 = vector.broadcast %c7_i32_92 : i32 to vector<32x1152xi32>
    %186 = arith.andi %182, %185 : vector<32x1152xi32>
    %c4_i32_93 = arith.constant 4 : i32
    %187 = vector.broadcast %c4_i32_93 : i32 to vector<32x1152xi32>
    %188 = arith.shrsi %161, %187 : vector<32x1152xi32>
    %c15_i32_94 = arith.constant 15 : i32
    %189 = vector.broadcast %c15_i32_94 : i32 to vector<32x1152xi32>
    %190 = arith.andi %161, %189 : vector<32x1152xi32>
    %c2_i32_95 = arith.constant 2 : i32
    %191 = vector.broadcast %c2_i32_95 : i32 to vector<32x1152xi32>
    %192 = arith.shrsi %190, %191 : vector<32x1152xi32>
    %c3_i32_96 = arith.constant 3 : i32
    %193 = vector.broadcast %c3_i32_96 : i32 to vector<32x1152xi32>
    %194 = arith.andi %190, %193 : vector<32x1152xi32>
    %195 = arith.cmpi eq, %188, %180 : vector<32x1152xi32>
    %c2_i32_97 = arith.constant 2 : i32
    %196 = vector.broadcast %c2_i32_97 : i32 to vector<32x1152xi32>
    %197 = arith.muli %196, %192 : vector<32x1152xi32>
    %c0_i32_98 = arith.constant 0 : i32
    %198 = vector.broadcast %c0_i32_98 : i32 to vector<32x1152xi32>
    %199 = arith.addi %197, %198 : vector<32x1152xi32>
    %200 = arith.addi %199, %175 : vector<32x1152xi32>
    %201 = arith.cmpi eq, %184, %200 : vector<32x1152xi32>
    %202 = arith.andi %195, %201 : vector<32x1152xi1>
    %c2_i32_99 = arith.constant 2 : i32
    %203 = vector.broadcast %c2_i32_99 : i32 to vector<32x1152xi32>
    %204 = arith.muli %203, %194 : vector<32x1152xi32>
    %c-1_i32_100 = arith.constant -1 : i32
    %205 = vector.broadcast %c-1_i32_100 : i32 to vector<32x1152xi32>
    %206 = arith.addi %204, %205 : vector<32x1152xi32>
    %207 = arith.addi %206, %178 : vector<32x1152xi32>
    %208 = arith.cmpi eq, %186, %207 : vector<32x1152xi32>
    %209 = arith.andi %202, %208 : vector<32x1152xi1>
    %cst_101 = arith.constant 1.000000e+00 : f32
    %cst_102 = arith.constant 0.000000e+00 : f32
    %210 = vector.broadcast %cst_101 : f32 to vector<32x1152xf32>
    %211 = vector.broadcast %cst_102 : f32 to vector<32x1152xf32>
    %212 = arith.select %209, %210, %211 : vector<32x1152xi1>, vector<32x1152xf32>
    %cst_103 = arith.constant dense<0.000000e+00> : vector<32x32xf32>
    %213 = tpu.matmul %212, %53, %cst_103 {dimension_numbers = #tpu.dot_dimension_numbers<[1], [0], [0], [1], [0, 0, 1, 1], [], []>} : vector<32x1152xf32>, vector<1152x32xf32>, vector<32x32xf32> -> vector<32x32xf32>
    %214 = arith.maximumf %160, %213 : vector<32x32xf32>
    %215 = tpu.iota {dimensions = array<i32: 0>} : vector<32x1152xi32>
    %216 = tpu.iota {dimensions = array<i32: 1>} : vector<32x1152xi32>
    %c7_i32_104 = arith.constant 7 : i32
    %217 = vector.broadcast %c7_i32_104 : i32 to vector<32x1152xi32>
    %218 = arith.shrsi %216, %217 : vector<32x1152xi32>
    %c127_i32_105 = arith.constant 127 : i32
    %219 = vector.broadcast %c127_i32_105 : i32 to vector<32x1152xi32>
    %220 = arith.andi %216, %219 : vector<32x1152xi32>
    %c6_i32_106 = arith.constant 6 : i32
    %221 = vector.broadcast %c6_i32_106 : i32 to vector<32x1152xi32>
    %222 = arith.cmpi sge, %218, %221 : vector<32x1152xi32>
    %c3_i32_107 = arith.constant 3 : i32
    %223 = vector.broadcast %c3_i32_107 : i32 to vector<32x1152xi32>
    %224 = arith.cmpi sge, %218, %223 : vector<32x1152xi32>
    %c1_i32_108 = arith.constant 1 : i32
    %c0_i32_109 = arith.constant 0 : i32
    %225 = vector.broadcast %c1_i32_108 : i32 to vector<32x1152xi32>
    %226 = vector.broadcast %c0_i32_109 : i32 to vector<32x1152xi32>
    %227 = arith.select %224, %225, %226 : vector<32x1152xi1>, vector<32x1152xi32>
    %c2_i32_110 = arith.constant 2 : i32
    %228 = vector.broadcast %c2_i32_110 : i32 to vector<32x1152xi32>
    %229 = arith.select %222, %228, %227 : vector<32x1152xi1>, vector<32x1152xi32>
    %c3_i32_111 = arith.constant 3 : i32
    %230 = vector.broadcast %c3_i32_111 : i32 to vector<32x1152xi32>
    %231 = arith.muli %230, %229 : vector<32x1152xi32>
    %232 = arith.subi %218, %231 : vector<32x1152xi32>
    %c6_i32_112 = arith.constant 6 : i32
    %233 = vector.broadcast %c6_i32_112 : i32 to vector<32x1152xi32>
    %234 = arith.shrsi %220, %233 : vector<32x1152xi32>
    %c63_i32_113 = arith.constant 63 : i32
    %235 = vector.broadcast %c63_i32_113 : i32 to vector<32x1152xi32>
    %236 = arith.andi %220, %235 : vector<32x1152xi32>
    %c3_i32_114 = arith.constant 3 : i32
    %237 = vector.broadcast %c3_i32_114 : i32 to vector<32x1152xi32>
    %238 = arith.shrsi %236, %237 : vector<32x1152xi32>
    %c7_i32_115 = arith.constant 7 : i32
    %239 = vector.broadcast %c7_i32_115 : i32 to vector<32x1152xi32>
    %240 = arith.andi %236, %239 : vector<32x1152xi32>
    %c4_i32_116 = arith.constant 4 : i32
    %241 = vector.broadcast %c4_i32_116 : i32 to vector<32x1152xi32>
    %242 = arith.shrsi %215, %241 : vector<32x1152xi32>
    %c15_i32_117 = arith.constant 15 : i32
    %243 = vector.broadcast %c15_i32_117 : i32 to vector<32x1152xi32>
    %244 = arith.andi %215, %243 : vector<32x1152xi32>
    %c2_i32_118 = arith.constant 2 : i32
    %245 = vector.broadcast %c2_i32_118 : i32 to vector<32x1152xi32>
    %246 = arith.shrsi %244, %245 : vector<32x1152xi32>
    %c3_i32_119 = arith.constant 3 : i32
    %247 = vector.broadcast %c3_i32_119 : i32 to vector<32x1152xi32>
    %248 = arith.andi %244, %247 : vector<32x1152xi32>
    %249 = arith.cmpi eq, %242, %234 : vector<32x1152xi32>
    %c2_i32_120 = arith.constant 2 : i32
    %250 = vector.broadcast %c2_i32_120 : i32 to vector<32x1152xi32>
    %251 = arith.muli %250, %246 : vector<32x1152xi32>
    %c0_i32_121 = arith.constant 0 : i32
    %252 = vector.broadcast %c0_i32_121 : i32 to vector<32x1152xi32>
    %253 = arith.addi %251, %252 : vector<32x1152xi32>
    %254 = arith.addi %253, %229 : vector<32x1152xi32>
    %255 = arith.cmpi eq, %238, %254 : vector<32x1152xi32>
    %256 = arith.andi %249, %255 : vector<32x1152xi1>
    %c2_i32_122 = arith.constant 2 : i32
    %257 = vector.broadcast %c2_i32_122 : i32 to vector<32x1152xi32>
    %258 = arith.muli %257, %248 : vector<32x1152xi32>
    %c0_i32_123 = arith.constant 0 : i32
    %259 = vector.broadcast %c0_i32_123 : i32 to vector<32x1152xi32>
    %260 = arith.addi %258, %259 : vector<32x1152xi32>
    %261 = arith.addi %260, %232 : vector<32x1152xi32>
    %262 = arith.cmpi eq, %240, %261 : vector<32x1152xi32>
    %263 = arith.andi %256, %262 : vector<32x1152xi1>
    %cst_124 = arith.constant 1.000000e+00 : f32
    %cst_125 = arith.constant 0.000000e+00 : f32
    %264 = vector.broadcast %cst_124 : f32 to vector<32x1152xf32>
    %265 = vector.broadcast %cst_125 : f32 to vector<32x1152xf32>
    %266 = arith.select %263, %264, %265 : vector<32x1152xi1>, vector<32x1152xf32>
    %cst_126 = arith.constant dense<0.000000e+00> : vector<32x32xf32>
    %267 = tpu.matmul %266, %53, %cst_126 {dimension_numbers = #tpu.dot_dimension_numbers<[1], [0], [0], [1], [0, 0, 1, 1], [], []>} : vector<32x1152xf32>, vector<1152x32xf32>, vector<32x32xf32> -> vector<32x32xf32>
    %268 = arith.maximumf %214, %267 : vector<32x32xf32>
    %c0_127 = arith.constant 0 : index
    %c0_128 = arith.constant 0 : index
    %269 = vector.load %arg5[%c0_127, %c0_128] : memref<1x32xf32, #tpu.memory_space<vmem>>, vector<1x32xf32>
    %270 = vector.broadcast %269 : vector<1x32xf32> to vector<32x32xf32>
    %271 = arith.addf %268, %270 : vector<32x32xf32>
    %cst_129 = arith.constant 0.000000e+00 : f32
    %272 = vector.broadcast %cst_129 : f32 to vector<32x32xf32>
    %273 = arith.maximumf %271, %272 : vector<32x32xf32>
    %274 = arith.truncf %273 : vector<32x32xf32> to vector<32x32xbf16>
    %c0_130 = arith.constant 0 : index
    %c0_131 = arith.constant 0 : index
    %c0_132 = arith.constant 0 : index
    %275 = vector.load %arg6[%c0_130, %c0_131, %c0_132] : memref<9x32x64xbf16, #tpu.memory_space<vmem>>, vector<1x32x64xbf16>
    %276 = vector.shape_cast %275 : vector<1x32x64xbf16> to vector<32x64xbf16>
    %cst_133 = arith.constant dense<0.000000e+00> : vector<32x64xf32>
    %277 = tpu.matmul %274, %276, %cst_133 {dimension_numbers = #tpu.dot_dimension_numbers<[1], [0], [0], [1], [0, 0, 1, 1], [], []>} : vector<32x32xbf16>, vector<32x64xbf16>, vector<32x64xf32> -> vector<32x64xf32>
    %c0_134 = arith.constant 0 : index
    %c0_135 = arith.constant 0 : index
    %278 = vector.load %arg14[%c0_134, %c0_135] : memref<288x64xf32, #tpu.memory_space<vmem>>, vector<32x64xf32>
    tpu.vector_store %arg14[%c0_134, %c0_135], %277 {strides = array<i32>} : memref<288x64xf32, #tpu.memory_space<vmem>>, vector<32x64xf32>,
    %c1_136 = arith.constant 1 : index
    %c0_137 = arith.constant 0 : index
    %c0_138 = arith.constant 0 : index
    %279 = vector.load %arg6[%c1_136, %c0_137, %c0_138] : memref<9x32x64xbf16, #tpu.memory_space<vmem>>, vector<1x32x64xbf16>
    %280 = vector.shape_cast %279 : vector<1x32x64xbf16> to vector<32x64xbf16>
    %cst_139 = arith.constant dense<0.000000e+00> : vector<32x64xf32>
    %281 = tpu.matmul %274, %280, %cst_139 {dimension_numbers = #tpu.dot_dimension_numbers<[1], [0], [0], [1], [0, 0, 1, 1], [], []>} : vector<32x32xbf16>, vector<32x64xbf16>, vector<32x64xf32> -> vector<32x64xf32>
    %c32 = arith.constant 32 : index
    %c0_140 = arith.constant 0 : index
    %282 = vector.load %arg14[%c32, %c0_140] : memref<288x64xf32, #tpu.memory_space<vmem>>, vector<32x64xf32>
    tpu.vector_store %arg14[%c32, %c0_140], %281 {strides = array<i32>} : memref<288x64xf32, #tpu.memory_space<vmem>>, vector<32x64xf32>,
    %c2_141 = arith.constant 2 : index
    %c0_142 = arith.constant 0 : index
    %c0_143 = arith.constant 0 : index
    %283 = vector.load %arg6[%c2_141, %c0_142, %c0_143] : memref<9x32x64xbf16, #tpu.memory_space<vmem>>, vector<1x32x64xbf16>
    %284 = vector.shape_cast %283 : vector<1x32x64xbf16> to vector<32x64xbf16>
    %cst_144 = arith.constant dense<0.000000e+00> : vector<32x64xf32>
    %285 = tpu.matmul %274, %284, %cst_144 {dimension_numbers = #tpu.dot_dimension_numbers<[1], [0], [0], [1], [0, 0, 1, 1], [], []>} : vector<32x32xbf16>, vector<32x64xbf16>, vector<32x64xf32> -> vector<32x64xf32>
    %c64 = arith.constant 64 : index
    %c0_145 = arith.constant 0 : index
    %286 = vector.load %arg14[%c64, %c0_145] : memref<288x64xf32, #tpu.memory_space<vmem>>, vector<32x64xf32>
    tpu.vector_store %arg14[%c64, %c0_145], %285 {strides = array<i32>} : memref<288x64xf32, #tpu.memory_space<vmem>>, vector<32x64xf32>,
    %c3_146 = arith.constant 3 : index
    %c0_147 = arith.constant 0 : index
    %c0_148 = arith.constant 0 : index
    %287 = vector.load %arg6[%c3_146, %c0_147, %c0_148] : memref<9x32x64xbf16, #tpu.memory_space<vmem>>, vector<1x32x64xbf16>
    %288 = vector.shape_cast %287 : vector<1x32x64xbf16> to vector<32x64xbf16>
    %cst_149 = arith.constant dense<0.000000e+00> : vector<32x64xf32>
    %289 = tpu.matmul %274, %288, %cst_149 {dimension_numbers = #tpu.dot_dimension_numbers<[1], [0], [0], [1], [0, 0, 1, 1], [], []>} : vector<32x32xbf16>, vector<32x64xbf16>, vector<32x64xf32> -> vector<32x64xf32>
    %c96 = arith.constant 96 : index
    %c0_150 = arith.constant 0 : index
    %290 = vector.load %arg14[%c96, %c0_150] : memref<288x64xf32, #tpu.memory_space<vmem>>, vector<32x64xf32>
    tpu.vector_store %arg14[%c96, %c0_150], %289 {strides = array<i32>} : memref<288x64xf32, #tpu.memory_space<vmem>>, vector<32x64xf32>,
    %c4_151 = arith.constant 4 : index
    %c0_152 = arith.constant 0 : index
    %c0_153 = arith.constant 0 : index
    %291 = vector.load %arg6[%c4_151, %c0_152, %c0_153] : memref<9x32x64xbf16, #tpu.memory_space<vmem>>, vector<1x32x64xbf16>
    %292 = vector.shape_cast %291 : vector<1x32x64xbf16> to vector<32x64xbf16>
    %cst_154 = arith.constant dense<0.000000e+00> : vector<32x64xf32>
    %293 = tpu.matmul %274, %292, %cst_154 {dimension_numbers = #tpu.dot_dimension_numbers<[1], [0], [0], [1], [0, 0, 1, 1], [], []>} : vector<32x32xbf16>, vector<32x64xbf16>, vector<32x64xf32> -> vector<32x64xf32>
    %c128_155 = arith.constant 128 : index
    %c0_156 = arith.constant 0 : index
    %294 = vector.load %arg14[%c128_155, %c0_156] : memref<288x64xf32, #tpu.memory_space<vmem>>, vector<32x64xf32>
    tpu.vector_store %arg14[%c128_155, %c0_156], %293 {strides = array<i32>} : memref<288x64xf32, #tpu.memory_space<vmem>>, vector<32x64xf32>,
    %c5_157 = arith.constant 5 : index
    %c0_158 = arith.constant 0 : index
    %c0_159 = arith.constant 0 : index
    %295 = vector.load %arg6[%c5_157, %c0_158, %c0_159] : memref<9x32x64xbf16, #tpu.memory_space<vmem>>, vector<1x32x64xbf16>
    %296 = vector.shape_cast %295 : vector<1x32x64xbf16> to vector<32x64xbf16>
    %cst_160 = arith.constant dense<0.000000e+00> : vector<32x64xf32>
    %297 = tpu.matmul %274, %296, %cst_160 {dimension_numbers = #tpu.dot_dimension_numbers<[1], [0], [0], [1], [0, 0, 1, 1], [], []>} : vector<32x32xbf16>, vector<32x64xbf16>, vector<32x64xf32> -> vector<32x64xf32>
    %c160 = arith.constant 160 : index
    %c0_161 = arith.constant 0 : index
    %298 = vector.load %arg14[%c160, %c0_161] : memref<288x64xf32, #tpu.memory_space<vmem>>, vector<32x64xf32>
    tpu.vector_store %arg14[%c160, %c0_161], %297 {strides = array<i32>} : memref<288x64xf32, #tpu.memory_space<vmem>>, vector<32x64xf32>,
    %c6_162 = arith.constant 6 : index
    %c0_163 = arith.constant 0 : index
    %c0_164 = arith.constant 0 : index
    %299 = vector.load %arg6[%c6_162, %c0_163, %c0_164] : memref<9x32x64xbf16, #tpu.memory_space<vmem>>, vector<1x32x64xbf16>
    %300 = vector.shape_cast %299 : vector<1x32x64xbf16> to vector<32x64xbf16>
    %cst_165 = arith.constant dense<0.000000e+00> : vector<32x64xf32>
    %301 = tpu.matmul %274, %300, %cst_165 {dimension_numbers = #tpu.dot_dimension_numbers<[1], [0], [0], [1], [0, 0, 1, 1], [], []>} : vector<32x32xbf16>, vector<32x64xbf16>, vector<32x64xf32> -> vector<32x64xf32>
    %c192 = arith.constant 192 : index
    %c0_166 = arith.constant 0 : index
    %302 = vector.load %arg14[%c192, %c0_166] : memref<288x64xf32, #tpu.memory_space<vmem>>, vector<32x64xf32>
    tpu.vector_store %arg14[%c192, %c0_166], %301 {strides = array<i32>} : memref<288x64xf32, #tpu.memory_space<vmem>>, vector<32x64xf32>,
    %c7_167 = arith.constant 7 : index
    %c0_168 = arith.constant 0 : index
    %c0_169 = arith.constant 0 : index
    %303 = vector.load %arg6[%c7_167, %c0_168, %c0_169] : memref<9x32x64xbf16, #tpu.memory_space<vmem>>, vector<1x32x64xbf16>
    %304 = vector.shape_cast %303 : vector<1x32x64xbf16> to vector<32x64xbf16>
    %cst_170 = arith.constant dense<0.000000e+00> : vector<32x64xf32>
    %305 = tpu.matmul %274, %304, %cst_170 {dimension_numbers = #tpu.dot_dimension_numbers<[1], [0], [0], [1], [0, 0, 1, 1], [], []>} : vector<32x32xbf16>, vector<32x64xbf16>, vector<32x64xf32> -> vector<32x64xf32>
    %c224 = arith.constant 224 : index
    %c0_171 = arith.constant 0 : index
    %306 = vector.load %arg14[%c224, %c0_171] : memref<288x64xf32, #tpu.memory_space<vmem>>, vector<32x64xf32>
    tpu.vector_store %arg14[%c224, %c0_171], %305 {strides = array<i32>} : memref<288x64xf32, #tpu.memory_space<vmem>>, vector<32x64xf32>,
    %c8_172 = arith.constant 8 : index
    %c0_173 = arith.constant 0 : index
    %c0_174 = arith.constant 0 : index
    %307 = vector.load %arg6[%c8_172, %c0_173, %c0_174] : memref<9x32x64xbf16, #tpu.memory_space<vmem>>, vector<1x32x64xbf16>
    %308 = vector.shape_cast %307 : vector<1x32x64xbf16> to vector<32x64xbf16>
    %cst_175 = arith.constant dense<0.000000e+00> : vector<32x64xf32>
    %309 = tpu.matmul %274, %308, %cst_175 {dimension_numbers = #tpu.dot_dimension_numbers<[1], [0], [0], [1], [0, 0, 1, 1], [], []>} : vector<32x32xbf16>, vector<32x64xbf16>, vector<32x64xf32> -> vector<32x64xf32>
    %c256_176 = arith.constant 256 : index
    %c0_177 = arith.constant 0 : index
    %310 = vector.load %arg14[%c256_176, %c0_177] : memref<288x64xf32, #tpu.memory_space<vmem>>, vector<32x64xf32>
    tpu.vector_store %arg14[%c256_176, %c0_177], %309 {strides = array<i32>} : memref<288x64xf32, #tpu.memory_space<vmem>>, vector<32x64xf32>,
    %c0_178 = arith.constant 0 : index
    %c0_179 = arith.constant 0 : index
    %311 = vector.load %arg14[%c0_178, %c0_179] : memref<288x64xf32, #tpu.memory_space<vmem>>, vector<288x64xf32>
    %312 = tpu.iota {dimensions = array<i32: 0>} : vector<8x288xi32>
    %313 = tpu.iota {dimensions = array<i32: 1>} : vector<8x288xi32>
    %c5_i32 = arith.constant 5 : i32
    %314 = vector.broadcast %c5_i32 : i32 to vector<8x288xi32>
    %315 = arith.shrsi %313, %314 : vector<8x288xi32>
    %c31_i32 = arith.constant 31 : i32
    %316 = vector.broadcast %c31_i32 : i32 to vector<8x288xi32>
    %317 = arith.andi %313, %316 : vector<8x288xi32>
    %c6_i32_180 = arith.constant 6 : i32
    %318 = vector.broadcast %c6_i32_180 : i32 to vector<8x288xi32>
    %319 = arith.cmpi sge, %315, %318 : vector<8x288xi32>
    %c3_i32_181 = arith.constant 3 : i32
    %320 = vector.broadcast %c3_i32_181 : i32 to vector<8x288xi32>
    %321 = arith.cmpi sge, %315, %320 : vector<8x288xi32>
    %c1_i32_182 = arith.constant 1 : i32
    %c0_i32_183 = arith.constant 0 : i32
    %322 = vector.broadcast %c1_i32_182 : i32 to vector<8x288xi32>
    %323 = vector.broadcast %c0_i32_183 : i32 to vector<8x288xi32>
    %324 = arith.select %321, %322, %323 : vector<8x288xi1>, vector<8x288xi32>
    %c2_i32_184 = arith.constant 2 : i32
    %325 = vector.broadcast %c2_i32_184 : i32 to vector<8x288xi32>
    %326 = arith.select %319, %325, %324 : vector<8x288xi1>, vector<8x288xi32>
    %c3_i32_185 = arith.constant 3 : i32
    %327 = vector.broadcast %c3_i32_185 : i32 to vector<8x288xi32>
    %328 = arith.muli %327, %326 : vector<8x288xi32>
    %329 = arith.subi %315, %328 : vector<8x288xi32>
    %c4_i32_186 = arith.constant 4 : i32
    %330 = vector.broadcast %c4_i32_186 : i32 to vector<8x288xi32>
    %331 = arith.shrsi %317, %330 : vector<8x288xi32>
    %c15_i32_187 = arith.constant 15 : i32
    %332 = vector.broadcast %c15_i32_187 : i32 to vector<8x288xi32>
    %333 = arith.andi %317, %332 : vector<8x288xi32>
    %c2_i32_188 = arith.constant 2 : i32
    %334 = vector.broadcast %c2_i32_188 : i32 to vector<8x288xi32>
    %335 = arith.shrsi %333, %334 : vector<8x288xi32>
    %c3_i32_189 = arith.constant 3 : i32
    %336 = vector.broadcast %c3_i32_189 : i32 to vector<8x288xi32>
    %337 = arith.andi %333, %336 : vector<8x288xi32>
    %c1_i32_190 = arith.constant 1 : i32
    %338 = vector.broadcast %c1_i32_190 : i32 to vector<8x288xi32>
    %339 = arith.andi %312, %338 : vector<8x288xi32>
    %c1_i32_191 = arith.constant 1 : i32
    %340 = vector.broadcast %c1_i32_191 : i32 to vector<8x288xi32>
    %341 = arith.shrsi %312, %340 : vector<8x288xi32>
    %c1_i32_192 = arith.constant 1 : i32
    %342 = vector.broadcast %c1_i32_192 : i32 to vector<8x288xi32>
    %343 = arith.shrsi %341, %342 : vector<8x288xi32>
    %c1_i32_193 = arith.constant 1 : i32
    %344 = vector.broadcast %c1_i32_193 : i32 to vector<8x288xi32>
    %345 = arith.andi %341, %344 : vector<8x288xi32>
    %346 = arith.cmpi eq, %339, %331 : vector<8x288xi32>
    %c2_i32_194 = arith.constant 2 : i32
    %347 = vector.broadcast %c2_i32_194 : i32 to vector<8x288xi32>
    %348 = arith.muli %347, %343 : vector<8x288xi32>
    %c-1_i32_195 = arith.constant -1 : i32
    %349 = vector.broadcast %c-1_i32_195 : i32 to vector<8x288xi32>
    %350 = arith.addi %348, %349 : vector<8x288xi32>
    %351 = arith.addi %350, %326 : vector<8x288xi32>
    %352 = arith.cmpi eq, %335, %351 : vector<8x288xi32>
    %353 = arith.andi %346, %352 : vector<8x288xi1>
    %c2_i32_196 = arith.constant 2 : i32
    %354 = vector.broadcast %c2_i32_196 : i32 to vector<8x288xi32>
    %355 = arith.muli %354, %345 : vector<8x288xi32>
    %c-1_i32_197 = arith.constant -1 : i32
    %356 = vector.broadcast %c-1_i32_197 : i32 to vector<8x288xi32>
    %357 = arith.addi %355, %356 : vector<8x288xi32>
    %358 = arith.addi %357, %329 : vector<8x288xi32>
    %359 = arith.cmpi eq, %337, %358 : vector<8x288xi32>
    %360 = arith.andi %353, %359 : vector<8x288xi1>
    %cst_198 = arith.constant 1.000000e+00 : f32
    %cst_199 = arith.constant 0.000000e+00 : f32
    %361 = vector.broadcast %cst_198 : f32 to vector<8x288xf32>
    %362 = vector.broadcast %cst_199 : f32 to vector<8x288xf32>
    %363 = arith.select %360, %361, %362 : vector<8x288xi1>, vector<8x288xf32>
    %cst_200 = arith.constant dense<0.000000e+00> : vector<8x64xf32>
    %364 = tpu.matmul %363, %311, %cst_200 {dimension_numbers = #tpu.dot_dimension_numbers<[1], [0], [0], [1], [0, 0, 1, 1], [], []>} : vector<8x288xf32>, vector<288x64xf32>, vector<8x64xf32> -> vector<8x64xf32>
    %365 = tpu.iota {dimensions = array<i32: 0>} : vector<8x288xi32>
    %366 = tpu.iota {dimensions = array<i32: 1>} : vector<8x288xi32>
    %c5_i32_201 = arith.constant 5 : i32
    %367 = vector.broadcast %c5_i32_201 : i32 to vector<8x288xi32>
    %368 = arith.shrsi %366, %367 : vector<8x288xi32>
    %c31_i32_202 = arith.constant 31 : i32
    %369 = vector.broadcast %c31_i32_202 : i32 to vector<8x288xi32>
    %370 = arith.andi %366, %369 : vector<8x288xi32>
    %c6_i32_203 = arith.constant 6 : i32
    %371 = vector.broadcast %c6_i32_203 : i32 to vector<8x288xi32>
    %372 = arith.cmpi sge, %368, %371 : vector<8x288xi32>
    %c3_i32_204 = arith.constant 3 : i32
    %373 = vector.broadcast %c3_i32_204 : i32 to vector<8x288xi32>
    %374 = arith.cmpi sge, %368, %373 : vector<8x288xi32>
    %c1_i32_205 = arith.constant 1 : i32
    %c0_i32_206 = arith.constant 0 : i32
    %375 = vector.broadcast %c1_i32_205 : i32 to vector<8x288xi32>
    %376 = vector.broadcast %c0_i32_206 : i32 to vector<8x288xi32>
    %377 = arith.select %374, %375, %376 : vector<8x288xi1>, vector<8x288xi32>
    %c2_i32_207 = arith.constant 2 : i32
    %378 = vector.broadcast %c2_i32_207 : i32 to vector<8x288xi32>
    %379 = arith.select %372, %378, %377 : vector<8x288xi1>, vector<8x288xi32>
    %c3_i32_208 = arith.constant 3 : i32
    %380 = vector.broadcast %c3_i32_208 : i32 to vector<8x288xi32>
    %381 = arith.muli %380, %379 : vector<8x288xi32>
    %382 = arith.subi %368, %381 : vector<8x288xi32>
    %c4_i32_209 = arith.constant 4 : i32
    %383 = vector.broadcast %c4_i32_209 : i32 to vector<8x288xi32>
    %384 = arith.shrsi %370, %383 : vector<8x288xi32>
    %c15_i32_210 = arith.constant 15 : i32
    %385 = vector.broadcast %c15_i32_210 : i32 to vector<8x288xi32>
    %386 = arith.andi %370, %385 : vector<8x288xi32>
    %c2_i32_211 = arith.constant 2 : i32
    %387 = vector.broadcast %c2_i32_211 : i32 to vector<8x288xi32>
    %388 = arith.shrsi %386, %387 : vector<8x288xi32>
    %c3_i32_212 = arith.constant 3 : i32
    %389 = vector.broadcast %c3_i32_212 : i32 to vector<8x288xi32>
    %390 = arith.andi %386, %389 : vector<8x288xi32>
    %c1_i32_213 = arith.constant 1 : i32
    %391 = vector.broadcast %c1_i32_213 : i32 to vector<8x288xi32>
    %392 = arith.andi %365, %391 : vector<8x288xi32>
    %c1_i32_214 = arith.constant 1 : i32
    %393 = vector.broadcast %c1_i32_214 : i32 to vector<8x288xi32>
    %394 = arith.shrsi %365, %393 : vector<8x288xi32>
    %c1_i32_215 = arith.constant 1 : i32
    %395 = vector.broadcast %c1_i32_215 : i32 to vector<8x288xi32>
    %396 = arith.shrsi %394, %395 : vector<8x288xi32>
    %c1_i32_216 = arith.constant 1 : i32
    %397 = vector.broadcast %c1_i32_216 : i32 to vector<8x288xi32>
    %398 = arith.andi %394, %397 : vector<8x288xi32>
    %399 = arith.cmpi eq, %392, %384 : vector<8x288xi32>
    %c2_i32_217 = arith.constant 2 : i32
    %400 = vector.broadcast %c2_i32_217 : i32 to vector<8x288xi32>
    %401 = arith.muli %400, %396 : vector<8x288xi32>
    %c-1_i32_218 = arith.constant -1 : i32
    %402 = vector.broadcast %c-1_i32_218 : i32 to vector<8x288xi32>
    %403 = arith.addi %401, %402 : vector<8x288xi32>
    %404 = arith.addi %403, %379 : vector<8x288xi32>
    %405 = arith.cmpi eq, %388, %404 : vector<8x288xi32>
    %406 = arith.andi %399, %405 : vector<8x288xi1>
    %c2_i32_219 = arith.constant 2 : i32
    %407 = vector.broadcast %c2_i32_219 : i32 to vector<8x288xi32>
    %408 = arith.muli %407, %398 : vector<8x288xi32>
    %c0_i32_220 = arith.constant 0 : i32
    %409 = vector.broadcast %c0_i32_220 : i32 to vector<8x288xi32>
    %410 = arith.addi %408, %409 : vector<8x288xi32>
    %411 = arith.addi %410, %382 : vector<8x288xi32>
    %412 = arith.cmpi eq, %390, %411 : vector<8x288xi32>
    %413 = arith.andi %406, %412 : vector<8x288xi1>
    %cst_221 = arith.constant 1.000000e+00 : f32
    %cst_222 = arith.constant 0.000000e+00 : f32
    %414 = vector.broadcast %cst_221 : f32 to vector<8x288xf32>
    %415 = vector.broadcast %cst_222 : f32 to vector<8x288xf32>
    %416 = arith.select %413, %414, %415 : vector<8x288xi1>, vector<8x288xf32>
    %cst_223 = arith.constant dense<0.000000e+00> : vector<8x64xf32>
    %417 = tpu.matmul %416, %311, %cst_223 {dimension_numbers = #tpu.dot_dimension_numbers<[1], [0], [0], [1], [0, 0, 1, 1], [], []>} : vector<8x288xf32>, vector<288x64xf32>, vector<8x64xf32> -> vector<8x64xf32>
    %418 = arith.maximumf %364, %417 : vector<8x64xf32>
    %419 = tpu.iota {dimensions = array<i32: 0>} : vector<8x288xi32>
    %420 = tpu.iota {dimensions = array<i32: 1>} : vector<8x288xi32>
    %c5_i32_224 = arith.constant 5 : i32
    %421 = vector.broadcast %c5_i32_224 : i32 to vector<8x288xi32>
    %422 = arith.shrsi %420, %421 : vector<8x288xi32>
    %c31_i32_225 = arith.constant 31 : i32
    %423 = vector.broadcast %c31_i32_225 : i32 to vector<8x288xi32>
    %424 = arith.andi %420, %423 : vector<8x288xi32>
    %c6_i32_226 = arith.constant 6 : i32
    %425 = vector.broadcast %c6_i32_226 : i32 to vector<8x288xi32>
    %426 = arith.cmpi sge, %422, %425 : vector<8x288xi32>
    %c3_i32_227 = arith.constant 3 : i32
    %427 = vector.broadcast %c3_i32_227 : i32 to vector<8x288xi32>
    %428 = arith.cmpi sge, %422, %427 : vector<8x288xi32>
    %c1_i32_228 = arith.constant 1 : i32
    %c0_i32_229 = arith.constant 0 : i32
    %429 = vector.broadcast %c1_i32_228 : i32 to vector<8x288xi32>
    %430 = vector.broadcast %c0_i32_229 : i32 to vector<8x288xi32>
    %431 = arith.select %428, %429, %430 : vector<8x288xi1>, vector<8x288xi32>
    %c2_i32_230 = arith.constant 2 : i32
    %432 = vector.broadcast %c2_i32_230 : i32 to vector<8x288xi32>
    %433 = arith.select %426, %432, %431 : vector<8x288xi1>, vector<8x288xi32>
    %c3_i32_231 = arith.constant 3 : i32
    %434 = vector.broadcast %c3_i32_231 : i32 to vector<8x288xi32>
    %435 = arith.muli %434, %433 : vector<8x288xi32>
    %436 = arith.subi %422, %435 : vector<8x288xi32>
    %c4_i32_232 = arith.constant 4 : i32
    %437 = vector.broadcast %c4_i32_232 : i32 to vector<8x288xi32>
    %438 = arith.shrsi %424, %437 : vector<8x288xi32>
    %c15_i32_233 = arith.constant 15 : i32
    %439 = vector.broadcast %c15_i32_233 : i32 to vector<8x288xi32>
    %440 = arith.andi %424, %439 : vector<8x288xi32>
    %c2_i32_234 = arith.constant 2 : i32
    %441 = vector.broadcast %c2_i32_234 : i32 to vector<8x288xi32>
    %442 = arith.shrsi %440, %441 : vector<8x288xi32>
    %c3_i32_235 = arith.constant 3 : i32
    %443 = vector.broadcast %c3_i32_235 : i32 to vector<8x288xi32>
    %444 = arith.andi %440, %443 : vector<8x288xi32>
    %c1_i32_236 = arith.constant 1 : i32
    %445 = vector.broadcast %c1_i32_236 : i32 to vector<8x288xi32>
    %446 = arith.andi %419, %445 : vector<8x288xi32>
    %c1_i32_237 = arith.constant 1 : i32
    %447 = vector.broadcast %c1_i32_237 : i32 to vector<8x288xi32>
    %448 = arith.shrsi %419, %447 : vector<8x288xi32>
    %c1_i32_238 = arith.constant 1 : i32
    %449 = vector.broadcast %c1_i32_238 : i32 to vector<8x288xi32>
    %450 = arith.shrsi %448, %449 : vector<8x288xi32>
    %c1_i32_239 = arith.constant 1 : i32
    %451 = vector.broadcast %c1_i32_239 : i32 to vector<8x288xi32>
    %452 = arith.andi %448, %451 : vector<8x288xi32>
    %453 = arith.cmpi eq, %446, %438 : vector<8x288xi32>
    %c2_i32_240 = arith.constant 2 : i32
    %454 = vector.broadcast %c2_i32_240 : i32 to vector<8x288xi32>
    %455 = arith.muli %454, %450 : vector<8x288xi32>
    %c0_i32_241 = arith.constant 0 : i32
    %456 = vector.broadcast %c0_i32_241 : i32 to vector<8x288xi32>
    %457 = arith.addi %455, %456 : vector<8x288xi32>
    %458 = arith.addi %457, %433 : vector<8x288xi32>
    %459 = arith.cmpi eq, %442, %458 : vector<8x288xi32>
    %460 = arith.andi %453, %459 : vector<8x288xi1>
    %c2_i32_242 = arith.constant 2 : i32
    %461 = vector.broadcast %c2_i32_242 : i32 to vector<8x288xi32>
    %462 = arith.muli %461, %452 : vector<8x288xi32>
    %c-1_i32_243 = arith.constant -1 : i32
    %463 = vector.broadcast %c-1_i32_243 : i32 to vector<8x288xi32>
    %464 = arith.addi %462, %463 : vector<8x288xi32>
    %465 = arith.addi %464, %436 : vector<8x288xi32>
    %466 = arith.cmpi eq, %444, %465 : vector<8x288xi32>
    %467 = arith.andi %460, %466 : vector<8x288xi1>
    %cst_244 = arith.constant 1.000000e+00 : f32
    %cst_245 = arith.constant 0.000000e+00 : f32
    %468 = vector.broadcast %cst_244 : f32 to vector<8x288xf32>
    %469 = vector.broadcast %cst_245 : f32 to vector<8x288xf32>
    %470 = arith.select %467, %468, %469 : vector<8x288xi1>, vector<8x288xf32>
    %cst_246 = arith.constant dense<0.000000e+00> : vector<8x64xf32>
    %471 = tpu.matmul %470, %311, %cst_246 {dimension_numbers = #tpu.dot_dimension_numbers<[1], [0], [0], [1], [0, 0, 1, 1], [], []>} : vector<8x288xf32>, vector<288x64xf32>, vector<8x64xf32> -> vector<8x64xf32>
    %472 = arith.maximumf %418, %471 : vector<8x64xf32>
    %473 = tpu.iota {dimensions = array<i32: 0>} : vector<8x288xi32>
    %474 = tpu.iota {dimensions = array<i32: 1>} : vector<8x288xi32>
    %c5_i32_247 = arith.constant 5 : i32
    %475 = vector.broadcast %c5_i32_247 : i32 to vector<8x288xi32>
    %476 = arith.shrsi %474, %475 : vector<8x288xi32>
    %c31_i32_248 = arith.constant 31 : i32
    %477 = vector.broadcast %c31_i32_248 : i32 to vector<8x288xi32>
    %478 = arith.andi %474, %477 : vector<8x288xi32>
    %c6_i32_249 = arith.constant 6 : i32
    %479 = vector.broadcast %c6_i32_249 : i32 to vector<8x288xi32>
    %480 = arith.cmpi sge, %476, %479 : vector<8x288xi32>
    %c3_i32_250 = arith.constant 3 : i32
    %481 = vector.broadcast %c3_i32_250 : i32 to vector<8x288xi32>
    %482 = arith.cmpi sge, %476, %481 : vector<8x288xi32>
    %c1_i32_251 = arith.constant 1 : i32
    %c0_i32_252 = arith.constant 0 : i32
    %483 = vector.broadcast %c1_i32_251 : i32 to vector<8x288xi32>
    %484 = vector.broadcast %c0_i32_252 : i32 to vector<8x288xi32>
    %485 = arith.select %482, %483, %484 : vector<8x288xi1>, vector<8x288xi32>
    %c2_i32_253 = arith.constant 2 : i32
    %486 = vector.broadcast %c2_i32_253 : i32 to vector<8x288xi32>
    %487 = arith.select %480, %486, %485 : vector<8x288xi1>, vector<8x288xi32>
    %c3_i32_254 = arith.constant 3 : i32
    %488 = vector.broadcast %c3_i32_254 : i32 to vector<8x288xi32>
    %489 = arith.muli %488, %487 : vector<8x288xi32>
    %490 = arith.subi %476, %489 : vector<8x288xi32>
    %c4_i32_255 = arith.constant 4 : i32
    %491 = vector.broadcast %c4_i32_255 : i32 to vector<8x288xi32>
    %492 = arith.shrsi %478, %491 : vector<8x288xi32>
    %c15_i32_256 = arith.constant 15 : i32
    %493 = vector.broadcast %c15_i32_256 : i32 to vector<8x288xi32>
    %494 = arith.andi %478, %493 : vector<8x288xi32>
    %c2_i32_257 = arith.constant 2 : i32
    %495 = vector.broadcast %c2_i32_257 : i32 to vector<8x288xi32>
    %496 = arith.shrsi %494, %495 : vector<8x288xi32>
    %c3_i32_258 = arith.constant 3 : i32
    %497 = vector.broadcast %c3_i32_258 : i32 to vector<8x288xi32>
    %498 = arith.andi %494, %497 : vector<8x288xi32>
    %c1_i32_259 = arith.constant 1 : i32
    %499 = vector.broadcast %c1_i32_259 : i32 to vector<8x288xi32>
    %500 = arith.andi %473, %499 : vector<8x288xi32>
    %c1_i32_260 = arith.constant 1 : i32
    %501 = vector.broadcast %c1_i32_260 : i32 to vector<8x288xi32>
    %502 = arith.shrsi %473, %501 : vector<8x288xi32>
    %c1_i32_261 = arith.constant 1 : i32
    %503 = vector.broadcast %c1_i32_261 : i32 to vector<8x288xi32>
    %504 = arith.shrsi %502, %503 : vector<8x288xi32>
    %c1_i32_262 = arith.constant 1 : i32
    %505 = vector.broadcast %c1_i32_262 : i32 to vector<8x288xi32>
    %506 = arith.andi %502, %505 : vector<8x288xi32>
    %507 = arith.cmpi eq, %500, %492 : vector<8x288xi32>
    %c2_i32_263 = arith.constant 2 : i32
    %508 = vector.broadcast %c2_i32_263 : i32 to vector<8x288xi32>
    %509 = arith.muli %508, %504 : vector<8x288xi32>
    %c0_i32_264 = arith.constant 0 : i32
    %510 = vector.broadcast %c0_i32_264 : i32 to vector<8x288xi32>
    %511 = arith.addi %509, %510 : vector<8x288xi32>
    %512 = arith.addi %511, %487 : vector<8x288xi32>
    %513 = arith.cmpi eq, %496, %512 : vector<8x288xi32>
    %514 = arith.andi %507, %513 : vector<8x288xi1>
    %c2_i32_265 = arith.constant 2 : i32
    %515 = vector.broadcast %c2_i32_265 : i32 to vector<8x288xi32>
    %516 = arith.muli %515, %506 : vector<8x288xi32>
    %c0_i32_266 = arith.constant 0 : i32
    %517 = vector.broadcast %c0_i32_266 : i32 to vector<8x288xi32>
    %518 = arith.addi %516, %517 : vector<8x288xi32>
    %519 = arith.addi %518, %490 : vector<8x288xi32>
    %520 = arith.cmpi eq, %498, %519 : vector<8x288xi32>
    %521 = arith.andi %514, %520 : vector<8x288xi1>
    %cst_267 = arith.constant 1.000000e+00 : f32
    %cst_268 = arith.constant 0.000000e+00 : f32
    %522 = vector.broadcast %cst_267 : f32 to vector<8x288xf32>
    %523 = vector.broadcast %cst_268 : f32 to vector<8x288xf32>
    %524 = arith.select %521, %522, %523 : vector<8x288xi1>, vector<8x288xf32>
    %cst_269 = arith.constant dense<0.000000e+00> : vector<8x64xf32>
    %525 = tpu.matmul %524, %311, %cst_269 {dimension_numbers = #tpu.dot_dimension_numbers<[1], [0], [0], [1], [0, 0, 1, 1], [], []>} : vector<8x288xf32>, vector<288x64xf32>, vector<8x64xf32> -> vector<8x64xf32>
    %526 = arith.maximumf %472, %525 : vector<8x64xf32>
    %c0_270 = arith.constant 0 : index
    %c0_271 = arith.constant 0 : index
    %527 = vector.load %arg7[%c0_270, %c0_271] : memref<1x64xf32, #tpu.memory_space<vmem>>, vector<1x64xf32>
    %528 = vector.broadcast %527 : vector<1x64xf32> to vector<8x64xf32>
    %529 = arith.addf %526, %528 : vector<8x64xf32>
    %cst_272 = arith.constant 0.000000e+00 : f32
    %530 = vector.broadcast %cst_272 : f32 to vector<8x64xf32>
    %531 = arith.maximumf %529, %530 : vector<8x64xf32>
    %532 = tpu.iota {dimensions = array<i32: 0>} : vector<2x8xi32>
    %533 = tpu.iota {dimensions = array<i32: 1>} : vector<2x8xi32>
    %c0_i32_273 = arith.constant 0 : i32
    %534 = vector.broadcast %c0_i32_273 : i32 to vector<2x8xi32>
    %535 = arith.addi %534, %532 : vector<2x8xi32>
    %536 = arith.cmpi eq, %533, %535 : vector<2x8xi32>
    %cst_274 = arith.constant 1.000000e+00 : f32
    %cst_275 = arith.constant 0.000000e+00 : f32
    %537 = vector.broadcast %cst_274 : f32 to vector<2x8xf32>
    %538 = vector.broadcast %cst_275 : f32 to vector<2x8xf32>
    %539 = arith.select %536, %537, %538 : vector<2x8xi1>, vector<2x8xf32>
    %cst_276 = arith.constant dense<0.000000e+00> : vector<2x64xf32>
    %540 = tpu.matmul %539, %531, %cst_276 {dimension_numbers = #tpu.dot_dimension_numbers<[1], [0], [0], [1], [0, 0, 1, 1], [], []>} : vector<2x8xf32>, vector<8x64xf32>, vector<2x64xf32> -> vector<2x64xf32>
    %c0_277 = arith.constant 0 : index
    %c0_278 = arith.constant 0 : index
    %541 = vector.load %arg15[%c0_277, %c0_278] : memref<2x256xf32, #tpu.memory_space<vmem>>, vector<2x64xf32>
    tpu.vector_store %arg15[%c0_277, %c0_278], %540 {strides = array<i32>} : memref<2x256xf32, #tpu.memory_space<vmem>>, vector<2x64xf32>,
    %542 = tpu.iota {dimensions = array<i32: 0>} : vector<2x8xi32>
    %543 = tpu.iota {dimensions = array<i32: 1>} : vector<2x8xi32>
    %c2_i32_279 = arith.constant 2 : i32
    %544 = vector.broadcast %c2_i32_279 : i32 to vector<2x8xi32>
    %545 = arith.addi %544, %542 : vector<2x8xi32>
    %546 = arith.cmpi eq, %543, %545 : vector<2x8xi32>
    %cst_280 = arith.constant 1.000000e+00 : f32
    %cst_281 = arith.constant 0.000000e+00 : f32
    %547 = vector.broadcast %cst_280 : f32 to vector<2x8xf32>
    %548 = vector.broadcast %cst_281 : f32 to vector<2x8xf32>
    %549 = arith.select %546, %547, %548 : vector<2x8xi1>, vector<2x8xf32>
    %cst_282 = arith.constant dense<0.000000e+00> : vector<2x64xf32>
    %550 = tpu.matmul %549, %531, %cst_282 {dimension_numbers = #tpu.dot_dimension_numbers<[1], [0], [0], [1], [0, 0, 1, 1], [], []>} : vector<2x8xf32>, vector<8x64xf32>, vector<2x64xf32> -> vector<2x64xf32>
    %c0_283 = arith.constant 0 : index
    %c64_284 = arith.constant 64 : index
    %551 = vector.load %arg15[%c0_283, %c64_284] : memref<2x256xf32, #tpu.memory_space<vmem>>, vector<2x64xf32>
    tpu.vector_store %arg15[%c0_283, %c64_284], %550 {strides = array<i32>} : memref<2x256xf32, #tpu.memory_space<vmem>>, vector<2x64xf32>,
    %552 = tpu.iota {dimensions = array<i32: 0>} : vector<2x8xi32>
    %553 = tpu.iota {dimensions = array<i32: 1>} : vector<2x8xi32>
    %c4_i32_285 = arith.constant 4 : i32
    %554 = vector.broadcast %c4_i32_285 : i32 to vector<2x8xi32>
    %555 = arith.addi %554, %552 : vector<2x8xi32>
    %556 = arith.cmpi eq, %553, %555 : vector<2x8xi32>
    %cst_286 = arith.constant 1.000000e+00 : f32
    %cst_287 = arith.constant 0.000000e+00 : f32
    %557 = vector.broadcast %cst_286 : f32 to vector<2x8xf32>
    %558 = vector.broadcast %cst_287 : f32 to vector<2x8xf32>
    %559 = arith.select %556, %557, %558 : vector<2x8xi1>, vector<2x8xf32>
    %cst_288 = arith.constant dense<0.000000e+00> : vector<2x64xf32>
    %560 = tpu.matmul %559, %531, %cst_288 {dimension_numbers = #tpu.dot_dimension_numbers<[1], [0], [0], [1], [0, 0, 1, 1], [], []>} : vector<2x8xf32>, vector<8x64xf32>, vector<2x64xf32> -> vector<2x64xf32>
    %c0_289 = arith.constant 0 : index
    %c128_290 = arith.constant 128 : index
    %561 = vector.load %arg15[%c0_289, %c128_290] : memref<2x256xf32, #tpu.memory_space<vmem>>, vector<2x64xf32>
    tpu.vector_store %arg15[%c0_289, %c128_290], %560 {strides = array<i32>} : memref<2x256xf32, #tpu.memory_space<vmem>>, vector<2x64xf32>,
    %562 = tpu.iota {dimensions = array<i32: 0>} : vector<2x8xi32>
    %563 = tpu.iota {dimensions = array<i32: 1>} : vector<2x8xi32>
    %c6_i32_291 = arith.constant 6 : i32
    %564 = vector.broadcast %c6_i32_291 : i32 to vector<2x8xi32>
    %565 = arith.addi %564, %562 : vector<2x8xi32>
    %566 = arith.cmpi eq, %563, %565 : vector<2x8xi32>
    %cst_292 = arith.constant 1.000000e+00 : f32
    %cst_293 = arith.constant 0.000000e+00 : f32
    %567 = vector.broadcast %cst_292 : f32 to vector<2x8xf32>
    %568 = vector.broadcast %cst_293 : f32 to vector<2x8xf32>
    %569 = arith.select %566, %567, %568 : vector<2x8xi1>, vector<2x8xf32>
    %cst_294 = arith.constant dense<0.000000e+00> : vector<2x64xf32>
    %570 = tpu.matmul %569, %531, %cst_294 {dimension_numbers = #tpu.dot_dimension_numbers<[1], [0], [0], [1], [0, 0, 1, 1], [], []>} : vector<2x8xf32>, vector<8x64xf32>, vector<2x64xf32> -> vector<2x64xf32>
    %c0_295 = arith.constant 0 : index
    %c192_296 = arith.constant 192 : index
    %571 = vector.load %arg15[%c0_295, %c192_296] : memref<2x256xf32, #tpu.memory_space<vmem>>, vector<2x64xf32>
    tpu.vector_store %arg15[%c0_295, %c192_296], %570 {strides = array<i32>} : memref<2x256xf32, #tpu.memory_space<vmem>>, vector<2x64xf32>,
    %c0_297 = arith.constant 0 : index
    %c0_298 = arith.constant 0 : index
    %572 = vector.load %arg15[%c0_297, %c0_298] : memref<2x256xf32, #tpu.memory_space<vmem>>, vector<2x256xf32>
    %573 = arith.truncf %572 : vector<2x256xf32> to vector<2x256xbf16>
    %c0_299 = arith.constant 0 : index
    %c0_300 = arith.constant 0 : index
    %574 = vector.load %arg8[%c0_299, %c0_300] : memref<256x256xbf16, #tpu.memory_space<vmem>>, vector<256x256xbf16>
    %cst_301 = arith.constant dense<0.000000e+00> : vector<2x256xf32>
    %575 = tpu.matmul %573, %574, %cst_301 {dimension_numbers = #tpu.dot_dimension_numbers<[1], [0], [0], [1], [0, 0, 1, 1], [], []>} : vector<2x256xbf16>, vector<256x256xbf16>, vector<2x256xf32> -> vector<2x256xf32>
    %c0_302 = arith.constant 0 : index
    %c0_303 = arith.constant 0 : index
    %576 = vector.load %arg9[%c0_302, %c0_303] : memref<1x256xf32, #tpu.memory_space<vmem>>, vector<1x256xf32>
    %577 = vector.broadcast %576 : vector<1x256xf32> to vector<2x256xf32>
    %578 = arith.addf %575, %577 : vector<2x256xf32>
    %cst_304 = arith.constant 0.000000e+00 : f32
    %579 = vector.broadcast %cst_304 : f32 to vector<2x256xf32>
    %580 = arith.maximumf %578, %579 : vector<2x256xf32>
    %c0_305 = arith.constant 0 : index
    %c0_306 = arith.constant 0 : index
    %581 = vector.load %arg10[%c0_305, %c0_306] : memref<1x256xf32, #tpu.memory_space<vmem>>, vector<1x256xf32>
    %582 = vector.broadcast %581 : vector<1x256xf32> to vector<2x256xf32>
    %583 = arith.mulf %580, %582 : vector<2x256xf32>
    %cst_307 = arith.constant dense<0.000000e+00> : vector<2xf32>
    %584 = vector.multi_reduction <add>, %583, %cst_307 [1] : vector<2x256xf32> to vector<2xf32>
    %585 = vector.shape_cast %584 : vector<2xf32> to vector<2x1xf32>
    %c0_308 = arith.constant 0 : index
    %c0_309 = arith.constant 0 : index
    %586 = vector.load %arg11[%c0_308, %c0_309] : memref<1x1xf32, #tpu.memory_space<vmem>>, vector<1x1xf32>
    %587 = vector.broadcast %586 : vector<1x1xf32> to vector<2x1xf32>
    %588 = arith.addf %585, %587 : vector<2x1xf32>
    %cst_310 = arith.constant 0.000000e+00 : f32
    %589 = vector.broadcast %cst_310 : f32 to vector<2x1xf32>
    %590 = arith.subf %589, %588 : vector<2x1xf32>
    %591 = math.exp %590 : vector<2x1xf32>
    %cst_311 = arith.constant 1.000000e+00 : f32
    %592 = vector.broadcast %cst_311 : f32 to vector<2x1xf32>
    %593 = arith.addf %592, %591 : vector<2x1xf32>
    %cst_312 = arith.constant 1.000000e+00 : f32
    %594 = vector.broadcast %cst_312 : f32 to vector<2x1xf32>
    %595 = arith.divf %594, %593 : vector<2x1xf32>
    %c0_313 = arith.constant 0 : index
    %c0_314 = arith.constant 0 : index
    %596 = vector.load %arg12[%c0_313, %c0_314] : memref<2x1xf32, #tpu.memory_space<vmem>>, vector<2x1xf32>
    tpu.vector_store %arg12[%c0_313, %c0_314], %595 {strides = array<i32>} : memref<2x1xf32, #tpu.memory_space<vmem>>, vector<2x1xf32>,
    return
  }
  func.func @transform_0(%arg0: i32) -> (i32, i32) {
    %c0_i32 = arith.constant 0 : i32
    %c0_i32_0 = arith.constant 0 : i32
    %c0_i32_1 = arith.constant 0 : i32
    return %c0_i32, %c0_i32_0 : i32, i32
  }
  func.func @transform_1(%arg0: i32) -> (i32, i32) {
    %c0_i32 = arith.constant 0 : i32
    %c0_i32_0 = arith.constant 0 : i32
    %c0_i32_1 = arith.constant 0 : i32
    return %c0_i32, %c0_i32_0 : i32, i32
  }
  func.func @transform_2(%arg0: i32) -> (i32, i32) {
    %c0_i32 = arith.constant 0 : i32
    %c0_i32_0 = arith.constant 0 : i32
    %c0_i32_1 = arith.constant 0 : i32
    return %c0_i32, %c0_i32_0 : i32, i32
  }
  func.func @transform_3(%arg0: i32) -> (i32, i32, i32) {
    %c0_i32 = arith.constant 0 : i32
    %c0_i32_0 = arith.constant 0 : i32
    %c0_i32_1 = arith.constant 0 : i32
    %c0_i32_2 = arith.constant 0 : i32
    return %c0_i32, %c0_i32_0, %c0_i32_1 : i32, i32, i32
  }
  func.func @transform_4(%arg0: i32) -> (i32, i32) {
    %c0_i32 = arith.constant 0 : i32
    %c0_i32_0 = arith.constant 0 : i32
    %c0_i32_1 = arith.constant 0 : i32
    return %c0_i32, %c0_i32_0 : i32, i32
  }
  func.func @transform_5(%arg0: i32) -> (i32, i32, i32) {
    %c0_i32 = arith.constant 0 : i32
    %c0_i32_0 = arith.constant 0 : i32
    %c0_i32_1 = arith.constant 0 : i32
    %c0_i32_2 = arith.constant 0 : i32
    return %c0_i32, %c0_i32_0, %c0_i32_1 : i32, i32, i32
  }
  func.func @transform_6(%arg0: i32) -> (i32, i32) {
    %c0_i32 = arith.constant 0 : i32
    %c0_i32_0 = arith.constant 0 : i32
    %c0_i32_1 = arith.constant 0 : i32
    return %c0_i32, %c0_i32_0 : i32, i32
  }
  func.func @transform_7(%arg0: i32) -> (i32, i32) {
    %c0_i32 = arith.constant 0 : i32
    %c0_i32_0 = arith.constant 0 : i32
    %c0_i32_1 = arith.constant 0 : i32
    return %c0_i32, %c0_i32_0 : i32, i32
  }
  func.func @transform_8(%arg0: i32) -> (i32, i32) {
    %c0_i32 = arith.constant 0 : i32
    %c0_i32_0 = arith.constant 0 : i32
    %c0_i32_1 = arith.constant 0 : i32
    return %c0_i32, %c0_i32_0 : i32, i32
  }
  func.func @transform_9(%arg0: i32) -> (i32, i32) {
    %c0_i32 = arith.constant 0 : i32
    %c0_i32_0 = arith.constant 0 : i32
    %c0_i32_1 = arith.constant 0 : i32
    return %c0_i32, %c0_i32_0 : i32, i32
  }
  func.func @transform_10(%arg0: i32) -> (i32, i32) {
    %c0_i32 = arith.constant 0 : i32
    %c0_i32_0 = arith.constant 0 : i32
    %c0_i32_1 = arith.constant 0 : i32
    return %c0_i32, %c0_i32_0 : i32, i32
  }
  func.func @transform_11(%arg0: i32) -> (i32, i32) {
    %c0_i32 = arith.constant 0 : i32
    %c0_i32_0 = arith.constant 0 : i32
    %c0_i32_1 = arith.constant 0 : i32
    return %c0_i32, %c0_i32_0 : i32, i32
  }
}

</mosaic_0001>

<bundles_post_ra>
// kernel: simplenet_forward.1
= control target key start
LH: loop header
LB: loop body
LE: loop exit
PB: predicated region body
PF: predicated region fallthrough
CT: control target
= control target key end

     0   :  { %vm249_vm0 = vcmask 1044480   ;;  %vm250_vm1 = vcmask 1045504   ;;  %v5306_v2 = vmov 65535   ;;  %vm152_vm2 = vcmask 220160   ;;  %s5310_s30 = smov 64   ;;  %s10194_s1 = inlined_call_operand.vmem [shape: bf16[27,16], index: 1, kind: input, shape index: {}]   ;;  %s10195_s0 = inlined_call_operand.vmem [shape: f32[512,27], index: 0, kind: input, shape index: {}]   ;;  %s10196_s2 = inlined_call_operand.vmem [shape: f32[1,16], index: 2, kind: input, shape index: {}]   ;;  %s10197_s3 = inlined_call_operand.vmem [shape: bf16[9,16,32], index: 3, kind: input, shape index: {}]   ;;  %s10198_s4 = inlined_call_operand.vmem [shape: f32[1,32], index: 4, kind: input, shape index: {}]   ;;  %s10199_s5 = inlined_call_operand.vmem [shape: bf16[9,32,64], index: 5, kind: input, shape index: {}]   ;;  %s10200_s6 = inlined_call_operand.vmem [shape: f32[1,64], index: 6, kind: input, shape index: {}]   ;;  %s10201_s7 = inlined_call_operand.vmem [shape: bf16[256,256], index: 7, kind: input, shape index: {}]   ;;  %s10202_s10 = inlined_call_operand.<no memory space> [shape: f32[1,1], index: 10, kind: input, shape index: {}]   ;;  %s10203_s8 = inlined_call_operand.vmem [shape: f32[1,256], index: 8, kind: input, shape index: {}]   ;;  %s10204_s9 = inlined_call_operand.vmem [shape: f32[1,256], index: 9, kind: input, shape index: {}]   ;;  %s10205_s11 = inlined_call_operand.vmem [shape: f32[2,1], index: 11, kind: output, shape index: {}]  }
   0x1   :  { %v4454_v0 = vld [vmem:[%s10194_s1 + $0x8] sm:$0xf]  ;;  %v5023_v1 = vld [vmem:[%s10194_s1 + $0x8] sm:$0x30]  ;;  %v251_v3 = vsel %vm249_vm0, 4294967295, %v5306_v2  ;;  %v5022_v7 = vld [vmem:[%s10194_s1] sm:$0xff] }
   0x2   :  { %v4455_v4 = vor.u32 %v5023_v1, %v4454_v0  ;;  %v252_v5 = vsel %vm250_vm1, %v251_v3, 0  ;;  %v41_v8 = vld [vmem:[%s10195_s0] sm:$0xff]  ;;  %v42_v9 = vld [vmem:[%s10195_s0 + $0x8] sm:$0xff]  ;;  %v43_v11 = vld [vmem:[%s10195_s0 + $0x10] sm:$0xff]  ;;  %vm525_vm3 = vcmask 130048   ;;  %vm10219_vm4 = vcmask 261120  }
   0x3   :  { %v105_v10 = vpack.c.bf16 %v42_v9, %v41_v8  ;;  %v44_v12 = vld [vmem:[%s10195_s0 + $0x18] sm:$0xff]  ;;  %v45_v14 = vld [vmem:[%s10195_s0 + $0x20] sm:$0xff]  ;;  %v46_v15 = vld [vmem:[%s10195_s0 + $0x28] sm:$0xff] }
   0x4   :  { %v254_v6 = vand.u32 %v4455_v4, %v252_v5  ;;  %v106_v13 = vpack.c.bf16 %v44_v12, %v43_v11  ;;  %v107_v16 = vpack.c.bf16 %v46_v15, %v45_v14  ;;  %v47_v17 = vld [vmem:[%s10195_s0 + $0x30] sm:$0xff]  ;;  %v48_v18 = vld [vmem:[%s10195_s0 + $0x38] sm:$0xff]  ;;  %v49_v20 = vld [vmem:[%s10195_s0 + $0x40] sm:$0xff] }
   0x5   :  { %v108_v19 = vpack.c.bf16 %v48_v18, %v47_v17  ;;  %v50_v21 = vld [vmem:[%s10195_s0 + $0x48] sm:$0xff]  ;;  %v51_v23 = vld [vmem:[%s10195_s0 + $0x50] sm:$0xff]  ;;  %v52_v24 = vld [vmem:[%s10195_s0 + $0x58] sm:$0xff] }
   0x6   :  { %262 = vmatpush.bf16.msra.mxu0 %v254_v6  ;;  %v109_v22 = vpack.c.bf16 %v50_v21, %v49_v20  ;;  %v110_v25 = vpack.c.bf16 %v52_v24, %v51_v23  ;;  %v53_v26 = vld [vmem:[%s10195_s0 + $0x60] sm:$0xff]  ;;  %v54_v27 = vld [vmem:[%s10195_s0 + $0x68] sm:$0xff]  ;;  %v55_v29 = vld [vmem:[%s10195_s0 + $0x70] sm:$0xff] }
   0x7   :  { %v111_v28 = vpack.c.bf16 %v54_v27, %v53_v26  ;;  %v56_v30 = vld [vmem:[%s10195_s0 + $0x78] sm:$0xff]  ;;  %v57_v32 = vld [vmem:[%s10195_s0 + $0x80] sm:$0xff]  ;;  %v58_v33 = vld [vmem:[%s10195_s0 + $0x88] sm:$0xff] }
   0x8   :  { %v112_v31 = vpack.c.bf16 %v56_v30, %v55_v29  ;;  %v113_v34 = vpack.c.bf16 %v58_v33, %v57_v32  ;;  %v59_v37 = vld [vmem:[%s10195_s0 + $0x90] sm:$0xff]  ;;  %v60_v38 = vld [vmem:[%s10195_s0 + $0x98] sm:$0xff]  ;;  %v61_v42 = vld [vmem:[%s10195_s0 + $0xa0] sm:$0xff] }
   0x9   :  { %v114_v39 = vpack.c.bf16 %v60_v38, %v59_v37  ;;  %v62_v43 = vld [vmem:[%s10195_s0 + $0xa8] sm:$0xff]  ;;  %v63_v47 = vld [vmem:[%s10195_s0 + $0xb0] sm:$0xff]  ;;  %v64_v48 = vld [vmem:[%s10195_s0 + $0xb8] sm:$0xff] }
   0xa   :  { %263 = vmatpush.bf16.msra.mxu0 %v5022_v7  ;;  %v115_v44 = vpack.c.bf16 %v62_v43, %v61_v42  ;;  %v116_v49 = vpack.c.bf16 %v64_v48, %v63_v47  ;;  %v65_v52 = vld [vmem:[%s10195_s0 + $0xc0] sm:$0xff]  ;;  %v66_v53 = vld [vmem:[%s10195_s0 + $0xc8] sm:$0xff]  ;;  %v67_v57 = vld [vmem:[%s10195_s0 + $0xd0] sm:$0xff] }
   0xb   :  { %v117_v54 = vpack.c.bf16 %v66_v53, %v65_v52  ;;  %v68_v58 = vld [vmem:[%s10195_s0 + $0xd8] sm:$0xff]  ;;  %v69_v62 = vld [vmem:[%s10195_s0 + $0xe0] sm:$0xff]  ;;  %v70_v63 = vld [vmem:[%s10195_s0 + $0xe8] sm:$0xff] }
   0xc   :  { %v118_v59 = vpack.c.bf16 %v68_v58, %v67_v57  ;;  %v119_v0 = vpack.c.bf16 %v70_v63, %v69_v62  ;;  %v71_v3 = vld [vmem:[%s10195_s0 + $0xf0] sm:$0xff]  ;;  %v72_v4 = vld [vmem:[%s10195_s0 + $0xf8] sm:$0xff]  ;;  %v73_v8 = vld [vmem:[%s10195_s0 + $0x100] sm:$0xff] }
   0xd   :  { %4456 = vmatmul.msk.bf16.vlgmr.msra.gmra.mxu0 %vm152_vm2, %v105_v10  ;;  %v120_v5 = vpack.c.bf16 %v72_v4, %v71_v3  ;;  %v74_v9 = vld [vmem:[%s10195_s0 + $0x108] sm:$0xff]  ;;  %v76_v14 = vld [vmem:[%s10195_s0 + $0x118] sm:$0xff]  ;;  %v77_v18 = vld [vmem:[%s10195_s0 + $0x120] sm:$0xff] }
   0xe   :  { %v121_v10 = vpack.c.bf16 %v74_v9, %v73_v8  ;;  %v79_v23 = vld [vmem:[%s10195_s0 + $0x130] sm:$0xff]  ;;  %v80_v24 = vld [vmem:[%s10195_s0 + $0x138] sm:$0xff]  ;;  %v82_v29 = vld [vmem:[%s10195_s0 + $0x148] sm:$0xff] }
   0xf   :  { %v83_v33 = vld [vmem:[%s10195_s0 + $0x150] sm:$0xff]  ;;  %v85_v42 = vld [vmem:[%s10195_s0 + $0x160] sm:$0xff]  ;;  %v86_v43 = vld [vmem:[%s10195_s0 + $0x168] sm:$0xff] }
  0x10   :  { %v88_v52 = vld [vmem:[%s10195_s0 + $0x178] sm:$0xff]  ;;  %v89_v58 = vld [vmem:[%s10195_s0 + $0x180] sm:$0xff]  ;;  %v91_v3 = vld [vmem:[%s10195_s0 + $0x190] sm:$0xff] }
  0x11   :  { %v92_v4 = vld [vmem:[%s10195_s0 + $0x198] sm:$0xff] }
  0x1d   :  { %4457 = vmatmul.msk.bf16.gmra.mxu0 %vm152_vm2, %v106_v13  ;;  %v75_v13 = vld [vmem:[%s10195_s0 + $0x110] sm:$0xff] }
  0x1e   :  { %v122_v15 = vpack.c.bf16 %v76_v14, %v75_v13  ;;  %v94_v13 = vld [vmem:[%s10195_s0 + $0x1a8] sm:$0xff] }
  0x2d   :  { %4458 = vmatmul.msk.bf16.gmra.mxu0 %vm152_vm2, %v107_v16 }
  0x3d   :  { %4459 = vmatmul.msk.bf16.gmra.mxu0 %vm152_vm2, %v108_v19  ;;  %v78_v19 = vld [vmem:[%s10195_s0 + $0x128] sm:$0xff] }
  0x3e   :  { %v123_v20 = vpack.c.bf16 %v78_v19, %v77_v18  ;;  %v95_v19 = vld [vmem:[%s10195_s0 + $0x1b0] sm:$0xff] }
  0x4d   :  { %4460 = vmatmul.msk.bf16.gmra.mxu0 %vm152_vm2, %v109_v22 }
  0x5d   :  { %4461 = vmatmul.msk.bf16.gmra.mxu0 %vm152_vm2, %v110_v25  ;;  %v124_v25 = vpack.c.bf16 %v80_v24, %v79_v23 }
  0x6d   :  { %4462 = vmatmul.msk.bf16.gmra.mxu0 %vm152_vm2, %v111_v28  ;;  %v81_v28 = vld [vmem:[%s10195_s0 + $0x140] sm:$0xff] }
  0x6e   :  { %v125_v30 = vpack.c.bf16 %v82_v29, %v81_v28  ;;  %v97_v28 = vld [vmem:[%s10195_s0 + $0x1c0] sm:$0xff]  ;;  %v98_v29 = vld [vmem:[%s10195_s0 + $0x1c8] sm:$0xff] }
  0x7d   :  { %4463 = vmatmul.msk.bf16.gmra.mxu0 %vm152_vm2, %v112_v31 }
  0x8a   :  { %v5442_v35 = vpop.f32.mrf.mxu0 }
  0x8d   :  { %4464 = vmatmul.msk.bf16.gmra.mxu0 %vm152_vm2, %v113_v34  ;;  %v84_v34 = vld [vmem:[%s10195_s0 + $0x158] sm:$0xff] }
  0x8e   :  { %v126_v37 = vpack.c.bf16 %v84_v34, %v83_v33 }
  0x92   :  { %v5445_v36 = vpop.f32.mrf.mxu0 }
  0x9a   :  { %v5453_v40 = vpop.f32.mrf.mxu0 }
  0x9d   :  { %4465 = vmatmul.msk.bf16.gmra.mxu0 %vm152_vm2, %v114_v39 }
  0xa2   :  { %v5456_v41 = vpop.f32.mrf.mxu0 }
  0xaa   :  { %v5464_v45 = vpop.f32.mrf.mxu0 }
  0xad   :  { %4466 = vmatmul.msk.bf16.gmra.mxu0 %vm152_vm2, %v115_v44  ;;  %v127_v44 = vpack.c.bf16 %v86_v43, %v85_v42  ;;  %v100_v42 = vld [vmem:[%s10195_s0 + $0x1d8] sm:$0xff] }
  0xb2   :  { %v5467_v46 = vpop.f32.mrf.mxu0 }
  0xba   :  { %v5475_v50 = vpop.f32.mrf.mxu0 }
  0xbd   :  { %4467 = vmatmul.msk.bf16.gmra.mxu0 %vm152_vm2, %v116_v49  ;;  %v87_v49 = vld [vmem:[%s10195_s0 + $0x170] sm:$0xff] }
  0xbe   :  { %v128_v53 = vpack.c.bf16 %v88_v52, %v87_v49  ;;  %v101_v52 = vld [vmem:[%s10195_s0 + $0x1e0] sm:$0xff] }
  0xc2   :  { %v5478_v51 = vpop.f32.mrf.mxu0 }
  0xca   :  { %v5486_v55 = vpop.f32.mrf.mxu0 }
  0xcd   :  { %4468 = vmatmul.msk.bf16.gmra.mxu0 %vm152_vm2, %v117_v54 }
  0xd2   :  { %v5489_v56 = vpop.f32.mrf.mxu0 }
  0xda   :  { %v5497_v60 = vpop.f32.mrf.mxu0 }
  0xdd   :  { %4469 = vmatmul.msk.bf16.gmra.mxu0 %vm152_vm2, %v118_v59  ;;  %v90_v59 = vld [vmem:[%s10195_s0 + $0x188] sm:$0xff] }
  0xde   :  { %v129_v62 = vpack.c.bf16 %v90_v59, %v89_v58 }
  0xe2   :  { %v5500_v61 = vpop.f32.mrf.mxu0 }
  0xea   :  { %v5508_v1 = vpop.f32.mrf.mxu0 }
  0xed   :  { %4470 = vmatmul.msk.bf16.gmra.mxu0 %vm152_vm2, %v119_v0 }
  0xf2   :  { %v5511_v2 = vpop.f32.mrf.mxu0 }
  0xfa   :  { %v5519_v6 = vpop.f32.mrf.mxu0 }
  0xfd   :  { %4471 = vmatmul.msk.bf16.gmra.mxu0 %vm152_vm2, %v120_v5  ;;  %v130_v5 = vpack.c.bf16 %v92_v4, %v91_v3  ;;  %v103_v3 = vld [vmem:[%s10195_s0 + $0x1f0] sm:$0xff]  ;;  %v104_v4 = vld [vmem:[%s10195_s0 + $0x1f8] sm:$0xff] }
 0x102   :  { %v5522_v7 = vpop.f32.mrf.mxu0 }
 0x10a   :  { %v5530_v11 = vpop.f32.mrf.mxu0 }
 0x10d   :  { %4472 = vmatmul.msk.bf16.gmra.mxu0 %vm152_vm2, %v121_v10  ;;  %v93_v10 = vld [vmem:[%s10195_s0 + $0x1a0] sm:$0xff] }
 0x10e   :  { %v131_v14 = vpack.c.bf16 %v94_v13, %v93_v10  ;;  %v5025_v10 = vld [vmem:[%s10197_s3 + $0x8] sm:$0xff]  ;;  %v5026_v13 = vld [vmem:[%s10197_s3 + $0x10] sm:$0xff] }
 0x10f   :  { %632 = vmatpush.bf16.msra.mxu2 %v5025_v10  ;;  %706 = vmatpush.bf16.msra.mxu3 %v5026_v13 }
 0x112   :  { %v5533_v12 = vpop.f32.mrf.mxu0 }
 0x11a   :  { %v5541_v16 = vpop.f32.mrf.mxu0 }
 0x11d   :  { %4473 = vmatmul.msk.bf16.gmra.mxu0 %vm152_vm2, %v122_v15 }
 0x122   :  { %v5544_v17 = vpop.f32.mrf.mxu0 }
 0x123   :  { %v428_v10 = vmax.f32 %v5456_v41, %v5544_v17 }
 0x12a   :  { %v5552_v21 = vpop.f32.mrf.mxu0 }
 0x12d   :  { %4474 = vmatmul.msk.bf16.gmra.mxu0 %vm152_vm2, %v123_v20  ;;  %v96_v20 = vld [vmem:[%s10195_s0 + $0x1b8] sm:$0xff] }
 0x12e   :  { %v132_v23 = vpack.c.bf16 %v96_v20, %v95_v19 }
 0x132   :  { %v5555_v22 = vpop.f32.mrf.mxu0 }
 0x133   :  { %v430_v17 = vmax.f32 %v5467_v46, %v5555_v22 }
 0x13a   :  { %v5563_v26 = vpop.f32.mrf.mxu0 }
 0x13d   :  { %4475 = vmatmul.msk.bf16.gmra.mxu0 %vm152_vm2, %v124_v25 }
 0x142   :  { %v5566_v27 = vpop.f32.mrf.mxu0 }
 0x143   :  { %v432_v22 = vmax.f32 %v5478_v51, %v5566_v27 }
 0x14a   :  { %v5574_v31 = vpop.f32.mrf.mxu0 }
 0x14d   :  { %4476 = vmatmul.msk.bf16.gmra.mxu0 %vm152_vm2, %v125_v30  ;;  %v133_v30 = vpack.c.bf16 %v98_v29, %v97_v28  ;;  %v425_v29 = vmax.f32 %v5442_v35, %v5530_v11 }
 0x152   :  { %v5577_v32 = vpop.f32.mrf.mxu0 }
 0x153   :  { %v434_v27 = vmax.f32 %v5489_v56, %v5577_v32 }
 0x15a   :  { %v5585_v38 = vpop.f32.mrf.mxu0 }
 0x15d   :  { %4477 = vmatmul.msk.bf16.gmra.mxu0 %vm152_vm2, %v126_v37  ;;  %v99_v37 = vld [vmem:[%s10195_s0 + $0x1d0] sm:$0xff] }
 0x15e   :  { %v134_v43 = vpack.c.bf16 %v100_v42, %v99_v37  ;;  %v5710_v37 = vld [vmem:[%s10196_s2] ss:$0 sm:$0xff] }
 0x162   :  { %v5588_v39 = vpop.f32.mrf.mxu0 }
 0x163   :  { %v436_v32 = vmax.f32 %v5500_v61, %v5588_v39 }
 0x16a   :  { %v5596_v47 = vpop.f32.mrf.mxu0 }
 0x16d   :  { %4478 = vmatmul.msk.bf16.gmra.mxu0 %vm152_vm2, %v127_v44 }
 0x172   :  { %v5599_v48 = vpop.f32.mrf.mxu0 }
 0x173   :  { %v438_v39 = vmax.f32 %v5511_v2, %v5599_v48  ;;  %v5029_v2 = vld [vmem:[%s10197_s3 + $0x28] sm:$0xff] }
 0x174   :  { %928 = vmatpush.bf16.msrb.mxu3 %v5029_v2 }
 0x17a   :  { %v5607_v54 = vpop.f32.mrf.mxu0 }
 0x17d   :  { %4479 = vmatmul.msk.bf16.gmra.mxu0 %vm152_vm2, %v128_v53  ;;  %v102_v53 = vld [vmem:[%s10195_s0 + $0x1e8] sm:$0xff] }
 0x17e   :  { %v135_v58 = vpack.c.bf16 %v102_v53, %v101_v52 }
 0x182   :  { %v5610_v57 = vpop.f32.mrf.mxu0 }
 0x18a   :  { %v345_v63 = vpop.f32.mrf.mxu0 }
 0x18d   :  { %4480 = vmatmul.msk.bf16.gmra.mxu0 %vm152_vm2, %v129_v62 }
 0x192   :  { %v347_v0 = vpop.f32.mrf.mxu0 }
 0x19a   :  { %v5625_v8 = vpop.f32.mrf.mxu0 }
 0x19d   :  { %4481 = vmatmul.msk.bf16.gmra.mxu0 %vm152_vm2, %v130_v5  ;;  %v5024_v5 = vld [vmem:[%s10197_s3] sm:$0xff] }
 0x19e   :  { %557 = vmatpush.bf16.msra.mxu1 %v5024_v5 }
 0x1a2   :  { %v5628_v9 = vpop.f32.mrf.mxu0 }
 0x1aa   :  { %v5636_v15 = vpop.f32.mrf.mxu0 }
 0x1ad   :  { %4482 = vmatmul.msk.bf16.gmra.mxu0 %vm152_vm2, %v131_v14  ;;  %v136_v14 = vpack.c.bf16 %v104_v4, %v103_v3 }
 0x1b2   :  { %v5639_v18 = vpop.f32.mrf.mxu0 }
 0x1ba   :  { %v5647_v24 = vpop.f32.mrf.mxu0 }
 0x1bd   :  { %4483 = vmatmul.msk.bf16.gmra.mxu0 %vm152_vm2, %v132_v23 }
 0x1c2   :  { %v5650_v25 = vpop.f32.mrf.mxu0 }
 0x1ca   :  { %v5658_v33 = vpop.f32.mrf.mxu0 }
 0x1cd   :  { %4484 = vmatmul.msk.bf16.gmra.mxu0 %vm152_vm2, %v133_v30 }
 0x1d2   :  { %v5661_v34 = vpop.f32.mrf.mxu0 }
 0x1da   :  { %v5669_v44 = vpop.f32.mrf.mxu0 }
 0x1dd   :  { %4485 = vmatmul.msk.bf16.gmra.mxu0 %vm152_vm2, %v134_v43  ;;  %v426_v43 = vmax.f32 %v5445_v36, %v5533_v12  ;;  %v427_v36 = vmax.f32 %v5453_v40, %v5541_v16  ;;  %v429_v40 = vmax.f32 %v5464_v45, %v5552_v21  ;;  %v431_v45 = vmax.f32 %v5475_v50, %v5563_v26 }
 0x1de   :  { %v433_v50 = vmax.f32 %v5486_v55, %v5574_v31  ;;  %v435_v55 = vmax.f32 %v5497_v60, %v5585_v38  ;;  %v437_v60 = vmax.f32 %v5508_v1, %v5596_v47  ;;  %v5028_v1 = vld [vmem:[%s10197_s3 + $0x20] sm:$0xff] }
 0x1df   :  { %854 = vmatpush.bf16.msrb.mxu2 %v5028_v1 }
 0x1e2   :  { %v5672_v49 = vpop.f32.mrf.mxu0 }
 0x1ea   :  { %v5680_v59 = vpop.f32.mrf.mxu0 }
 0x1ed   :  { %4486 = vmatmul.msk.bf16.gmra.mxu0 %vm152_vm2, %v135_v58 }
 0x1f2   :  { %v5683_v62 = vpop.f32.mrf.mxu0 }
 0x1fa   :  { %v5700_v19 = vpop.f32.mrf.mxu0 }
 0x1fd   :  { %4487 = vmatmul.msk.bf16.gmra.mxu0 %vm152_vm2, %v136_v14 }
 0x202   :  { %v5703_v20 = vpop.f32.mrf.mxu0 }
 0x20a   :  { %v385_v23 = vpop.f32.mrf.mxu0 }
 0x20b   :  { %v441_v28 = vmax.f32 %v345_v63, %v385_v23 }
 0x20d   :  { %v457_v30 = vmax.f32 %v425_v29, %v441_v28 }
 0x20f   :  { %v477_v53 = vadd.f32 %v5710_v37, %v457_v30 }
 0x211   :  { %v493_v63 = vmax.f32 %v477_v53, 0.0 }
 0x212   :  { %v387_v42 = vpop.f32.mrf.mxu0 }
 0x213   :  { %v442_v52 = vmax.f32 %v347_v0, %v387_v42 }
 0x215   :  { %v458_v58 = vmax.f32 %v426_v43, %v442_v52 }
 0x217   :  { %v478_v3 = vadd.f32 %v5710_v37, %v458_v58 }
 0x219   :  { %v494_v4 = vmax.f32 %v478_v3, 0.0 }
 0x21a   :  { %v390_v5 = vpop.f32.mrf.mxu0 }
 0x21b   :  { %v5716_v35 = vpack.c.bf16 %v494_v4, %v493_v63  ;;  %v443_v11 = vmax.f32 %v5625_v8, %v390_v5 }
 0x21d   :  { %4492 = vmatmul.msk.bf16.vlgmr.msra.gmra.mxu1 %vm525_vm3, %v5716_v35  ;;  %4506 = vmatmul.msk.bf16.vlgmr.msra.gmra.mxu2 %vm525_vm3, %v5716_v35  ;;  %v459_v12 = vmax.f32 %v427_v36, %v443_v11 }
 0x21e   :  { %4520 = vmatmul.msk.bf16.vlgmr.msra.gmra.mxu3 %vm525_vm3, %v5716_v35 }
 0x21f   :  { %v479_v8 = vadd.f32 %v5710_v37, %v459_v12 }
 0x221   :  { %v495_v28 = vmax.f32 %v479_v8, 0.0 }
 0x222   :  { %v392_v0 = vpop.f32.mrf.mxu0 }
 0x223   :  { %v444_v13 = vmax.f32 %v5628_v9, %v392_v0 }
 0x225   :  { %v460_v14 = vmax.f32 %v428_v10, %v444_v13 }
 0x227   :  { %v480_v23 = vadd.f32 %v5710_v37, %v460_v14 }
 0x229   :  { %v496_v29 = vmax.f32 %v480_v23, 0.0 }
 0x22a   :  { %v395_v30 = vpop.f32.mrf.mxu0 }
 0x22b   :  { %v5732_v42 = vpack.c.bf16 %v496_v29, %v495_v28  ;;  %v445_v43 = vmax.f32 %v5636_v15, %v395_v30 }
 0x22d   :  { %4493 = vmatmul.msk.bf16.gmra.mxu1 %vm525_vm3, %v5732_v42  ;;  %4507 = vmatmul.msk.bf16.gmra.mxu2 %vm525_vm3, %v5732_v42  ;;  %v461_v41 = vmax.f32 %v429_v40, %v445_v43 }
 0x22e   :  { %4521 = vmatmul.msk.bf16.gmra.mxu3 %vm525_vm3, %v5732_v42 }
 0x22f   :  { %v481_v15 = vadd.f32 %v5710_v37, %v461_v41 }
 0x231   :  { %v497_v58 = vmax.f32 %v481_v15, 0.0 }
 0x232   :  { %v397_v16 = vpop.f32.mrf.mxu0 }
 0x233   :  { %v446_v9 = vmax.f32 %v5639_v18, %v397_v16 }
 0x235   :  { %v462_v52 = vmax.f32 %v430_v17, %v446_v9 }
 0x237   :  { %v482_v53 = vadd.f32 %v5710_v37, %v462_v52 }
 0x239   :  { %v498_v3 = vmax.f32 %v482_v53, 0.0 }
 0x23a   :  { %v400_v63 = vpop.f32.mrf.mxu0 }
 0x23b   :  { %v5748_v4 = vpack.c.bf16 %v498_v3, %v497_v58  ;;  %v447_v5 = vmax.f32 %v5647_v24, %v400_v63 }
 0x23d   :  { %4494 = vmatmul.msk.bf16.gmra.mxu1 %vm525_vm3, %v5748_v4  ;;  %4508 = vmatmul.msk.bf16.gmra.mxu2 %vm525_vm3, %v5748_v4  ;;  %v463_v46 = vmax.f32 %v431_v45, %v447_v5  ;;  %v5027_v45 = vld [vmem:[%s10197_s3 + $0x18] sm:$0xff] }
 0x23e   :  { %4522 = vmatmul.msk.bf16.gmra.mxu3 %vm525_vm3, %v5748_v4  ;;  %780 = vmatpush.bf16.msrb.mxu1 %v5027_v45 }
 0x23f   :  { %v483_v24 = vadd.f32 %v5710_v37, %v463_v46  ;;  %v439_v46 = vmax.f32 %v5519_v6, %v5607_v54 }
 0x241   :  { %v499_v12 = vmax.f32 %v483_v24, 0.0 }
 0x242   :  { %v402_v21 = vpop.f32.mrf.mxu0 }
 0x243   :  { %v448_v18 = vmax.f32 %v5650_v25, %v402_v21 }
 0x245   :  { %v464_v11 = vmax.f32 %v432_v22, %v448_v18  ;;  %v440_v18 = vmax.f32 %v5522_v7, %v5610_v57 }
 0x247   :  { %v484_v36 = vadd.f32 %v5710_v37, %v464_v11 }
 0x249   :  { %v500_v0 = vmax.f32 %v484_v36, 0.0 }
 0x24a   :  { %v405_v10 = vpop.f32.mrf.mxu0 }
 0x24b   :  { %v5764_v13 = vpack.c.bf16 %v500_v0, %v499_v12  ;;  %v449_v8 = vmax.f32 %v5658_v33, %v405_v10 }
 0x24d   :  { %4495 = vmatmul.msk.bf16.gmra.mxu1 %vm525_vm3, %v5764_v13  ;;  %4509 = vmatmul.msk.bf16.gmra.mxu2 %vm525_vm3, %v5764_v13  ;;  %v465_v51 = vmax.f32 %v433_v50, %v449_v8 }
 0x24e   :  { %4523 = vmatmul.msk.bf16.gmra.mxu3 %vm525_vm3, %v5764_v13 }
 0x24f   :  { %v485_v33 = vadd.f32 %v5710_v37, %v465_v51 }
 0x251   :  { %v501_v28 = vmax.f32 %v485_v33, 0.0 }
 0x252   :  { %v407_v26 = vpop.f32.mrf.mxu0 }
 0x253   :  { %v450_v25 = vmax.f32 %v5661_v34, %v407_v26 }
 0x255   :  { %v466_v14 = vmax.f32 %v434_v27, %v450_v25 }
 0x257   :  { %v486_v23 = vadd.f32 %v5710_v37, %v466_v14 }
 0x259   :  { %v502_v29 = vmax.f32 %v486_v23, 0.0 }
 0x25a   :  { %v410_v30 = vpop.f32.mrf.mxu0 }
 0x25b   :  { %v5780_v43 = vpack.c.bf16 %v502_v29, %v501_v28  ;;  %v451_v40 = vmax.f32 %v5669_v44, %v410_v30 }
 0x25d   :  { %4496 = vmatmul.msk.bf16.gmra.mxu1 %vm525_vm3, %v5780_v43  ;;  %4510 = vmatmul.msk.bf16.gmra.mxu2 %vm525_vm3, %v5780_v43  ;;  %v467_v56 = vmax.f32 %v435_v55, %v451_v40 }
 0x25e   :  { %4524 = vmatmul.msk.bf16.gmra.mxu3 %vm525_vm3, %v5780_v43 }
 0x25f   :  { %v487_v44 = vadd.f32 %v5710_v37, %v467_v56 }
 0x261   :  { %v503_v17 = vmax.f32 %v487_v44, 0.0 }
 0x262   :  { %v412_v31 = vpop.f32.mrf.mxu0 }
 0x263   :  { %v452_v34 = vmax.f32 %v5672_v49, %v412_v31 }
 0x265   :  { %v468_v41 = vmax.f32 %v436_v32, %v452_v34 }
 0x267   :  { %v488_v16 = vadd.f32 %v5710_v37, %v468_v41 }
 0x269   :  { %v504_v9 = vmax.f32 %v488_v16, 0.0 }
 0x26a   :  { %v415_v15 = vpop.f32.mrf.mxu0 }
 0x26b   :  { %v5796_v52 = vpack.c.bf16 %v504_v9, %v503_v17  ;;  %v453_v53 = vmax.f32 %v5680_v59, %v415_v15 }
 0x26d   :  { %4497 = vmatmul.msk.bf16.gmra.mxu1 %vm525_vm3, %v5796_v52  ;;  %4511 = vmatmul.msk.bf16.gmra.mxu2 %vm525_vm3, %v5796_v52  ;;  %v469_v61 = vmax.f32 %v437_v60, %v453_v53 }
 0x26e   :  { %4525 = vmatmul.msk.bf16.gmra.mxu3 %vm525_vm3, %v5796_v52 }
 0x26f   :  { %v489_v59 = vadd.f32 %v5710_v37, %v469_v61 }
 0x271   :  { %v505_v63 = vmax.f32 %v489_v59, 0.0  ;;  %v5030_v59 = vld [vmem:[%s10197_s3 + $0x30] sm:$0xff] }
 0x272   :  { %v417_v38 = vpop.f32.mrf.mxu0  ;;  %1002 = vmatpush.bf16.msra.mxu1 %v5030_v59 }
 0x273   :  { %v454_v49 = vmax.f32 %v5683_v62, %v417_v38 }
 0x275   :  { %v470_v58 = vmax.f32 %v438_v39, %v454_v49 }
 0x277   :  { %v490_v3 = vadd.f32 %v5710_v37, %v470_v58  ;;  %v5031_v58 = vld [vmem:[%s10197_s3 + $0x38] sm:$0xff] }
 0x278   :  { %1076 = vmatpush.bf16.msra.mxu2 %v5031_v58 }
 0x279   :  { %v506_v5 = vmax.f32 %v490_v3, 0.0  ;;  %v5032_v3 = vld [vmem:[%s10197_s3 + $0x40] sm:$0xff] }
 0x27a   :  { %v420_v47 = vpop.f32.mrf.mxu0  ;;  %1150 = vmatpush.bf16.msra.mxu3 %v5032_v3 }
 0x27b   :  { %v5821_v48 = vpack.c.bf16 %v506_v5, %v505_v63  ;;  %v455_v62 = vmax.f32 %v5700_v19, %v420_v47 }
 0x27d   :  { %4498 = vmatmul.msk.bf16.gmra.mxu1 %vm525_vm3, %v5821_v48  ;;  %4512 = vmatmul.msk.bf16.gmra.mxu2 %vm525_vm3, %v5821_v48  ;;  %v471_v21 = vmax.f32 %v439_v46, %v455_v62 }
 0x27e   :  { %4526 = vmatmul.msk.bf16.gmra.mxu3 %vm525_vm3, %v5821_v48 }
 0x27f   :  { %v491_v19 = vadd.f32 %v5710_v37, %v471_v21 }
 0x281   :  { %v507_v12 = vmax.f32 %v491_v19, 0.0 }
 0x282   :  { %v422_v22 = vpop.f32.mrf.mxu0 }
 0x283   :  { %v456_v24 = vmax.f32 %v5703_v20, %v422_v22 }
 0x285   :  { %v472_v11 = vmax.f32 %v440_v18, %v456_v24 }
 0x287   :  { %v492_v36 = vadd.f32 %v5710_v37, %v472_v11 }
 0x289   :  { %v508_v0 = vmax.f32 %v492_v36, 0.0 }
 0x28b   :  { %v5837_v10 = vpack.c.bf16 %v508_v0, %v507_v12 }
 0x28d   :  { %4499 = vmatmul.msk.bf16.gmra.mxu1 %vm525_vm3, %v5837_v10  ;;  %4513 = vmatmul.msk.bf16.gmra.mxu2 %vm525_vm3, %v5837_v10 }
 0x28e   :  { %4527 = vmatmul.msk.bf16.gmra.mxu3 %vm525_vm3, %v5837_v10 }
 0x29a   :  { %v559_v6 = vpop.f32.mrf.mxu1 }
 0x29b   :  { %600 = vst.msk [vmem:[#allocation2] sm:$0xff] %vm10219_vm4, %v559_v6 }
 0x29d   :  { %4534 = vmatmul.msk.bf16.vlgmr.msrb.gmra.mxu1 %vm525_vm3, %v5716_v35  ;;  %4548 = vmatmul.msk.bf16.vlgmr.msrb.gmra.mxu2 %vm525_vm3, %v5716_v35 }
 0x29e   :  { %4562 = vmatmul.msk.bf16.vlgmr.msrb.gmra.mxu3 %vm525_vm3, %v5716_v35 }
 0x2a0   :  { %v634_v7 = vpop.f32.mrf.mxu2 }
 0x2a1   :  { %674 = vst.msk [vmem:[#allocation2 + $0x80] sm:$0xff] %vm10219_vm4, %v634_v7  ;;  %v708_v54 = vpop.f32.mrf.mxu3 }
 0x2a2   :  { %748 = vst.msk [vmem:[#allocation2 + $0x100] sm:$0xff] %vm10219_vm4, %v708_v54  ;;  %v561_v57 = vpop.f32.mrf.mxu1 }
 0x2a3   :  { %601 = vst.msk [vmem:[#allocation2 + $0x8] sm:$0xff] %vm10219_vm4, %v561_v57 }
 0x2a8   :  { %v636_v20 = vpop.f32.mrf.mxu2 }
 0x2a9   :  { %675 = vst.msk [vmem:[#allocation2 + $0x88] sm:$0xff] %vm10219_vm4, %v636_v20  ;;  %v710_v37 = vpop.f32.mrf.mxu3 }
 0x2aa   :  { %749 = vst.msk [vmem:[#allocation2 + $0x108] sm:$0xff] %vm10219_vm4, %v710_v37  ;;  %v564_v8 = vpop.f32.mrf.mxu1 }
 0x2ab   :  { %602 = vst.msk [vmem:[#allocation2 + $0x10] sm:$0xff] %vm10219_vm4, %v564_v8 }
 0x2ad   :  { %4535 = vmatmul.msk.bf16.gmra.mxu1 %vm525_vm3, %v5732_v42  ;;  %4549 = vmatmul.msk.bf16.gmra.mxu2 %vm525_vm3, %v5732_v42 }
 0x2ae   :  { %4563 = vmatmul.msk.bf16.gmra.mxu3 %vm525_vm3, %v5732_v42 }
 0x2b0   :  { %v639_v50 = vpop.f32.mrf.mxu2 }
 0x2b1   :  { %676 = vst.msk [vmem:[#allocation2 + $0x90] sm:$0xff] %vm10219_vm4, %v639_v50  ;;  %v713_v51 = vpop.f32.mrf.mxu3 }
 0x2b2   :  { %750 = vst.msk [vmem:[#allocation2 + $0x110] sm:$0xff] %vm10219_vm4, %v713_v51  ;;  %v566_v26 = vpop.f32.mrf.mxu1  ;;  %v1210_v59 = vld [vmem:[#allocation2 + $0x10] sm:$0xff] }
 0x2b3   :  { %603 = vst.msk [vmem:[#allocation2 + $0x18] sm:$0xff] %vm10219_vm4, %v566_v26 }
 0x2b8   :  { %v641_v27 = vpop.f32.mrf.mxu2 }
 0x2b9   :  { %677 = vst.msk [vmem:[#allocation2 + $0x98] sm:$0xff] %vm10219_vm4, %v641_v27  ;;  %v715_v25 = vpop.f32.mrf.mxu3 }
 0x2ba   :  { %751 = vst.msk [vmem:[#allocation2 + $0x118] sm:$0xff] %vm10219_vm4, %v715_v25  ;;  %v569_v33 = vpop.f32.mrf.mxu1 }
 0x2bb   :  { %604 = vst.msk [vmem:[#allocation2 + $0x20] sm:$0xff] %vm10219_vm4, %v569_v33 }
 0x2bd   :  { %4536 = vmatmul.msk.bf16.gmra.mxu1 %vm525_vm3, %v5748_v4  ;;  %4550 = vmatmul.msk.bf16.gmra.mxu2 %vm525_vm3, %v5748_v4 }
 0x2be   :  { %4564 = vmatmul.msk.bf16.gmra.mxu3 %vm525_vm3, %v5748_v4 }
 0x2c0   :  { %v644_v14 = vpop.f32.mrf.mxu2 }
 0x2c1   :  { %678 = vst.msk [vmem:[#allocation2 + $0xa0] sm:$0xff] %vm10219_vm4, %v644_v14  ;;  %v718_v23 = vpop.f32.mrf.mxu3 }
 0x2c2   :  { %752 = vst.msk [vmem:[#allocation2 + $0x120] sm:$0xff] %vm10219_vm4, %v718_v23  ;;  %v571_v28 = vpop.f32.mrf.mxu1 }
 0x2c3   :  { %605 = vst.msk [vmem:[#allocation2 + $0x28] sm:$0xff] %vm10219_vm4, %v571_v28 }
 0x2c8   :  { %v646_v29 = vpop.f32.mrf.mxu2 }
 0x2c9   :  { %679 = vst.msk [vmem:[#allocation2 + $0xa8] sm:$0xff] %vm10219_vm4, %v646_v29  ;;  %v720_v30 = vpop.f32.mrf.mxu3 }
 0x2ca   :  { %753 = vst.msk [vmem:[#allocation2 + $0x128] sm:$0xff] %vm10219_vm4, %v720_v30  ;;  %v574_v40 = vpop.f32.mrf.mxu1 }
 0x2cb   :  { %606 = vst.msk [vmem:[#allocation2 + $0x30] sm:$0xff] %vm10219_vm4, %v574_v40 }
 0x2cd   :  { %4537 = vmatmul.msk.bf16.gmra.mxu1 %vm525_vm3, %v5764_v13  ;;  %4551 = vmatmul.msk.bf16.gmra.mxu2 %vm525_vm3, %v5764_v13 }
 0x2ce   :  { %4565 = vmatmul.msk.bf16.gmra.mxu3 %vm525_vm3, %v5764_v13 }
 0x2d0   :  { %v649_v55 = vpop.f32.mrf.mxu2  ;;  %v1229_v58 = vld [vmem:[#allocation2 + $0xa8] sm:$0xff] }
 0x2d1   :  { %680 = vst.msk [vmem:[#allocation2 + $0xb0] sm:$0xff] %vm10219_vm4, %v649_v55  ;;  %v723_v56 = vpop.f32.mrf.mxu3  ;;  %v1245_v3 = vld [vmem:[#allocation2 + $0x128] sm:$0xff] }
 0x2d2   :  { %754 = vst.msk [vmem:[#allocation2 + $0x130] sm:$0xff] %vm10219_vm4, %v723_v56  ;;  %v576_v31 = vpop.f32.mrf.mxu1 }
 0x2d3   :  { %607 = vst.msk [vmem:[#allocation2 + $0x38] sm:$0xff] %vm10219_vm4, %v576_v31 }
 0x2d8   :  { %v651_v32 = vpop.f32.mrf.mxu2 }
 0x2d9   :  { %681 = vst.msk [vmem:[#allocation2 + $0xb8] sm:$0xff] %vm10219_vm4, %v651_v32  ;;  %v725_v34 = vpop.f32.mrf.mxu3  ;;  %v1214_v32 = vld [vmem:[#allocation2 + $0x30] sm:$0xff] }
 0x2da   :  { %755 = vst.msk [vmem:[#allocation2 + $0x138] sm:$0xff] %vm10219_vm4, %v725_v34  ;;  %v579_v44 = vpop.f32.mrf.mxu1  ;;  %v1215_v56 = vld [vmem:[#allocation2 + $0x38] sm:$0xff] }
 0x2db   :  { %608 = vst.msk [vmem:[#allocation2 + $0x40] sm:$0xff] %vm10219_vm4, %v579_v44 }
 0x2dd   :  { %4538 = vmatmul.msk.bf16.gmra.mxu1 %vm525_vm3, %v5780_v43  ;;  %4552 = vmatmul.msk.bf16.gmra.mxu2 %vm525_vm3, %v5780_v43 }
 0x2de   :  { %4566 = vmatmul.msk.bf16.gmra.mxu3 %vm525_vm3, %v5780_v43 }
 0x2e0   :  { %v654_v41 = vpop.f32.mrf.mxu2 }
 0x2e1   :  { %682 = vst.msk [vmem:[#allocation2 + $0xc0] sm:$0xff] %vm10219_vm4, %v654_v41  ;;  %v728_v16 = vpop.f32.mrf.mxu3  ;;  %v1213_v41 = vld [vmem:[#allocation2 + $0x28] sm:$0xff] }
 0x2e2   :  { %756 = vst.msk [vmem:[#allocation2 + $0x140] sm:$0xff] %vm10219_vm4, %v728_v16  ;;  %v581_v17 = vpop.f32.mrf.mxu1  ;;  %v1216_v29 = vld [vmem:[#allocation2 + $0x40] sm:$0xff] }
 0x2e3   :  { %609 = vst.msk [vmem:[#allocation2 + $0x48] sm:$0xff] %vm10219_vm4, %v581_v17 }
 0x2e8   :  { %v656_v9 = vpop.f32.mrf.mxu2  ;;  %v1232_v16 = vld [vmem:[#allocation2 + $0xc0] sm:$0xff] }
 0x2e9   :  { %683 = vst.msk [vmem:[#allocation2 + $0xc8] sm:$0xff] %vm10219_vm4, %v656_v9  ;;  %v730_v15 = vpop.f32.mrf.mxu3  ;;  %v1248_v17 = vld [vmem:[#allocation2 + $0x140] sm:$0xff] }
 0x2ea   :  { %757 = vst.msk [vmem:[#allocation2 + $0x148] sm:$0xff] %vm10219_vm4, %v730_v15  ;;  %v584_v53 = vpop.f32.mrf.mxu1  ;;  %v1217_v25 = vld [vmem:[#allocation2 + $0x48] sm:$0xff] }
 0x2eb   :  { %610 = vst.msk [vmem:[#allocation2 + $0x50] sm:$0xff] %vm10219_vm4, %v584_v53  ;;  %v1212_v53 = vld [vmem:[#allocation2 + $0x20] sm:$0xff] }
 0x2ed   :  { %4539 = vmatmul.msk.bf16.gmra.mxu1 %vm525_vm3, %v5796_v52  ;;  %4553 = vmatmul.msk.bf16.gmra.mxu2 %vm525_vm3, %v5796_v52 }
 0x2ee   :  { %4567 = vmatmul.msk.bf16.gmra.mxu3 %vm525_vm3, %v5796_v52 }
 0x2f0   :  { %v659_v60 = vpop.f32.mrf.mxu2  ;;  %v1233_v34 = vld [vmem:[#allocation2 + $0xc8] sm:$0xff] }
 0x2f1   :  { %684 = vst.msk [vmem:[#allocation2 + $0xd0] sm:$0xff] %vm10219_vm4, %v659_v60  ;;  %v733_v61 = vpop.f32.mrf.mxu3  ;;  %v1249_v44 = vld [vmem:[#allocation2 + $0x148] sm:$0xff]  ;;  %v1247_v60 = vld [vmem:[#allocation2 + $0x138] sm:$0xff] }
 0x2f2   :  { %758 = vst.msk [vmem:[#allocation2 + $0x150] sm:$0xff] %vm10219_vm4, %v733_v61  ;;  %v586_v38 = vpop.f32.mrf.mxu1  ;;  %v1218_v51 = vld [vmem:[#allocation2 + $0x50] sm:$0xff] }
 0x2f3   :  { %611 = vst.msk [vmem:[#allocation2 + $0x58] sm:$0xff] %vm10219_vm4, %v586_v38  ;;  %v1211_v38 = vld [vmem:[#allocation2 + $0x18] sm:$0xff] }
 0x2f8   :  { %v661_v39 = vpop.f32.mrf.mxu2  ;;  %v1234_v55 = vld [vmem:[#allocation2 + $0xd0] sm:$0xff] }
 0x2f9   :  { %685 = vst.msk [vmem:[#allocation2 + $0xd8] sm:$0xff] %vm10219_vm4, %v661_v39  ;;  %v735_v49 = vpop.f32.mrf.mxu3  ;;  %v1250_v31 = vld [vmem:[#allocation2 + $0x150] sm:$0xff] }
 0x2fa   :  { %759 = vst.msk [vmem:[#allocation2 + $0x158] sm:$0xff] %vm10219_vm4, %v735_v49  ;;  %v589_v63 = vpop.f32.mrf.mxu1  ;;  %v1230_v39 = vld [vmem:[#allocation2 + $0xb0] sm:$0xff] }
 0x2fb   :  { %612 = vst.msk [vmem:[#allocation2 + $0x60] sm:$0xff] %vm10219_vm4, %v589_v63  ;;  %v1246_v49 = vld [vmem:[#allocation2 + $0x130] sm:$0xff]  ;;  %v1209_v63 = vld [vmem:[#allocation2 + $0x8] sm:$0xff] }
 0x2fd   :  { %4540 = vmatmul.msk.bf16.gmra.mxu1 %vm525_vm3, %v5821_v48  ;;  %4554 = vmatmul.msk.bf16.gmra.mxu2 %vm525_vm3, %v5821_v48 }
 0x2fe   :  { %4568 = vmatmul.msk.bf16.gmra.mxu3 %vm525_vm3, %v5821_v48 }
 0x300   :  { %v664_v5 = vpop.f32.mrf.mxu2  ;;  %v1235_v23 = vld [vmem:[#allocation2 + $0xd8] sm:$0xff] }
 0x301   :  { %686 = vst.msk [vmem:[#allocation2 + $0xe0] sm:$0xff] %vm10219_vm4, %v664_v5  ;;  %v738_v45 = vpop.f32.mrf.mxu3  ;;  %v1251_v30 = vld [vmem:[#allocation2 + $0x158] sm:$0xff]  ;;  %v1228_v5 = vld [vmem:[#allocation2 + $0xa0] sm:$0xff] }
 0x302   :  { %760 = vst.msk [vmem:[#allocation2 + $0x160] sm:$0xff] %vm10219_vm4, %v738_v45  ;;  %v591_v1 = vpop.f32.mrf.mxu1  ;;  %v1220_v54 = vld [vmem:[#allocation2 + $0x60] sm:$0xff] }
 0x303   :  { %613 = vst.msk [vmem:[#allocation2 + $0x68] sm:$0xff] %vm10219_vm4, %v591_v1  ;;  %v1244_v45 = vld [vmem:[#allocation2 + $0x120] sm:$0xff] }
 0x308   :  { %v666_v2 = vpop.f32.mrf.mxu2  ;;  %v1236_v27 = vld [vmem:[#allocation2 + $0xe0] sm:$0xff] }
 0x309   :  { %687 = vst.msk [vmem:[#allocation2 + $0xe8] sm:$0xff] %vm10219_vm4, %v666_v2  ;;  %v740_v47 = vpop.f32.mrf.mxu3  ;;  %v1252_v33 = vld [vmem:[#allocation2 + $0x160] sm:$0xff] }
 0x30a   :  { %761 = vst.msk [vmem:[#allocation2 + $0x168] sm:$0xff] %vm10219_vm4, %v740_v47  ;;  %v594_v62 = vpop.f32.mrf.mxu1  ;;  %v1221_v12 = vld [vmem:[#allocation2 + $0x68] sm:$0xff]  ;;  %v1208_v47 = vld [vmem:[#allocation2] sm:$0xff] }
 0x30b   :  { %614 = vst.msk [vmem:[#allocation2 + $0x70] sm:$0xff] %vm10219_vm4, %v594_v62  ;;  %v1227_v62 = vld [vmem:[#allocation2 + $0x98] sm:$0xff] }
 0x30d   :  { %4541 = vmatmul.msk.bf16.gmra.mxu1 %vm525_vm3, %v5837_v10  ;;  %4555 = vmatmul.msk.bf16.gmra.mxu2 %vm525_vm3, %v5837_v10 }
 0x30e   :  { %4569 = vmatmul.msk.bf16.gmra.mxu3 %vm525_vm3, %v5837_v10 }
 0x310   :  { %v669_v46 = vpop.f32.mrf.mxu2  ;;  %v1237_v50 = vld [vmem:[#allocation2 + $0xe8] sm:$0xff] }
 0x311   :  { %688 = vst.msk [vmem:[#allocation2 + $0xf0] sm:$0xff] %vm10219_vm4, %v669_v46  ;;  %v743_v21 = vpop.f32.mrf.mxu3  ;;  %v1253_v26 = vld [vmem:[#allocation2 + $0x168] sm:$0xff]  ;;  %v1243_v46 = vld [vmem:[#allocation2 + $0x118] sm:$0xff] }
 0x312   :  { %762 = vst.msk [vmem:[#allocation2 + $0x170] sm:$0xff] %vm10219_vm4, %v743_v21  ;;  %v596_v22 = vpop.f32.mrf.mxu1  ;;  %v1222_v36 = vld [vmem:[#allocation2 + $0x70] sm:$0xff] }
 0x313   :  { %615 = vst.msk [vmem:[#allocation2 + $0x78] sm:$0xff] %vm10219_vm4, %v596_v22  ;;  %v1226_v22 = vld [vmem:[#allocation2 + $0x90] sm:$0xff] }
 0x318   :  { %v671_v18 = vpop.f32.mrf.mxu2  ;;  %v1238_v37 = vld [vmem:[#allocation2 + $0xf0] sm:$0xff] }
 0x319   :  { %689 = vst.msk [vmem:[#allocation2 + $0xf8] sm:$0xff] %vm10219_vm4, %v671_v18  ;;  %v745_v24 = vpop.f32.mrf.mxu3  ;;  %v1254_v8 = vld [vmem:[#allocation2 + $0x170] sm:$0xff] }
 0x31a   :  { %763 = vst.msk [vmem:[#allocation2 + $0x178] sm:$0xff] %vm10219_vm4, %v745_v24  ;;  %v782_v19 = vpop.f32.mrf.mxu1  ;;  %v1223_v11 = vld [vmem:[#allocation2 + $0x78] sm:$0xff]  ;;  %v1242_v18 = vld [vmem:[#allocation2 + $0x110] sm:$0xff]  ;;  %v1225_v24 = vld [vmem:[#allocation2 + $0x88] sm:$0xff] }
 0x31b   :  { %822 = vst.msk [vmem:[#allocation2 + $0x180] sm:$0xff] %vm10219_vm4, %v782_v19  ;;  %1795 = vmatpush.msrb.mxu1 %v1223_v11  ;;  %v1241_v19 = vld [vmem:[#allocation2 + $0x108] sm:$0xff]  ;;  %v1224_v11 = vld [vmem:[#allocation2 + $0x80] sm:$0xff] }
 0x31d   :  { %4576 = vmatmul.msk.bf16.vlgmr.msra.gmra.mxu1 %vm525_vm3, %v5716_v35  ;;  %4590 = vmatmul.msk.bf16.vlgmr.msra.gmra.mxu2 %vm525_vm3, %v5716_v35 }
 0x31e   :  { %4604 = vmatmul.msk.bf16.vlgmr.msra.gmra.mxu3 %vm525_vm3, %v5716_v35  ;;  %1796 = vmatpush.msrb.mxu1 %v1222_v36  ;;  %v1219_v35 = vld [vmem:[#allocation2 + $0x58] sm:$0xff] }
 0x320   :  { %1797 = vmatpush.msrb.mxu1 %v1221_v12  ;;  %v856_v0 = vpop.f32.mrf.mxu2  ;;  %v1239_v6 = vld [vmem:[#allocation2 + $0xf8] sm:$0xff]  ;;  %v1240_v12 = vld [vmem:[#allocation2 + $0x100] sm:$0xff] }
 0x321   :  { %896 = vst.msk [vmem:[#allocation2 + $0x200] sm:$0xff] %vm10219_vm4, %v856_v0  ;;  %v930_v7 = vpop.f32.mrf.mxu3  ;;  %1824 = vmatpush.msrb.mxu2 %v1239_v6  ;;  %v1255_v57 = vld [vmem:[#allocation2 + $0x178] sm:$0xff] }
 0x322   :  { %970 = vst.msk [vmem:[#allocation2 + $0x280] sm:$0xff] %vm10219_vm4, %v930_v7  ;;  %1798 = vmatpush.msrb.mxu1 %v1220_v54  ;;  %1853 = vmatpush.msrb.mxu3 %v1255_v57  ;;  %v784_v20 = vpop.f32.mrf.mxu1 }
 0x323   :  { %823 = vst.msk [vmem:[#allocation2 + $0x188] sm:$0xff] %vm10219_vm4, %v784_v20  ;;  %1825 = vmatpush.msrb.mxu2 %v1238_v37 }
 0x324   :  { %1799 = vmatpush.msrb.mxu1 %v1219_v35  ;;  %1854 = vmatpush.msrb.mxu3 %v1254_v8 }
 0x325   :  { %1826 = vmatpush.msrb.mxu2 %v1237_v50 }
 0x326   :  { %1800 = vmatpush.msrb.mxu1 %v1218_v51  ;;  %1855 = vmatpush.msrb.mxu3 %v1253_v26 }
 0x327   :  { %1827 = vmatpush.msrb.mxu2 %v1236_v27 }
 0x328   :  { %1801 = vmatpush.msrb.mxu1 %v1217_v25  ;;  %1856 = vmatpush.msrb.mxu3 %v1252_v33  ;;  %v858_v14 = vpop.f32.mrf.mxu2 }
 0x329   :  { %897 = vst.msk [vmem:[#allocation2 + $0x208] sm:$0xff] %vm10219_vm4, %v858_v14  ;;  %v932_v28 = vpop.f32.mrf.mxu3  ;;  %1828 = vmatpush.msrb.mxu2 %v1235_v23 }
 0x32a   :  { %971 = vst.msk [vmem:[#allocation2 + $0x288] sm:$0xff] %vm10219_vm4, %v932_v28  ;;  %1802 = vmatpush.msrb.mxu1 %v1216_v29  ;;  %1857 = vmatpush.msrb.mxu3 %v1251_v30  ;;  %v787_v40 = vpop.f32.mrf.mxu1 }
 0x32b   :  { %824 = vst.msk [vmem:[#allocation2 + $0x190] sm:$0xff] %vm10219_vm4, %v787_v40  ;;  %1829 = vmatpush.msrb.mxu2 %v1234_v55 }
 0x32c   :  { %1803 = vmatpush.msrb.mxu1 %v1215_v56  ;;  %1858 = vmatpush.msrb.mxu3 %v1250_v31 }
 0x32d   :  { %4577 = vmatmul.msk.bf16.gmra.mxu1 %vm525_vm3, %v5732_v42  ;;  %4591 = vmatmul.msk.bf16.gmra.mxu2 %vm525_vm3, %v5732_v42 }
 0x32e   :  { %4605 = vmatmul.msk.bf16.gmra.mxu3 %vm525_vm3, %v5732_v42  ;;  %1804 = vmatpush.msrb.mxu1 %v1214_v32  ;;  %v1231_v42 = vld [vmem:[#allocation2 + $0xb8] sm:$0xff] }
 0x32f   :  { %1830 = vmatpush.msrb.mxu2 %v1233_v34  ;;  %1859 = vmatpush.msrb.mxu3 %v1249_v44 }
 0x330   :  { %1805 = vmatpush.msrb.mxu1 %v1213_v41  ;;  %v861_v9 = vpop.f32.mrf.mxu2 }
 0x331   :  { %1831 = vmatpush.msrb.mxu2 %v1232_v16  ;;  %1860 = vmatpush.msrb.mxu3 %v1248_v17  ;;  %898 = vst.msk [vmem:[#allocation2 + $0x210] sm:$0xff] %vm10219_vm4, %v861_v9  ;;  %v935_v15 = vpop.f32.mrf.mxu3 }
 0x332   :  { %972 = vst.msk [vmem:[#allocation2 + $0x290] sm:$0xff] %vm10219_vm4, %v935_v15  ;;  %1806 = vmatpush.msrb.mxu1 %v1212_v53  ;;  %v789_v61 = vpop.f32.mrf.mxu1 }
 0x333   :  { %1832 = vmatpush.msrb.mxu2 %v1231_v42  ;;  %1861 = vmatpush.msrb.mxu3 %v1247_v60  ;;  %825 = vst.msk [vmem:[#allocation2 + $0x198] sm:$0xff] %vm10219_vm4, %v789_v61 }
 0x334   :  { %1807 = vmatpush.msrb.mxu1 %v1211_v38 }
 0x335   :  { %1833 = vmatpush.msrb.mxu2 %v1230_v39  ;;  %1862 = vmatpush.msrb.mxu3 %v1246_v49 }
 0x336   :  { %1808 = vmatpush.msrb.mxu1 %v1210_v59 }
 0x337   :  { %1834 = vmatpush.msrb.mxu2 %v1229_v58  ;;  %1863 = vmatpush.msrb.mxu3 %v1245_v3 }
 0x338   :  { %1809 = vmatpush.msrb.mxu1 %v1209_v63  ;;  %v863_v1 = vpop.f32.mrf.mxu2 }
 0x339   :  { %1835 = vmatpush.msrb.mxu2 %v1228_v5  ;;  %1864 = vmatpush.msrb.mxu3 %v1244_v45  ;;  %899 = vst.msk [vmem:[#allocation2 + $0x218] sm:$0xff] %vm10219_vm4, %v863_v1  ;;  %v937_v2 = vpop.f32.mrf.mxu3 }
 0x33a   :  { %973 = vst.msk [vmem:[#allocation2 + $0x298] sm:$0xff] %vm10219_vm4, %v937_v2  ;;  %1810 = vmatpush.msrb.mxu1 %v1208_v47  ;;  %v792_v21 = vpop.f32.mrf.mxu1 }
 0x33b   :  { %1836 = vmatpush.msrb.mxu2 %v1227_v62  ;;  %1865 = vmatpush.msrb.mxu3 %v1243_v46  ;;  %826 = vst.msk [vmem:[#allocation2 + $0x1a0] sm:$0xff] %vm10219_vm4, %v792_v21 }
 0x33d   :  { %1837 = vmatpush.msrb.mxu2 %v1226_v22  ;;  %1866 = vmatpush.msrb.mxu3 %v1242_v18 }
 0x33e   :  { %4578 = vmatmul.msk.bf16.gmra.mxu1 %vm525_vm3, %v5748_v4  ;;  %4592 = vmatmul.msk.bf16.gmra.mxu2 %vm525_vm3, %v5748_v4 }
 0x33f   :  { %4606 = vmatmul.msk.bf16.gmra.mxu3 %vm525_vm3, %v5748_v4  ;;  %1838 = vmatpush.msrb.mxu2 %v1225_v24 }
 0x340   :  { %1867 = vmatpush.msrb.mxu3 %v1241_v19  ;;  %v866_v36 = vpop.f32.mrf.mxu2 }
 0x341   :  { %1839 = vmatpush.msrb.mxu2 %v1224_v11  ;;  %900 = vst.msk [vmem:[#allocation2 + $0x220] sm:$0xff] %vm10219_vm4, %v866_v36  ;;  %v940_v0 = vpop.f32.mrf.mxu3 }
 0x342   :  { %1868 = vmatpush.msrb.mxu3 %v1240_v12  ;;  %974 = vst.msk [vmem:[#allocation2 + $0x2a0] sm:$0xff] %vm10219_vm4, %v940_v0  ;;  %v794_v6 = vpop.f32.mrf.mxu1 }
 0x343   :  { %827 = vst.msk [vmem:[#allocation2 + $0x1a8] sm:$0xff] %vm10219_vm4, %v794_v6 }
 0x348   :  { %v868_v7 = vpop.f32.mrf.mxu2 }
 0x349   :  { %901 = vst.msk [vmem:[#allocation2 + $0x228] sm:$0xff] %vm10219_vm4, %v868_v7  ;;  %v942_v4 = vpop.f32.mrf.mxu3 }
 0x34a   :  { %975 = vst.msk [vmem:[#allocation2 + $0x2a8] sm:$0xff] %vm10219_vm4, %v942_v4  ;;  %v797_v54 = vpop.f32.mrf.mxu1  ;;  %v1261_v6 = vld [vmem:[#allocation2 + $0x1a8] sm:$0xff] }
 0x34b   :  { %828 = vst.msk [vmem:[#allocation2 + $0x1b0] sm:$0xff] %vm10219_vm4, %v797_v54 }
 0x34e   :  { %4579 = vmatmul.msk.bf16.gmra.mxu1 %vm525_vm3, %v5764_v13  ;;  %4593 = vmatmul.msk.bf16.gmra.mxu2 %vm525_vm3, %v5764_v13 }
 0x34f   :  { %4607 = vmatmul.msk.bf16.gmra.mxu3 %vm525_vm3, %v5764_v13 }
 0x350   :  { %v871_v57 = vpop.f32.mrf.mxu2 }
 0x351   :  { %902 = vst.msk [vmem:[#allocation2 + $0x230] sm:$0xff] %vm10219_vm4, %v871_v57  ;;  %v945_v20 = vpop.f32.mrf.mxu3  ;;  %v1260_v57 = vld [vmem:[#allocation2 + $0x1a0] sm:$0xff] }
 0x352   :  { %976 = vst.msk [vmem:[#allocation2 + $0x2b0] sm:$0xff] %vm10219_vm4, %v945_v20  ;;  %v799_v37 = vpop.f32.mrf.mxu1  ;;  %v1262_v36 = vld [vmem:[#allocation2 + $0x1b0] sm:$0xff] }
 0x353   :  { %829 = vst.msk [vmem:[#allocation2 + $0x1b8] sm:$0xff] %vm10219_vm4, %v799_v37 }
 0x358   :  { %v873_v35 = vpop.f32.mrf.mxu2 }
 0x359   :  { %903 = vst.msk [vmem:[#allocation2 + $0x238] sm:$0xff] %vm10219_vm4, %v873_v35  ;;  %v947_v8 = vpop.f32.mrf.mxu3 }
 0x35a   :  { %977 = vst.msk [vmem:[#allocation2 + $0x2b8] sm:$0xff] %vm10219_vm4, %v947_v8  ;;  %v802_v50 = vpop.f32.mrf.mxu1  ;;  %v1263_v24 = vld [vmem:[#allocation2 + $0x1b8] sm:$0xff] }
 0x35b   :  { %830 = vst.msk [vmem:[#allocation2 + $0x1c0] sm:$0xff] %vm10219_vm4, %v802_v50  ;;  %v1259_v50 = vld [vmem:[#allocation2 + $0x198] sm:$0xff] }
 0x35e   :  { %4580 = vmatmul.msk.bf16.gmra.mxu1 %vm525_vm3, %v5780_v43  ;;  %4594 = vmatmul.msk.bf16.gmra.mxu2 %vm525_vm3, %v5780_v43 }
 0x35f   :  { %4608 = vmatmul.msk.bf16.gmra.mxu3 %vm525_vm3, %v5780_v43 }
 0x360   :  { %v876_v13 = vpop.f32.mrf.mxu2  ;;  %v1279_v20 = vld [vmem:[#allocation2 + $0x238] sm:$0xff] }
 0x361   :  { %904 = vst.msk [vmem:[#allocation2 + $0x240] sm:$0xff] %vm10219_vm4, %v876_v13  ;;  %v950_v51 = vpop.f32.mrf.mxu3  ;;  %v1295_v35 = vld [vmem:[#allocation2 + $0x2b8] sm:$0xff]  ;;  %v1278_v13 = vld [vmem:[#allocation2 + $0x230] sm:$0xff] }
 0x362   :  { %978 = vst.msk [vmem:[#allocation2 + $0x2c0] sm:$0xff] %vm10219_vm4, %v950_v51  ;;  %v804_v26 = vpop.f32.mrf.mxu1  ;;  %v1264_v62 = vld [vmem:[#allocation2 + $0x1c0] sm:$0xff]  ;;  %v1294_v51 = vld [vmem:[#allocation2 + $0x2b0] sm:$0xff] }
 0x363   :  { %831 = vst.msk [vmem:[#allocation2 + $0x1c8] sm:$0xff] %vm10219_vm4, %v804_v26  ;;  %v1258_v26 = vld [vmem:[#allocation2 + $0x190] sm:$0xff] }
 0x368   :  { %v878_v27 = vpop.f32.mrf.mxu2  ;;  %v1280_v7 = vld [vmem:[#allocation2 + $0x240] sm:$0xff] }
 0x369   :  { %905 = vst.msk [vmem:[#allocation2 + $0x248] sm:$0xff] %vm10219_vm4, %v878_v27  ;;  %v952_v25 = vpop.f32.mrf.mxu3  ;;  %v1296_v4 = vld [vmem:[#allocation2 + $0x2c0] sm:$0xff]  ;;  %v1277_v27 = vld [vmem:[#allocation2 + $0x228] sm:$0xff] }
 0x36a   :  { %979 = vst.msk [vmem:[#allocation2 + $0x2c8] sm:$0xff] %vm10219_vm4, %v952_v25  ;;  %v807_v33 = vpop.f32.mrf.mxu1  ;;  %v1265_v45 = vld [vmem:[#allocation2 + $0x1c8] sm:$0xff]  ;;  %v1352_v25 = vlaneseq }
 0x36b   :  { %832 = vst.msk [vmem:[#allocation2 + $0x1d0] sm:$0xff] %vm10219_vm4, %v807_v33  ;;  %v1293_v33 = vld [vmem:[#allocation2 + $0x2a8] sm:$0xff] }
 0x36e   :  { %4581 = vmatmul.msk.bf16.gmra.mxu1 %vm525_vm3, %v5796_v52  ;;  %4595 = vmatmul.msk.bf16.gmra.mxu2 %vm525_vm3, %v5796_v52 }
 0x36f   :  { %4609 = vmatmul.msk.bf16.gmra.mxu3 %vm525_vm3, %v5796_v52 }
 0x370   :  { %v881_v43 = vpop.f32.mrf.mxu2  ;;  %v1281_v12 = vld [vmem:[#allocation2 + $0x248] sm:$0xff] }
 0x371   :  { %906 = vst.msk [vmem:[#allocation2 + $0x250] sm:$0xff] %vm10219_vm4, %v881_v43  ;;  %v955_v14 = vpop.f32.mrf.mxu3  ;;  %v1297_v0 = vld [vmem:[#allocation2 + $0x2c8] sm:$0xff] }
 0x372   :  { %980 = vst.msk [vmem:[#allocation2 + $0x2d0] sm:$0xff] %vm10219_vm4, %v955_v14  ;;  %v809_v23 = vpop.f32.mrf.mxu1  ;;  %v1266_v3 = vld [vmem:[#allocation2 + $0x1d0] sm:$0xff]  ;;  %v1257_v43 = vld [vmem:[#allocation2 + $0x188] sm:$0xff]  ;;  %v1276_v14 = vld [vmem:[#allocation2 + $0x220] sm:$0xff] }
 0x373   :  { %833 = vst.msk [vmem:[#allocation2 + $0x1d8] sm:$0xff] %vm10219_vm4, %v809_v23  ;;  %v6056_v23 = vand.u32 127, %v1352_v25 }
 0x375   :  { %10626 = vst [vmem:[#allocation6_spill] sm:$0xff] %v6056_v23 }
 0x378   :  { %v883_v28 = vpop.f32.mrf.mxu2  ;;  %v1282_v19 = vld [vmem:[#allocation2 + $0x250] sm:$0xff] }
 0x379   :  { %907 = vst.msk [vmem:[#allocation2 + $0x258] sm:$0xff] %vm10219_vm4, %v883_v28  ;;  %v957_v29 = vpop.f32.mrf.mxu3  ;;  %v1298_v11 = vld [vmem:[#allocation2 + $0x2d0] sm:$0xff]  ;;  %v1292_v28 = vld [vmem:[#allocation2 + $0x2a0] sm:$0xff] }
 0x37a   :  { %981 = vst.msk [vmem:[#allocation2 + $0x2d8] sm:$0xff] %vm10219_vm4, %v957_v29  ;;  %v812_v30 = vpop.f32.mrf.mxu1  ;;  %v1267_v49 = vld [vmem:[#allocation2 + $0x1d8] sm:$0xff] }
 0x37b   :  { %834 = vst.msk [vmem:[#allocation2 + $0x1e0] sm:$0xff] %vm10219_vm4, %v812_v30  ;;  %v1256_v30 = vld [vmem:[#allocation2 + $0x180] sm:$0xff] }
 0x37e   :  { %4582 = vmatmul.msk.bf16.gmra.mxu1 %vm525_vm3, %v5821_v48  ;;  %4596 = vmatmul.msk.bf16.gmra.mxu2 %vm525_vm3, %v5821_v48 }
 0x37f   :  { %4610 = vmatmul.msk.bf16.gmra.mxu3 %vm525_vm3, %v5821_v48 }
 0x380   :  { %v886_v52 = vpop.f32.mrf.mxu2  ;;  %v1283_v46 = vld [vmem:[#allocation2 + $0x258] sm:$0xff] }
 0x381   :  { %908 = vst.msk [vmem:[#allocation2 + $0x260] sm:$0xff] %vm10219_vm4, %v886_v52  ;;  %v960_v40 = vpop.f32.mrf.mxu3  ;;  %v1299_v22 = vld [vmem:[#allocation2 + $0x2d8] sm:$0xff] }
 0x382   :  { %982 = vst.msk [vmem:[#allocation2 + $0x2e0] sm:$0xff] %vm10219_vm4, %v960_v40  ;;  %v814_v55 = vpop.f32.mrf.mxu1  ;;  %v1268_v42 = vld [vmem:[#allocation2 + $0x1e0] sm:$0xff]  ;;  %v1275_v52 = vld [vmem:[#allocation2 + $0x218] sm:$0xff]  ;;  %v6058_v40 = vshrl.u32 %v1352_v25, 7  ;;  %v1448_v25 = vand.u32 63, %v6056_v23 }
 0x383   :  { %835 = vst.msk [vmem:[#allocation2 + $0x1e8] sm:$0xff] %vm10219_vm4, %v814_v55  ;;  %v6061_v55 = vadd.s32 128, %v6056_v23 }
 0x384   :  { %10627 = vst [vmem:[#allocation7_spill] sm:$0xff] %v6058_v40 }
 0x385   :  { %10628 = vst [vmem:[#allocation8_spill] sm:$0xff] %v6061_v55 }
 0x388   :  { %v888_v56 = vpop.f32.mrf.mxu2  ;;  %v1284_v1 = vld [vmem:[#allocation2 + $0x260] sm:$0xff] }
 0x389   :  { %909 = vst.msk [vmem:[#allocation2 + $0x268] sm:$0xff] %vm10219_vm4, %v888_v56  ;;  %v962_v31 = vpop.f32.mrf.mxu3  ;;  %v1300_v2 = vld [vmem:[#allocation2 + $0x2e0] sm:$0xff] }
 0x38a   :  { %983 = vst.msk [vmem:[#allocation2 + $0x2e8] sm:$0xff] %vm10219_vm4, %v962_v31  ;;  %v817_v32 = vpop.f32.mrf.mxu1  ;;  %v1269_v15 = vld [vmem:[#allocation2 + $0x1e8] sm:$0xff]  ;;  %v1291_v31 = vld [vmem:[#allocation2 + $0x298] sm:$0xff] }
 0x38b   :  { %836 = vst.msk [vmem:[#allocation2 + $0x1f0] sm:$0xff] %vm10219_vm4, %v817_v32  ;;  %v1274_v32 = vld [vmem:[#allocation2 + $0x210] sm:$0xff] }
 0x38e   :  { %4583 = vmatmul.msk.bf16.gmra.mxu1 %vm525_vm3, %v5837_v10  ;;  %4597 = vmatmul.msk.bf16.gmra.mxu2 %vm525_vm3, %v5837_v10 }
 0x38f   :  { %4611 = vmatmul.msk.bf16.gmra.mxu3 %vm525_vm3, %v5837_v10 }
 0x390   :  { %v891_v48 = vpop.f32.mrf.mxu2  ;;  %v1285_v63 = vld [vmem:[#allocation2 + $0x268] sm:$0xff] }
 0x391   :  { %910 = vst.msk [vmem:[#allocation2 + $0x270] sm:$0xff] %vm10219_vm4, %v891_v48  ;;  %v965_v34 = vpop.f32.mrf.mxu3  ;;  %v1301_v5 = vld [vmem:[#allocation2 + $0x2e8] sm:$0xff]  ;;  %v1368_v48 = vshra.s32 %v6061_v55, 7 }
 0x392   :  { %984 = vst.msk [vmem:[#allocation2 + $0x2f0] sm:$0xff] %vm10219_vm4, %v965_v34  ;;  %v819_v44 = vpop.f32.mrf.mxu1  ;;  %v1270_v10 = vld [vmem:[#allocation2 + $0x1f0] sm:$0xff]  ;;  %v1479_v34 = vand.u32 15, %v6058_v40 }
 0x393   :  { %837 = vst.msk [vmem:[#allocation2 + $0x1f8] sm:$0xff] %vm10219_vm4, %v819_v44  ;;  %v6068_v44 = vadd.s32 256, %v6056_v23  ;;  %vm1395_vm5 = vcmp.ge.s32.totalorder %v1368_v48, 3  ;;  %vm1386_vm6 = vcmp.ge.s32.totalorder %v1368_v48, 6 }
 0x395   :  { %10629 = vst [vmem:[#allocation9_spill] sm:$0xff] %v6068_v44 }
 0x398   :  { %v893_v41 = vpop.f32.mrf.mxu2  ;;  %v1286_v59 = vld [vmem:[#allocation2 + $0x270] sm:$0xff] }
 0x399   :  { %911 = vst.msk [vmem:[#allocation2 + $0x278] sm:$0xff] %vm10219_vm4, %v893_v41  ;;  %v967_v16 = vpop.f32.mrf.mxu3  ;;  %v1302_v58 = vld [vmem:[#allocation2 + $0x2f0] sm:$0xff] }
 0x39a   :  { %985 = vst.msk [vmem:[#allocation2 + $0x2f8] sm:$0xff] %vm10219_vm4, %v967_v16  ;;  %v1004_v17 = vpop.f32.mrf.mxu1  ;;  %v1271_v9 = vld [vmem:[#allocation2 + $0x1f8] sm:$0xff]  ;;  %v1290_v16 = vld [vmem:[#allocation2 + $0x290] sm:$0xff] }
 0x39b   :  { %1044 = vst.msk [vmem:[#allocation2 + $0x300] sm:$0xff] %vm10219_vm4, %v1004_v17  ;;  %1882 = vmatpush.msra.mxu1 %v1271_v9  ;;  %v1273_v17 = vld [vmem:[#allocation2 + $0x208] sm:$0xff]  ;;  %v1483_v9 = vshra.s32 %v1479_v34, 2 }
 0x39d   :  { %1883 = vmatpush.msra.mxu1 %v1270_v10  ;;  %v1369_v10 = vshra.s32 %v6068_v44, 7 }
 0x39f   :  { %1884 = vmatpush.msra.mxu1 %v1269_v15  ;;  %v1289_v15 = vld [vmem:[#allocation2 + $0x288] sm:$0xff]  ;;  %vm1396_vm7 = vcmp.ge.s32.totalorder %v1369_v10, 3  ;;  %vm1387_vm8 = vcmp.ge.s32.totalorder %v1369_v10, 6 }
 0x3a0   :  { %v1078_v53 = vpop.f32.mrf.mxu2  ;;  %v1287_v60 = vld [vmem:[#allocation2 + $0x278] sm:$0xff] }
 0x3a1   :  { %1118 = vst.msk [vmem:[#allocation2 + $0x380] sm:$0xff] %vm10219_vm4, %v1078_v53  ;;  %v1152_v61 = vpop.f32.mrf.mxu3  ;;  %1885 = vmatpush.msra.mxu1 %v1268_v42  ;;  %1911 = vmatpush.msra.mxu2 %v1287_v60  ;;  %v1303_v38 = vld [vmem:[#allocation2 + $0x2f8] sm:$0xff]  ;;  %v10220_v53 = vmov 0   ;;  %v1487_v60 = vand.u32 3, %v1479_v34 }
 0x3a2   :  { %1192 = vst.msk [vmem:[#allocation2 + $0x400] sm:$0xff] %vm10219_vm4, %v1152_v61  ;;  %1940 = vmatpush.msra.mxu3 %v1303_v38  ;;  %v1006_v39 = vpop.f32.mrf.mxu1  ;;  %v1404_v42 = vsel %vm1395_vm5, 1, %v10220_v53  ;;  %v1272_v61 = vld [vmem:[#allocation2 + $0x200] sm:$0xff]  ;;  %v1377_v38 = vand.u32 127, %v6061_v55  ;;  %v10670_v55 = vmov 0 }
 0x3a3   :  { %1045 = vst.msk [vmem:[#allocation2 + $0x308] sm:$0xff] %vm10219_vm4, %v1006_v39  ;;  %1886 = vmatpush.msra.mxu1 %v1267_v49  ;;  %1912 = vmatpush.msra.mxu2 %v1286_v59  ;;  %v6074_v39 = vsel %vm1386_vm6, 2, %v1404_v42  ;;  %v6076_v49 = vmul.u32 2, %v1483_v9  ;;  %v1288_v59 = vld [vmem:[#allocation2 + $0x280] sm:$0xff] }
 0x3a4   :  { %1941 = vmatpush.msra.mxu3 %v1302_v58  ;;  %v1422_v58 = vmul.u32 3, %v6074_v39 }
 0x3a5   :  { %1887 = vmatpush.msra.mxu1 %v1266_v3  ;;  %1913 = vmatpush.msra.mxu2 %v1285_v63  ;;  %v6079_v3 = vmul.u32 2, %v1487_v60  ;;  %v1405_v63 = vsel %vm1396_vm7, 1, %v10220_v53 }
 0x3a6   :  { %1942 = vmatpush.msra.mxu3 %v1301_v5  ;;  %v1449_v5 = vand.u32 63, %v1377_v38 }
 0x3a7   :  { %1888 = vmatpush.msra.mxu1 %v1265_v45  ;;  %1914 = vmatpush.msra.mxu2 %v1284_v1  ;;  %v6083_v45 = vadd.s32 4294967295, %v6076_v49  ;;  %v1378_v1 = vand.u32 127, %v6068_v44  ;;  %v10668_v44 = vmov 1.0  }
 0x3a8   :  { %1943 = vmatpush.msra.mxu3 %v1300_v2  ;;  %v1080_v47 = vpop.f32.mrf.mxu2  ;;  %v6086_v2 = vsel %vm1387_vm8, 2, %v1405_v63 }
 0x3a9   :  { %1119 = vst.msk [vmem:[#allocation2 + $0x388] sm:$0xff] %vm10219_vm4, %v1080_v47  ;;  %v1154_v21 = vpop.f32.mrf.mxu3  ;;  %1889 = vmatpush.msra.mxu1 %v1264_v62  ;;  %1915 = vmatpush.msra.mxu2 %v1283_v46  ;;  %v6088_v62 = vsub.s32 %v1368_v48, %v1422_v58  ;;  %v6091_v46 = vadd.s32 4294967295, %v6079_v3  ;;  %v6183_v48 = vand.u32 7, %v1448_v25 }
 0x3aa   :  { %1193 = vst.msk [vmem:[#allocation2 + $0x408] sm:$0xff] %vm10219_vm4, %v1154_v21  ;;  %1944 = vmatpush.msra.mxu3 %v1299_v22  ;;  %v1009_v18 = vpop.f32.mrf.mxu1  ;;  %v1423_v21 = vmul.u32 3, %v6086_v2  ;;  %v1367_v22 = vshra.s32 %v6056_v23, 7 }
 0x3ab   :  { %1046 = vst.msk [vmem:[#allocation2 + $0x310] sm:$0xff] %vm10219_vm4, %v1009_v18  ;;  %1890 = vmatpush.msra.mxu1 %v1263_v24  ;;  %1916 = vmatpush.msra.mxu2 %v1282_v19  ;;  %v6096_v24 = vshra.s32 %v1377_v38, 6  ;;  %v6098_v19 = vshra.s32 %v1449_v5, 3 }
 0x3ac   :  { %1945 = vmatpush.msra.mxu3 %v1298_v11  ;;  %10630 = vst [vmem:[#allocation10_spill] sm:$0xff] %v6086_v2  ;;  %v6101_v11 = vshra.s32 %v6058_v40, 4  ;;  %vm1385_vm15 = vcmp.ge.s32.totalorder %v1367_v22, 6  ;;  %vm1394_vm0 = vcmp.ge.s32.totalorder %v1367_v22, 3 }
 0x3ad   :  { %1891 = vmatpush.msra.mxu1 %v1262_v36  ;;  %1917 = vmatpush.msra.mxu2 %v1281_v12  ;;  %10631 = vst [vmem:[#allocation11_spill] sm:$0xff] %v6096_v24  ;;  %v1536_v36 = vadd.s32 %v6083_v45, %v6074_v39 }
 0x3ae   :  { %1946 = vmatpush.msra.mxu3 %v1297_v0  ;;  %v6106_v0 = vand.u32 7, %v1449_v5  ;;  %vm10217_vm9 = vcmp.eq.s32.totalorder %v6101_v11, %v6096_v24 }
 0x3af   :  { %1892 = vmatpush.msra.mxu1 %v1261_v6  ;;  %1918 = vmatpush.msra.mxu2 %v1280_v7  ;;  %v6110_v6 = vadd.s32 %v6091_v46, %v6088_v62  ;;  %v6112_v7 = vsub.s32 %v1369_v10, %v1423_v21  ;;  %vm1572_vm10 = vcmp.eq.s32.totalorder %v6098_v19, %v1536_v36 }
 0x3b0   :  { %1947 = vmatpush.msra.mxu3 %v1296_v4  ;;  %v1083_v54 = vpop.f32.mrf.mxu2  ;;  %v1450_v4 = vand.u32 63, %v1378_v1  ;;  %vm6125_vm11 = vmand %vm10217_vm9, %vm1572_vm10 }
 0x3b1   :  { %1120 = vst.msk [vmem:[#allocation2 + $0x390] sm:$0xff] %vm10219_vm4, %v1083_v54  ;;  %v1157_v37 = vpop.f32.mrf.mxu3  ;;  %1893 = vmatpush.msra.mxu1 %v1260_v57  ;;  %1919 = vmatpush.msra.mxu2 %v1279_v20  ;;  %v6118_v54 = vshra.s32 %v1378_v1, 6  ;;  %v1537_v57 = vadd.s32 %v6083_v45, %v6086_v2  ;;  %vm10214_vm12 = vcmp.eq.s32.totalorder %v6106_v0, %v6110_v6  ;;  %v7591_v20 = vld [vmem:[#allocation2 + $0x1d8] sm:$0xff] }
 0x3b2   :  { %1194 = vst.msk [vmem:[#allocation2 + $0x410] sm:$0xff] %vm10219_vm4, %v1157_v37  ;;  %1948 = vmatpush.msra.mxu3 %v1295_v35  ;;  %v1011_v8 = vpop.f32.mrf.mxu1  ;;  %v6131_v37 = vshra.s32 %v1450_v4, 3  ;;  %v6133_v35 = vand.u32 7, %v1450_v4  ;;  %vm1724_vm13 = vmand %vm6125_vm11, %vm10214_vm12 }
 0x3b3   :  { %1047 = vst.msk [vmem:[#allocation2 + $0x318] sm:$0xff] %vm10219_vm4, %v1011_v8  ;;  %1894 = vmatpush.msra.mxu1 %v1259_v50  ;;  %1920 = vmatpush.msra.mxu2 %v1278_v13  ;;  %v6137_v8 = vadd.s32 %v6091_v46, %v6112_v7  ;;  %vm10207_vm14 = vcmp.eq.s32.totalorder %v6101_v11, %v6118_v54  ;;  %v10223_v50 = vmov 1.0   ;;  %v1403_v13 = vsel %vm1394_vm0, 1, %v10220_v53 }
 0x3b4   :  { %1949 = vmatpush.msra.mxu3 %v1294_v51  ;;  %10632 = vst [vmem:[#allocation12_spill] sm:$0xff] %v6110_v6  ;;  %4616 = vmatmul.msk.f32.vlgmr.msrb.gmra.mxu2 %vm1724_vm13, %v10223_v50  ;;  %vm1573_vm1 = vcmp.eq.s32.totalorder %v6131_v37, %v1537_v57  ;;  %v6152_v51 = vshra.s32 %v6056_v23, 6  ;;  %v6389_v53 = vadd.s32 384, %v6056_v23 }
 0x3b5   :  { %1895 = vmatpush.msra.mxu1 %v1258_v26  ;;  %1921 = vmatpush.msra.mxu2 %v1277_v27  ;;  %10633 = vst [vmem:[#allocation13_spill] sm:$0xff] %v6118_v54  ;;  %vm10206_vm2 = vcmp.eq.s32.totalorder %v6133_v35, %v6137_v8  ;;  %vm6157_vm3 = vmand %vm10207_vm14, %vm1573_vm1  ;;  %v6161_v27 = vsel %vm1385_vm15, 2, %v1403_v13  ;;  %v5157_v26 = vld [vmem:[#allocation2 + $0x2d8] sm:$0xff] }
 0x3b6   :  { %1950 = vmatpush.msra.mxu3 %v1293_v33  ;;  %10636 = vst [vmem:[#allocation14_spill] sm:$0xff] %v6131_v37  ;;  %v1354_v33 = vadd.s32 8, %v6058_v40  ;;  %vm1725_vm5 = vmand %vm6157_vm3, %vm10206_vm2  ;;  %vm10209_vm6 = vcmp.eq.s32.totalorder %v6101_v11, %v6152_v51 }
 0x3b7   :  { %1896 = vmatpush.msra.mxu1 %v1257_v43  ;;  %1922 = vmatpush.msra.mxu2 %v1276_v14  ;;  %10637 = vst [vmem:[#allocation15_spill] sm:$0xff] %v6133_v35  ;;  %v1355_v43 = vadd.s32 16, %v6058_v40 }
 0x3b8   :  { %1951 = vmatpush.msra.mxu3 %v1292_v28  ;;  %v1085_v29 = vpop.f32.mrf.mxu2  ;;  %10638 = vst [vmem:[#allocation16_spill] sm:$0xff] %v6137_v8  ;;  %v1421_v28 = vmul.u32 3, %v6161_v27  ;;  %v6198_v10 = vshra.s32 %v1354_v33, 4 }
 0x3b9   :  { %1121 = vst.msk [vmem:[#allocation2 + $0x398] sm:$0xff] %vm10219_vm4, %v1085_v29  ;;  %v1159_v56 = vpop.f32.mrf.mxu3  ;;  %1897 = vmatpush.msra.mxu1 %v1256_v30  ;;  %1923 = vmatpush.msra.mxu2 %v1275_v52  ;;  %v1535_v29 = vadd.s32 %v6083_v45, %v6161_v27  ;;  %v6176_v52 = vshra.s32 %v1448_v25, 3  ;;  %v1481_v34 = vand.u32 15, %v1355_v43  ;;  %v6252_v25 = vshra.s32 %v1355_v43, 4  ;;  %v7663_v43 = vld [vmem:[#allocation2 + $0x1b8] sm:$0xff] }
 0x3ba   :  { %1195 = vst.msk [vmem:[#allocation2 + $0x418] sm:$0xff] %vm10219_vm4, %v1159_v56  ;;  %1952 = vmatpush.msra.mxu3 %v1291_v31  ;;  %v1480_v56 = vand.u32 15, %v1354_v33  ;;  %vm10213_vm15 = vcmp.eq.s32.totalorder %v6198_v10, %v6096_v24  ;;  %vm10211_vm0 = vcmp.eq.s32.totalorder %v6198_v10, %v6118_v54  ;;  %v1356_v33 = vadd.s32 24, %v6058_v40 }
 0x3bb   :  { %v1014_v41 = vpop.f32.mrf.mxu1  ;;  %1924 = vmatpush.msra.mxu2 %v1274_v32  ;;  %10639 = vst [vmem:[#allocation17_spill] sm:$0xff] %v6152_v51  ;;  %4620 = vmatmul.msk.f32.vlgmr.msrb.gmra.mxu3 %vm1725_vm5, %v10223_v50  ;;  %v6181_v32 = vsub.s32 %v1367_v22, %v1421_v28  ;;  %vm1571_vm7 = vcmp.eq.s32.totalorder %v6176_v52, %v1535_v29  ;;  %v1489_v42 = vand.u32 3, %v1481_v34 }
 0x3bc   :  { %1048 = vst.msk [vmem:[#allocation2 + $0x320] sm:$0xff] %vm10219_vm4, %v1014_v41  ;;  %1953 = vmatpush.msra.mxu3 %v1290_v16  ;;  %v1484_v41 = vshra.s32 %v1480_v56, 2  ;;  %v1488_v16 = vand.u32 3, %v1480_v56  ;;  %vm6190_vm8 = vmand %vm10209_vm6, %vm1571_vm7  ;;  %vm10222_vm12 = vcmp.eq.s32.totalorder %v6252_v25, %v6118_v54 }
 0x3bd   :  { %1925 = vmatpush.msra.mxu2 %v1273_v17  ;;  %10642 = vst [vmem:[#allocation18_spill] sm:$0xff] %v6161_v27  ;;  %v6196_v9 = vadd.s32 %v6091_v46, %v6181_v32  ;;  %v7622_v17 = vld [vmem:[#allocation2 + $0x260] sm:$0xff] }
 0x3be   :  { %1954 = vmatpush.msra.mxu3 %v1289_v15  ;;  %10643 = vst [vmem:[#allocation19_spill] sm:$0xff] %v6176_v52  ;;  %v1485_v15 = vshra.s32 %v1481_v34, 2  ;;  %v6200_v60 = vmul.u32 2, %v1484_v41 }
 0x3bf   :  { %1926 = vmatpush.msra.mxu2 %v1272_v61  ;;  %10646 = vst [vmem:[#allocation20_spill] sm:$0xff] %v6196_v9  ;;  %v6202_v61 = vmul.u32 2, %v1488_v16  ;;  %vm10208_vm10 = vcmp.eq.s32.totalorder %v6183_v48, %v6196_v9 }
 0x3c0   :  { %1955 = vmatpush.msra.mxu3 %v1288_v59  ;;  %10647 = vst [vmem:[#allocation21_spill] sm:$0xff] %v6200_v60  ;;  %v6206_v38 = vmul.u32 2, %v1485_v15  ;;  %v6208_v59 = vmul.u32 2, %v1489_v42  ;;  %vm1723_vm13 = vmand %vm6190_vm8, %vm10208_vm10  ;;  %v6216_v58 = vadd.s32 4294967295, %v6200_v60  ;;  %vm10216_vm10 = vcmp.eq.s32.totalorder %v6198_v10, %v6152_v51 }
 0x3c1   :  { %v1088_v47 = vpop.f32.mrf.mxu2  ;;  %v6219_v63 = vadd.s32 4294967295, %v6202_v61  ;;  %4612 = vmatmul.msk.f32.vlgmr.msrb.gmra.mxu1 %vm1723_vm13, %v10223_v50  ;;  %v10659_v15 = vmov 0  ;;  %10965 = vst [vmem:[#allocation171_spill] sm:$0xff] %v7663_v43 }
 0x3c2   :  { %1122 = vst.msk [vmem:[#allocation2 + $0x3a0] sm:$0xff] %vm10219_vm4, %v1088_v47  ;;  %v1162_v18 = vpop.f32.mrf.mxu3  ;;  %v6227_v1 = vadd.s32 4294967295, %v6206_v38  ;;  %v6230_v47 = vadd.s32 4294967295, %v6208_v59  ;;  %v1545_v22 = vadd.s32 %v6216_v58, %v6074_v39  ;;  %v1546_v36 = vadd.s32 %v6216_v58, %v6086_v2 }
 0x3c3   :  { %1196 = vst.msk [vmem:[#allocation2 + $0x420] sm:$0xff] %vm10219_vm4, %v1162_v18  ;;  %v1016_v12 = vpop.f32.mrf.mxu1  ;;  %v6237_v18 = vadd.s32 %v6219_v63, %v6088_v62  ;;  %v1544_v57 = vadd.s32 %v6216_v58, %v6161_v27  ;;  %v6250_v13 = vadd.s32 %v6219_v63, %v6181_v32 }
 0x3c4   :  { %1049 = vst.msk [vmem:[#allocation2 + $0x328] sm:$0xff] %vm10219_vm4, %v1016_v12  ;;  %v6243_v12 = vadd.s32 %v6219_v63, %v6112_v7  ;;  %vm1581_vm1 = vcmp.eq.s32.totalorder %v6098_v19, %v1545_v22  ;;  %vm1582_vm7 = vcmp.eq.s32.totalorder %v6131_v37, %v1546_v36  ;;  %v6281_v28 = vadd.s32 %v6230_v47, %v6088_v62 }
 0x3c5   :  { %10648 = vst [vmem:[#allocation22_spill] sm:$0xff] %v6206_v38  ;;  %vm10210_vm5 = vcmp.eq.s32.totalorder %v6106_v0, %v6237_v18  ;;  %vm6265_vm13 = vmand %vm10213_vm15, %vm1581_vm1  ;;  %vm1580_vm6 = vcmp.eq.s32.totalorder %v6176_v52, %v1544_v57  ;;  %v1555_v29 = vadd.s32 %v6227_v1, %v6086_v2  ;;  %v6297_v56 = vadd.s32 %v6230_v47, %v6112_v7 }
 0x3c6   :  { %10649 = vst [vmem:[#allocation23_spill] sm:$0xff] %v6237_v18  ;;  %vm10212_vm2 = vcmp.eq.s32.totalorder %v6133_v35, %v6243_v12  ;;  %vm1733_vm14 = vmand %vm6265_vm13, %vm10210_vm5  ;;  %vm10215_vm5 = vcmp.eq.s32.totalorder %v6183_v48, %v6250_v13  ;;  %v1553_v34 = vadd.s32 %v6227_v1, %v6161_v27  ;;  %v6311_v41 = vadd.s32 %v6230_v47, %v6181_v32 }
 0x3c7   :  { %10650 = vst [vmem:[#allocation24_spill] sm:$0xff] %v6243_v12  ;;  %4617 = vmatmul.msk.f32.gmra.mxu2 %vm1733_vm14, %v10223_v50  ;;  %vm6289_vm1 = vmand %vm10211_vm0, %vm1582_vm7  ;;  %vm10218_vm7 = vcmp.eq.s32.totalorder %v6252_v25, %v6096_v24  ;;  %vm10225_vm15 = vcmp.eq.s32.totalorder %v6106_v0, %v6281_v28  ;;  %v6334_v22 = vshra.s32 %v1356_v33, 4  ;;  %v1362_v36 = vadd.s32 512, %v6056_v23 }
 0x3c8   :  { %10651 = vst [vmem:[#allocation25_spill] sm:$0xff] %v6250_v13  ;;  %vm1734_vm14 = vmand %vm6289_vm1, %vm10212_vm2  ;;  %v10678_v13 = vmov 0   ;;  %v10693_v12 = vmov 0 }
 0x3c9   :  { %v1090_v14 = vpop.f32.mrf.mxu2  ;;  %10654 = vst [vmem:[#allocation26_spill] sm:$0xff] %v6281_v28  ;;  %4621 = vmatmul.msk.f32.gmra.mxu3 %vm1734_vm14, %v10223_v50  ;;  %vm6319_vm2 = vmand %vm10216_vm10, %vm1580_vm6  ;;  %vm1591_vm14 = vcmp.eq.s32.totalorder %v6131_v37, %v1555_v29  ;;  %vm10242_vm10 = vcmp.eq.s32.totalorder %v6133_v35, %v6297_v56 }
 0x3ca   :  { %1123 = vst.msk [vmem:[#allocation2 + $0x3a8] sm:$0xff] %vm10219_vm4, %v1090_v14  ;;  %v1164_v30 = vpop.f32.mrf.mxu3  ;;  %v1554_v14 = vadd.s32 %v6227_v1, %v6074_v39  ;;  %v10660_v15 = vsel %vm6319_vm2, 4294967295, %v10659_v15  ;;  %vm1732_vm6 = vmand %vm6319_vm2, %vm10215_vm5 }
 0x3cb   :  { %1197 = vst.msk [vmem:[#allocation2 + $0x428] sm:$0xff] %vm10219_vm4, %v1164_v30  ;;  %v1019_v31 = vpop.f32.mrf.mxu1  ;;  %4613 = vmatmul.msk.f32.gmra.mxu1 %vm1732_vm6, %v10223_v50  ;;  %vm1589_vm6 = vcmp.eq.s32.totalorder %v6176_v52, %v1553_v34  ;;  %v1380_v50 = vand.u32 127, %v1362_v36  ;;  %v5169_v30 = vld [vmem:[#allocation2 + $0x2b8] sm:$0xff] }
 0x3cc   :  { %1050 = vst.msk [vmem:[#allocation2 + $0x330] sm:$0xff] %vm10219_vm4, %v1019_v31  ;;  %v1482_v31 = vand.u32 15, %v1356_v33  ;;  %vm1590_vm0 = vcmp.eq.s32.totalorder %v6098_v19, %v1554_v14  ;;  %v1371_v14 = vshra.s32 %v1362_v36, 7 }
 0x3cd   :  { %10657 = vst [vmem:[#allocation27_spill] sm:$0xff] %v6297_v56  ;;  %vm6347_vm5 = vmand %vm10218_vm7, %vm1590_vm0  ;;  %vm10669_vm7 = vcmp.eq.s32.totalorder %v6252_v25, %v6152_v51  ;;  %v6465_v29 = vshra.s32 %v1380_v50, 6  ;;  %v1452_v38 = vand.u32 63, %v1380_v50  ;;  %v1370_v50 = vshra.s32 %v6389_v53, 7 }
 0x3ce   :  { %10658 = vst [vmem:[#allocation28_spill] sm:$0xff] %v6311_v41  ;;  %v1486_v42 = vshra.s32 %v1482_v31, 2  ;;  %vm1742_vm0 = vmand %vm6347_vm5, %vm10225_vm15  ;;  %vm1398_vm9 = vcmp.ge.s32.totalorder %v1371_v14, 3  ;;  %vm10679_vm15 = vcmask 261120  }
 0x3cf   :  { %4618 = vmatmul.msk.f32.gmra.mxu2 %vm1742_vm0, %v10668_v44  ;;  %v1407_v9 = vsel %vm1398_vm9, 1, %v10678_v13  ;;  %vm10680_vm9 = vcmp.eq.s32.totalorder %v6334_v22, %v6096_v24  ;;  %10686 = vst [vmem:[#allocation35_spill] sm:$0xff] %v6465_v29  ;;  %v5103_v24 = vld [vmem:[#allocation2 + $0xe8] sm:$0xff] }
 0x3d0   :  { %v6355_v33 = vmul.u32 2, %v1486_v42  ;;  %v10664_v42 = vmov 0 }
 0x3d1   :  { %v1093_v5 = vpop.f32.mrf.mxu2 }
 0x3d2   :  { %1124 = vst.msk [vmem:[#allocation2 + $0x3b0] sm:$0xff] %vm10219_vm4, %v1093_v5  ;;  %v1167_v21 = vpop.f32.mrf.mxu3  ;;  %v1490_v5 = vand.u32 3, %v1482_v31  ;;  %v10661_v31 = vmov 0 }
 0x3d3   :  { %1198 = vst.msk [vmem:[#allocation2 + $0x430] sm:$0xff] %vm10219_vm4, %v1167_v21  ;;  %v1021_v4 = vpop.f32.mrf.mxu1  ;;  %v10662_v31 = vsel %vm6347_vm5, 4294967295, %v10661_v31  ;;  %vm6408_vm5 = vmand %vm10669_vm7, %vm1589_vm6  ;;  %vm10674_vm7 = vcmp.eq.s32.totalorder %v6183_v48, %v6311_v41 }
 0x3d4   :  { %1051 = vst.msk [vmem:[#allocation2 + $0x338] sm:$0xff] %vm10219_vm4, %v1021_v4  ;;  %v6338_v4 = vadd.s32 640, %v6056_v23  ;;  %v10671_v55 = vsel %vm6408_vm5, 4294967295, %v10670_v55  ;;  %vm6429_vm0 = vmand %vm6408_vm5, %vm10674_vm7 }
 0x3d5   :  { %10663 = vst [vmem:[#allocation29_spill] sm:$0xff] %v6355_v33  ;;  %4614 = vmatmul.msk.f32.gmra.mxu1 %vm6429_vm0, %v10668_v44 }
 0x3d6   :  { %v1381_v18 = vand.u32 127, %v6338_v4 }
 0x3d9   :  { %v1095_v16 = vpop.f32.mrf.mxu2 }
 0x3da   :  { %1125 = vst.msk [vmem:[#allocation2 + $0x3b8] sm:$0xff] %vm10219_vm4, %v1095_v16  ;;  %v1169_v21 = vpop.f32.mrf.mxu3  ;;  %v6357_v16 = vmul.u32 2, %v1490_v5  ;;  %v6380_v5 = vadd.s32 4294967295, %v6355_v33 }
 0x3db   :  { %1199 = vst.msk [vmem:[#allocation2 + $0x438] sm:$0xff] %vm10219_vm4, %v1169_v21  ;;  %v1024_v57 = vpop.f32.mrf.mxu1 }
 0x3dc   :  { %1052 = vst.msk [vmem:[#allocation2 + $0x340] sm:$0xff] %vm10219_vm4, %v1024_v57  ;;  %vm6375_vm4 = vmand %vm10222_vm12, %vm1591_vm14  ;;  %v6383_v21 = vadd.s32 4294967295, %v6357_v16  ;;  %v6386_v57 = vshra.s32 %v6338_v4, 7  ;;  %v1563_v40 = vadd.s32 %v6380_v5, %v6074_v39  ;;  %v1564_v36 = vadd.s32 %v6380_v5, %v6086_v2 }
 0x3dd   :  { %v10665_v42 = vsel %vm6375_vm4, 4294967295, %v10664_v42  ;;  %vm6396_vm14 = vmand %vm6375_vm4, %vm10242_vm10  ;;  %v1562_v8 = vadd.s32 %v6380_v5, %v6161_v27  ;;  %v10681_v27 = vmov 0  ;;  %vm10684_vm4 = vcmp.ge.s32.totalorder %v1371_v14, 6 }
 0x3de   :  { %v6416_v56 = vadd.s32 %v6383_v21, %v6088_v62  ;;  %v6422_v34 = vadd.s32 %v6383_v21, %v6112_v7  ;;  %v6439_v2 = vadd.s32 %v6383_v21, %v6181_v32  ;;  %4622 = vmatmul.msk.f32.gmra.mxu3 %vm6396_vm14, %v10668_v44  ;;  %vm1599_vm7 = vcmp.eq.s32.totalorder %v6098_v19, %v1563_v40  ;;  %vm10687_vm12 = vmmov %vm10679_vm15 }
 0x3df   :  { %vm1600_vm6 = vcmp.eq.s32.totalorder %v6131_v37, %v1564_v36  ;;  %vm6455_vm5 = vmand %vm10680_vm9, %vm1599_vm7  ;;  %v6463_v40 = vsel %vm10684_vm4, 2, %v1407_v9  ;;  %vm1399_vm10 = vcmp.ge.s32.totalorder %v6386_v57, 3 }
 0x3e0   :  { %10672 = vst [vmem:[#allocation30_spill] sm:$0xff] %v6416_v56  ;;  %v10682_v27 = vsel %vm6455_vm5, 4294967295, %v10681_v27  ;;  %v1425_v9 = vmul.u32 3, %v6463_v40  ;;  %vm10691_vm4 = vmmov %vm10687_vm12  ;;  %v1408_v37 = vsel %vm1399_vm10, 1, %v10678_v13  ;;  %v1557_v6 = vadd.s32 %v6227_v1, %v6463_v40 }
 0x3e1   :  { %10673 = vst [vmem:[#allocation31_spill] sm:$0xff] %v6422_v34  ;;  %v1098_v33 = vpop.f32.mrf.mxu2 }
 0x3e2   :  { %10677 = vst [vmem:[#allocation32_spill] sm:$0xff] %v6439_v2  ;;  %v1172_v41 = vpop.f32.mrf.mxu3  ;;  %v6508_v36 = vsub.s32 %v1371_v14, %v1425_v9  ;;  %v1453_v14 = vand.u32 63, %v1381_v18  ;;  %v1379_v9 = vand.u32 127, %v6389_v53 }
 0x3e3   :  { %1126 = vst.msk [vmem:[#allocation2 + $0x3c0] sm:$0xff] %vm10679_vm15, %v1098_v33  ;;  %v1026_v33 = vpop.f32.mrf.mxu1  ;;  %vm10688_vm15 = vcmp.eq.s32.totalorder %v6106_v0, %v6416_v56 }
 0x3e4   :  { %10683 = vst [vmem:[#allocation33_spill] sm:$0xff] %v10682_v27  ;;  %vm6476_vm7 = vmand %vm6455_vm5, %vm10688_vm15  ;;  %vm1390_vm15 = vcmp.ge.s32.totalorder %v6386_v57, 6  ;;  %v6551_v28 = vand.u32 7, %v1453_v14  ;;  %v1548_v27 = vadd.s32 %v6216_v58, %v6463_v40 }
 0x3e5   :  { %10685 = vst [vmem:[#allocation34_spill] sm:$0xff] %v6463_v40  ;;  %v6524_v56 = vsel %vm1390_vm15, 2, %v1408_v37  ;;  %4619 = vmatmul.msk.f32.gmra.mxu2 %vm6476_vm7, %v10668_v44  ;;  %vm10710_vm15 = vcmp.eq.s32.totalorder %v6183_v48, %v6439_v2  ;;  %v10716_v2 = vmov 0  ;;  %vm1397_vm7 = vcmp.ge.s32.totalorder %v1370_v50, 3 }
 0x3e6   :  { %1200 = vst.msk [vmem:[#allocation2 + $0x440] sm:$0xff] %vm10687_vm12, %v1172_v41  ;;  %v1539_v41 = vadd.s32 %v6083_v45, %v6463_v40  ;;  %vm10692_vm12 = vcmp.eq.s32.totalorder %v6334_v22, %v6118_v54  ;;  %v6512_v54 = vand.u32 7, %v1452_v38  ;;  %v1540_v37 = vadd.s32 %v6083_v45, %v6524_v56 }
 0x3e7   :  { %1053 = vst.msk [vmem:[#allocation2 + $0x348] sm:$0xff] %vm10691_vm4, %v1026_v33  ;;  %vm6490_vm0 = vmand %vm10692_vm12, %vm1600_vm6  ;;  %vm10696_vm4 = vcmp.eq.s32.totalorder %v6133_v35, %v6422_v34  ;;  %v6510_v33 = vshra.s32 %v1452_v38, 3  ;;  %vm10702_vm6 = vcmp.eq.s32.totalorder %v6176_v52, %v1562_v8  ;;  %vm10703_vm12 = vcmp.eq.s32.totalorder %v6334_v22, %v6152_v51 }
 0x3e8   :  { %v10694_v12 = vsel %vm6490_vm0, 4294967295, %v10693_v12  ;;  %vm6504_vm14 = vmand %vm6490_vm0, %vm10696_vm4  ;;  %10699 = vst [vmem:[#allocation37_spill] sm:$0xff] %v6508_v36  ;;  %v10704_v34 = vmov 0  ;;  %v6535_v8 = vadd.s32 %v6091_v46, %v6508_v36  ;;  %v1426_v38 = vmul.u32 3, %v6524_v56 }
 0x3e9   :  { %10695 = vst [vmem:[#allocation36_spill] sm:$0xff] %v10694_v12  ;;  %vm6520_vm9 = vmand %vm10703_vm12, %vm10702_vm6  ;;  %v6526_v12 = vshra.s32 %v1381_v18, 6  ;;  %vm1575_vm10 = vcmp.eq.s32.totalorder %v6510_v33, %v1539_v41  ;;  %v6549_v18 = vshra.s32 %v1453_v14, 3  ;;  %v1100_v41 = vpop.f32.mrf.mxu2  ;;  %4623 = vmatmul.msk.f32.gmra.mxu3 %vm6504_vm14, %v10668_v44  ;;  %vm10715_vm12 = vcmp.eq.s32.totalorder %v6101_v11, %v6465_v29 }
 0x3ea   :  { %10700 = vst [vmem:[#allocation38_spill] sm:$0xff] %v6510_v33  ;;  %v10705_v34 = vsel %vm6520_vm9, 4294967295, %v10704_v34  ;;  %vm6545_vm4 = vmand %vm6520_vm9, %vm10710_vm15  ;;  %vm10269_vm9 = vcmp.eq.s32.totalorder %v6512_v54, %v6535_v8  ;;  %v6568_v14 = vsub.s32 %v6386_v57, %v1426_v38  ;;  %v6570_v51 = vshra.s32 %v1379_v9, 6  ;;  %v1174_v4 = vpop.f32.mrf.mxu3 }
 0x3eb   :  { %10701 = vst [vmem:[#allocation39_spill] sm:$0xff] %v6512_v54  ;;  %vm6561_vm15 = vmand %vm10715_vm12, %vm1575_vm10  ;;  %vm10721_vm6 = vcmask 261120   ;;  %vm1576_vm14 = vcmp.eq.s32.totalorder %v6549_v18, %v1540_v37  ;;  %v1406_v52 = vsel %vm1397_vm7, 1, %v10678_v13  ;;  %v1029_v60 = vpop.f32.mrf.mxu1  ;;  %4615 = vmatmul.msk.f32.gmra.mxu1 %vm6545_vm4, %v10668_v44  ;;  %vm10723_vm12 = vcmp.eq.s32.totalorder %v6101_v11, %v6526_v12 }
 0x3ec   :  { %10706 = vst [vmem:[#allocation40_spill] sm:$0xff] %v10705_v34  ;;  %v10717_v2 = vsel %vm6561_vm15, 4294967295, %v10716_v2  ;;  %v1451_v34 = vand.u32 63, %v1379_v9  ;;  %vm10722_vm10 = vmmov %vm10721_vm6  ;;  %v10724_v57 = vmov 0  ;;  %v6590_v9 = vadd.s32 %v6091_v46, %v6568_v14 }
 0x3ed   :  { %10707 = vst [vmem:[#allocation41_spill] sm:$0xff] %v6524_v56  ;;  %vm10728_vm7 = vcmp.ge.s32.totalorder %v1370_v50, 6  ;;  %vm1727_vm4 = vmand %vm6561_vm15, %vm10269_vm9  ;;  %vm10746_vm0 = vcmp.eq.s32.totalorder %v6198_v10, %v6526_v12  ;;  %vm10752_vm2 = vcmp.eq.s32.totalorder %v6198_v10, %v6570_v51 }
 0x3ee   :  { %10708 = vst [vmem:[#allocation42_spill] sm:$0xff] %v6526_v12  ;;  %v6593_v38 = vsel %vm10728_vm7, 2, %v1406_v52  ;;  %v6602_v53 = vshra.s32 %v1451_v34, 3  ;;  %v6610_v52 = vand.u32 7, %v1451_v34  ;;  %v1549_v34 = vadd.s32 %v6216_v58, %v6524_v56  ;;  %4628 = vmatmul.msk.f32.vlgmr.msra.gmra.mxu2 %vm1727_vm4, %v10668_v44 }
 0x3ef   :  { %10709 = vst [vmem:[#allocation43_spill] sm:$0xff] %v6535_v8  ;;  %v1424_v37 = vmul.u32 3, %v6593_v38  ;;  %v6634_v8 = vadd.s32 %v6219_v63, %v6568_v14  ;;  %vm10740_vm7 = vcmp.eq.s32.totalorder %v6198_v10, %v6465_v29 }
 0x3f0   :  { %10713 = vst [vmem:[#allocation44_spill] sm:$0xff] %v6549_v18  ;;  %vm1585_vm4 = vcmp.eq.s32.totalorder %v6549_v18, %v1549_v34 }
 0x3f1   :  { %10714 = vst [vmem:[#allocation45_spill] sm:$0xff] %v6551_v28 }
 0x3f2   :  { %10718 = vst [vmem:[#allocation46_spill] sm:$0xff] %v10717_v2  ;;  %v1177_v34 = vpop.f32.mrf.mxu3  ;;  %v10747_v2 = vmov 0 }
 0x3f3   :  { %10719 = vst [vmem:[#allocation47_spill] sm:$0xff] %v6568_v14 }
 0x3f4   :  { %10720 = vst [vmem:[#allocation48_spill] sm:$0xff] %v6570_v51 }
 0x3f5   :  { %1127 = vst.msk [vmem:[#allocation2 + $0x3c8] sm:$0xff] %vm10721_vm6, %v1100_v41  ;;  %vm6584_vm6 = vmand %vm10723_vm12, %vm1576_vm14  ;;  %v1538_v41 = vadd.s32 %v6083_v45, %v6593_v38  ;;  %vm10271_vm12 = vcmp.eq.s32.totalorder %v6551_v28, %v6590_v9  ;;  %vm1584_vm14 = vcmp.eq.s32.totalorder %v6510_v33, %v1548_v27  ;;  %v10736_v27 = vmov 0 }
 0x3f6   :  { %1201 = vst.msk [vmem:[#allocation2 + $0x448] sm:$0xff] %vm10722_vm10, %v1174_v4  ;;  %v10725_v57 = vsel %vm6584_vm6, 4294967295, %v10724_v57  ;;  %v6623_v4 = vsub.s32 %v1370_v50, %v1424_v37  ;;  %v1547_v50 = vadd.s32 %v6216_v58, %v6593_v38  ;;  %vm6654_vm15 = vmand %vm10740_vm7, %vm1584_vm14 }
 0x3f7   :  { %10726 = vst [vmem:[#allocation49_spill] sm:$0xff] %v10725_v57  ;;  %vm1574_vm9 = vcmp.eq.s32.totalorder %v6602_v53, %v1538_v41  ;;  %v1103_v41 = vpop.f32.mrf.mxu2  ;;  %vm6670_vm14 = vmand %vm10746_vm0, %vm1585_vm4  ;;  %vm10285_vm4 = vcmp.eq.s32.totalorder %v6551_v28, %v6634_v8 }
 0x3f8   :  { %10727 = vst [vmem:[#allocation50_spill] sm:$0xff] %v6590_v9  ;;  %v6647_v37 = vadd.s32 %v6091_v46, %v6623_v4  ;;  %v10741_v9 = vmov 0  ;;  %v6662_v57 = vadd.s32 %v6219_v63, %v6623_v4  ;;  %v10748_v2 = vsel %vm6670_vm14, 4294967295, %v10747_v2 }
 0x3f9   :  { %10729 = vst [vmem:[#allocation51_spill] sm:$0xff] %v6593_v38  ;;  %v10742_v9 = vsel %vm6654_vm15, 4294967295, %v10741_v9 }
 0x3fa   :  { %1054 = vst.msk [vmem:[#allocation2 + $0x350] sm:$0xff] %vm10722_vm10, %v1029_v60  ;;  %v6616_v60 = vadd.s32 %v6219_v63, %v6508_v36  ;;  %vm1728_vm10 = vmand %vm6584_vm6, %vm10271_vm12  ;;  %vm10735_vm12 = vcmp.eq.s32.totalorder %v6101_v11, %v6570_v51 }
 0x3fb   :  { %10730 = vst [vmem:[#allocation52_spill] sm:$0xff] %v6602_v53  ;;  %vm6641_vm6 = vmand %vm10735_vm12, %vm1574_vm9  ;;  %4632 = vmatmul.msk.f32.vlgmr.msra.gmra.mxu3 %vm1728_vm10, %v10668_v44  ;;  %vm10745_vm12 = vcmask 261120   ;;  %vm10281_vm10 = vcmp.eq.s32.totalorder %v6610_v52, %v6647_v37  ;;  %vm1583_vm9 = vcmp.eq.s32.totalorder %v6602_v53, %v1547_v50  ;;  %v1558_v50 = vadd.s32 %v6227_v1, %v6524_v56 }
 0x3fc   :  { %10731 = vst [vmem:[#allocation53_spill] sm:$0xff] %v6610_v52  ;;  %v10737_v27 = vsel %vm6641_vm6, 4294967295, %v10736_v27  ;;  %vm1726_vm0 = vmand %vm6641_vm6, %vm10281_vm10  ;;  %vm10751_vm7 = vcmp.eq.s32.totalorder %v6512_v54, %v6616_v60  ;;  %vm10785_vm6 = vcmp.eq.s32.totalorder %v6334_v22, %v6526_v12 }
 0x3fd   :  { %10732 = vst [vmem:[#allocation54_spill] sm:$0xff] %v6616_v60  ;;  %vm10750_vm5 = vmmov %vm10745_vm12  ;;  %4624 = vmatmul.msk.f32.vlgmr.msra.gmra.mxu1 %vm1726_vm0, %v10668_v44  ;;  %v1556_v60 = vadd.s32 %v6227_v1, %v6593_v38  ;;  %vm1594_vm0 = vcmp.eq.s32.totalorder %v6549_v18, %v1558_v50  ;;  %v1179_v50 = vpop.f32.mrf.mxu3 }
 0x3fe   :  { %10733 = vst [vmem:[#allocation55_spill] sm:$0xff] %v6623_v4  ;;  %vm6699_vm10 = vmand %vm10752_vm2, %vm1583_vm9  ;;  %vm1593_vm2 = vcmp.eq.s32.totalorder %v6510_v33, %v1557_v6 }
 0x3ff   :  { %10734 = vst [vmem:[#allocation56_spill] sm:$0xff] %v6634_v8  ;;  %v1105_v6 = vpop.f32.mrf.mxu2  ;;  %v6788_v8 = vadd.s32 %v6383_v21, %v6508_v36 }
 0x400   :  { %10738 = vst [vmem:[#allocation57_spill] sm:$0xff] %v10737_v27  ;;  %v10768_v27 = vmov 0 }
 0x401   :  { %10739 = vst [vmem:[#allocation58_spill] sm:$0xff] %v6647_v37  ;;  %v6722_v37 = vadd.s32 %v6230_v47, %v6568_v14 }
 0x402   :  { %10743 = vst [vmem:[#allocation59_spill] sm:$0xff] %v10742_v9 }
 0x403   :  { %10744 = vst [vmem:[#allocation60_spill] sm:$0xff] %v6662_v57 }
 0x404   :  { %1128 = vst.msk [vmem:[#allocation2 + $0x3d0] sm:$0xff] %vm10745_vm12, %v1103_v41  ;;  %v1031_v41 = vpop.f32.mrf.mxu1 }
 0x405   :  { %10749 = vst [vmem:[#allocation61_spill] sm:$0xff] %v10748_v2  ;;  %v10761_v2 = vmov 0 }
 0x406   :  { %1202 = vst.msk [vmem:[#allocation2 + $0x450] sm:$0xff] %vm10745_vm12, %v1177_v34  ;;  %vm1736_vm12 = vmand %vm6654_vm15, %vm10751_vm7  ;;  %v10753_v34 = vmov 0 }
 0x407   :  { %1055 = vst.msk [vmem:[#allocation2 + $0x358] sm:$0xff] %vm10750_vm5, %v1031_v41  ;;  %v10754_v34 = vsel %vm6699_vm10, 4294967295, %v10753_v34  ;;  %vm10288_vm5 = vcmp.eq.s32.totalorder %v6610_v52, %v6662_v57  ;;  %v6707_v41 = vadd.s32 %v6230_v47, %v6508_v36  ;;  %vm1737_vm7 = vmand %vm6670_vm14, %vm10285_vm4  ;;  %4629 = vmatmul.msk.f32.gmra.mxu2 %vm1736_vm12, %v10668_v44  ;;  %vm10760_vm12 = vcmp.eq.s32.totalorder %v6252_v25, %v6465_v29 }
 0x408   :  { %10755 = vst [vmem:[#allocation62_spill] sm:$0xff] %v10754_v34  ;;  %vm6729_vm9 = vmand %vm6699_vm10, %vm10288_vm5  ;;  %4633 = vmatmul.msk.f32.gmra.mxu3 %vm1737_vm7, %v10668_v44  ;;  %v6748_v57 = vadd.s32 %v6230_v47, %v6623_v4  ;;  %vm10765_vm4 = vcmask 261120   ;;  %vm1592_vm10 = vcmp.eq.s32.totalorder %v6602_v53, %v1556_v60  ;;  %v1566_v34 = vadd.s32 %v6380_v5, %v6463_v40 }
 0x409   :  { %10756 = vst [vmem:[#allocation63_spill] sm:$0xff] %v6707_v41  ;;  %vm6740_vm14 = vmand %vm10760_vm12, %vm1593_vm2  ;;  %vm10767_vm12 = vcmp.eq.s32.totalorder %v6252_v25, %v6526_v12  ;;  %4625 = vmatmul.msk.f32.gmra.mxu1 %vm6729_vm9, %v10668_v44  ;;  %v1567_v60 = vadd.s32 %v6380_v5, %v6524_v56  ;;  %v1311_v56 = vld [vmem:[#allocation2 + $0x338] sm:$0xff] }
 0x40a   :  { %10757 = vst [vmem:[#allocation64_spill] sm:$0xff] %v6722_v37  ;;  %v10762_v2 = vsel %vm6740_vm14, 4294967295, %v10761_v2  ;;  %vm10766_vm2 = vmmov %vm10765_vm4 }
 0x40b   :  { %10763 = vst [vmem:[#allocation65_spill] sm:$0xff] %v10762_v2  ;;  %vm6760_vm5 = vmand %vm10767_vm12, %vm1594_vm0  ;;  %vm10773_vm0 = vcmp.eq.s32.totalorder %v6252_v25, %v6570_v51  ;;  %v6931_v2 = vld [vmem:[#allocation2 + $0x3d0] sm:$0xff] }
 0x40c   :  { %10764 = vst [vmem:[#allocation66_spill] sm:$0xff] %v6748_v57  ;;  %v1034_v9 = vpop.f32.mrf.mxu1  ;;  %v10769_v27 = vsel %vm6760_vm5, 4294967295, %v10768_v27  ;;  %vm10771_vm15 = vmmov %vm10766_vm2 }
 0x40d   :  { %1129 = vst.msk [vmem:[#allocation2 + $0x3d8] sm:$0xff] %vm10765_vm4, %v1105_v6  ;;  %vm10295_vm4 = vcmp.eq.s32.totalorder %v6551_v28, %v6722_v37  ;;  %vm6780_vm12 = vmand %vm10773_vm0, %vm1592_vm10  ;;  %v10774_v6 = vmov 0  ;;  %vm1602_vm10 = vcmp.eq.s32.totalorder %v6510_v33, %v1566_v34  ;;  %v1108_v34 = vpop.f32.mrf.mxu2 }
 0x40e   :  { %1203 = vst.msk [vmem:[#allocation2 + $0x458] sm:$0xff] %vm10766_vm2, %v1179_v50  ;;  %vm10772_vm2 = vcmp.eq.s32.totalorder %v6512_v54, %v6707_v41  ;;  %v10775_v6 = vsel %vm6780_vm12, 4294967295, %v10774_v6  ;;  %vm1746_vm9 = vmand %vm6760_vm5, %vm10295_vm4  ;;  %v1565_v50 = vadd.s32 %v6380_v5, %v6593_v38  ;;  %vm10779_vm4 = vcmp.eq.s32.totalorder %v6610_v52, %v6748_v57 }
 0x40f   :  { %10770 = vst [vmem:[#allocation67_spill] sm:$0xff] %v10769_v27  ;;  %vm1745_vm7 = vmand %vm6740_vm14, %vm10772_vm2  ;;  %v10781_v41 = vmov 0  ;;  %vm10784_vm14 = vcmask 261120   ;;  %v10786_v57 = vmov 0 }
 0x410   :  { %1056 = vst.msk [vmem:[#allocation2 + $0x360] sm:$0xff] %vm10771_vm15, %v1034_v9  ;;  %v6800_v9 = vadd.s32 %v6383_v21, %v6568_v14  ;;  %4630 = vmatmul.msk.f32.gmra.mxu2 %vm1745_vm7, %v10668_v44  ;;  %vm1603_vm15 = vcmp.eq.s32.totalorder %v6549_v18, %v1567_v60  ;;  %vm1744_vm2 = vmand %vm6780_vm12, %vm10779_vm4  ;;  %4634 = vmatmul.msk.f32.gmra.mxu3 %vm1746_vm9, %v10668_v44  ;;  %v1182_v60 = vpop.f32.mrf.mxu3  ;;  %v7011_v14 = vld [vmem:[#allocation2 + $0x3a0] sm:$0xff] }
 0x411   :  { %10776 = vst [vmem:[#allocation68_spill] sm:$0xff] %v10775_v6  ;;  %vm10780_vm7 = vcmp.eq.s32.totalorder %v6334_v22, %v6465_v29  ;;  %vm6827_vm4 = vmand %vm10785_vm6, %vm1603_vm15  ;;  %v6835_v29 = vadd.s32 %v6383_v21, %v6623_v4  ;;  %4626 = vmatmul.msk.f32.gmra.mxu1 %vm1744_vm2, %v10668_v44  ;;  %vm10792_vm6 = vcmp.eq.s32.totalorder %v6512_v54, %v6788_v8  ;;  %v1312_v6 = vld [vmem:[#allocation2 + $0x340] sm:$0xff] }
 0x412   :  { %10777 = vst [vmem:[#allocation69_spill] sm:$0xff] %v6788_v8  ;;  %vm6817_vm5 = vmand %vm10780_vm7, %vm1602_vm10  ;;  %v10787_v57 = vsel %vm6827_vm4, 4294967295, %v10786_v57  ;;  %vm10311_vm9 = vcmp.eq.s32.totalorder %v6551_v28, %v6800_v9  ;;  %vm1601_vm7 = vcmp.eq.s32.totalorder %v6602_v53, %v1565_v50  ;;  %v10793_v50 = vmov 0  ;;  %v6984_v28 = vld [vmem:[#allocation2 + $0x430] sm:$0xff] }
 0x413   :  { %10778 = vst [vmem:[#allocation70_spill] sm:$0xff] %v6800_v9  ;;  %v10782_v41 = vsel %vm6817_vm5, 4294967295, %v10781_v41  ;;  %vm10790_vm10 = vmmov %vm10784_vm14  ;;  %vm10314_vm2 = vcmp.eq.s32.totalorder %v6610_v52, %v6835_v29 }
 0x414   :  { %10783 = vst [vmem:[#allocation71_spill] sm:$0xff] %v10782_v41  ;;  %v1036_v33 = vpop.f32.mrf.mxu1  ;;  %vm10791_vm0 = vmmov %vm10790_vm10  ;;  %v1313_v41 = vld [vmem:[#allocation2 + $0x348] sm:$0xff]  ;;  %v6922_v18 = vld [vmem:[#allocation2 + $0x3d8] sm:$0xff] }
 0x415   :  { %1130 = vst.msk [vmem:[#allocation2 + $0x3e0] sm:$0xff] %vm10784_vm14, %v1108_v34  ;;  %vm10306_vm14 = vcmp.eq.s32.totalorder %v6334_v22, %v6570_v51  ;;  %vm1754_vm15 = vmand %vm6817_vm5, %vm10792_vm6  ;;  %vm10796_vm6 = vcmask 261120  }
 0x416   :  { %10788 = vst [vmem:[#allocation72_spill] sm:$0xff] %v10787_v57  ;;  %vm6856_vm12 = vmand %vm10306_vm14, %vm1601_vm7 }
 0x417   :  { %10789 = vst [vmem:[#allocation73_spill] sm:$0xff] %v6835_v29  ;;  %v10794_v50 = vsel %vm6856_vm12, 4294967295, %v10793_v50  ;;  %vm10797_vm7 = vmmov %vm10796_vm6 }
 0x418   :  { %1204 = vst.msk [vmem:[#allocation2 + $0x460] sm:$0xff] %vm10790_vm10, %v1182_v60  ;;  %vm1755_vm10 = vmand %vm6827_vm4, %vm10311_vm9  ;;  %4631 = vmatmul.msk.f32.gmra.mxu2 %vm1754_vm15, %v10668_v44  ;;  %v1184_v34 = vpop.f32.mrf.mxu3 }
 0x419   :  { %1057 = vst.msk [vmem:[#allocation2 + $0x368] sm:$0xff] %vm10791_vm0, %v1036_v33  ;;  %v1110_v33 = vpop.f32.mrf.mxu2  ;;  %4635 = vmatmul.msk.f32.gmra.mxu3 %vm1755_vm10, %v10668_v44  ;;  %vm1753_vm0 = vmand %vm6856_vm12, %vm10314_vm2 }
 0x41a   :  { %10795 = vst [vmem:[#allocation74_spill] sm:$0xff] %v10794_v50  ;;  %vm10798_vm14 = vmmov %vm10796_vm6  ;;  %4627 = vmatmul.msk.f32.gmra.mxu1 %vm1753_vm0, %v10668_v44 }
 0x41b   :  { %1131 = vst.msk [vmem:[#allocation2 + $0x3e8] sm:$0xff] %vm10796_vm6, %v1110_v33  ;;  %vm10799_vm15 = vmmov %vm10796_vm6 }
 0x41c   :  { %1205 = vst.msk [vmem:[#allocation2 + $0x468] sm:$0xff] %vm10797_vm7, %v1184_v34  ;;  %v1039_v60 = vpop.f32.mrf.mxu1  ;;  %vm10800_vm10 = vmmov %vm10796_vm6  ;;  %v6914_v12 = vld [vmem:[#allocation2 + $0x3e0] sm:$0xff] }
 0x41d   :  { %1058 = vst.msk [vmem:[#allocation2 + $0x370] sm:$0xff] %vm10798_vm14, %v1039_v60  ;;  %vm10801_vm9 = vmmov %vm10796_vm6 }
 0x41e   :  { %vm10802_vm2 = vmmov %vm10796_vm6  ;;  %10810 = vst [vmem:[#allocation81_spill] sm:$0xff] %v6914_v12 }
 0x41f   :  { %vm10803_vm6 = vmmov %vm10802_vm2  ;;  %10812 = vst [vmem:[#allocation83_spill] sm:$0xff] %v6922_v18 }
 0x420   :  { %v1187_v51 = vpop.f32.mrf.mxu3  ;;  %v1317_v53 = vld [vmem:[#allocation2 + $0x368] sm:$0xff]  ;;  %10814 = vst [vmem:[#allocation85_spill] sm:$0xff] %v6931_v2 }
 0x421   :  { %v1113_v8 = vpop.f32.mrf.mxu2  ;;  %1206 = vst.msk [vmem:[#allocation2 + $0x470] sm:$0xff] %vm10800_vm10, %v1187_v51  ;;  %v6882_v51 = vadd.s32 1024, %v6056_v23 }
 0x422   :  { %1132 = vst.msk [vmem:[#allocation2 + $0x3f0] sm:$0xff] %vm10799_vm15, %v1113_v8  ;;  %v6879_v8 = vadd.s32 896, %v6056_v23  ;;  %v6905_v50 = vld [vmem:[#allocation2 + $0x3e8] sm:$0xff] }
 0x423   :  { %v6902_v37 = vshra.s32 %v6882_v51, 7  ;;  %10808 = vst [vmem:[#allocation79_spill] sm:$0xff] %v6905_v50 }
 0x424   :  { %v1041_v29 = vpop.f32.mrf.mxu1  ;;  %v1318_v60 = vld [vmem:[#allocation2 + $0x370] sm:$0xff]  ;;  %10826 = vst [vmem:[#allocation97_spill] sm:$0xff] %v6984_v28 }
 0x425   :  { %1059 = vst.msk [vmem:[#allocation2 + $0x378] sm:$0xff] %vm10801_vm9, %v1041_v29  ;;  %v1316_v29 = vld [vmem:[#allocation2 + $0x360] sm:$0xff]  ;;  %vm1402_vm14 = vcmp.ge.s32.totalorder %v6902_v37, 3  ;;  %vm1393_vm7 = vcmp.ge.s32.totalorder %v6902_v37, 6 }
 0x426   :  { %10833 = vst [vmem:[#allocation104_spill] sm:$0xff] %v7011_v14 }
 0x428   :  { %v1189_v33 = vpop.f32.mrf.mxu3  ;;  %v6899_v9 = vld [vmem:[#allocation2 + $0x470] sm:$0xff] }
 0x429   :  { %v1115_v40 = vpop.f32.mrf.mxu2  ;;  %1207 = vst.msk [vmem:[#allocation2 + $0x478] sm:$0xff] %vm10803_vm6, %v1189_v33  ;;  %v6893_v38 = vld [vmem:[#allocation2 + $0x3f0] sm:$0xff] }
 0x42a   :  { %1133 = vst.msk [vmem:[#allocation2 + $0x3f8] sm:$0xff] %vm10802_vm2, %v1115_v40 }
 0x42b   :  { %10806 = vst [vmem:[#allocation77_spill] sm:$0xff] %v6893_v38 }
 0x42c   :  { %v1319_v34 = vld [vmem:[#allocation2 + $0x378] sm:$0xff]  ;;  %10807 = vst [vmem:[#allocation78_spill] sm:$0xff] %v6899_v9 }
 0x42d   :  { %1969 = vmatpush.msrb.mxu1 %v1319_v34  ;;  %2374 = vmatpush.msrb.mxu0 %v1319_v34  ;;  %v6890_v34 = vadd.s32 768, %v6056_v23  ;;  %v1314_v23 = vld [vmem:[#allocation2 + $0x350] sm:$0xff] }
 0x42f   :  { %1970 = vmatpush.msrb.mxu1 %v1318_v60  ;;  %2375 = vmatpush.msrb.mxu0 %v1318_v60  ;;  %v1315_v60 = vld [vmem:[#allocation2 + $0x358] sm:$0xff]  ;;  %v6911_v57 = vshra.s32 %v6890_v34, 7  ;;  %v1382_v52 = vand.u32 127, %v6890_v34 }
 0x430   :  { %v6887_v33 = vld [vmem:[#allocation2 + $0x478] sm:$0xff] }
 0x431   :  { %1971 = vmatpush.msrb.mxu1 %v1317_v53  ;;  %2376 = vmatpush.msrb.mxu0 %v1317_v53  ;;  %v6884_v40 = vld [vmem:[#allocation2 + $0x3f8] sm:$0xff]  ;;  %10805 = vst [vmem:[#allocation76_spill] sm:$0xff] %v6887_v33  ;;  %v6896_v53 = vshra.s32 %v6879_v8, 7  ;;  %vm1400_vm0 = vcmp.ge.s32.totalorder %v6911_v57, 3  ;;  %vm1391_vm15 = vcmp.ge.s32.totalorder %v6911_v57, 6 }
 0x432   :  { %10804 = vst [vmem:[#allocation75_spill] sm:$0xff] %v6884_v40  ;;  %1998 = vmatpush.msrb.mxu2 %v6884_v40  ;;  %2027 = vmatpush.msrb.mxu3 %v6887_v33  ;;  %v6980_v33 = vld [vmem:[#allocation2 + $0x3b0] sm:$0xff]  ;;  %v7458_v40 = vld [vmem:[#allocation2 + $0x128] sm:$0xff] }
 0x433   :  { %1972 = vmatpush.msrb.mxu1 %v1316_v29  ;;  %2377 = vmatpush.msrb.mxu0 %v1316_v29  ;;  %v6908_v29 = vld [vmem:[#allocation2 + $0x468] sm:$0xff]  ;;  %vm1401_vm9 = vcmp.ge.s32.totalorder %v6896_v53, 3  ;;  %vm1392_vm2 = vcmp.ge.s32.totalorder %v6896_v53, 6  ;;  %10825 = vst [vmem:[#allocation96_spill] sm:$0xff] %v6980_v33 }
 0x434   :  { %1999 = vmatpush.msrb.mxu2 %v6893_v38  ;;  %2028 = vmatpush.msrb.mxu3 %v6899_v9  ;;  %10809 = vst [vmem:[#allocation80_spill] sm:$0xff] %v6908_v29  ;;  %v1410_v27 = vsel %vm1401_vm9, 1, %v10678_v13  ;;  %v7023_v38 = vld [vmem:[#allocation2 + $0x420] sm:$0xff] }
 0x435   :  { %1973 = vmatpush.msrb.mxu1 %v1315_v60  ;;  %2378 = vmatpush.msrb.mxu0 %v1315_v60  ;;  %v6918_v60 = vld [vmem:[#allocation2 + $0x460] sm:$0xff]  ;;  %v6946_v9 = vsel %vm1392_vm2, 2, %v1410_v27  ;;  %v1309_v27 = vld [vmem:[#allocation2 + $0x328] sm:$0xff]  ;;  %10836 = vst [vmem:[#allocation107_spill] sm:$0xff] %v7023_v38 }
 0x436   :  { %2000 = vmatpush.msrb.mxu2 %v6905_v50  ;;  %2029 = vmatpush.msrb.mxu3 %v6908_v29  ;;  %10811 = vst [vmem:[#allocation82_spill] sm:$0xff] %v6918_v60  ;;  %v1310_v29 = vld [vmem:[#allocation2 + $0x330] sm:$0xff]  ;;  %v1542_v54 = vadd.s32 %v6083_v45, %v6946_v9 }
 0x437   :  { %1974 = vmatpush.msrb.mxu1 %v1314_v23  ;;  %2379 = vmatpush.msrb.mxu0 %v1314_v23  ;;  %v6925_v23 = vld [vmem:[#allocation2 + $0x458] sm:$0xff]  ;;  %10817 = vst [vmem:[#allocation88_spill] sm:$0xff] %v6946_v9 }
 0x438   :  { %2001 = vmatpush.msrb.mxu2 %v6914_v12  ;;  %2030 = vmatpush.msrb.mxu3 %v6918_v60  ;;  %10813 = vst [vmem:[#allocation84_spill] sm:$0xff] %v6925_v23  ;;  %v6938_v60 = vld [vmem:[#allocation2 + $0x450] sm:$0xff] }
 0x439   :  { %1975 = vmatpush.msrb.mxu1 %v1313_v41  ;;  %2380 = vmatpush.msrb.mxu0 %v1313_v41  ;;  %v1411_v41 = vsel %vm1402_vm14, 1, %v10678_v13  ;;  %10815 = vst [vmem:[#allocation86_spill] sm:$0xff] %v6938_v60 }
 0x43a   :  { %2002 = vmatpush.msrb.mxu2 %v6922_v18  ;;  %2031 = vmatpush.msrb.mxu3 %v6925_v23  ;;  %v6941_v23 = vld [vmem:[#allocation2 + $0x3c8] sm:$0xff]  ;;  %v6961_v18 = vld [vmem:[#allocation2 + $0x3c0] sm:$0xff]  ;;  %10939 = vst [vmem:[#allocation152_spill] sm:$0xff] %v7458_v40 }
 0x43b   :  { %1976 = vmatpush.msrb.mxu1 %v1312_v6  ;;  %2381 = vmatpush.msrb.mxu0 %v1312_v6  ;;  %10816 = vst [vmem:[#allocation87_spill] sm:$0xff] %v6941_v23  ;;  %v1383_v6 = vand.u32 127, %v6879_v8  ;;  %v6958_v8 = vsel %vm1393_vm7, 2, %v1411_v41  ;;  %v6973_v41 = vld [vmem:[#allocation2 + $0x3b8] sm:$0xff] }
 0x43c   :  { %2003 = vmatpush.msrb.mxu2 %v6931_v2  ;;  %2032 = vmatpush.msrb.mxu3 %v6938_v60  ;;  %v1409_v2 = vsel %vm1400_vm0, 1, %v10678_v13  ;;  %v6953_v60 = vld [vmem:[#allocation2 + $0x448] sm:$0xff]  ;;  %10819 = vst [vmem:[#allocation90_spill] sm:$0xff] %v6958_v8  ;;  %v6965_v13 = vld [vmem:[#allocation2 + $0x440] sm:$0xff]  ;;  %v1429_v34 = vmul.u32 3, %v6958_v8 }
 0x43d   :  { %1977 = vmatpush.msrb.mxu1 %v1311_v56  ;;  %2382 = vmatpush.msrb.mxu0 %v1311_v56  ;;  %10818 = vst [vmem:[#allocation89_spill] sm:$0xff] %v6953_v60  ;;  %v1384_v56 = vand.u32 127, %v6882_v51  ;;  %v6970_v51 = vsel %vm1391_vm15, 2, %v1409_v2  ;;  %v1307_v2 = vld [vmem:[#allocation2 + $0x318] sm:$0xff] }
 0x43e   :  { %2004 = vmatpush.msrb.mxu2 %v6941_v23  ;;  %2033 = vmatpush.msrb.mxu3 %v6953_v60  ;;  %10820 = vst [vmem:[#allocation91_spill] sm:$0xff] %v6961_v18  ;;  %v1428_v23 = vmul.u32 3, %v6946_v9  ;;  %v1455_v60 = vand.u32 63, %v1383_v6  ;;  %v2471_v36 = vadd.s32 %v6076_v49, %v6970_v51 }
 0x43f   :  { %1978 = vmatpush.msrb.mxu1 %v1310_v29  ;;  %2383 = vmatpush.msrb.mxu0 %v1310_v29  ;;  %10821 = vst [vmem:[#allocation92_spill] sm:$0xff] %v6965_v13  ;;  %v1308_v29 = vld [vmem:[#allocation2 + $0x320] sm:$0xff]  ;;  %v1456_v12 = vand.u32 63, %v1384_v56 }
 0x440   :  { %2005 = vmatpush.msrb.mxu2 %v6961_v18  ;;  %10822 = vst [vmem:[#allocation93_spill] sm:$0xff] %v6970_v51  ;;  %2034 = vmatpush.msrb.mxu3 %v6965_v13  ;;  %v6977_v18 = vld [vmem:[#allocation2 + $0x438] sm:$0xff]  ;;  %v1454_v13 = vand.u32 63, %v1382_v52  ;;  %v6987_v50 = vsub.s32 %v6896_v53, %v1428_v23  ;;  %v6994_v4 = vshra.s32 %v1455_v60, 3  ;;  %v7002_v53 = vld [vmem:[#allocation2 + $0x428] sm:$0xff]  ;;  %v7004_v23 = vshra.s32 %v1384_v56, 6 }
 0x441   :  { %1979 = vmatpush.msrb.mxu1 %v1309_v27  ;;  %2384 = vmatpush.msrb.mxu0 %v1309_v27  ;;  %10823 = vst [vmem:[#allocation94_spill] sm:$0xff] %v6973_v41  ;;  %v1427_v27 = vmul.u32 3, %v6970_v51  ;;  %v1541_v56 = vadd.s32 %v6083_v45, %v6970_v51 }
 0x442   :  { %2006 = vmatpush.msrb.mxu2 %v6973_v41  ;;  %10824 = vst [vmem:[#allocation95_spill] sm:$0xff] %v6977_v18  ;;  %2035 = vmatpush.msrb.mxu3 %v6977_v18  ;;  %v1306_v41 = vld [vmem:[#allocation2 + $0x310] sm:$0xff]  ;;  %v6990_v18 = vld [vmem:[#allocation2 + $0x3a8] sm:$0xff]  ;;  %vm1578_vm6 = vcmp.eq.s32.totalorder %v6994_v4, %v1542_v54  ;;  %vm10375_vm9 = vcmp.eq.s32.totalorder %v6101_v11, %v7004_v23 }
 0x443   :  { %1980 = vmatpush.msrb.mxu1 %v1308_v29  ;;  %2385 = vmatpush.msrb.mxu0 %v1308_v29  ;;  %10827 = vst [vmem:[#allocation98_spill] sm:$0xff] %v6990_v18  ;;  %v6992_v29 = vshra.s32 %v1383_v6, 6  ;;  %v1543_v6 = vadd.s32 %v6083_v45, %v6958_v8  ;;  %v7037_v45 = vand.u32 7, %v1456_v12  ;;  %v1551_v54 = vadd.s32 %v6216_v58, %v6946_v9 }
 0x444   :  { %2007 = vmatpush.msrb.mxu2 %v6980_v33  ;;  %2036 = vmatpush.msrb.mxu3 %v6984_v28  ;;  %10829 = vst [vmem:[#allocation100_spill] sm:$0xff] %v6994_v4  ;;  %v6999_v33 = vsub.s32 %v6902_v37, %v1429_v34  ;;  %v1305_v28 = vld [vmem:[#allocation2 + $0x308] sm:$0xff]  ;;  %v7014_v37 = vsub.s32 %v6911_v57, %v1427_v27  ;;  %v7016_v34 = vshra.s32 %v1382_v52, 6  ;;  %v1304_v57 = vld [vmem:[#allocation2 + $0x300] sm:$0xff]  ;;  %v7032_v52 = vld [vmem:[#allocation2 + $0x398] sm:$0xff] }
 0x445   :  { %1981 = vmatpush.msrb.mxu1 %v1307_v2  ;;  %2386 = vmatpush.msrb.mxu0 %v1307_v2  ;;  %10828 = vst [vmem:[#allocation99_spill] sm:$0xff] %v6992_v29  ;;  %v7006_v2 = vshra.s32 %v1456_v12, 3  ;;  %vm10379_vm10 = vcmp.eq.s32.totalorder %v6101_v11, %v6992_v29  ;;  %v7044_v27 = vld [vmem:[#allocation2 + $0x418] sm:$0xff] }
 0x446   :  { %2008 = vmatpush.msrb.mxu2 %v6990_v18  ;;  %10830 = vst [vmem:[#allocation101_spill] sm:$0xff] %v7002_v53  ;;  %2037 = vmatpush.msrb.mxu3 %v7002_v53  ;;  %v7018_v18 = vshra.s32 %v1454_v13, 3  ;;  %v7025_v53 = vand.u32 7, %v1455_v60  ;;  %v7041_v60 = vadd.s32 %v6091_v46, %v6999_v33  ;;  %v7057_v12 = vadd.s32 %v6091_v46, %v7014_v37  ;;  %vm7071_vm7 = vmand %vm10379_vm10, %vm1578_vm6 }
 0x447   :  { %1982 = vmatpush.msrb.mxu1 %v1306_v41  ;;  %10831 = vst [vmem:[#allocation102_spill] sm:$0xff] %v7004_v23  ;;  %2387 = vmatpush.msrb.mxu0 %v1306_v41  ;;  %v7029_v41 = vadd.s32 %v6091_v46, %v6987_v50  ;;  %vm1579_vm14 = vcmp.eq.s32.totalorder %v7006_v2, %v1543_v6  ;;  %v10849_v46 = vmov 0  ;;  %v5101_v6 = vld [vmem:[#allocation2 + $0xf0] sm:$0xff] }
 0x448   :  { %10832 = vst [vmem:[#allocation103_spill] sm:$0xff] %v7006_v2  ;;  %2009 = vmatpush.msrb.mxu2 %v7011_v14  ;;  %2038 = vmatpush.msrb.mxu3 %v7023_v38  ;;  %vm1577_vm0 = vcmp.eq.s32.totalorder %v7018_v18, %v1541_v56  ;;  %v7059_v38 = vld [vmem:[#allocation2 + $0x78] sm:$0xff]  ;;  %v7062_v14 = vld [vmem:[#allocation2 + $0x390] sm:$0xff]  ;;  %vm7084_vm2 = vmand %vm10375_vm9, %vm1579_vm14  ;;  %vm10391_vm6 = vcmp.eq.s32.totalorder %v7037_v45, %v7041_v60 }
 0x449   :  { %10834 = vst [vmem:[#allocation105_spill] sm:$0xff] %v7016_v34  ;;  %1983 = vmatpush.msrb.mxu1 %v1305_v28  ;;  %2388 = vmatpush.msrb.mxu0 %v1305_v28  ;;  %v7050_v28 = vand.u32 7, %v1454_v13  ;;  %v10846_v13 = vmov 0  ;;  %vm10387_vm15 = vcmp.eq.s32.totalorder %v7025_v53, %v7029_v41  ;;  %v10850_v46 = vsel %vm7084_vm2, 4294967295, %v10849_v46  ;;  %v7242_v56 = vld [vmem:[#allocation2 + $0x168] sm:$0xff] }
 0x44a   :  { %10835 = vst [vmem:[#allocation106_spill] sm:$0xff] %v7018_v18  ;;  %2010 = vmatpush.msrb.mxu2 %v7032_v52  ;;  %2039 = vmatpush.msrb.mxu3 %v7044_v27  ;;  %v10847_v13 = vsel %vm7071_vm7, 4294967295, %v10846_v13  ;;  %vm10855_vm14 = vcmp.eq.s32.totalorder %v6101_v11, %v7016_v34  ;;  %vm7121_vm10 = vmand %vm7071_vm7, %vm10387_vm15  ;;  %vm10865_vm15 = vcmp.eq.s32.totalorder %v6101_v11, %v7016_v34 }
 0x44b   :  { %10837 = vst [vmem:[#allocation108_spill] sm:$0xff] %v7029_v41  ;;  %1984 = vmatpush.msrb.mxu1 %v1304_v57  ;;  %2389 = vmatpush.msrb.mxu0 %v1304_v57  ;;  %v7064_v57 = vld [vmem:[#allocation2 + $0x410] sm:$0xff]  ;;  %vm7108_vm9 = vmand %vm10855_vm14, %vm1577_vm0  ;;  %vm2507_vm0 = vcmp.eq.s32.totalorder %v7018_v18, %v2471_v36  ;;  %v7167_v36 = vld [vmem:[#allocation2 + $0x60] sm:$0xff] }
 0x44c   :  { %10838 = vst [vmem:[#allocation109_spill] sm:$0xff] %v7032_v52  ;;  %v5099_v52 = vld [vmem:[#allocation2 + $0xf8] sm:$0xff]  ;;  %2011 = vmatpush.msrb.mxu2 %v7062_v14  ;;  %2040 = vmatpush.msrb.mxu3 %v7064_v57  ;;  %vm7139_vm14 = vmand %vm7084_vm2, %vm10391_vm6  ;;  %v7217_v41 = vld [vmem:[#allocation2 + $0x170] sm:$0xff] }
 0x44d   :  { %10839 = vst [vmem:[#allocation110_spill] sm:$0xff] %v7041_v60  ;;  %2200 = vmatpush.msra.mxu1 %v7059_v38  ;;  %2674 = vmatpush.msra.mxu0 %v5099_v52  ;;  %v1552_v60 = vadd.s32 %v6216_v58, %v6958_v8  ;;  %vm7160_vm2 = vmand %vm10865_vm15, %vm2507_vm0  ;;  %vm10877_vm0 = vcmp.eq.s32.totalorder %v6994_v4, %v1551_v54  ;;  %v5109_v54 = vld [vmem:[#allocation2 + $0xd8] sm:$0xff] }
 0x44e   :  { %10840 = vst [vmem:[#allocation111_spill] sm:$0xff] %v7044_v27  ;;  %v7094_v27 = vadd.s32 %v6079_v3, %v7014_v37 }
 0x44f   :  { %10841 = vst [vmem:[#allocation112_spill] sm:$0xff] %v7050_v28  ;;  %2675 = vmatpush.msra.mxu0 %v5101_v6 }
 0x450   :  { %10842 = vst [vmem:[#allocation113_spill] sm:$0xff] %v7057_v12  ;;  %vm10399_vm6 = vcmp.eq.s32.totalorder %v7050_v28, %v7094_v27 }
 0x451   :  { %10843 = vst [vmem:[#allocation114_spill] sm:$0xff] %v7059_v38  ;;  %v7101_v38 = vld [vmem:[#allocation2 + $0x408] sm:$0xff]  ;;  %2676 = vmatpush.msra.mxu0 %v5103_v24  ;;  %vm7175_vm7 = vmand %vm7160_vm2, %vm10399_vm6  ;;  %vm10878_vm6 = vcmp.eq.s32.totalorder %v6198_v10, %v6992_v29 }
 0x452   :  { %10844 = vst [vmem:[#allocation115_spill] sm:$0xff] %v7062_v14  ;;  %v7099_v14 = vld [vmem:[#allocation2 + $0x388] sm:$0xff]  ;;  %2041 = vmatpush.msrb.mxu3 %v7101_v38 }
 0x453   :  { %10845 = vst [vmem:[#allocation116_spill] sm:$0xff] %v7064_v57  ;;  %v7096_v57 = vld [vmem:[#allocation2 + $0x70] sm:$0xff]  ;;  %2012 = vmatpush.msrb.mxu2 %v7099_v14 }
 0x454   :  { %10848 = vst [vmem:[#allocation117_spill] sm:$0xff] %v10847_v13  ;;  %2201 = vmatpush.msra.mxu1 %v7096_v57  ;;  %v7147_v13 = vadd.s32 %v6219_v63, %v6987_v50 }
 0x455   :  { %10851 = vst [vmem:[#allocation118_spill] sm:$0xff] %v10850_v46  ;;  %v10866_v46 = vmov 0 }
 0x456   :  { %10852 = vst [vmem:[#allocation119_spill] sm:$0xff] %v7096_v57  ;;  %v7127_v57 = vld [vmem:[#allocation2 + $0x68] sm:$0xff]  ;;  %v10867_v46 = vsel %vm7160_vm2, 4294967295, %v10866_v46 }
 0x457   :  { %10853 = vst [vmem:[#allocation120_spill] sm:$0xff] %v7099_v14  ;;  %2202 = vmatpush.msra.mxu1 %v7127_v57  ;;  %v7130_v14 = vld [vmem:[#allocation2 + $0x380] sm:$0xff] }
 0x458   :  { %10854 = vst [vmem:[#allocation121_spill] sm:$0xff] %v7101_v38  ;;  %v7132_v38 = vld [vmem:[#allocation2 + $0x400] sm:$0xff]  ;;  %2013 = vmatpush.msrb.mxu2 %v7130_v14 }
 0x459   :  { %10860 = vst [vmem:[#allocation122_spill] sm:$0xff] %v7130_v14  ;;  %2042 = vmatpush.msrb.mxu3 %v7132_v38  ;;  %4640 = vmatmul.msk.f32.vlgmr.msrb.gmra.mxu2 %vm7121_vm10, %v10668_v44  ;;  %v7179_v14 = vld [vmem:[#allocation2 + $0x178] sm:$0xff]  ;;  %vm10874_vm10 = vcmp.eq.s32.totalorder %v7050_v28, %v7057_v12  ;;  %v7222_v12 = vadd.s32 %v6219_v63, %v7014_v37 }
 0x45a   :  { %10861 = vst [vmem:[#allocation123_spill] sm:$0xff] %v7132_v38  ;;  %2203 = vmatpush.msra.mxu1 %v7167_v36  ;;  %v10870_v38 = vmov 0  ;;  %2229 = vmatpush.msra.mxu2 %v5099_v52  ;;  %vm7187_vm15 = vmand %vm7108_vm9, %vm10874_vm10  ;;  %v10879_v52 = vmov 0  ;;  %vm10402_vm10 = vcmp.eq.s32.totalorder %v7025_v53, %v7147_v13 }
 0x45b   :  { %10864 = vst [vmem:[#allocation124_spill] sm:$0xff] %v7147_v13  ;;  %v10871_v38 = vsel %vm7175_vm7, 4294967295, %v10870_v38  ;;  %2258 = vmatpush.msra.mxu3 %v7179_v14  ;;  %vm7201_vm7 = vmand %vm10878_vm6, %vm10877_vm0  ;;  %4636 = vmatmul.msk.f32.vlgmr.msrb.gmra.mxu1 %vm7187_vm15, %v10668_v44  ;;  %vm10888_vm15 = vcmp.eq.s32.totalorder %v7006_v2, %v1552_v60  ;;  %v1560_v13 = vadd.s32 %v6227_v1, %v6946_v9  ;;  %v7261_v60 = vld [vmem:[#allocation2 + $0x160] sm:$0xff] }
 0x45c   :  { %10868 = vst [vmem:[#allocation125_spill] sm:$0xff] %v10867_v46  ;;  %v1550_v46 = vadd.s32 %v6216_v58, %v6970_v51  ;;  %4644 = vmatmul.msk.f32.vlgmr.msrb.gmra.mxu3 %vm7139_vm14, %v10668_v44  ;;  %v10880_v52 = vsel %vm7201_vm7, 4294967295, %v10879_v52  ;;  %v7209_v58 = vadd.s32 %v6219_v63, %v6999_v33  ;;  %2230 = vmatpush.msra.mxu2 %v5101_v6  ;;  %vm7232_vm0 = vmand %vm7201_vm7, %vm10402_vm10  ;;  %v7239_v63 = vld [vmem:[#allocation2 + $0x50] sm:$0xff] }
 0x45d   :  { %10869 = vst [vmem:[#allocation126_spill] sm:$0xff] %v7167_v36  ;;  %v5106_v36 = vld [vmem:[#allocation2 + $0xe0] sm:$0xff]  ;;  %2259 = vmatpush.msra.mxu3 %v7217_v41  ;;  %vm10889_vm10 = vcmp.eq.s32.totalorder %v6198_v10, %v7004_v23  ;;  %vm10415_vm14 = vcmp.eq.s32.totalorder %v7050_v28, %v7222_v12  ;;  %v1559_v6 = vadd.s32 %v6227_v1, %v6970_v51 }
 0x45e   :  { %10872 = vst [vmem:[#allocation127_spill] sm:$0xff] %v10871_v38  ;;  %2677 = vmatpush.msra.mxu0 %v5106_v36  ;;  %v7211_v38 = vld [vmem:[#allocation2 + $0x58] sm:$0xff]  ;;  %2231 = vmatpush.msra.mxu2 %v5103_v24  ;;  %vm1586_vm6 = vcmp.eq.s32.totalorder %v7018_v18, %v1550_v46  ;;  %vm7250_vm2 = vmand %vm10889_vm10, %vm10888_vm15  ;;  %v10890_v24 = vmov 0  ;;  %vm10894_vm10 = vcmp.eq.s32.totalorder %v6198_v10, %v7016_v34 }
 0x45f   :  { %10873 = vst [vmem:[#allocation128_spill] sm:$0xff] %v7179_v14  ;;  %2204 = vmatpush.msra.mxu1 %v7211_v38  ;;  %2260 = vmatpush.msra.mxu3 %v7242_v56  ;;  %v10891_v24 = vsel %vm7250_vm2, 4294967295, %v10890_v24  ;;  %vm7269_vm15 = vmand %vm10894_vm10, %vm1586_vm6  ;;  %v5115_v14 = vld [vmem:[#allocation2 + $0xc8] sm:$0xff]  ;;  %vm10897_vm7 = vcmp.eq.s32.totalorder %v7037_v45, %v7209_v58  ;;  %v7287_v46 = vadd.s32 %v6230_v47, %v6987_v50 }
 0x460   :  { %10881 = vst [vmem:[#allocation129_spill] sm:$0xff] %v10880_v52  ;;  %2678 = vmatpush.msra.mxu0 %v5109_v54  ;;  %v5112_v52 = vld [vmem:[#allocation2 + $0xd0] sm:$0xff]  ;;  %2232 = vmatpush.msra.mxu2 %v5106_v36  ;;  %v1561_v36 = vadd.s32 %v6227_v1, %v6958_v8  ;;  %vm1740_vm6 = vmand %vm7250_vm2, %vm10897_vm7  ;;  %vm10905_vm2 = vcmp.eq.s32.totalorder %v6252_v25, %v6992_v29 }
 0x461   :  { %10882 = vst [vmem:[#allocation130_spill] sm:$0xff] %v7209_v58  ;;  %2205 = vmatpush.msra.mxu1 %v7239_v63  ;;  %2261 = vmatpush.msra.mxu3 %v7261_v60  ;;  %v7297_v58 = vld [vmem:[#allocation2 + $0x158] sm:$0xff]  ;;  %vm1738_vm7 = vmand %vm7269_vm15, %vm10415_vm14  ;;  %v7316_v1 = vld [vmem:[#allocation2 + $0x150] sm:$0xff]  ;;  %vm10904_vm14 = vcmp.eq.s32.totalorder %v6994_v4, %v1560_v13  ;;  %v1569_v13 = vadd.s32 %v6380_v5, %v6946_v9 }
 0x462   :  { %10883 = vst [vmem:[#allocation131_spill] sm:$0xff] %v7217_v41  ;;  %2679 = vmatpush.msra.mxu0 %v5112_v52  ;;  %v7258_v41 = vld [vmem:[#allocation2 + $0x48] sm:$0xff]  ;;  %4641 = vmatmul.msk.f32.gmra.mxu2 %vm7232_vm0, %v10668_v44  ;;  %v5124_v9 = vld [vmem:[#allocation2 + $0xb0] sm:$0xff]  ;;  %vm10916_vm10 = vcmp.eq.s32.totalorder %v7025_v53, %v7287_v46 }
 0x463   :  { %10884 = vst [vmem:[#allocation132_spill] sm:$0xff] %v7222_v12  ;;  %2206 = vmatpush.msra.mxu1 %v7258_v41  ;;  %2233 = vmatpush.msra.mxu2 %v5109_v54  ;;  %v7307_v54 = vadd.s32 %v6230_v47, %v6999_v33  ;;  %v10906_v12 = vmov 0  ;;  %vm1605_vm4 = vcmp.eq.s32.totalorder %v6994_v4, %v1569_v13  ;;  %v7431_v4 = vld [vmem:[#allocation2 + $0x130] sm:$0xff] }
 0x464   :  { %10887 = vst [vmem:[#allocation133_spill] sm:$0xff] %v7242_v56  ;;  %2680 = vmatpush.msra.mxu0 %v5115_v14  ;;  %2262 = vmatpush.msra.mxu3 %v7297_v58  ;;  %v5136_v13 = vld [vmem:[#allocation2 + $0x90] sm:$0xff]  ;;  %v7564_v56 = vld [vmem:[#allocation2 + $0x100] sm:$0xff] }
 0x465   :  { %10892 = vst [vmem:[#allocation134_spill] sm:$0xff] %v10891_v24  ;;  %v5118_v24 = vld [vmem:[#allocation2 + $0xc0] sm:$0xff]  ;;  %4645 = vmatmul.msk.f32.gmra.mxu3 %vm1740_vm6, %v10668_v44  ;;  %2234 = vmatpush.msra.mxu2 %v5112_v52  ;;  %vm7324_vm6 = vmand %vm10905_vm2, %vm10904_vm14  ;;  %v5121_v52 = vld [vmem:[#allocation2 + $0xb8] sm:$0xff]  ;;  %vm10910_vm2 = vcmp.eq.s32.totalorder %v7006_v2, %v1561_v36  ;;  %vm10911_vm14 = vcmp.eq.s32.totalorder %v6252_v25, %v7004_v23 }
 0x466   :  { %10893 = vst [vmem:[#allocation135_spill] sm:$0xff] %v7261_v60  ;;  %v7289_v60 = vld [vmem:[#allocation2 + $0x40] sm:$0xff]  ;;  %2681 = vmatpush.msra.mxu0 %v5118_v24  ;;  %2263 = vmatpush.msra.mxu3 %v7316_v1  ;;  %v10907_v12 = vsel %vm7324_vm6, 4294967295, %v10906_v12  ;;  %vm7348_vm12 = vmand %vm10911_vm14, %vm10910_vm2  ;;  %vm10917_vm2 = vcmp.eq.s32.totalorder %v7018_v18, %v1559_v6  ;;  %vm10918_vm14 = vcmp.eq.s32.totalorder %v6252_v25, %v7016_v34 }
 0x467   :  { %10898 = vst [vmem:[#allocation136_spill] sm:$0xff] %v7287_v46  ;;  %2207 = vmatpush.msra.mxu1 %v7289_v60  ;;  %2235 = vmatpush.msra.mxu2 %v5115_v14  ;;  %vm1748_vm0 = vmand %vm7324_vm6, %vm10916_vm10  ;;  %v7362_v14 = vld [vmem:[#allocation2 + $0x28] sm:$0xff]  ;;  %v7378_v46 = vadd.s32 %v6383_v21, %v6987_v50  ;;  %vm10923_vm10 = vcmp.eq.s32.totalorder %v7037_v45, %v7307_v54  ;;  %v7648_v36 = vld [vmem:[#allocation2 + $0x1c0] sm:$0xff] }
 0x468   :  { %10899 = vst [vmem:[#allocation137_spill] sm:$0xff] %v7289_v60  ;;  %v7310_v60 = vld [vmem:[#allocation2 + $0x38] sm:$0xff]  ;;  %2682 = vmatpush.msra.mxu0 %v5121_v52  ;;  %4637 = vmatmul.msk.f32.gmra.mxu1 %vm1738_vm7, %v10668_v44  ;;  %vm7370_vm7 = vmand %vm10918_vm14, %vm10917_vm2  ;;  %v1570_v6 = vadd.s32 %v6380_v5, %v6958_v8 }
 0x469   :  { %10900 = vst [vmem:[#allocation138_spill] sm:$0xff] %v7297_v58  ;;  %2208 = vmatpush.msra.mxu1 %v7310_v60  ;;  %v7332_v58 = vadd.s32 %v6230_v47, %v7014_v37  ;;  %v10912_v47 = vmov 0  ;;  %2236 = vmatpush.msra.mxu2 %v5118_v24  ;;  %v5127_v24 = vld [vmem:[#allocation2 + $0xa8] sm:$0xff]  ;;  %vm1749_vm2 = vmand %vm7348_vm12, %vm10923_vm10  ;;  %v7423_v8 = vld [vmem:[#allocation2 + $0x18] sm:$0xff] }
 0x46a   :  { %10901 = vst [vmem:[#allocation139_spill] sm:$0xff] %v7307_v54  ;;  %v10913_v47 = vsel %vm7348_vm12, 4294967295, %v10912_v47  ;;  %2683 = vmatpush.msra.mxu0 %v5124_v9  ;;  %4642 = vmatmul.msk.f32.gmra.mxu2 %vm1748_vm0, %v10668_v44  ;;  %v5130_v54 = vld [vmem:[#allocation2 + $0xa0] sm:$0xff]  ;;  %vm10928_vm0 = vcmp.eq.s32.totalorder %v6334_v22, %v6992_v29  ;;  %vm10441_vm12 = vcmp.eq.s32.totalorder %v7025_v53, %v7378_v46 }
 0x46b   :  { %10902 = vst [vmem:[#allocation140_spill] sm:$0xff] %v7310_v60  ;;  %v7354_v60 = vld [vmem:[#allocation2 + $0x148] sm:$0xff]  ;;  %2237 = vmatpush.msra.mxu2 %v5121_v52  ;;  %vm10925_vm10 = vcmp.eq.s32.totalorder %v7050_v28, %v7332_v58  ;;  %vm7413_vm6 = vmand %vm10928_vm0, %vm1605_vm4  ;;  %v10929_v52 = vmov 0  ;;  %vm1606_vm4 = vcmp.eq.s32.totalorder %v7006_v2, %v1570_v6  ;;  %v1568_v29 = vadd.s32 %v6380_v5, %v6970_v51  ;;  %v7480_v51 = vld [vmem:[#allocation2 + $0x120] sm:$0xff] }
 0x46c   :  { %10903 = vst [vmem:[#allocation141_spill] sm:$0xff] %v7316_v1  ;;  %v7340_v1 = vld [vmem:[#allocation2 + $0x30] sm:$0xff]  ;;  %2264 = vmatpush.msra.mxu3 %v7354_v60  ;;  %2684 = vmatpush.msra.mxu0 %v5127_v24  ;;  %vm7405_vm14 = vmand %vm7370_vm7, %vm10925_vm10  ;;  %v10930_v52 = vsel %vm7413_vm6, 4294967295, %v10929_v52  ;;  %vm10934_vm10 = vcmp.eq.s32.totalorder %v7050_v28, %v7094_v27  ;;  %v7472_v6 = vadd.s32 %v6383_v21, %v7014_v37  ;;  %v5144_v2 = vld [vmem:[#allocation2 + $0x2f8] sm:$0xff] }
 0x46d   :  { %10908 = vst [vmem:[#allocation142_spill] sm:$0xff] %v10907_v12  ;;  %2209 = vmatpush.msra.mxu1 %v7340_v1  ;;  %v7380_v12 = vld [vmem:[#allocation2 + $0x140] sm:$0xff]  ;;  %4646 = vmatmul.msk.f32.gmra.mxu3 %vm1749_vm2, %v10668_v44  ;;  %vm7439_vm0 = vmand %vm7108_vm9, %vm10934_vm10  ;;  %v7455_v27 = vld [vmem:[#allocation2 + $0x10] sm:$0xff]  ;;  %vm10940_vm9 = vcmp.eq.s32.totalorder %v6334_v22, %v7004_v23 }
 0x46e   :  { %10909 = vst [vmem:[#allocation143_spill] sm:$0xff] %v7332_v58  ;;  %2265 = vmatpush.msra.mxu3 %v7380_v12  ;;  %2685 = vmatpush.msra.mxu0 %v5130_v54  ;;  %v7421_v58 = vadd.s32 %v6383_v21, %v6999_v33  ;;  %vm7451_vm2 = vmand %vm7413_vm6, %vm10441_vm12  ;;  %vm10526_vm12 = vcmp.eq.s32.totalorder %v6334_v22, %v7016_v34  ;;  %v7517_v23 = vld [vmem:[#allocation2 + $0x1f8] sm:$0xff]  ;;  %v7541_v21 = vld [vmem:[#allocation2 + $0x1f0] sm:$0xff] }
 0x46f   :  { %10914 = vst [vmem:[#allocation144_spill] sm:$0xff] %v10913_v47  ;;  %2210 = vmatpush.msra.mxu1 %v7362_v14  ;;  %2238 = vmatpush.msra.mxu2 %v5124_v9  ;;  %v5133_v47 = vld [vmem:[#allocation2 + $0x98] sm:$0xff]  ;;  %vm1604_vm6 = vcmp.eq.s32.totalorder %v7018_v18, %v1568_v29  ;;  %v7500_v29 = vadd.s32 %v6202_v61, %v7014_v37  ;;  %v7502_v9 = vld [vmem:[#allocation2] sm:$0xff] }
 0x470   :  { %10915 = vst [vmem:[#allocation145_spill] sm:$0xff] %v7354_v60  ;;  %v7394_v60 = vld [vmem:[#allocation2 + $0x20] sm:$0xff]  ;;  %2686 = vmatpush.msra.mxu0 %v5133_v47  ;;  %4638 = vmatmul.msk.f32.gmra.mxu1 %vm7405_vm14, %v10668_v44  ;;  %vm7464_vm14 = vmand %vm10940_vm9, %vm1606_vm4  ;;  %vm10502_vm10 = vcmp.eq.s32.totalorder %v7037_v45, %v7421_v58  ;;  %v7522_v34 = vadd.s32 %v6079_v3, %v6088_v62 }
 0x471   :  { %10921 = vst [vmem:[#allocation146_spill] sm:$0xff] %v7378_v46  ;;  %2211 = vmatpush.msra.mxu1 %v7394_v60  ;;  %2239 = vmatpush.msra.mxu2 %v5127_v24  ;;  %v10941_v24 = vmov 0  ;;  %v7477_v46 = vld [vmem:[#allocation2 + $0x8] sm:$0xff]  ;;  %vm7494_vm4 = vmand %vm7464_vm14, %vm10502_vm10  ;;  %v5142_v18 = vld [vmem:[#allocation2 + $0x80] sm:$0xff]  ;;  %vm10481_vm9 = vcmp.eq.s32.totalorder %v7050_v28, %v7500_v29 }
 0x472   :  { %10922 = vst [vmem:[#allocation147_spill] sm:$0xff] %v7380_v12  ;;  %v7397_v12 = vld [vmem:[#allocation2 + $0x138] sm:$0xff]  ;;  %v10942_v24 = vsel %vm7464_vm14, 4294967295, %v10941_v24  ;;  %2687 = vmatpush.msra.mxu0 %v5136_v13  ;;  %4643 = vmatmul.msk.f32.gmra.mxu2 %vm7451_vm2, %v10668_v44  ;;  %vm7508_vm2 = vmand %vm10526_vm12, %vm1604_vm6  ;;  %v7726_v5 = vld [vmem:[#allocation2 + $0x1a0] sm:$0xff] }
 0x473   :  { %10924 = vst [vmem:[#allocation148_spill] sm:$0xff] %v7397_v12  ;;  %2266 = vmatpush.msra.mxu3 %v7397_v12  ;;  %2212 = vmatpush.msra.mxu1 %v7423_v8  ;;  %v7717_v12 = vld [vmem:[#allocation2 + $0x238] sm:$0xff] }
 0x474   :  { %10931 = vst [vmem:[#allocation149_spill] sm:$0xff] %v10930_v52  ;;  %2240 = vmatpush.msra.mxu2 %v5130_v54  ;;  %4672 = vmatmul.msk.f32.vlgmr.msrb.gmra.mxu0 %vm7439_vm0, %v10668_v44  ;;  %v5139_v54 = vld [vmem:[#allocation2 + $0x88] sm:$0xff]  ;;  %vm10457_vm0 = vcmp.eq.s32.totalorder %v7050_v28, %v7472_v6  ;;  %v7539_v52 = vadd.s32 %v6079_v3, %v6112_v7 }
 0x475   :  { %10932 = vst [vmem:[#allocation150_spill] sm:$0xff] %v7421_v58  ;;  %2267 = vmatpush.msra.mxu3 %v7431_v4  ;;  %2213 = vmatpush.msra.mxu1 %v7455_v27  ;;  %v7514_v58 = vld [vmem:[#allocation2 + $0x118] sm:$0xff]  ;;  %vm1756_vm6 = vmand %vm7508_vm2, %vm10457_vm0  ;;  %vm10496_vm0 = vcmp.eq.s32.totalorder %v6106_v0, %v7522_v34 }
 0x476   :  { %10933 = vst [vmem:[#allocation151_spill] sm:$0xff] %v7431_v4  ;;  %2688 = vmatpush.msra.mxu0 %v5139_v54  ;;  %2241 = vmatpush.msra.mxu2 %v5133_v47  ;;  %v7534_v47 = vld [vmem:[#allocation2 + $0x110] sm:$0xff]  ;;  %v7639_v4 = vld [vmem:[#allocation2 + $0x258] sm:$0xff] }
 0x477   :  { %2268 = vmatpush.msra.mxu3 %v7458_v40  ;;  %10943 = vst [vmem:[#allocation153_spill] sm:$0xff] %v10942_v24  ;;  %2214 = vmatpush.msra.mxu1 %v7477_v46  ;;  %v7555_v24 = vld [vmem:[#allocation2 + $0x1e8] sm:$0xff] }
 0x478   :  { %10944 = vst [vmem:[#allocation154_spill] sm:$0xff] %v7472_v6  ;;  %2689 = vmatpush.msra.mxu0 %v5142_v18  ;;  %4647 = vmatmul.msk.f32.gmra.mxu3 %vm7494_vm4, %v10668_v44  ;;  %v5147_v6 = vld [vmem:[#allocation2 + $0x2f0] sm:$0xff]  ;;  %vm2143_vm4 = vmand %vm7269_vm15, %vm10481_vm9  ;;  %vm10501_vm15 = vcmp.eq.s32.totalorder %v6133_v35, %v7539_v52  ;;  %v5163_v40 = vld [vmem:[#allocation2 + $0x2c8] sm:$0xff] }
 0x479   :  { %10945 = vst [vmem:[#allocation155_spill] sm:$0xff] %v7480_v51  ;;  %2269 = vmatpush.msra.mxu3 %v7480_v51  ;;  %2215 = vmatpush.msra.mxu1 %v7502_v9  ;;  %v7634_v51 = vld [vmem:[#allocation2 + $0x1c8] sm:$0xff] }
 0x47a   :  { %10948 = vst [vmem:[#allocation156_spill] sm:$0xff] %v7500_v29  ;;  %2790 = vmatpush.msrb.mxu0 %v5144_v2  ;;  %2242 = vmatpush.msra.mxu2 %v5136_v13  ;;  %v7552_v13 = vld [vmem:[#allocation2 + $0x108] sm:$0xff]  ;;  %v7573_v29 = vld [vmem:[#allocation2 + $0x1e0] sm:$0xff] }
 0x47b   :  { %10951 = vst [vmem:[#allocation157_spill] sm:$0xff] %v7514_v58  ;;  %2270 = vmatpush.msra.mxu3 %v7514_v58  ;;  %2287 = vmatpush.msrb.mxu1 %v7517_v23  ;;  %v7613_v58 = vld [vmem:[#allocation2 + $0x1d0] sm:$0xff] }
 0x47c   :  { %10952 = vst [vmem:[#allocation158_spill] sm:$0xff] %v7522_v34  ;;  %2791 = vmatpush.msrb.mxu0 %v5147_v6  ;;  %4639 = vmatmul.msk.f32.gmra.mxu1 %vm1756_vm6, %v10668_v44  ;;  %vm2129_vm6 = vmand %vm6125_vm11, %vm10496_vm0  ;;  %v7598_v34 = vld [vmem:[#allocation2 + $0x270] sm:$0xff] }
 0x47d   :  { %10953 = vst [vmem:[#allocation159_spill] sm:$0xff] %v7534_v47  ;;  %2271 = vmatpush.msra.mxu3 %v7534_v47  ;;  %2288 = vmatpush.msrb.mxu1 %v7541_v21  ;;  %v5150_v47 = vld [vmem:[#allocation2 + $0x2e8] sm:$0xff]  ;;  %vm2130_vm11 = vmand %vm6157_vm3, %vm10501_vm15 }
 0x47e   :  { %10954 = vst [vmem:[#allocation160_spill] sm:$0xff] %v7539_v52  ;;  %2243 = vmatpush.msra.mxu2 %v5139_v54  ;;  %v7560_v54 = vadd.s32 %v6079_v3, %v6181_v32  ;;  %2792 = vmatpush.msrb.mxu0 %v5150_v47  ;;  %v7611_v52 = vadd.s32 %v6202_v61, %v6112_v7 }
 0x47f   :  { %10955 = vst [vmem:[#allocation161_spill] sm:$0xff] %v7552_v13  ;;  %2272 = vmatpush.msra.mxu3 %v7552_v13  ;;  %2289 = vmatpush.msrb.mxu1 %v7555_v24  ;;  %v7581_v13 = vadd.s32 %v6208_v59, %v7014_v37 }
 0x480   :  { %10956 = vst [vmem:[#allocation162_spill] sm:$0xff] %v7560_v54  ;;  %2244 = vmatpush.msra.mxu2 %v5142_v18  ;;  %4673 = vmatmul.msk.f32.gmra.mxu0 %vm2143_vm4, %v10668_v44  ;;  %v7576_v18 = vld [vmem:[#allocation2 + $0x278] sm:$0xff]  ;;  %vm10543_vm4 = vcmp.eq.s32.totalorder %v6183_v48, %v7560_v54  ;;  %v5160_v54 = vld [vmem:[#allocation2 + $0x2d0] sm:$0xff] }
 0x481   :  { %10957 = vst [vmem:[#allocation163_spill] sm:$0xff] %v7564_v56  ;;  %2273 = vmatpush.msra.mxu3 %v7564_v56  ;;  %2290 = vmatpush.msrb.mxu1 %v7573_v29  ;;  %v5154_v56 = vld [vmem:[#allocation2 + $0x2e0] sm:$0xff]  ;;  %vm2128_vm3 = vmand %vm6190_vm8, %vm10543_vm4 }
 0x482   :  { %2316 = vmatpush.msrb.mxu2 %v7576_v18  ;;  %10958 = vst [vmem:[#allocation164_spill] sm:$0xff] %v7581_v13  ;;  %2793 = vmatpush.msrb.mxu0 %v5154_v56 }
 0x483   :  { %2345 = vmatpush.msrb.mxu3 %v5144_v2  ;;  %4652 = vmatmul.msk.f32.vlgmr.msra.gmra.mxu2 %vm2129_vm6, %v10668_v44  ;;  %v7596_v2 = vadd.s32 %v6202_v61, %v6088_v62  ;;  %vm10471_vm6 = vcmp.eq.s32.totalorder %v7050_v28, %v7581_v13  ;;  %10960 = vst [vmem:[#allocation166_spill] sm:$0xff] %v7611_v52  ;;  %v5166_v13 = vld [vmem:[#allocation2 + $0x2c0] sm:$0xff] }
 0x484   :  { %2291 = vmatpush.msrb.mxu1 %v7591_v20  ;;  %2317 = vmatpush.msrb.mxu2 %v7598_v34  ;;  %10962 = vst [vmem:[#allocation168_spill] sm:$0xff] %v7634_v51 }
 0x485   :  { %10959 = vst [vmem:[#allocation165_spill] sm:$0xff] %v7596_v2  ;;  %2346 = vmatpush.msrb.mxu3 %v5147_v6  ;;  %2794 = vmatpush.msrb.mxu0 %v5157_v26  ;;  %v7616_v6 = vld [vmem:[#allocation2 + $0x268] sm:$0xff]  ;;  %vm10482_vm8 = vcmp.eq.s32.totalorder %v6106_v0, %v7596_v2  ;;  %v7683_v2 = vadd.s32 %v6208_v59, %v6112_v7 }
 0x486   :  { %4656 = vmatmul.msk.f32.vlgmr.msra.gmra.mxu3 %vm2130_vm11, %v10668_v44  ;;  %2292 = vmatpush.msrb.mxu1 %v7613_v58  ;;  %vm2152_vm11 = vmand %vm7370_vm7, %vm10471_vm6  ;;  %10963 = vst [vmem:[#allocation169_spill] sm:$0xff] %v7648_v36 }
 0x487   :  { %2318 = vmatpush.msrb.mxu2 %v7616_v6  ;;  %2347 = vmatpush.msrb.mxu3 %v5150_v47  ;;  %v7632_v47 = vadd.s32 %v6202_v61, %v6181_v32  ;;  %vm2138_vm7 = vmand %vm6265_vm13, %vm10482_vm8  ;;  %10968 = vst [vmem:[#allocation173_spill] sm:$0xff] %v7683_v2  ;;  %vm10978_vm8 = vnez %v10665_v42  ;;  %v5187_v42 = vld [vmem:[#allocation2 + $0x288] sm:$0xff] }
 0x488   :  { %2795 = vmatpush.msrb.mxu0 %v5160_v54  ;;  %4648 = vmatmul.msk.f32.vlgmr.msra.gmra.mxu1 %vm2128_vm3, %v10668_v44  ;;  %vm10494_vm3 = vcmp.eq.s32.totalorder %v6133_v35, %v7611_v52  ;;  %v7685_v52 = vpop.f32.mrf.mxu1  ;;  %10974 = vst [vmem:[#allocation179_spill] sm:$0xff] %v7717_v12 }
 0x489   :  { %2319 = vmatpush.msrb.mxu2 %v7622_v17  ;;  %10961 = vst [vmem:[#allocation167_spill] sm:$0xff] %v7632_v47  ;;  %2293 = vmatpush.msrb.mxu1 %v7634_v51  ;;  %vm2139_vm6 = vmand %vm6289_vm1, %vm10494_vm3  ;;  %vm10542_vm13 = vcmp.eq.s32.totalorder %v6183_v48, %v7632_v47  ;;  %vm10967_vm1 = vnez %v10660_v15  ;;  %v5172_v15 = vld [vmem:[#allocation2 + $0x2b0] sm:$0xff]  ;;  %v7697_v47 = vadd.s32 %v6208_v59, %v6181_v32  ;;  %v5175_v51 = vld [vmem:[#allocation2 + $0x2a8] sm:$0xff] }
 0x48a   :  { %2348 = vmatpush.msrb.mxu3 %v5154_v56  ;;  %2796 = vmatpush.msrb.mxu0 %v5163_v40  ;;  %v7653_v56 = vadd.s32 %v6357_v16, %v7014_v37  ;;  %v7668_v37 = vadd.s32 %v6208_v59, %v6088_v62  ;;  %10969 = vst [vmem:[#allocation174_spill] sm:$0xff] %v7685_v52  ;;  %v7700_v52 = vld [vmem:[#allocation2 + $0x240] sm:$0xff] }
 0x48b   :  { %2320 = vmatpush.msrb.mxu2 %v7639_v4  ;;  %4674 = vmatmul.msk.f32.gmra.mxu0 %vm2152_vm11, %v10668_v44  ;;  %vm2137_vm11 = vmand %vm10967_vm1, %vm10542_vm13  ;;  %10971 = vst [vmem:[#allocation176_spill] sm:$0xff] %v7697_v47  ;;  %vm10541_vm9 = vcmp.eq.s32.totalorder %v6183_v48, %v7697_v47  ;;  %v5184_v47 = vld [vmem:[#allocation2 + $0x290] sm:$0xff] }
 0x48c   :  { %2294 = vmatpush.msrb.mxu1 %v7648_v36  ;;  %10964 = vst [vmem:[#allocation170_spill] sm:$0xff] %v7653_v56  ;;  %2349 = vmatpush.msrb.mxu3 %v5157_v26  ;;  %v7670_v26 = vld [vmem:[#allocation2 + $0x250] sm:$0xff]  ;;  %v7715_v36 = vpop.f32.mrf.mxu2 }
 0x48d   :  { %2797 = vmatpush.msrb.mxu0 %v5166_v13  ;;  %4653 = vmatmul.msk.f32.gmra.mxu2 %vm2138_vm7, %v10668_v44  ;;  %10966 = vst [vmem:[#allocation172_spill] sm:$0xff] %v7668_v37  ;;  %vm10480_vm7 = vcmp.eq.s32.totalorder %v7050_v28, %v7653_v56  ;;  %v10987_v56 = vmov 0  ;;  %v7788_v28 = vld [vmem:[#allocation2 + $0x220] sm:$0xff] }
 0x48e   :  { %2295 = vmatpush.msrb.mxu1 %v7663_v43  ;;  %2321 = vmatpush.msrb.mxu2 %v7670_v26  ;;  %v7690_v43 = vld [vmem:[#allocation2 + $0x248] sm:$0xff]  ;;  %vm2161_vm1 = vmand %vm7508_vm2, %vm10480_vm7  ;;  %10973 = vst [vmem:[#allocation178_spill] sm:$0xff] %v7715_v36  ;;  %vm10975_vm2 = vnez %v10662_v31  ;;  %v5178_v36 = vld [vmem:[#allocation2 + $0x2a0] sm:$0xff] }
 0x48f   :  { %2350 = vmatpush.msrb.mxu3 %v5160_v54  ;;  %2798 = vmatpush.msrb.mxu0 %v5169_v30  ;;  %v7687_v54 = vld [vmem:[#allocation2 + $0x1b0] sm:$0xff]  ;;  %10976 = vst [vmem:[#allocation180_spill] sm:$0xff] %v7726_v5  ;;  %v7740_v31 = vld [vmem:[#allocation2 + $0x198] sm:$0xff] }
 0x490   :  { %4657 = vmatmul.msk.f32.gmra.mxu3 %vm2139_vm6, %v10668_v44  ;;  %10970 = vst [vmem:[#allocation175_spill] sm:$0xff] %v7687_v54  ;;  %2296 = vmatpush.msrb.mxu1 %v7687_v54  ;;  %vm10483_vm6 = vcmp.eq.s32.totalorder %v6106_v0, %v7668_v37  ;;  %v7710_v54 = vld [vmem:[#allocation2 + $0x1a8] sm:$0xff]  ;;  %v7769_v37 = vld [vmem:[#allocation2 + $0x190] sm:$0xff] }
 0x491   :  { %2322 = vmatpush.msrb.mxu2 %v7690_v43  ;;  %2351 = vmatpush.msrb.mxu3 %v5163_v40  ;;  %v2466_v40 = vadd.s32 %v6076_v49, %v6074_v39  ;;  %10972 = vst [vmem:[#allocation177_spill] sm:$0xff] %v7710_v54  ;;  %vm2147_vm7 = vmand %vm10975_vm2, %vm10483_vm6 }
 0x492   :  { %2799 = vmatpush.msrb.mxu0 %v5172_v15  ;;  %4649 = vmatmul.msk.f32.gmra.mxu1 %vm2137_vm11, %v10668_v44  ;;  %vm10484_vm11 = vcmp.eq.s32.totalorder %v6133_v35, %v7683_v2  ;;  %10979 = vst [vmem:[#allocation182_spill] sm:$0xff] %v7740_v31  ;;  %v7777_v2 = vadd.s32 %v6357_v16, %v6112_v7  ;;  %v10996_v7 = vld [vmem:[#allocation12_spill] sm:$0xff] }
 0x493   :  { %2323 = vmatpush.msrb.mxu2 %v7700_v52  ;;  %2297 = vmatpush.msrb.mxu1 %v7710_v54  ;;  %vm2148_vm2 = vmand %vm10978_vm8, %vm10484_vm11  ;;  %vm10982_vm8 = vnez %v10671_v55  ;;  %10991 = vst [vmem:[#allocation186_spill] sm:$0xff] %v7769_v37  ;;  %v7772_v55 = vld [vmem:[#allocation2 + $0x228] sm:$0xff] }
 0x494   :  { %2352 = vmatpush.msrb.mxu3 %v5166_v13  ;;  %2800 = vmatpush.msrb.mxu0 %v5175_v51  ;;  %v7731_v13 = vpop.f32.mrf.mxu3  ;;  %vm7755_vm6 = vmand %vm10982_vm8, %vm10541_vm9  ;;  %10992 = vst [vmem:[#allocation187_spill] sm:$0xff] %v7772_v55 }
 0x495   :  { %2324 = vmatpush.msrb.mxu2 %v7717_v12  ;;  %4675 = vmatmul.msk.f32.gmra.mxu0 %vm2161_vm1, %v10668_v44  ;;  %10977 = vst [vmem:[#allocation181_spill] sm:$0xff] %v7731_v13  ;;  %vm2502_vm1 = vcmp.eq.s32.totalorder %v6098_v19, %v2466_v40  ;;  %v7745_v13 = vadd.s32 %v6357_v16, %v6088_v62  ;;  %v5181_v40 = vld [vmem:[#allocation2 + $0x298] sm:$0xff]  ;;  %v10985_v62 = vld [vmem:[#allocation11_spill] sm:$0xff] }
 0x496   :  { %2298 = vmatpush.msrb.mxu1 %v7726_v5  ;;  %2353 = vmatpush.msrb.mxu3 %v5169_v30  ;;  %v7747_v30 = vld [vmem:[#allocation2 + $0x230] sm:$0xff]  ;;  %10993 = vst [vmem:[#allocation188_spill] sm:$0xff] %v7777_v2  ;;  %v7803_v5 = vld [vmem:[#allocation2 + $0x218] sm:$0xff]  ;;  %vm11015_vm15 = vcmp.eq.s32.totalorder %v6198_v10, %v10985_v62 }
 0x497   :  { %2801 = vmatpush.msrb.mxu0 %v5178_v36  ;;  %4654 = vmatmul.msk.f32.gmra.mxu2 %vm2147_vm7, %v10668_v44  ;;  %10980 = vst [vmem:[#allocation183_spill] sm:$0xff] %v7745_v13  ;;  %vm10986_vm7 = vcmp.eq.s32.totalorder %v6101_v11, %v10985_v62  ;;  %v11036_v12 = vld [vmem:[#allocation81_spill] sm:$0xff] }
 0x498   :  { %2299 = vmatpush.msrb.mxu1 %v7740_v31  ;;  %10981 = vst [vmem:[#allocation184_spill] sm:$0xff] %v7747_v30  ;;  %2325 = vmatpush.msrb.mxu2 %v7747_v30  ;;  %vm7763_vm11 = vmand %vm10986_vm7, %vm2502_vm1  ;;  %vm10997_vm1 = vcmp.eq.s32.totalorder %v6106_v0, %v10996_v7  ;;  %v7798_v31 = vld [vmem:[#allocation2 + $0x188] sm:$0xff]  ;;  %v11002_v7 = vld [vmem:[#allocation33_spill] sm:$0xff] }
 0x499   :  { %2354 = vmatpush.msrb.mxu3 %v5172_v15  ;;  %2802 = vmatpush.msrb.mxu0 %v5181_v40  ;;  %v10988_v56 = vsel %vm7763_vm11, 4294967295, %v10987_v56  ;;  %v7767_v15 = vpop.f32.mrf.mxu1  ;;  %10995 = vst [vmem:[#allocation190_spill] sm:$0xff] %v7788_v28  ;;  %vm2574_vm8 = vmand %vm7763_vm11, %vm10997_vm1  ;;  %vm10525_vm1 = vcmp.eq.s32.totalorder %v6133_v35, %v7777_v2  ;;  %v11019_v2 = vld [vmem:[#allocation47_spill] sm:$0xff]  ;;  %v11035_v30 = vld [vmem:[#allocation76_spill] sm:$0xff] }
 0x49a   :  { %4658 = vmatmul.msk.f32.gmra.mxu3 %vm2148_vm2, %v10668_v44  ;;  %10989 = vst [vmem:[#allocation11_spill] sm:$0xff] %v10988_v56  ;;  %2300 = vmatpush.msrb.mxu1 %v7769_v37  ;;  %vm10500_vm2 = vcmp.eq.s32.totalorder %v6106_v0, %v7745_v13  ;;  %v5190_v56 = vld [vmem:[#allocation2 + $0x280] sm:$0xff]  ;;  %v7852_v35 = vadd.s32 %v6079_v3, %v11019_v2 }
 0x49b   :  { %10990 = vst [vmem:[#allocation185_spill] sm:$0xff] %v7767_v15  ;;  %2326 = vmatpush.msrb.mxu2 %v7772_v55  ;;  %2355 = vmatpush.msrb.mxu3 %v5175_v51  ;;  %v7783_v15 = vadd.s32 %v6357_v16, %v6181_v32  ;;  %v10998_v51 = vld [vmem:[#allocation21_spill] sm:$0xff]  ;;  %v7801_v32 = vpop.f32.mrf.mxu2  ;;  %v11029_v55 = vld [vmem:[#allocation79_spill] sm:$0xff] }
 0x49c   :  { %2803 = vmatpush.msrb.mxu0 %v5184_v47  ;;  %4650 = vmatmul.msk.f32.gmra.mxu1 %vm7755_vm6, %v10668_v44  ;;  %v2475_v37 = vadd.s32 %v10998_v51, %v6074_v39  ;;  %10999 = vst [vmem:[#allocation12_spill] sm:$0xff] %v7798_v31  ;;  %vm11003_vm6 = vnez %v11002_v7  ;;  %v11006_v7 = vld [vmem:[#allocation37_spill] sm:$0xff] }
 0x49d   :  { %10994 = vst [vmem:[#allocation189_spill] sm:$0xff] %v7783_v15  ;;  %2327 = vmatpush.msrb.mxu2 %v7788_v28  ;;  %2301 = vmatpush.msrb.mxu1 %v7798_v31  ;;  %vm2156_vm7 = vmand %vm11003_vm6, %vm10500_vm2  ;;  %vm10535_vm3 = vcmp.eq.s32.totalorder %v6183_v48, %v7783_v15  ;;  %v7824_v13 = vadd.s32 %v6079_v3, %v11006_v7  ;;  %v11007_v31 = vld [vmem:[#allocation75_spill] sm:$0xff] }
 0x49e   :  { %2356 = vmatpush.msrb.mxu3 %v5178_v36  ;;  %11000 = vst [vmem:[#allocation21_spill] sm:$0xff] %v7801_v32  ;;  %2804 = vmatpush.msrb.mxu0 %v5187_v42  ;;  %v7814_v36 = vld [vmem:[#allocation2 + $0x180] sm:$0xff]  ;;  %v7819_v32 = vpop.f32.mrf.mxu3  ;;  %vm2511_vm0 = vcmp.eq.s32.totalorder %v6098_v19, %v2475_v37  ;;  %v11012_v37 = vld [vmem:[#allocation40_spill] sm:$0xff]  ;;  %v11025_v15 = vld [vmem:[#allocation55_spill] sm:$0xff] }
 0x49f   :  { %11001 = vst [vmem:[#allocation191_spill] sm:$0xff] %v7803_v5  ;;  %2328 = vmatpush.msrb.mxu2 %v7803_v5  ;;  %4688 = vmatmul.msk.f32.vlgmr.msra.gmra.mxu0 %vm2574_vm8, %v10668_v44  ;;  %vm11013_vm2 = vnez %v11012_v37  ;;  %vm7846_vm10 = vmand %vm11015_vm15, %vm2511_vm0  ;;  %v11022_v37 = vld [vmem:[#allocation119_spill] sm:$0xff]  ;;  %v7865_v54 = vadd.s32 %v6079_v3, %v11025_v15  ;;  %v11028_v5 = vld [vmem:[#allocation22_spill] sm:$0xff] }
 0x4a0   :  { %11004 = vst [vmem:[#allocation33_spill] sm:$0xff] %v7814_v36  ;;  %2302 = vmatpush.msrb.mxu1 %v7814_v36  ;;  %2357 = vmatpush.msrb.mxu3 %v5181_v40  ;;  %v11008_v36 = vld [vmem:[#allocation36_spill] sm:$0xff]  ;;  %v2484_v28 = vadd.s32 %v11028_v5, %v6074_v39 }
 0x4a1   :  { %11005 = vst [vmem:[#allocation192_spill] sm:$0xff] %v7819_v32  ;;  %2805 = vmatpush.msrb.mxu0 %v5190_v56  ;;  %4655 = vmatmul.msk.f32.gmra.mxu2 %vm2156_vm7, %v10668_v44  ;;  %vm11009_vm8 = vnez %v11008_v36  ;;  %v11010_v32 = vld [vmem:[#allocation114_spill] sm:$0xff]  ;;  %v7834_v40 = vld [vmem:[#allocation2 + $0x210] sm:$0xff]  ;;  %vm2155_vm7 = vmand %vm11013_vm2, %vm10535_vm3  ;;  %v11016_v36 = vmov 0 }
 0x4a2   :  { %2403 = vmatpush.msra.mxu1 %v11007_v31  ;;  %vm2157_vm6 = vmand %vm11009_vm8, %vm10525_vm1  ;;  %11011 = vst [vmem:[#allocation37_spill] sm:$0xff] %v7834_v40  ;;  %2329 = vmatpush.msrb.mxu2 %v7834_v40  ;;  %v11014_v31 = vld [vmem:[#allocation77_spill] sm:$0xff]  ;;  %v11017_v36 = vsel %vm7846_vm10, 4294967295, %v11016_v36  ;;  %v7854_v40 = vpop.f32.mrf.mxu1  ;;  %vm2520_vm12 = vcmp.eq.s32.totalorder %v6098_v19, %v2484_v28  ;;  %v11047_v28 = vmov 0 }
 0x4a3   :  { %2982 = vmatpush.msra.mxu0 %v11010_v32  ;;  %2358 = vmatpush.msrb.mxu3 %v5184_v47  ;;  %11018 = vst [vmem:[#allocation75_spill] sm:$0xff] %v11017_v36  ;;  %v11023_v47 = vld [vmem:[#allocation39_spill] sm:$0xff]  ;;  %v7887_v36 = vpop.f32.mrf.mxu2 }
 0x4a4   :  { %2404 = vmatpush.msra.mxu1 %v11014_v31  ;;  %11020 = vst [vmem:[#allocation36_spill] sm:$0xff] %v7852_v35  ;;  %4659 = vmatmul.msk.f32.gmra.mxu3 %vm2157_vm6, %v10668_v44  ;;  %vm10531_vm2 = vcmp.eq.s32.totalorder %v11023_v47, %v7824_v13  ;;  %v7860_v31 = vld [vmem:[#allocation2 + $0x208] sm:$0xff] }
 0x4a5   :  { %11021 = vst [vmem:[#allocation114_spill] sm:$0xff] %v7854_v40  ;;  %2983 = vmatpush.msra.mxu0 %v11022_v37  ;;  %2330 = vmatpush.msrb.mxu2 %v7860_v31  ;;  %v11026_v40 = vld [vmem:[#allocation23_spill] sm:$0xff] }
 0x4a6   :  { %11024 = vst [vmem:[#allocation40_spill] sm:$0xff] %v7860_v31  ;;  %2359 = vmatpush.msrb.mxu3 %v5187_v42  ;;  %4651 = vmatmul.msk.f32.gmra.mxu1 %vm2155_vm7, %v10668_v44  ;;  %vm11027_vm0 = vcmp.eq.s32.totalorder %v6106_v0, %v11026_v40  ;;  %v7877_v42 = vld [vmem:[#allocation2 + $0x200] sm:$0xff] }
 0x4a7   :  { %2984 = vmatpush.msra.mxu0 %v7127_v57  ;;  %vm2583_vm15 = vmand %vm7846_vm10, %vm11027_vm0  ;;  %2405 = vmatpush.msra.mxu1 %v11029_v55  ;;  %11030 = vst [vmem:[#allocation77_spill] sm:$0xff] %v7877_v42  ;;  %v11031_v31 = vld [vmem:[#allocation46_spill] sm:$0xff]  ;;  %v11033_v40 = vld [vmem:[#allocation45_spill] sm:$0xff] }
 0x4a8   :  { %2331 = vmatpush.msrb.mxu2 %v7877_v42  ;;  %vm11032_vm8 = vnez %v11031_v31  ;;  %vm10527_vm7 = vcmp.eq.s32.totalorder %v11033_v40, %v7852_v35  ;;  %11034 = vst [vmem:[#allocation47_spill] sm:$0xff] %v7887_v36  ;;  %2360 = vmatpush.msrb.mxu3 %v5190_v56  ;;  %v11037_v55 = vld [vmem:[#allocation53_spill] sm:$0xff]  ;;  %v7894_v42 = vpop.f32.mrf.mxu3  ;;  %v11041_v56 = vld [vmem:[#allocation126_spill] sm:$0xff]  ;;  %v11060_v35 = vld [vmem:[#allocation59_spill] sm:$0xff] }
 0x4a9   :  { %vm2132_vm6 = vmand %vm11032_vm8, %vm10531_vm2  ;;  %2406 = vmatpush.msra.mxu1 %v11036_v12  ;;  %vm10529_vm0 = vcmp.eq.s32.totalorder %v11037_v55, %v7865_v54  ;;  %11038 = vst [vmem:[#allocation119_spill] sm:$0xff] %v7894_v42  ;;  %4689 = vmatmul.msk.f32.gmra.mxu0 %vm2583_vm15, %v10668_v44  ;;  %v11039_v31 = vld [vmem:[#allocation49_spill] sm:$0xff]  ;;  %v7906_v12 = vadd.s32 %v6202_v61, %v11006_v7  ;;  %v11055_v36 = vld [vmem:[#allocation82_spill] sm:$0xff] }
 0x4aa   :  { %2432 = vmatpush.msra.mxu2 %v11035_v30  ;;  %2645 = vmatpush.msra.mxu3 %v11010_v32  ;;  %vm11040_vm8 = vnez %v11039_v31  ;;  %v11042_v30 = vld [vmem:[#allocation83_spill] sm:$0xff]  ;;  %v11043_v32 = vld [vmem:[#allocation78_spill] sm:$0xff]  ;;  %v11044_v42 = vld [vmem:[#allocation57_spill] sm:$0xff]  ;;  %v7930_v31 = vpop.f32.mrf.mxu1 }
 0x4ab   :  { %4664 = vmatmul.msk.f32.vlgmr.msrb.gmra.mxu2 %vm2132_vm6, %v10668_v44  ;;  %vm2133_vm1 = vmand %vm11040_vm8, %vm10527_vm7  ;;  %2985 = vmatpush.msra.mxu0 %v11041_v56  ;;  %vm11045_vm15 = vnez %v11044_v42  ;;  %vm11046_vm8 = vcmp.eq.s32.totalorder %v6252_v25, %v10985_v62  ;;  %11051 = vst [vmem:[#allocation23_spill] sm:$0xff] %v7930_v31  ;;  %v11053_v42 = vld [vmem:[#allocation80_spill] sm:$0xff]  ;;  %v11056_v31 = vld [vmem:[#allocation26_spill] sm:$0xff] }
 0x4ac   :  { %2407 = vmatpush.msra.mxu1 %v11042_v30  ;;  %2433 = vmatpush.msra.mxu2 %v11043_v32  ;;  %vm2131_vm6 = vmand %vm11045_vm15, %vm10529_vm0  ;;  %v11052_v30 = vld [vmem:[#allocation85_spill] sm:$0xff]  ;;  %v7940_v32 = vadd.s32 %v6202_v61, %v11025_v15 }
 0x4ad   :  { %2646 = vmatpush.msra.mxu3 %v11022_v37  ;;  %2986 = vmatpush.msra.mxu0 %v7211_v38  ;;  %vm7922_vm7 = vmand %vm11046_vm8, %vm2520_vm12  ;;  %v7928_v37 = vadd.s32 %v6202_v61, %v11019_v2  ;;  %vm11057_vm12 = vcmp.eq.s32.totalorder %v6106_v0, %v11056_v31  ;;  %v11063_v31 = vld [vmem:[#allocation84_spill] sm:$0xff] }
 0x4ae   :  { %4668 = vmatmul.msk.f32.vlgmr.msrb.gmra.mxu3 %vm2133_vm1, %v10668_v44  ;;  %v11048_v28 = vsel %vm7922_vm7, 4294967295, %v11047_v28  ;;  %2408 = vmatpush.msra.mxu1 %v11052_v30  ;;  %vm10530_vm1 = vcmp.eq.s32.totalorder %v11023_v47, %v7906_v12  ;;  %11054 = vst [vmem:[#allocation22_spill] sm:$0xff] %v7940_v32  ;;  %vm2592_vm15 = vmand %vm7922_vm7, %vm11057_vm12  ;;  %v11058_v30 = vld [vmem:[#allocation29_spill] sm:$0xff]  ;;  %vm10533_vm12 = vcmp.eq.s32.totalorder %v11037_v55, %v7940_v32 }
 0x4af   :  { %11049 = vst [vmem:[#allocation39_spill] sm:$0xff] %v11048_v28  ;;  %2434 = vmatpush.msra.mxu2 %v11053_v42  ;;  %2647 = vmatpush.msra.mxu3 %v7127_v57  ;;  %v2493_v42 = vadd.s32 %v11058_v30, %v6074_v39  ;;  %v11059_v57 = vld [vmem:[#allocation87_spill] sm:$0xff]  ;;  %vm10532_vm0 = vcmp.eq.s32.totalorder %v11033_v40, %v7928_v37 }
 0x4b0   :  { %11050 = vst [vmem:[#allocation55_spill] sm:$0xff] %v7928_v37  ;;  %2987 = vmatpush.msra.mxu0 %v7239_v63  ;;  %4660 = vmatmul.msk.f32.vlgmr.msrb.gmra.mxu1 %vm2131_vm6, %v10668_v44  ;;  %vm11061_vm6 = vnez %v11060_v35  ;;  %v11064_v39 = vld [vmem:[#allocation91_spill] sm:$0xff]  ;;  %v11066_v35 = vld [vmem:[#allocation61_spill] sm:$0xff] }
 0x4b1   :  { %2435 = vmatpush.msra.mxu2 %v11055_v36  ;;  %2409 = vmatpush.msra.mxu1 %v11059_v57  ;;  %vm2141_vm8 = vmand %vm11061_vm6, %vm10530_vm1  ;;  %v7960_v36 = vpop.f32.mrf.mxu2  ;;  %vm11067_vm6 = vnez %v11066_v35  ;;  %vm2529_vm2 = vcmp.eq.s32.totalorder %v6098_v19, %v2493_v42  ;;  %v11068_v57 = vld [vmem:[#allocation137_spill] sm:$0xff]  ;;  %v11073_v35 = vld [vmem:[#allocation140_spill] sm:$0xff]  ;;  %v11075_v19 = vmov 0 }
 0x4b2   :  { %2648 = vmatpush.msra.mxu3 %v11041_v56  ;;  %11062 = vst [vmem:[#allocation79_spill] sm:$0xff] %v7960_v36  ;;  %2988 = vmatpush.msra.mxu0 %v7258_v41  ;;  %v7968_v56 = vpop.f32.mrf.mxu3  ;;  %vm2142_vm1 = vmand %vm11067_vm6, %vm10532_vm0  ;;  %vm11074_vm6 = vcmp.eq.s32.totalorder %v6334_v22, %v10985_v62  ;;  %v8004_v42 = vpop.f32.mrf.mxu1  ;;  %v11082_v62 = vld [vmem:[#allocation92_spill] sm:$0xff] }
 0x4b3   :  { %2436 = vmatpush.msra.mxu2 %v11063_v31  ;;  %2410 = vmatpush.msra.mxu1 %v11064_v39  ;;  %11065 = vst [vmem:[#allocation46_spill] sm:$0xff] %v7968_v56  ;;  %v11069_v31 = vld [vmem:[#allocation94_spill] sm:$0xff]  ;;  %vm7996_vm0 = vmand %vm11074_vm6, %vm2529_vm2  ;;  %v8523_v37 = vld [vmem:[#allocation2 + $0x350] sm:$0xff] }
 0x4b4   :  { %2649 = vmatpush.msra.mxu3 %v7211_v38  ;;  %4690 = vmatmul.msk.f32.gmra.mxu0 %vm2592_vm15, %v10668_v44  ;;  %v7980_v38 = vadd.s32 %v6208_v59, %v11006_v7  ;;  %v11070_v39 = vld [vmem:[#allocation86_spill] sm:$0xff]  ;;  %v11076_v19 = vsel %vm7996_vm0, 4294967295, %v11075_v19  ;;  %11079 = vst [vmem:[#allocation53_spill] sm:$0xff] %v8004_v42  ;;  %v11091_v42 = vld [vmem:[#allocation95_spill] sm:$0xff] }
 0x4b5   :  { %4665 = vmatmul.msk.f32.gmra.mxu2 %vm2141_vm8, %v10668_v44  ;;  %2989 = vmatpush.msra.mxu0 %v11068_v57  ;;  %v11071_v56 = vld [vmem:[#allocation62_spill] sm:$0xff]  ;;  %11077 = vst [vmem:[#allocation76_spill] sm:$0xff] %v11076_v19  ;;  %v11281_v19 = vld [vmem:[#allocation60_spill] sm:$0xff] }
 0x4b6   :  { %2411 = vmatpush.msra.mxu1 %v11069_v31  ;;  %2437 = vmatpush.msra.mxu2 %v11070_v39  ;;  %vm11072_vm15 = vnez %v11071_v56  ;;  %v11080_v31 = vld [vmem:[#allocation96_spill] sm:$0xff]  ;;  %v11081_v56 = vld [vmem:[#allocation89_spill] sm:$0xff]  ;;  %v11083_v39 = vld [vmem:[#allocation30_spill] sm:$0xff] }
 0x4b7   :  { %2650 = vmatpush.msra.mxu3 %v7239_v63  ;;  %vm2140_vm8 = vmand %vm11072_vm15, %vm10533_vm12  ;;  %2990 = vmatpush.msra.mxu0 %v11073_v35  ;;  %v8002_v63 = vadd.s32 %v6208_v59, %v11019_v2  ;;  %vm11084_vm2 = vcmp.eq.s32.totalorder %v6106_v0, %v11083_v39 }
 0x4b8   :  { %4669 = vmatmul.msk.f32.gmra.mxu3 %vm2142_vm1, %v10668_v44  ;;  %2412 = vmatpush.msra.mxu1 %v11080_v31  ;;  %vm10534_vm1 = vcmp.eq.s32.totalorder %v11023_v47, %v7980_v38  ;;  %vm2601_vm15 = vmand %vm7996_vm0, %vm11084_vm2  ;;  %v8021_v31 = vadd.s32 %v6208_v59, %v11025_v15 }
 0x4b9   :  { %11078 = vst [vmem:[#allocation81_spill] sm:$0xff] %v8002_v63  ;;  %2438 = vmatpush.msra.mxu2 %v11081_v56  ;;  %2651 = vmatpush.msra.mxu3 %v7258_v41  ;;  %v11086_v56 = vld [vmem:[#allocation98_spill] sm:$0xff]  ;;  %v11087_v41 = vld [vmem:[#allocation65_spill] sm:$0xff]  ;;  %vm10536_vm12 = vcmp.eq.s32.totalorder %v11033_v40, %v8002_v63  ;;  %v8034_v36 = vpop.f32.mrf.mxu2 }
 0x4ba   :  { %2991 = vmatpush.msra.mxu0 %v7340_v1  ;;  %4661 = vmatmul.msk.f32.gmra.mxu1 %vm2140_vm8, %v10668_v44  ;;  %11085 = vst [vmem:[#allocation49_spill] sm:$0xff] %v8021_v31  ;;  %vm11088_vm8 = vnez %v11087_v41  ;;  %v11094_v41 = vld [vmem:[#allocation67_spill] sm:$0xff] }
 0x4bb   :  { %2439 = vmatpush.msra.mxu2 %v11082_v62  ;;  %2413 = vmatpush.msra.mxu1 %v11086_v56  ;;  %vm2150_vm6 = vmand %vm11088_vm8, %vm10534_vm1  ;;  %v11089_v62 = vld [vmem:[#allocation41_spill] sm:$0xff]  ;;  %11090 = vst [vmem:[#allocation126_spill] sm:$0xff] %v8034_v36  ;;  %v11092_v56 = vld [vmem:[#allocation104_spill] sm:$0xff]  ;;  %vm11095_vm2 = vnez %v11094_v41  ;;  %vm10537_vm1 = vcmp.eq.s32.totalorder %v11037_v55, %v8021_v31  ;;  %v8080_v36 = vadd.s32 %v6357_v16, %v11019_v2 }
 0x4bc   :  { %2652 = vmatpush.msra.mxu3 %v11068_v57  ;;  %v2470_v39 = vadd.s32 %v6076_v49, %v11089_v62  ;;  %2992 = vmatpush.msra.mxu0 %v7362_v14  ;;  %v8040_v57 = vpop.f32.mrf.mxu3  ;;  %vm2151_vm8 = vmand %vm11095_vm2, %vm10536_vm12  ;;  %v11100_v41 = vld [vmem:[#allocation68_spill] sm:$0xff] }
 0x4bd   :  { %2440 = vmatpush.msra.mxu2 %v11091_v42  ;;  %2414 = vmatpush.msra.mxu1 %v11092_v56  ;;  %11093 = vst [vmem:[#allocation83_spill] sm:$0xff] %v8040_v57  ;;  %v11096_v42 = vld [vmem:[#allocation109_spill] sm:$0xff]  ;;  %v8056_v56 = vadd.s32 %v6357_v16, %v11006_v7  ;;  %v8604_v31 = vld [vmem:[#allocation2 + $0x330] sm:$0xff] }
 0x4be   :  { %2653 = vmatpush.msra.mxu3 %v11073_v35  ;;  %4691 = vmatmul.msk.f32.gmra.mxu0 %vm2601_vm15, %v10668_v44  ;;  %v11097_v35 = vld [vmem:[#allocation44_spill] sm:$0xff]  ;;  %v11099_v57 = vld [vmem:[#allocation97_spill] sm:$0xff]  ;;  %vm11101_vm15 = vnez %v11100_v41  ;;  %11110 = vst [vmem:[#allocation80_spill] sm:$0xff] %v8080_v36  ;;  %v11111_v41 = vld [vmem:[#allocation107_spill] sm:$0xff] }
 0x4bf   :  { %4666 = vmatmul.msk.f32.gmra.mxu2 %vm2150_vm6, %v10668_v44  ;;  %2993 = vmatpush.msra.mxu0 %v7394_v60  ;;  %vm2506_vm3 = vcmp.eq.s32.totalorder %v11097_v35, %v2470_v39  ;;  %11098 = vst [vmem:[#allocation78_spill] sm:$0xff] %v8056_v56  ;;  %vm2149_vm6 = vmand %vm11101_vm15, %vm10537_vm1  ;;  %v11103_v39 = vld [vmem:[#allocation115_spill] sm:$0xff]  ;;  %v11104_v7 = vld [vmem:[#allocation101_spill] sm:$0xff] }
 0x4c0   :  { %2415 = vmatpush.msra.mxu1 %v11096_v42  ;;  %2441 = vmatpush.msra.mxu2 %v11099_v57  ;;  %v8067_v42 = vpop.f32.mrf.mxu1  ;;  %v11105_v57 = vld [vmem:[#allocation42_spill] sm:$0xff] }
 0x4c1   :  { %2654 = vmatpush.msra.mxu3 %v7340_v1  ;;  %2994 = vmatpush.msra.mxu0 %v7423_v8  ;;  %11102 = vst [vmem:[#allocation57_spill] sm:$0xff] %v8067_v42  ;;  %vm11106_vm2 = vcmp.eq.s32.totalorder %v6101_v11, %v11105_v57  ;;  %v11107_v1 = vmov 0  ;;  %v8099_v2 = vpop.f32.mrf.mxu2  ;;  %v11117_v42 = vld [vmem:[#allocation111_spill] sm:$0xff] }
 0x4c2   :  { %4670 = vmatmul.msk.f32.gmra.mxu3 %vm2151_vm8, %v10668_v44  ;;  %2416 = vmatpush.msra.mxu1 %v11103_v39  ;;  %vm8074_vm12 = vmand %vm11106_vm2, %vm2506_vm3  ;;  %vm10539_vm8 = vcmp.eq.s32.totalorder %v11023_v47, %v8056_v56  ;;  %v11112_v39 = vld [vmem:[#allocation120_spill] sm:$0xff]  ;;  %11116 = vst [vmem:[#allocation26_spill] sm:$0xff] %v8099_v2  ;;  %vm10538_vm2 = vcmp.eq.s32.totalorder %v11033_v40, %v8080_v36  ;;  %v11137_v2 = vld [vmem:[#allocation19_spill] sm:$0xff] }
 0x4c3   :  { %2442 = vmatpush.msra.mxu2 %v11104_v7  ;;  %v11108_v1 = vsel %vm8074_vm12, 4294967295, %v11107_v1  ;;  %2655 = vmatpush.msra.mxu3 %v7362_v14  ;;  %v11113_v7 = vld [vmem:[#allocation50_spill] sm:$0xff]  ;;  %v8097_v14 = vadd.s32 %v6357_v16, %v11025_v15 }
 0x4c4   :  { %11109 = vst [vmem:[#allocation85_spill] sm:$0xff] %v11108_v1  ;;  %2995 = vmatpush.msra.mxu0 %v7455_v27  ;;  %4662 = vmatmul.msk.f32.gmra.mxu1 %vm2149_vm6, %v10668_v44  ;;  %vm11114_vm3 = vcmp.eq.s32.totalorder %v11033_v40, %v11113_v7  ;;  %vm2159_vm6 = vmand %vm6817_vm5, %vm10539_vm8  ;;  %v11119_v15 = vld [vmem:[#allocation122_spill] sm:$0xff]  ;;  %v11122_v7 = vld [vmem:[#allocation72_spill] sm:$0xff] }
 0x4c5   :  { %2443 = vmatpush.msra.mxu2 %v11111_v41  ;;  %2417 = vmatpush.msra.mxu1 %v11112_v39  ;;  %vm2578_vm15 = vmand %vm8074_vm12, %vm11114_vm3  ;;  %11115 = vst [vmem:[#allocation82_spill] sm:$0xff] %v8097_v14  ;;  %v2479_v41 = vadd.s32 %v10998_v51, %v11089_v62  ;;  %v8114_v39 = vpop.f32.mrf.mxu3  ;;  %vm11123_vm5 = vnez %v11122_v7  ;;  %vm10540_vm1 = vcmp.eq.s32.totalorder %v11037_v55, %v8097_v14  ;;  %v5202_v36 = vld [vmem:[#allocation2 + $0x460] sm:$0xff]  ;;  %v8578_v14 = vld [vmem:[#allocation2 + $0x338] sm:$0xff] }
 0x4c6   :  { %2656 = vmatpush.msra.mxu3 %v7394_v60  ;;  %2996 = vmatpush.msra.mxu0 %v7477_v46  ;;  %11120 = vst [vmem:[#allocation29_spill] sm:$0xff] %v8114_v39  ;;  %vm2160_vm3 = vmand %vm11123_vm5, %vm10538_vm2  ;;  %v11125_v60 = vld [vmem:[#allocation18_spill] sm:$0xff]  ;;  %v8136_v7 = vadd.s32 %v6079_v3, %v6999_v33  ;;  %vm11132_vm2 = vcmp.eq.s32.totalorder %v6198_v10, %v11105_v57 }
 0x4c7   :  { %2444 = vmatpush.msra.mxu2 %v11117_v42  ;;  %2418 = vmatpush.msra.mxu1 %v11119_v15  ;;  %v11121_v42 = vld [vmem:[#allocation128_spill] sm:$0xff]  ;;  %v2465_v15 = vadd.s32 %v6076_v49, %v11125_v60  ;;  %v8544_v1 = vld [vmem:[#allocation2 + $0x3e0] sm:$0xff]  ;;  %11283 = vst [vmem:[#allocation71_spill] sm:$0xff] %v8578_v14  ;;  %v8611_v56 = vld [vmem:[#allocation2 + $0x3c8] sm:$0xff] }
 0x4c8   :  { %2657 = vmatpush.msra.mxu3 %v7423_v8  ;;  %4704 = vmatmul.msk.f32.vlgmr.msrb.gmra.mxu0 %vm2578_vm15, %v10668_v44  ;;  %v11124_v8 = vld [vmem:[#allocation116_spill] sm:$0xff]  ;;  %vm2515_vm15 = vcmp.eq.s32.totalorder %v11097_v35, %v2479_v41  ;;  %11127 = vst [vmem:[#allocation87_spill] sm:$0xff] %v8136_v7  ;;  %v8138_v39 = vpop.f32.mrf.mxu1  ;;  %v11129_v41 = vld [vmem:[#allocation74_spill] sm:$0xff] }
 0x4c9   :  { %2703 = vmatpush.msrb.mxu1 %v11121_v42  ;;  %2997 = vmatpush.msra.mxu0 %v7502_v9  ;;  %v11126_v42 = vld [vmem:[#allocation131_spill] sm:$0xff]  ;;  %11128 = vst [vmem:[#allocation59_spill] sm:$0xff] %v8138_v39  ;;  %vm8152_vm8 = vmand %vm11132_vm2, %vm2515_vm15  ;;  %v11142_v39 = vld [vmem:[#allocation56_spill] sm:$0xff] }
 0x4ca   :  { %4667 = vmatmul.msk.f32.gmra.mxu2 %vm2159_vm6, %v10668_v44  ;;  %2658 = vmatpush.msra.mxu3 %v7455_v27  ;;  %vm11130_vm6 = vnez %v11129_v41  ;;  %v11133_v27 = vmov 0  ;;  %v11138_v41 = vld [vmem:[#allocation123_spill] sm:$0xff]  ;;  %vm11143_vm2 = vcmp.eq.s32.totalorder %v11033_v40, %v11142_v39  ;;  %v11149_v39 = vld [vmem:[#allocation138_spill] sm:$0xff]  ;;  %11289 = vst [vmem:[#allocation122_spill] sm:$0xff] %v8604_v31 }
 0x4cb   :  { %3098 = vmatpush.msrb.mxu0 %v7576_v18  ;;  %2445 = vmatpush.msra.mxu2 %v11124_v8  ;;  %vm2158_vm5 = vmand %vm11130_vm6, %vm10540_vm1  ;;  %v11131_v8 = vld [vmem:[#allocation121_spill] sm:$0xff]  ;;  %v11134_v27 = vsel %vm8152_vm8, 4294967295, %v11133_v27  ;;  %vm10544_vm6 = vcmp.eq.s32.totalorder %v7037_v45, %v8136_v7  ;;  %v11287_v7 = vld [vmem:[#allocation54_spill] sm:$0xff]  ;;  %11290 = vst [vmem:[#allocation128_spill] sm:$0xff] %v8611_v56 }
 0x4cc   :  { %2704 = vmatpush.msrb.mxu1 %v11126_v42  ;;  %4671 = vmatmul.msk.f32.gmra.mxu3 %vm2160_vm3, %v10668_v44  ;;  %11135 = vst [vmem:[#allocation84_spill] sm:$0xff] %v11134_v27  ;;  %v11136_v42 = vld [vmem:[#allocation133_spill] sm:$0xff]  ;;  %vm2501_vm3 = vcmp.eq.s32.totalorder %v11137_v2, %v2465_v15  ;;  %vm2587_vm15 = vmand %vm8152_vm8, %vm11143_vm2  ;;  %v2488_v15 = vadd.s32 %v11028_v5, %v11089_v62 }
 0x4cd   :  { %3099 = vmatpush.msrb.mxu0 %v7598_v34  ;;  %2446 = vmatpush.msra.mxu2 %v11131_v8  ;;  %v8167_v8 = vpop.f32.mrf.mxu2 }
 0x4ce   :  { %2659 = vmatpush.msra.mxu3 %v7477_v46  ;;  %2705 = vmatpush.msrb.mxu1 %v11136_v42  ;;  %v8165_v46 = vadd.s32 %v6079_v3, %v6987_v50  ;;  %11140 = vst [vmem:[#allocation61_spill] sm:$0xff] %v8167_v8  ;;  %v11141_v42 = vld [vmem:[#allocation135_spill] sm:$0xff]  ;;  %v11144_v3 = vld [vmem:[#allocation17_spill] sm:$0xff]  ;;  %vm2524_vm4 = vcmp.eq.s32.totalorder %v11097_v35, %v2488_v15 }
 0x4cf   :  { %3100 = vmatpush.msrb.mxu0 %v7616_v6  ;;  %4663 = vmatmul.msk.f32.gmra.mxu1 %vm2158_vm5, %v10668_v44  ;;  %vm11145_vm5 = vcmp.eq.s32.totalorder %v6101_v11, %v11144_v3  ;;  %v11157_v15 = vld [vmem:[#allocation117_spill] sm:$0xff] }
 0x4d0   :  { %2447 = vmatpush.msra.mxu2 %v11138_v41  ;;  %11139 = vst [vmem:[#allocation91_spill] sm:$0xff] %v8165_v46  ;;  %2660 = vmatpush.msra.mxu3 %v7502_v9  ;;  %vm8183_vm1 = vmand %vm11145_vm5, %vm2501_vm3  ;;  %v8187_v41 = vpop.f32.mrf.mxu3  ;;  %vm10545_vm3 = vcmp.eq.s32.totalorder %v7025_v53, %v8165_v46  ;;  %v5277_v9 = vld [vmem:[#allocation2 + $0x1a8] sm:$0xff] }
 0x4d1   :  { %2706 = vmatpush.msrb.mxu1 %v11141_v42  ;;  %11148 = vst [vmem:[#allocation137_spill] sm:$0xff] %v8187_v41  ;;  %3101 = vmatpush.msrb.mxu0 %v7622_v17  ;;  %v11150_v42 = vld [vmem:[#allocation118_spill] sm:$0xff] }
 0x4d2   :  { %2732 = vmatpush.msrb.mxu2 %v7517_v23  ;;  %2761 = vmatpush.msrb.mxu3 %v7576_v18  ;;  %vm11151_vm2 = vnez %v11150_v42  ;;  %v11152_v23 = vld [vmem:[#allocation20_spill] sm:$0xff]  ;;  %v2474_v18 = vadd.s32 %v10998_v51, %v11125_v60  ;;  %v11160_v42 = vmov 0 }
 0x4d3   :  { %2707 = vmatpush.msrb.mxu1 %v11149_v39  ;;  %vm2136_vm9 = vmand %vm11151_vm2, %vm10544_vm6  ;;  %4705 = vmatmul.msk.f32.gmra.mxu0 %vm2587_vm15, %v10668_v44  ;;  %vm11153_vm5 = vcmp.eq.s32.totalorder %v6183_v48, %v11152_v23  ;;  %v8216_v39 = vpop.f32.mrf.mxu1  ;;  %vm11158_vm15 = vnez %v11157_v15  ;;  %v11177_v15 = vld [vmem:[#allocation179_spill] sm:$0xff] }
 0x4d4   :  { %2733 = vmatpush.msrb.mxu2 %v7541_v21  ;;  %2762 = vmatpush.msrb.mxu3 %v7598_v34  ;;  %vm2573_vm13 = vmand %vm8183_vm1, %vm11153_vm5  ;;  %v11154_v21 = vld [vmem:[#allocation141_spill] sm:$0xff]  ;;  %v8214_v34 = vadd.s32 %v6202_v61, %v6999_v33  ;;  %11156 = vst [vmem:[#allocation86_spill] sm:$0xff] %v8216_v39  ;;  %vm2510_vm6 = vcmp.eq.s32.totalorder %v11137_v2, %v2474_v18  ;;  %v11168_v18 = vld [vmem:[#allocation147_spill] sm:$0xff] }
 0x4d5   :  { %3102 = vmatpush.msrb.mxu0 %v7639_v4  ;;  %4680 = vmatmul.msk.f32.vlgmr.msra.gmra.mxu2 %vm2136_vm9, %v10668_v44  ;;  %vm2135_vm2 = vmand %vm11158_vm15, %vm10545_vm3  ;;  %vm11159_vm9 = vcmp.eq.s32.totalorder %v6252_v25, %v11105_v57  ;;  %v8245_v23 = vpop.f32.mrf.mxu2  ;;  %v11220_v39 = vld [vmem:[#allocation180_spill] sm:$0xff] }
 0x4d6   :  { %2708 = vmatpush.msrb.mxu1 %v11154_v21  ;;  %11155 = vst [vmem:[#allocation94_spill] sm:$0xff] %v8214_v34  ;;  %2734 = vmatpush.msrb.mxu2 %v7555_v24  ;;  %vm8230_vm5 = vmand %vm11159_vm9, %vm2524_vm4  ;;  %v11163_v24 = vld [vmem:[#allocation145_spill] sm:$0xff]  ;;  %vm11169_vm9 = vcmp.eq.s32.totalorder %v6198_v10, %v11144_v3 }
 0x4d7   :  { %2763 = vmatpush.msrb.mxu3 %v7616_v6  ;;  %3103 = vmatpush.msrb.mxu0 %v7670_v26  ;;  %v11161_v42 = vsel %vm8230_vm5, 4294967295, %v11160_v42  ;;  %v8243_v6 = vadd.s32 %v6202_v61, %v6987_v50  ;;  %11165 = vst [vmem:[#allocation96_spill] sm:$0xff] %v8245_v23  ;;  %vm8261_vm3 = vmand %vm11169_vm9, %vm2510_vm6  ;;  %v11216_v23 = vld [vmem:[#allocation37_spill] sm:$0xff]  ;;  %v5254_v61 = vld [vmem:[#allocation2 + $0xc8] sm:$0xff] }
 0x4d8   :  { %4684 = vmatmul.msk.f32.vlgmr.msra.gmra.mxu3 %vm2573_vm13, %v10668_v44  ;;  %11162 = vst [vmem:[#allocation62_spill] sm:$0xff] %v11161_v42  ;;  %2709 = vmatpush.msrb.mxu1 %v11163_v24  ;;  %vm10547_vm13 = vcmp.eq.s32.totalorder %v7037_v45, %v8214_v34  ;;  %v2483_v24 = vadd.s32 %v11028_v5, %v11125_v60  ;;  %v5214_v34 = vld [vmem:[#allocation2 + $0x440] sm:$0xff]  ;;  %v5295_v42 = vld [vmem:[#allocation2 + $0x2d0] sm:$0xff] }
 0x4d9   :  { %2735 = vmatpush.msrb.mxu2 %v7573_v29  ;;  %2764 = vmatpush.msrb.mxu3 %v7622_v17  ;;  %11164 = vst [vmem:[#allocation140_spill] sm:$0xff] %v8243_v6  ;;  %v11166_v29 = vld [vmem:[#allocation64_spill] sm:$0xff]  ;;  %v2497_v17 = vadd.s32 %v11058_v30, %v11089_v62  ;;  %v11173_v62 = vld [vmem:[#allocation134_spill] sm:$0xff]  ;;  %vm10549_vm6 = vcmp.eq.s32.totalorder %v7025_v53, %v8243_v6 }
 0x4da   :  { %3104 = vmatpush.msrb.mxu0 %v7690_v43  ;;  %4676 = vmatmul.msk.f32.vlgmr.msra.gmra.mxu1 %vm2135_vm2, %v10668_v44  ;;  %vm11167_vm4 = vcmp.eq.s32.totalorder %v11033_v40, %v11166_v29  ;;  %vm11174_vm2 = vnez %v11173_v62  ;;  %v11180_v29 = vld [vmem:[#allocation151_spill] sm:$0xff]  ;;  %v11183_v62 = vld [vmem:[#allocation129_spill] sm:$0xff]  ;;  %vm2519_vm8 = vcmp.eq.s32.totalorder %v11137_v2, %v2483_v24 }
 0x4db   :  { %2736 = vmatpush.msrb.mxu2 %v7591_v20  ;;  %vm2596_vm15 = vmand %vm8230_vm5, %vm11167_vm4  ;;  %2710 = vmatpush.msrb.mxu1 %v11168_v18  ;;  %v8265_v20 = vpop.f32.mrf.mxu3  ;;  %v8278_v21 = vpop.f32.mrf.mxu1  ;;  %v11182_v18 = vld [vmem:[#allocation168_spill] sm:$0xff]  ;;  %v11199_v24 = vld [vmem:[#allocation155_spill] sm:$0xff] }
 0x4dc   :  { %2765 = vmatpush.msrb.mxu3 %v7639_v4  ;;  %11172 = vst [vmem:[#allocation89_spill] sm:$0xff] %v8265_v20  ;;  %3105 = vmatpush.msrb.mxu0 %v7700_v52  ;;  %vm2145_vm4 = vmand %vm11174_vm2, %vm10547_vm13  ;;  %v11175_v4 = vld [vmem:[#allocation148_spill] sm:$0xff]  ;;  %vm2533_vm2 = vcmp.eq.s32.totalorder %v11097_v35, %v2497_v17  ;;  %v11187_v17 = vmov 0  ;;  %v8526_v6 = vld [vmem:[#allocation2 + $0x3e8] sm:$0xff] }
 0x4dd   :  { %2737 = vmatpush.msrb.mxu2 %v7613_v58  ;;  %4706 = vmatmul.msk.f32.gmra.mxu0 %vm2596_vm15, %v10668_v44  ;;  %11176 = vst [vmem:[#allocation92_spill] sm:$0xff] %v8278_v21  ;;  %v11178_v58 = vld [vmem:[#allocation25_spill] sm:$0xff]  ;;  %vm11184_vm15 = vnez %v11183_v62  ;;  %v11185_v35 = vld [vmem:[#allocation184_spill] sm:$0xff]  ;;  %v11196_v62 = vld [vmem:[#allocation70_spill] sm:$0xff] }
 0x4de   :  { %2711 = vmatpush.msrb.mxu1 %v11175_v4  ;;  %2766 = vmatpush.msrb.mxu3 %v7670_v26  ;;  %vm11179_vm9 = vcmp.eq.s32.totalorder %v6183_v48, %v11178_v58  ;;  %v8294_v26 = vadd.s32 %v6208_v59, %v6999_v33  ;;  %v8312_v4 = vpop.f32.mrf.mxu2  ;;  %v11192_v58 = vld [vmem:[#allocation169_spill] sm:$0xff]  ;;  %v11210_v20 = vld [vmem:[#allocation28_spill] sm:$0xff]  ;;  %v11252_v21 = vld [vmem:[#allocation58_spill] sm:$0xff] }
 0x4df   :  { %3106 = vmatpush.msrb.mxu0 %v11177_v15  ;;  %vm2582_vm5 = vmand %vm8261_vm3, %vm11179_vm9  ;;  %4681 = vmatmul.msk.f32.gmra.mxu2 %vm2145_vm4, %v10668_v44  ;;  %vm11186_vm4 = vcmp.eq.s32.totalorder %v6334_v22, %v11105_v57  ;;  %11190 = vst [vmem:[#allocation65_spill] sm:$0xff] %v8312_v4  ;;  %v11251_v4 = vld [vmem:[#allocation33_spill] sm:$0xff] }
 0x4e0   :  { %2712 = vmatpush.msrb.mxu1 %v11180_v29  ;;  %11181 = vst [vmem:[#allocation30_spill] sm:$0xff] %v8294_v26  ;;  %2738 = vmatpush.msrb.mxu2 %v11182_v18  ;;  %vm2144_vm9 = vmand %vm11184_vm15, %vm10549_vm6  ;;  %v11193_v29 = vld [vmem:[#allocation187_spill] sm:$0xff] }
 0x4e1   :  { %2767 = vmatpush.msrb.mxu3 %v7690_v43  ;;  %3107 = vmatpush.msrb.mxu0 %v11185_v35  ;;  %vm8308_vm13 = vmand %vm11186_vm4, %vm2533_vm2  ;;  %v11191_v43 = vld [vmem:[#allocation152_spill] sm:$0xff]  ;;  %v11195_v18 = vld [vmem:[#allocation171_spill] sm:$0xff]  ;;  %vm11197_vm2 = vcmp.eq.s32.totalorder %v11033_v40, %v11196_v62  ;;  %vm11200_vm4 = vcmp.eq.s32.totalorder %v6252_v25, %v11144_v3 }
 0x4e2   :  { %4685 = vmatmul.msk.f32.gmra.mxu3 %vm2582_vm5, %v10668_v44  ;;  %v11188_v17 = vsel %vm8308_vm13, 4294967295, %v11187_v17  ;;  %2713 = vmatpush.msrb.mxu1 %v11191_v43  ;;  %vm10565_vm5 = vcmp.eq.s32.totalorder %v7037_v45, %v8294_v26  ;;  %vm2605_vm15 = vmand %vm8308_vm13, %vm11197_vm2  ;;  %v11270_v26 = vld [vmem:[#allocation16_spill] sm:$0xff]  ;;  %v8558_v40 = vld [vmem:[#allocation2 + $0x340] sm:$0xff]  ;;  %v11396_v43 = vmov 0 }
 0x4e3   :  { %11189 = vst [vmem:[#allocation98_spill] sm:$0xff] %v11188_v17  ;;  %2739 = vmatpush.msrb.mxu2 %v11192_v58  ;;  %2768 = vmatpush.msrb.mxu3 %v7700_v52  ;;  %v8321_v57 = vpop.f32.mrf.mxu3  ;;  %v8332_v52 = vadd.s32 %v6208_v59, %v6987_v50  ;;  %v11203_v58 = vld [vmem:[#allocation190_spill] sm:$0xff]  ;;  %v11205_v59 = vld [vmem:[#allocation144_spill] sm:$0xff] }
 0x4e4   :  { %3108 = vmatpush.msrb.mxu0 %v11193_v29  ;;  %11194 = vst [vmem:[#allocation41_spill] sm:$0xff] %v8321_v57  ;;  %4677 = vmatmul.msk.f32.gmra.mxu1 %vm2144_vm9, %v10668_v44  ;;  %vm8339_vm9 = vmand %vm11200_vm4, %vm2519_vm8  ;;  %vm11206_vm2 = vnez %v11205_v59  ;;  %vm11211_vm8 = vcmp.eq.s32.totalorder %v6183_v48, %v11210_v20  ;;  %v11213_v59 = vld [vmem:[#allocation159_spill] sm:$0xff] }
 0x4e5   :  { %2740 = vmatpush.msrb.mxu2 %v11195_v18  ;;  %11198 = vst [vmem:[#allocation95_spill] sm:$0xff] %v8332_v52  ;;  %2714 = vmatpush.msrb.mxu1 %v11199_v24  ;;  %v11204_v18 = vld [vmem:[#allocation175_spill] sm:$0xff]  ;;  %vm2154_vm6 = vmand %vm11206_vm2, %vm10565_vm5  ;;  %v8352_v62 = vpop.f32.mrf.mxu1  ;;  %vm10551_vm13 = vcmp.eq.s32.totalorder %v7025_v53, %v8332_v52 }
 0x4e6   :  { %2769 = vmatpush.msrb.mxu3 %v11177_v15  ;;  %3109 = vmatpush.msrb.mxu0 %v11203_v58  ;;  %v11207_v15 = vld [vmem:[#allocation157_spill] sm:$0xff]  ;;  %11208 = vst [vmem:[#allocation104_spill] sm:$0xff] %v8352_v62  ;;  %v11209_v24 = vld [vmem:[#allocation191_spill] sm:$0xff]  ;;  %vm2591_vm4 = vmand %vm8339_vm9, %vm11211_vm8  ;;  %v8373_v20 = vpop.f32.mrf.mxu2 }
 0x4e7   :  { %2741 = vmatpush.msrb.mxu2 %v11204_v18  ;;  %4707 = vmatmul.msk.f32.gmra.mxu0 %vm2605_vm15, %v10668_v44  ;;  %v8365_v18 = vadd.s32 %v6357_v16, %v6999_v33  ;;  %11215 = vst [vmem:[#allocation109_spill] sm:$0xff] %v8373_v20  ;;  %v11217_v33 = vld [vmem:[#allocation142_spill] sm:$0xff]  ;;  %v5197_v20 = vld [vmem:[#allocation2 + $0x470] sm:$0xff]  ;;  %v11241_v62 = vld [vmem:[#allocation149_spill] sm:$0xff] }
 0x4e8   :  { %2715 = vmatpush.msrb.mxu1 %v11207_v15  ;;  %2770 = vmatpush.msrb.mxu3 %v11185_v35  ;;  %v2492_v35 = vadd.s32 %v11058_v30, %v11125_v60  ;;  %v11214_v15 = vld [vmem:[#allocation177_spill] sm:$0xff]  ;;  %v11221_v60 = vld [vmem:[#allocation40_spill] sm:$0xff]  ;;  %11277 = vst [vmem:[#allocation111_spill] sm:$0xff] %v8558_v40 }
 0x4e9   :  { %3110 = vmatpush.msrb.mxu0 %v11209_v24  ;;  %11212 = vst [vmem:[#allocation67_spill] sm:$0xff] %v8365_v18  ;;  %4682 = vmatmul.msk.f32.gmra.mxu2 %vm2154_vm6, %v10668_v44  ;;  %vm11218_vm6 = vnez %v11217_v33  ;;  %vm10552_vm2 = vcmp.eq.s32.totalorder %v7037_v45, %v8365_v18  ;;  %v11224_v33 = vld [vmem:[#allocation182_spill] sm:$0xff]  ;;  %v5205_v18 = vld [vmem:[#allocation2 + $0x458] sm:$0xff] }
 0x4ea   :  { %2716 = vmatpush.msrb.mxu1 %v11213_v59  ;;  %2742 = vmatpush.msrb.mxu2 %v11214_v15  ;;  %vm2153_vm15 = vmand %vm11218_vm6, %vm10551_vm13  ;;  %v11219_v59 = vld [vmem:[#allocation161_spill] sm:$0xff]  ;;  %vm2528_vm8 = vcmp.eq.s32.totalorder %v11137_v2, %v2492_v35  ;;  %v11228_v2 = vld [vmem:[#allocation163_spill] sm:$0xff] }
 0x4eb   :  { %2771 = vmatpush.msrb.mxu3 %v11193_v29  ;;  %3111 = vmatpush.msrb.mxu0 %v11216_v23  ;;  %v8391_v29 = vadd.s32 %v6357_v16, %v6987_v50  ;;  %v8393_v15 = vpop.f32.mrf.mxu3  ;;  %v11230_v50 = vld [vmem:[#allocation77_spill] sm:$0xff] }
 0x4ec   :  { %4686 = vmatmul.msk.f32.gmra.mxu3 %vm2591_vm4, %v10668_v44  ;;  %2717 = vmatpush.msrb.mxu1 %v11219_v59  ;;  %11223 = vst [vmem:[#allocation97_spill] sm:$0xff] %v8393_v15  ;;  %v8412_v35 = vld [vmem:[#allocation2 + $0x378] sm:$0xff]  ;;  %v8433_v15 = vld [vmem:[#allocation2 + $0x370] sm:$0xff] }
 0x4ed   :  { %2743 = vmatpush.msrb.mxu2 %v11220_v39  ;;  %2772 = vmatpush.msrb.mxu3 %v11203_v58  ;;  %11222 = vst [vmem:[#allocation44_spill] sm:$0xff] %v8391_v29  ;;  %v11225_v39 = vld [vmem:[#allocation162_spill] sm:$0xff]  ;;  %v11227_v58 = vld [vmem:[#allocation51_spill] sm:$0xff] }
 0x4ee   :  { %3112 = vmatpush.msrb.mxu0 %v11221_v60  ;;  %4678 = vmatmul.msk.f32.gmra.mxu1 %vm2153_vm15, %v10668_v44  ;;  %vm11226_vm4 = vcmp.eq.s32.totalorder %v6183_v48, %v11225_v39  ;;  %v2468_v59 = vadd.s32 %v6076_v49, %v11227_v58  ;;  %vm2163_vm15 = vmand %vm7464_vm14, %vm10552_vm2  ;;  %vm10554_vm14 = vcmp.eq.s32.totalorder %v7025_v53, %v8391_v29  ;;  %v5195_v39 = vld [vmem:[#allocation2 + $0x478] sm:$0xff]  ;;  %v8449_v8 = vpop.f32.mrf.mxu2  ;;  %v8496_v29 = vld [vmem:[#allocation2 + $0x3f0] sm:$0xff] }
 0x4ef   :  { %2744 = vmatpush.msrb.mxu2 %v11224_v33  ;;  %vm2910_vm6 = vmand %vm8183_vm1, %vm11226_vm4  ;;  %2718 = vmatpush.msrb.mxu1 %v11228_v2  ;;  %vm11231_vm1 = vcmp.eq.s32.totalorder %v6334_v22, %v11144_v3  ;;  %v8426_v33 = vpop.f32.mrf.mxu1  ;;  %v11236_v2 = vld [vmem:[#allocation52_spill] sm:$0xff]  ;;  %v11237_v3 = vld [vmem:[#allocation34_spill] sm:$0xff]  ;;  %11244 = vst [vmem:[#allocation115_spill] sm:$0xff] %v8449_v8 }
 0x4f0   :  { %2773 = vmatpush.msrb.mxu3 %v11209_v24  ;;  %3113 = vmatpush.msrb.mxu0 %v11230_v50  ;;  %vm8418_vm4 = vmand %vm11231_vm1, %vm2528_vm8  ;;  %v11234_v24 = vld [vmem:[#allocation186_spill] sm:$0xff]  ;;  %11235 = vst [vmem:[#allocation68_spill] sm:$0xff] %v8426_v33  ;;  %vm2504_vm13 = vcmp.eq.s32.totalorder %v11236_v2, %v2468_v59  ;;  %v2469_v16 = vadd.s32 %v6076_v49, %v11237_v3  ;;  %vm11242_vm1 = vnez %v11241_v62  ;;  %v8471_v59 = vld [vmem:[#allocation2 + $0x3f8] sm:$0xff] }
 0x4f1   :  { %2819 = vmatpush.msra.mxu1 %v8412_v35  ;;  %4720 = vmatmul.msk.f32.vlgmr.msra.gmra.mxu0 %vm2910_vm6, %v10668_v44  ;;  %v11243_v33 = vld [vmem:[#allocation10_spill] sm:$0xff]  ;;  %v2478_v63 = vadd.s32 %v10998_v51, %v11237_v3 }
 0x4f2   :  { %2745 = vmatpush.msrb.mxu2 %v11234_v24  ;;  %3214 = vmatpush.msra.mxu0 %v5195_v39  ;;  %v11238_v24 = vld [vmem:[#allocation32_spill] sm:$0xff]  ;;  %v2467_v41 = vadd.s32 %v6076_v49, %v11243_v33  ;;  %v5199_v62 = vld [vmem:[#allocation2 + $0x468] sm:$0xff]  ;;  %v2476_v17 = vadd.s32 %v10998_v51, %v11243_v33 }
 0x4f3   :  { %2774 = vmatpush.msrb.mxu3 %v11216_v23  ;;  %4683 = vmatmul.msk.f32.gmra.mxu2 %vm2163_vm15, %v10668_v44  ;;  %vm11239_vm8 = vcmp.eq.s32.totalorder %v6183_v48, %v11238_v24  ;;  %v11240_v23 = vld [vmem:[#allocation12_spill] sm:$0xff]  ;;  %vm2162_vm15 = vmand %vm11242_vm1, %vm10554_vm14  ;;  %v8452_v24 = vld [vmem:[#allocation2 + $0x368] sm:$0xff] }
 0x4f4   :  { %2820 = vmatpush.msra.mxu1 %v8433_v15  ;;  %vm2600_vm6 = vmand %vm8418_vm4, %vm11239_vm8  ;;  %3215 = vmatpush.msra.mxu0 %v5197_v20  ;;  %v11249_v8 = vld [vmem:[#allocation38_spill] sm:$0xff] }
 0x4f5   :  { %2746 = vmatpush.msrb.mxu2 %v11240_v23  ;;  %2775 = vmatpush.msrb.mxu3 %v11221_v60  ;;  %v11245_v23 = vld [vmem:[#allocation48_spill] sm:$0xff]  ;;  %vm2505_vm1 = vcmp.eq.s32.totalorder %v11249_v8, %v2469_v16  ;;  %v8466_v60 = vpop.f32.mrf.mxu3  ;;  %v11256_v16 = vld [vmem:[#allocation14_spill] sm:$0xff]  ;;  %vm2514_vm5 = vcmp.eq.s32.totalorder %v11249_v8, %v2478_v63 }
 0x4f6   :  { %2821 = vmatpush.msra.mxu1 %v8452_v24  ;;  %vm11246_vm8 = vcmp.eq.s32.totalorder %v6101_v11, %v11245_v23  ;;  %4687 = vmatmul.msk.f32.gmra.mxu3 %vm2600_vm6, %v10668_v44  ;;  %11250 = vst [vmem:[#allocation101_spill] sm:$0xff] %v8466_v60  ;;  %v8521_v27 = vpop.f32.mrf.mxu2  ;;  %vm11273_vm12 = vcmp.eq.s32.totalorder %v6198_v10, %v11245_v23  ;;  %v8581_v63 = vld [vmem:[#allocation2 + $0x3d0] sm:$0xff]  ;;  %v5288_v60 = vld [vmem:[#allocation2 + $0x108] sm:$0xff] }
 0x4f7   :  { %vm8460_vm2 = vmand %vm11246_vm8, %vm2504_vm13  ;;  %3216 = vmatpush.msra.mxu0 %v5199_v62  ;;  %2747 = vmatpush.msrb.mxu2 %v11251_v4  ;;  %vm11253_vm13 = vcmp.eq.s32.totalorder %v11037_v55, %v11252_v21  ;;  %vm2503_vm8 = vcmp.eq.s32.totalorder %v11256_v16, %v2467_v41  ;;  %v8484_v4 = vld [vmem:[#allocation2 + $0x360] sm:$0xff]  ;;  %v2477_v21 = vadd.s32 %v10998_v51, %v11227_v58  ;;  %v8499_v41 = vld [vmem:[#allocation2 + $0x358] sm:$0xff] }
 0x4f8   :  { %2776 = vmatpush.msrb.mxu3 %v11230_v50  ;;  %4679 = vmatmul.msk.f32.gmra.mxu1 %vm2162_vm15, %v10668_v44  ;;  %vm8479_vm6 = vmand %vm8460_vm2, %vm11253_vm13  ;;  %v11257_v50 = vld [vmem:[#allocation35_spill] sm:$0xff]  ;;  %11268 = vst [vmem:[#allocation107_spill] sm:$0xff] %v8521_v27 }
 0x4f9   :  { %2848 = vmatpush.msra.mxu2 %v8471_v59  ;;  %2822 = vmatpush.msra.mxu1 %v8484_v4  ;;  %vm11258_vm15 = vcmp.eq.s32.totalorder %v6101_v11, %v11257_v50  ;;  %v8511_v52 = vpop.f32.mrf.mxu1  ;;  %v8538_v27 = vld [vmem:[#allocation2 + $0x348] sm:$0xff] }
 0x4fa   :  { %2877 = vmatpush.msra.mxu3 %v5195_v39  ;;  %vm8490_vm14 = vmand %vm11258_vm15, %vm2505_vm1  ;;  %3217 = vmatpush.msra.mxu0 %v5202_v36  ;;  %v11261_v39 = vld [vmem:[#allocation13_spill] sm:$0xff]  ;;  %11265 = vst [vmem:[#allocation42_spill] sm:$0xff] %v8511_v52  ;;  %v11269_v52 = vld [vmem:[#allocation15_spill] sm:$0xff] }
 0x4fb   :  { %2849 = vmatpush.msra.mxu2 %v8496_v29  ;;  %2823 = vmatpush.msra.mxu1 %v8499_v41  ;;  %vm11262_vm1 = vcmp.eq.s32.totalorder %v6101_v11, %v11261_v39 }
 0x4fc   :  { %2878 = vmatpush.msra.mxu3 %v5197_v20  ;;  %vm8505_vm13 = vmand %vm11262_vm1, %vm2503_vm8  ;;  %3218 = vmatpush.msra.mxu0 %v5205_v18  ;;  %v11266_v20 = vld [vmem:[#allocation43_spill] sm:$0xff]  ;;  %vm2513_vm1 = vcmp.eq.s32.totalorder %v11236_v2, %v2477_v21 }
 0x4fd   :  { %4696 = vmatmul.msk.f32.vlgmr.msrb.gmra.mxu2 %vm8479_vm6, %v10668_v44  ;;  %vm11267_vm15 = vcmp.eq.s32.totalorder %v11023_v47, %v11266_v20  ;;  %2824 = vmatpush.msra.mxu1 %v8523_v37  ;;  %v5208_v20 = vld [vmem:[#allocation2 + $0x450] sm:$0xff]  ;;  %vm11271_vm6 = vcmp.eq.s32.totalorder %v11269_v52, %v11270_v26  ;;  %v8542_v21 = vpop.f32.mrf.mxu3  ;;  %vm8550_vm0 = vmand %vm11273_vm12, %vm2513_vm1  ;;  %v11274_v26 = vmov 0  ;;  %vm11278_vm12 = vcmp.eq.s32.totalorder %v6198_v10, %v11257_v50 }
 0x4fe   :  { %vm2577_vm8 = vmand %vm8490_vm14, %vm11267_vm15  ;;  %2850 = vmatpush.msra.mxu2 %v8526_v6  ;;  %2879 = vmatpush.msra.mxu3 %v5199_v62  ;;  %11272 = vst [vmem:[#allocation120_spill] sm:$0xff] %v8542_v21  ;;  %v11275_v26 = vsel %vm8550_vm0, 4294967295, %v11274_v26  ;;  %v5211_v62 = vld [vmem:[#allocation2 + $0x448] sm:$0xff]  ;;  %v2486_v21 = vadd.s32 %v11028_v5, %v11227_v58 }
 0x4ff   :  { %3219 = vmatpush.msra.mxu0 %v5208_v20  ;;  %vm2575_vm15 = vmand %vm8505_vm13, %vm11271_vm6  ;;  %4700 = vmatmul.msk.f32.vlgmr.msrb.gmra.mxu3 %vm2577_vm8, %v10668_v44  ;;  %11276 = vst [vmem:[#allocation50_spill] sm:$0xff] %v11275_v26  ;;  %vm2512_vm8 = vcmp.eq.s32.totalorder %v11256_v16, %v2476_v17  ;;  %vm11282_vm6 = vcmp.eq.s32.totalorder %v11037_v55, %v11281_v19  ;;  %v5217_v19 = vld [vmem:[#allocation2 + $0x438] sm:$0xff]  ;;  %v8636_v26 = vld [vmem:[#allocation2 + $0x3c0] sm:$0xff] }
 0x500   :  { %2825 = vmatpush.msra.mxu1 %v8538_v27  ;;  %2851 = vmatpush.msra.mxu2 %v8544_v1  ;;  %vm8569_vm1 = vmand %vm11278_vm12, %vm2514_vm5  ;;  %vm11284_vm5 = vcmp.eq.s32.totalorder %v6198_v10, %v11261_v39  ;;  %vm2522_vm10 = vcmp.eq.s32.totalorder %v11236_v2, %v2486_v21  ;;  %v2487_v17 = vadd.s32 %v11028_v5, %v11237_v3  ;;  %v5223_v21 = vld [vmem:[#allocation2 + $0x428] sm:$0xff] }
 0x501   :  { %2880 = vmatpush.msra.mxu3 %v5202_v36  ;;  %3220 = vmatpush.msra.mxu0 %v5211_v62  ;;  %v8561_v36 = vld [vmem:[#allocation2 + $0x3d8] sm:$0xff]  ;;  %vm8589_vm12 = vmand %vm11284_vm5, %vm2512_vm8  ;;  %vm11295_vm5 = vcmp.eq.s32.totalorder %v6252_v25, %v11245_v23  ;;  %11300 = vst [vmem:[#allocation18_spill] sm:$0xff] %v8636_v26 }
 0x502   :  { %4692 = vmatmul.msk.f32.vlgmr.msrb.gmra.mxu1 %vm2575_vm15, %v10668_v44  ;;  %2852 = vmatpush.msra.mxu2 %v8561_v36  ;;  %vm2585_vm15 = vmand %vm8550_vm0, %vm11282_vm6  ;;  %vm11288_vm6 = vcmp.eq.s32.totalorder %v11023_v47, %v11287_v7 }
 0x503   :  { %2826 = vmatpush.msra.mxu1 %v8558_v40  ;;  %2881 = vmatpush.msra.mxu3 %v5205_v18  ;;  %v11285_v18 = vmov 0  ;;  %vm2586_vm7 = vmand %vm8569_vm1, %vm11288_vm6  ;;  %v11308_v40 = vmov 0 }
 0x504   :  { %3221 = vmatpush.msra.mxu0 %v5214_v34  ;;  %2853 = vmatpush.msra.mxu2 %v8581_v63  ;;  %v11286_v18 = vsel %vm8589_vm12, 4294967295, %v11285_v18  ;;  %vm8629_vm6 = vmand %vm11295_vm5, %vm2522_vm10 }
 0x505   :  { %2827 = vmatpush.msra.mxu1 %v8578_v14  ;;  %2882 = vmatpush.msra.mxu3 %v5208_v20  ;;  %v8601_v28 = vpop.f32.mrf.mxu1  ;;  %v2485_v20 = vadd.s32 %v11028_v5, %v11243_v33  ;;  %v11291_v14 = vld [vmem:[#allocation24_spill] sm:$0xff] }
 0x506   :  { %3222 = vmatpush.msra.mxu0 %v5217_v19  ;;  %4697 = vmatmul.msk.f32.gmra.mxu2 %vm2585_vm15, %v10668_v44  ;;  %v8609_v7 = vpop.f32.mrf.mxu2  ;;  %vm11292_vm8 = vcmp.eq.s32.totalorder %v11269_v52, %v11291_v14  ;;  %v8633_v14 = vld [vmem:[#allocation2 + $0x328] sm:$0xff] }
 0x507   :  { %2828 = vmatpush.msra.mxu1 %v8604_v31  ;;  %2854 = vmatpush.msra.mxu2 %v8611_v56  ;;  %vm8619_vm15 = vmand %vm8589_vm12, %vm11292_vm8  ;;  %v5220_v31 = vld [vmem:[#allocation2 + $0x430] sm:$0xff]  ;;  %11299 = vst [vmem:[#allocation116_spill] sm:$0xff] %v8633_v14  ;;  %vm2523_vm8 = vcmp.eq.s32.totalorder %v11249_v8, %v2487_v17  ;;  %vm2521_vm10 = vcmp.eq.s32.totalorder %v11256_v16, %v2485_v20  ;;  %v11302_v17 = vld [vmem:[#allocation66_spill] sm:$0xff] }
 0x508   :  { %2883 = vmatpush.msra.mxu3 %v5211_v62  ;;  %3223 = vmatpush.msra.mxu0 %v5220_v31  ;;  %v11296_v62 = vmov 0  ;;  %v2495_v56 = vadd.s32 %v11058_v30, %v11227_v58  ;;  %v8660_v20 = vld [vmem:[#allocation2 + $0x320] sm:$0xff] }
 0x509   :  { %4701 = vmatmul.msk.f32.gmra.mxu3 %vm2586_vm7, %v10668_v44  ;;  %v11297_v62 = vsel %vm8629_vm6, 4294967295, %v11296_v62  ;;  %2829 = vmatpush.msra.mxu1 %v8633_v14  ;;  %v8640_v32 = vpop.f32.mrf.mxu3  ;;  %v8648_v14 = vld [vmem:[#allocation2 + $0x3b8] sm:$0xff]  ;;  %vm11303_vm7 = vcmp.eq.s32.totalorder %v11037_v55, %v11302_v17  ;;  %11306 = vst [vmem:[#allocation74_spill] sm:$0xff] %v8660_v20  ;;  %v5226_v58 = vld [vmem:[#allocation2 + $0x420] sm:$0xff]  ;;  %v8670_v17 = vld [vmem:[#allocation2 + $0x3b0] sm:$0xff] }
 0x50a   :  { %11298 = vst [vmem:[#allocation72_spill] sm:$0xff] %v11297_v62  ;;  %2855 = vmatpush.msra.mxu2 %v8636_v26  ;;  %2884 = vmatpush.msra.mxu3 %v5214_v34  ;;  %vm8656_vm5 = vmand %vm8629_vm6, %vm11303_vm7  ;;  %vm11311_vm7 = vcmp.eq.s32.totalorder %v6252_v25, %v11261_v39  ;;  %v11312_v62 = vmov 0  ;;  %v5238_v34 = vld [vmem:[#allocation2 + $0x400] sm:$0xff] }
 0x50b   :  { %3224 = vmatpush.msra.mxu0 %v5223_v21  ;;  %4693 = vmatmul.msk.f32.gmra.mxu1 %vm8619_vm15, %v10668_v44  ;;  %11301 = vst [vmem:[#allocation131_spill] sm:$0xff] %v8648_v14  ;;  %vm11307_vm15 = vcmp.eq.s32.totalorder %v6252_v25, %v11257_v50  ;;  %vm8676_vm6 = vmand %vm11311_vm7, %vm2521_vm10 }
 0x50c   :  { %2856 = vmatpush.msra.mxu2 %v8648_v14  ;;  %2830 = vmatpush.msra.mxu1 %v8660_v20  ;;  %vm8666_vm0 = vmand %vm11307_vm15, %vm2523_vm8  ;;  %11310 = vst [vmem:[#allocation121_spill] sm:$0xff] %v8670_v17  ;;  %v11313_v62 = vsel %vm8676_vm6, 4294967295, %v11312_v62  ;;  %vm2531_vm8 = vcmp.eq.s32.totalorder %v11236_v2, %v2495_v56  ;;  %v2496_v20 = vadd.s32 %v11058_v30, %v11237_v3  ;;  %v5229_v14 = vld [vmem:[#allocation2 + $0x418] sm:$0xff]  ;;  %v11320_v3 = vld [vmem:[#allocation27_spill] sm:$0xff] }
 0x50d   :  { %2885 = vmatpush.msra.mxu3 %v5217_v19  ;;  %v11309_v40 = vsel %vm8666_vm0, 4294967295, %v11308_v40  ;;  %3225 = vmatpush.msra.mxu0 %v5226_v58  ;;  %v8680_v19 = vld [vmem:[#allocation2 + $0x318] sm:$0xff]  ;;  %vm11321_vm7 = vcmp.eq.s32.totalorder %v11269_v52, %v11320_v3  ;;  %v11326_v3 = vmov 0 }
 0x50e   :  { %2857 = vmatpush.msra.mxu2 %v8670_v17  ;;  %11314 = vst [vmem:[#allocation133_spill] sm:$0xff] %v8680_v19  ;;  %2831 = vmatpush.msra.mxu1 %v8680_v19  ;;  %v11315_v17 = vld [vmem:[#allocation63_spill] sm:$0xff]  ;;  %v11331_v56 = vld [vmem:[#allocation88_spill] sm:$0xff] }
 0x50f   :  { %2886 = vmatpush.msra.mxu3 %v5220_v31  ;;  %3226 = vmatpush.msra.mxu0 %v5229_v14  ;;  %vm11316_vm10 = vcmp.eq.s32.totalorder %v11023_v47, %v11315_v17  ;;  %v8694_v26 = vpop.f32.mrf.mxu1  ;;  %v8696_v31 = vld [vmem:[#allocation2 + $0x310] sm:$0xff]  ;;  %v8699_v19 = vld [vmem:[#allocation2 + $0x3a8] sm:$0xff]  ;;  %v2494_v17 = vadd.s32 %v11058_v30, %v11243_v33  ;;  %v8729_v33 = vld [vmem:[#allocation2 + $0x3a0] sm:$0xff]  ;;  %v2472_v2 = vadd.s32 %v6076_v49, %v11331_v56 }
 0x510   :  { %4698 = vmatmul.msk.f32.gmra.mxu2 %vm8656_vm5, %v10668_v44  ;;  %vm2595_vm15 = vmand %vm8666_vm0, %vm11316_vm10  ;;  %11317 = vst [vmem:[#allocation19_spill] sm:$0xff] %v8694_v26  ;;  %2832 = vmatpush.msra.mxu1 %v8696_v31  ;;  %v8713_v26 = vpop.f32.mrf.mxu2  ;;  %vm11325_vm10 = vcmp.eq.s32.totalorder %v6334_v22, %v11245_v23 }
 0x511   :  { %11318 = vst [vmem:[#allocation123_spill] sm:$0xff] %v8696_v31  ;;  %2858 = vmatpush.msra.mxu2 %v8699_v19  ;;  %vm8707_vm5 = vmand %vm8676_vm6, %vm11321_vm7  ;;  %2887 = vmatpush.msra.mxu3 %v5223_v21  ;;  %v5232_v31 = vld [vmem:[#allocation2 + $0x410] sm:$0xff]  ;;  %vm2532_vm7 = vcmp.eq.s32.totalorder %v11249_v8, %v2496_v20  ;;  %v5235_v21 = vld [vmem:[#allocation2 + $0x408] sm:$0xff]  ;;  %v11344_v8 = vmov 0 }
 0x512   :  { %11319 = vst [vmem:[#allocation135_spill] sm:$0xff] %v8699_v19  ;;  %3227 = vmatpush.msra.mxu0 %v5232_v31  ;;  %vm8720_vm0 = vmand %vm11325_vm10, %vm2531_vm8  ;;  %4702 = vmatmul.msk.f32.gmra.mxu3 %vm2595_vm15, %v10668_v44  ;;  %v8725_v19 = vld [vmem:[#allocation2 + $0x308] sm:$0xff]  ;;  %vm2530_vm10 = vcmp.eq.s32.totalorder %v11256_v16, %v2494_v17  ;;  %v5239_v16 = vld [vmem:[#allocation2 + $0xf8] sm:$0xff] }
 0x513   :  { %11324 = vst [vmem:[#allocation56_spill] sm:$0xff] %v8713_v26  ;;  %v11327_v3 = vsel %vm8720_vm0, 4294967295, %v11326_v3  ;;  %2833 = vmatpush.msra.mxu1 %v8725_v19  ;;  %2859 = vmatpush.msra.mxu2 %v8729_v33  ;;  %v8734_v23 = vpop.f32.mrf.mxu3  ;;  %v11333_v26 = vld [vmem:[#allocation73_spill] sm:$0xff]  ;;  %v8764_v17 = vld [vmem:[#allocation2 + $0x390] sm:$0xff]  ;;  %v11348_v20 = vld [vmem:[#allocation90_spill] sm:$0xff] }
 0x514   :  { %11328 = vst [vmem:[#allocation17_spill] sm:$0xff] %v11327_v3  ;;  %2888 = vmatpush.msra.mxu3 %v5226_v58  ;;  %3228 = vmatpush.msra.mxu0 %v5235_v21  ;;  %vm11334_vm8 = vcmp.eq.s32.totalorder %v11037_v55, %v11333_v26  ;;  %v8749_v58 = vld [vmem:[#allocation2 + $0x300] sm:$0xff]  ;;  %v11340_v26 = vmov 0 }
 0x515   :  { %11329 = vst [vmem:[#allocation138_spill] sm:$0xff] %v8725_v19  ;;  %4694 = vmatmul.msk.f32.gmra.mxu1 %vm8707_vm5, %v10668_v44  ;;  %vm8744_vm15 = vmand %vm8720_vm0, %vm11334_vm8  ;;  %vm11339_vm5 = vcmp.eq.s32.totalorder %v6334_v22, %v11257_v50  ;;  %vm11343_vm8 = vcmp.eq.s32.totalorder %v6334_v22, %v11261_v39  ;;  %v11347_v50 = vld [vmem:[#allocation100_spill] sm:$0xff]  ;;  %v11354_v19 = vmov 0  ;;  %v8806_v3 = vld [vmem:[#allocation2 + $0x380] sm:$0xff] }
 0x516   :  { %11330 = vst [vmem:[#allocation118_spill] sm:$0xff] %v8729_v33  ;;  %2834 = vmatpush.msra.mxu1 %v8749_v58  ;;  %vm8760_vm6 = vmand %vm11339_vm5, %vm2532_vm7  ;;  %2889 = vmatpush.msra.mxu3 %v5229_v14  ;;  %vm2508_vm7 = vcmp.eq.s32.totalorder %v11347_v50, %v2472_v2  ;;  %v2473_v14 = vadd.s32 %v6076_v49, %v11348_v20  ;;  %v5241_v39 = vld [vmem:[#allocation2 + $0xf0] sm:$0xff]  ;;  %v5257_v33 = vld [vmem:[#allocation2 + $0xc0] sm:$0xff] }
 0x517   :  { %11332 = vst [vmem:[#allocation20_spill] sm:$0xff] %v8734_v23  ;;  %v8752_v23 = vld [vmem:[#allocation2 + $0x398] sm:$0xff]  ;;  %v11341_v26 = vsel %vm8760_vm6, 4294967295, %v11340_v26  ;;  %3229 = vmatpush.msra.mxu0 %v5238_v34  ;;  %vm8770_vm0 = vmand %vm11343_vm8, %vm2530_vm10  ;;  %v11352_v49 = vld [vmem:[#allocation99_spill] sm:$0xff] }
 0x518   :  { %11337 = vst [vmem:[#allocation141_spill] sm:$0xff] %v8749_v58  ;;  %2860 = vmatpush.msra.mxu2 %v8752_v23  ;;  %3011 = vmatpush.msrb.mxu1 %v5239_v16  ;;  %v11345_v8 = vsel %vm8770_vm0, 4294967295, %v11344_v8  ;;  %v11349_v16 = vld [vmem:[#allocation69_spill] sm:$0xff]  ;;  %v8785_v58 = vld [vmem:[#allocation2 + $0x388] sm:$0xff]  ;;  %vm11353_vm10 = vcmp.eq.s32.totalorder %v6101_v11, %v11352_v49 }
 0x519   :  { %11338 = vst [vmem:[#allocation117_spill] sm:$0xff] %v8752_v23  ;;  %2890 = vmatpush.msra.mxu3 %v5232_v31  ;;  %4699 = vmatmul.msk.f32.gmra.mxu2 %vm8744_vm15, %v10668_v44  ;;  %vm11350_vm5 = vcmp.eq.s32.totalorder %v11023_v47, %v11349_v16  ;;  %v8788_v2 = vpop.f32.mrf.mxu1  ;;  %vm8793_vm8 = vmand %vm11353_vm10, %vm2508_vm7  ;;  %v5243_v16 = vld [vmem:[#allocation2 + $0xe8] sm:$0xff]  ;;  %v11361_v23 = vld [vmem:[#allocation108_spill] sm:$0xff] }
 0x51a   :  { %11342 = vst [vmem:[#allocation145_spill] sm:$0xff] %v8764_v17  ;;  %2861 = vmatpush.msra.mxu2 %v8764_v17  ;;  %vm2604_vm12 = vmand %vm8760_vm6, %vm11350_vm5  ;;  %3012 = vmatpush.msrb.mxu1 %v5241_v39  ;;  %v11355_v19 = vsel %vm8793_vm8, 4294967295, %v11354_v19  ;;  %v8797_v31 = vpop.f32.mrf.mxu2  ;;  %v11357_v39 = vld [vmem:[#allocation31_spill] sm:$0xff]  ;;  %v5245_v17 = vld [vmem:[#allocation2 + $0xe0] sm:$0xff] }
 0x51b   :  { %11346 = vst [vmem:[#allocation64_spill] sm:$0xff] %v11345_v8  ;;  %2891 = vmatpush.msra.mxu3 %v5235_v21  ;;  %vm11358_vm15 = vcmp.eq.s32.totalorder %v11269_v52, %v11357_v39  ;;  %v11359_v21 = vld [vmem:[#allocation103_spill] sm:$0xff]  ;;  %v11379_v8 = vld [vmem:[#allocation113_spill] sm:$0xff] }
 0x51c   :  { %11351 = vst [vmem:[#allocation147_spill] sm:$0xff] %v8785_v58  ;;  %2862 = vmatpush.msra.mxu2 %v8785_v58  ;;  %3013 = vmatpush.msrb.mxu1 %v5243_v16  ;;  %vm2602_vm5 = vmand %vm8770_vm0, %vm11358_vm15  ;;  %vm2509_vm6 = vcmp.eq.s32.totalorder %v11359_v21, %v2473_v14  ;;  %v2481_v58 = vadd.s32 %v10998_v51, %v11331_v56  ;;  %v5246_v16 = vld [vmem:[#allocation2 + $0x178] sm:$0xff] }
 0x51d   :  { %11356 = vst [vmem:[#allocation134_spill] sm:$0xff] %v11355_v19  ;;  %4703 = vmatmul.msk.f32.gmra.mxu3 %vm2604_vm12, %v10668_v44  ;;  %vm11362_vm12 = vcmp.eq.s32.totalorder %v7025_v53, %v11361_v23  ;;  %v8816_v39 = vpop.f32.mrf.mxu3  ;;  %v5247_v14 = vld [vmem:[#allocation2 + $0x1f8] sm:$0xff]  ;;  %4695 = vmatmul.msk.f32.gmra.mxu1 %vm2602_vm5, %v10668_v44  ;;  %v11368_v23 = vld [vmem:[#allocation167_spill] sm:$0xff] }
 0x51e   :  { %11360 = vst [vmem:[#allocation148_spill] sm:$0xff] %v8806_v3  ;;  %2863 = vmatpush.msra.mxu2 %v8806_v3  ;;  %2892 = vmatpush.msra.mxu3 %v5238_v34  ;;  %vm2580_vm7 = vmand %vm8793_vm8, %vm11362_vm12  ;;  %v11363_v34 = vld [vmem:[#allocation102_spill] sm:$0xff]  ;;  %v11365_v3 = vmov 0  ;;  %vm11369_vm12 = vcmp.eq.s32.totalorder %v6183_v48, %v11368_v23  ;;  %vm2517_vm5 = vcmp.eq.s32.totalorder %v11347_v50, %v2481_v58  ;;  %v5251_v19 = vld [vmem:[#allocation2 + $0xd0] sm:$0xff] }
 0x51f   :  { %3014 = vmatpush.msrb.mxu1 %v5245_v17  ;;  %vm11364_vm10 = vcmp.eq.s32.totalorder %v6101_v11, %v11363_v34  ;;  %v5248_v17 = vld [vmem:[#allocation2 + $0xd8] sm:$0xff]  ;;  %vm2919_vm8 = vmand %vm8261_vm3, %vm11369_vm12  ;;  %v2482_v11 = vadd.s32 %v10998_v51, %v11348_v20  ;;  %v11370_v23 = vld [vmem:[#allocation110_spill] sm:$0xff] }
 0x520   :  { %3040 = vmatpush.msrb.mxu2 %v5246_v16  ;;  %3069 = vmatpush.msrb.mxu3 %v5247_v14  ;;  %vm8822_vm15 = vmand %vm11364_vm10, %vm2509_vm6  ;;  %v5249_v16 = vld [vmem:[#allocation2 + $0x170] sm:$0xff]  ;;  %vm11371_vm6 = vcmp.eq.s32.totalorder %v7037_v45, %v11370_v23  ;;  %v5255_v58 = vld [vmem:[#allocation2 + $0x160] sm:$0xff] }
 0x521   :  { %v11366_v3 = vsel %vm8822_vm15, 4294967295, %v11365_v3  ;;  %3015 = vmatpush.msrb.mxu1 %v5248_v17  ;;  %v5250_v14 = vld [vmem:[#allocation2 + $0x1f0] sm:$0xff]  ;;  %4712 = vmatmul.msk.f32.vlgmr.msra.gmra.mxu2 %vm2580_vm7, %v10668_v44  ;;  %v5252_v17 = vld [vmem:[#allocation2 + $0x168] sm:$0xff]  ;;  %vm2581_vm3 = vmand %vm8822_vm15, %vm11371_vm6  ;;  %vm11372_vm7 = vcmp.eq.s32.totalorder %v6198_v10, %v11352_v49  ;;  %vm2518_vm15 = vcmp.eq.s32.totalorder %v11359_v21, %v2482_v11 }
 0x522   :  { %11367 = vst [vmem:[#allocation179_spill] sm:$0xff] %v11366_v3  ;;  %3041 = vmatpush.msrb.mxu2 %v5249_v16  ;;  %3070 = vmatpush.msrb.mxu3 %v5250_v14  ;;  %v5253_v16 = vld [vmem:[#allocation2 + $0x1e8] sm:$0xff]  ;;  %vm8844_vm10 = vmand %vm11372_vm7, %vm2517_vm5  ;;  %v11376_v14 = vld [vmem:[#allocation93_spill] sm:$0xff] }
 0x523   :  { %3016 = vmatpush.msrb.mxu1 %v5251_v19  ;;  %4721 = vmatmul.msk.f32.gmra.mxu0 %vm2919_vm8, %v10668_v44  ;;  %v11373_v19 = vmov 0  ;;  %v5256_v23 = vld [vmem:[#allocation2 + $0x1e0] sm:$0xff]  ;;  %v11378_v3 = vld [vmem:[#allocation112_spill] sm:$0xff] }
 0x524   :  { %3042 = vmatpush.msrb.mxu2 %v5252_v17  ;;  %3071 = vmatpush.msrb.mxu3 %v5253_v16  ;;  %v11374_v19 = vsel %vm8844_vm10, 4294967295, %v11373_v19  ;;  %v2480_v17 = vadd.s32 %v10998_v51, %v11376_v14  ;;  %v8850_v16 = vpop.f32.mrf.mxu1  ;;  %vm11380_vm8 = vcmp.eq.s32.totalorder %v11378_v3, %v11379_v8  ;;  %v2490_v51 = vadd.s32 %v11028_v5, %v11331_v56  ;;  %v11384_v8 = vld [vmem:[#allocation124_spill] sm:$0xff]  ;;  %v11390_v11 = vld [vmem:[#allocation106_spill] sm:$0xff] }
 0x525   :  { %3017 = vmatpush.msrb.mxu1 %v5254_v61  ;;  %11375 = vst [vmem:[#allocation25_spill] sm:$0xff] %v11374_v19  ;;  %v11381_v61 = vld [vmem:[#allocation125_spill] sm:$0xff]  ;;  %4716 = vmatmul.msk.f32.vlgmr.msra.gmra.mxu3 %vm2581_vm3, %v10668_v44  ;;  %vm11385_vm5 = vcmp.eq.s32.totalorder %v7025_v53, %v11384_v8  ;;  %vm11386_vm3 = vcmp.eq.s32.totalorder %v6198_v10, %v11363_v34  ;;  %v5261_v8 = vld [vmem:[#allocation2 + $0x150] sm:$0xff] }
 0x526   :  { %3043 = vmatpush.msrb.mxu2 %v5255_v58  ;;  %11377 = vst [vmem:[#allocation151_spill] sm:$0xff] %v8850_v16  ;;  %3072 = vmatpush.msrb.mxu3 %v5256_v23  ;;  %vm11382_vm12 = vnez %v11381_v61  ;;  %v8858_v58 = vpop.f32.mrf.mxu2  ;;  %v5258_v16 = vld [vmem:[#allocation2 + $0x158] sm:$0xff]  ;;  %vm2589_vm7 = vmand %vm8844_vm10, %vm11385_vm5  ;;  %v2247_v61 = vadd.f32 %v8609_v7, %v8601_v28  ;;  %v5262_v19 = vld [vmem:[#allocation2 + $0x1d0] sm:$0xff]  ;;  %vm2526_vm5 = vcmp.eq.s32.totalorder %v11347_v50, %v2490_v51 }
 0x527   :  { %vm2579_vm6 = vmand %vm11382_vm12, %vm11380_vm8  ;;  %11383 = vst [vmem:[#allocation168_spill] sm:$0xff] %v8858_v58  ;;  %3018 = vmatpush.msrb.mxu1 %v5257_v33  ;;  %v5259_v23 = vld [vmem:[#allocation2 + $0x1d8] sm:$0xff]  ;;  %v11387_v33 = vmov 0  ;;  %vm2516_vm12 = vcmp.eq.s32.totalorder %v11390_v11, %v2480_v17  ;;  %v5263_v28 = vld [vmem:[#allocation2 + $0xb0] sm:$0xff] }
 0x528   :  { %3044 = vmatpush.msrb.mxu2 %v5258_v16  ;;  %3073 = vmatpush.msrb.mxu3 %v5259_v23  ;;  %vm8872_vm8 = vmand %vm11386_vm3, %vm2518_vm15  ;;  %v8877_v16 = vpop.f32.mrf.mxu3  ;;  %v5260_v23 = vld [vmem:[#allocation2 + $0xb8] sm:$0xff]  ;;  %v5264_v7 = vld [vmem:[#allocation2 + $0x148] sm:$0xff] }
 0x529   :  { %4708 = vmatmul.msk.f32.vlgmr.msra.gmra.mxu1 %vm2579_vm6, %v10668_v44  ;;  %v11388_v33 = vsel %vm8872_vm8, 4294967295, %v11387_v33  ;;  %11391 = vst [vmem:[#allocation184_spill] sm:$0xff] %v8877_v16  ;;  %v11392_v58 = vld [vmem:[#allocation176_spill] sm:$0xff]  ;;  %4713 = vmatmul.msk.f32.gmra.mxu2 %vm2589_vm7, %v10668_v44  ;;  %v2491_v16 = vadd.s32 %v11028_v5, %v11348_v20  ;;  %v5266_v17 = vld [vmem:[#allocation2 + $0xa8] sm:$0xff] }
 0x52a   :  { %11389 = vst [vmem:[#allocation129_spill] sm:$0xff] %v11388_v33  ;;  %3019 = vmatpush.msrb.mxu1 %v5260_v23  ;;  %3045 = vmatpush.msrb.mxu2 %v5261_v8  ;;  %vm11393_vm6 = vcmp.eq.s32.totalorder %v6183_v48, %v11392_v58  ;;  %v11394_v58 = vld [vmem:[#allocation105_spill] sm:$0xff]  ;;  %v11399_v23 = vld [vmem:[#allocation130_spill] sm:$0xff]  ;;  %v2276_v8 = vadd.f32 %v8640_v32, %v2247_v61  ;;  %v11404_v32 = vld [vmem:[#allocation132_spill] sm:$0xff] }
 0x52b   :  { %vm2928_vm15 = vmand %vm8339_vm9, %vm11393_vm6  ;;  %3074 = vmatpush.msrb.mxu3 %v5262_v19  ;;  %vm11395_vm3 = vcmp.eq.s32.totalorder %v6198_v10, %v11394_v58  ;;  %v5265_v19 = vld [vmem:[#allocation2 + $0x1c8] sm:$0xff]  ;;  %vm11400_vm9 = vcmp.eq.s32.totalorder %v7037_v45, %v11399_v23  ;;  %v11402_v10 = vmov 0  ;;  %v11408_v33 = vld [vmem:[#allocation136_spill] sm:$0xff] }
 0x52c   :  { %3020 = vmatpush.msrb.mxu1 %v5263_v28  ;;  %3046 = vmatpush.msrb.mxu2 %v5264_v7  ;;  %vm8895_vm10 = vmand %vm11395_vm3, %vm2516_vm12  ;;  %v5267_v28 = vld [vmem:[#allocation2 + $0x140] sm:$0xff]  ;;  %vm11401_vm12 = vcmp.eq.s32.totalorder %v6252_v25, %v11352_v49  ;;  %v2489_v7 = vadd.s32 %v11028_v5, %v11376_v14  ;;  %v2499_v5 = vadd.s32 %v11058_v30, %v11331_v56  ;;  %v11534_v56 = vld [vmem:[#allocation84_spill] sm:$0xff] }
 0x52d   :  { %v11397_v43 = vsel %vm8895_vm10, 4294967295, %v11396_v43  ;;  %3075 = vmatpush.msrb.mxu3 %v5265_v19  ;;  %vm2590_vm7 = vmand %vm8872_vm8, %vm11400_vm9  ;;  %4722 = vmatmul.msk.f32.gmra.mxu0 %vm2928_vm15, %v10668_v44  ;;  %v5268_v19 = vld [vmem:[#allocation2 + $0x1c0] sm:$0xff]  ;;  %vm11405_vm15 = vcmp.eq.s32.totalorder %v11378_v3, %v11404_v32  ;;  %vm2527_vm9 = vcmp.eq.s32.totalorder %v11359_v21, %v2491_v16  ;;  %v2304_v51 = vpop.f32.mrf.mxu1  ;;  %v5270_v32 = vld [vmem:[#allocation2 + $0x138] sm:$0xff] }
 0x52e   :  { %11398 = vst [vmem:[#allocation152_spill] sm:$0xff] %v11397_v43  ;;  %3021 = vmatpush.msrb.mxu1 %v5266_v17  ;;  %3047 = vmatpush.msrb.mxu2 %v5267_v28  ;;  %vm8911_vm6 = vmand %vm11401_vm12, %vm2526_vm5  ;;  %v2333_v23 = vpop.f32.mrf.mxu2  ;;  %v5269_v17 = vld [vmem:[#allocation2 + $0xa0] sm:$0xff]  ;;  %v2305_v28 = vadd.f32 %v2304_v51, %v2276_v8  ;;  %v5271_v43 = vld [vmem:[#allocation2 + $0x1b8] sm:$0xff]  ;;  %vm11409_vm5 = vcmp.eq.s32.totalorder %v7025_v53, %v11408_v33 }
 0x52f   :  { %v11403_v10 = vsel %vm8911_vm6, 4294967295, %v11402_v10  ;;  %3076 = vmatpush.msrb.mxu3 %v5268_v19  ;;  %vm8922_vm3 = vmand %vm8895_vm10, %vm11405_vm15  ;;  %v2391_v19 = vpop.f32.mrf.mxu0  ;;  %vm2525_vm10 = vcmp.eq.s32.totalorder %v11390_v11, %v2489_v7  ;;  %v5272_v8 = vld [vmem:[#allocation2 + $0x98] sm:$0xff]  ;;  %v5273_v51 = vld [vmem:[#allocation2 + $0x130] sm:$0xff] }
 0x530   :  { %4717 = vmatmul.msk.f32.gmra.mxu3 %vm2590_vm7, %v10668_v44  ;;  %3022 = vmatpush.msrb.mxu1 %v5269_v17  ;;  %vm2598_vm12 = vmand %vm8911_vm6, %vm11409_vm5  ;;  %vm11410_vm7 = vcmp.eq.s32.totalorder %v6252_v25, %v11363_v34  ;;  %v11413_v61 = vld [vmem:[#allocation189_spill] sm:$0xff]  ;;  %v5274_v17 = vld [vmem:[#allocation2 + $0x1b0] sm:$0xff] }
 0x531   :  { %3048 = vmatpush.msrb.mxu2 %v5270_v32  ;;  %3077 = vmatpush.msrb.mxu3 %v5271_v43  ;;  %vm8943_vm15 = vmand %vm11410_vm7, %vm2527_vm9  ;;  %v2334_v43 = vadd.f32 %v2333_v23, %v2305_v28  ;;  %v2362_v33 = vpop.f32.mrf.mxu3  ;;  %vm2535_vm9 = vcmp.eq.s32.totalorder %v11347_v50, %v2499_v5  ;;  %v2500_v23 = vadd.s32 %v11058_v30, %v11348_v20  ;;  %v5275_v32 = vld [vmem:[#allocation2 + $0x90] sm:$0xff]  ;;  %v5278_v7 = vld [vmem:[#allocation2 + $0x88] sm:$0xff] }
 0x532   :  { %4709 = vmatmul.msk.f32.gmra.mxu1 %vm8922_vm3, %v10668_v44  ;;  %vm11414_vm3 = vcmp.eq.s32.totalorder %v6183_v48, %v11413_v61  ;;  %4714 = vmatmul.msk.f32.gmra.mxu2 %vm2598_vm12, %v10668_v44  ;;  %v11418_v48 = vmov 0  ;;  %v2498_v20 = vadd.s32 %v11058_v30, %v11376_v14  ;;  %v5280_v30 = vld [vmem:[#allocation2 + $0x1a0] sm:$0xff]  ;;  %v11425_v14 = vld [vmem:[#allocation143_spill] sm:$0xff]  ;;  %v5283_v61 = vld [vmem:[#allocation2 + $0x198] sm:$0xff] }
 0x533   :  { %3023 = vmatpush.msrb.mxu1 %v5272_v8  ;;  %3049 = vmatpush.msrb.mxu2 %v5273_v51  ;;  %vm8953_vm5 = vmand %vm8418_vm4, %vm11414_vm3  ;;  %v2363_v28 = vadd.f32 %v2362_v33, %v2334_v43  ;;  %v5276_v8 = vld [vmem:[#allocation2 + $0x128] sm:$0xff]  ;;  %vm11417_vm4 = vcmp.eq.s32.totalorder %v6252_v25, %v11394_v58  ;;  %v5279_v43 = vld [vmem:[#allocation2 + $0x120] sm:$0xff]  ;;  %v11423_v33 = vmov 0  ;;  %vm2536_vm6 = vcmp.eq.s32.totalorder %v11359_v21, %v2500_v23 }
 0x534   :  { %3078 = vmatpush.msrb.mxu3 %v5274_v17  ;;  %vm8966_vm7 = vmand %vm11417_vm4, %vm2525_vm10  ;;  %v11420_v51 = vld [vmem:[#allocation139_spill] sm:$0xff]  ;;  %vm11422_vm10 = vcmp.eq.s32.totalorder %v6334_v22, %v11352_v49  ;;  %v5281_v50 = vld [vmem:[#allocation2 + $0x80] sm:$0xff] }
 0x535   :  { %3024 = vmatpush.msrb.mxu1 %v5275_v32  ;;  %3050 = vmatpush.msrb.mxu2 %v5276_v8  ;;  %v11419_v48 = vsel %vm8966_vm7, 4294967295, %v11418_v48  ;;  %vm11421_vm12 = vcmp.eq.s32.totalorder %v7037_v45, %v11420_v51  ;;  %v8980_v25 = vadd.f32 %v2391_v19, %v2363_v28  ;;  %vm8987_vm4 = vmand %vm11422_vm10, %vm2535_vm9  ;;  %v5282_v19 = vld [vmem:[#allocation2 + $0x118] sm:$0xff]  ;;  %v11427_v16 = vld [vmem:[#allocation146_spill] sm:$0xff]  ;;  %v2253_v8 = vadd.f32 %v8797_v31, %v8788_v2 }
 0x536   :  { %3079 = vmatpush.msrb.mxu3 %v5277_v9  ;;  %vm2599_vm3 = vmand %vm8943_vm15, %vm11421_vm12  ;;  %4723 = vmatmul.msk.f32.gmra.mxu0 %vm8953_vm5, %v10668_v44  ;;  %v11424_v33 = vsel %vm8987_vm4, 4294967295, %v11423_v33  ;;  %vm11426_vm5 = vcmp.eq.s32.totalorder %v11378_v3, %v11425_v14  ;;  %vm11428_vm9 = vcmp.eq.s32.totalorder %v7025_v53, %v11427_v16  ;;  %v5284_v23 = vld [vmem:[#allocation2 + $0x2f8] sm:$0xff]  ;;  %v5285_v28 = vld [vmem:[#allocation2 + $0x110] sm:$0xff] }
 0x537   :  { %3025 = vmatpush.msrb.mxu1 %v5278_v7  ;;  %3051 = vmatpush.msrb.mxu2 %v5279_v43  ;;  %vm2597_vm12 = vmand %vm8966_vm7, %vm11426_vm5  ;;  %v8998_v5 = vpop.f32.mrf.mxu1  ;;  %vm2534_vm5 = vcmp.eq.s32.totalorder %v11390_v11, %v2498_v20  ;;  %v9008_v21 = vpop.f32.mrf.mxu0  ;;  %v5286_v32 = vld [vmem:[#allocation2 + $0x190] sm:$0xff]  ;;  %v5289_v9 = vld [vmem:[#allocation2 + $0x188] sm:$0xff]  ;;  %v2282_v20 = vadd.f32 %v8816_v39, %v2253_v8 }
 0x538   :  { %3080 = vmatpush.msrb.mxu3 %v5280_v30  ;;  %v9000_v49 = vpop.f32.mrf.mxu2  ;;  %vm2607_vm10 = vmand %vm8987_vm4, %vm11428_vm9  ;;  %vm11432_vm9 = vcmp.eq.s32.totalorder %v11023_v47, %v7824_v13  ;;  %v5287_v13 = vld [vmem:[#allocation2 + $0x2f0] sm:$0xff]  ;;  %v11436_v51 = vld [vmem:[#allocation150_spill] sm:$0xff] }
 0x539   :  { %4718 = vmatmul.msk.f32.gmra.mxu3 %vm2599_vm3, %v10668_v44  ;;  %3026 = vmatpush.msrb.mxu1 %v5281_v50  ;;  %vm11429_vm3 = vcmp.eq.s32.totalorder %v6334_v22, %v11363_v34  ;;  %vm2914_vm4 = vmand %vm8490_vm14, %vm11432_vm9  ;;  %vm11437_vm14 = vcmp.eq.s32.totalorder %v7037_v45, %v11436_v51  ;;  %v11438_v2 = vld [vmem:[#allocation154_spill] sm:$0xff]  ;;  %v11440_v43 = vld [vmem:[#allocation160_spill] sm:$0xff] }
 0x53a   :  { %3052 = vmatpush.msrb.mxu2 %v5282_v19  ;;  %3081 = vmatpush.msrb.mxu3 %v5283_v61  ;;  %vm9014_vm7 = vmand %vm11429_vm3, %vm2536_vm6  ;;  %vm11433_vm6 = vcmp.eq.s32.totalorder %v6334_v22, %v11394_v58  ;;  %v5290_v22 = vld [vmem:[#allocation2 + $0x2e8] sm:$0xff]  ;;  %v5291_v58 = vld [vmem:[#allocation2 + $0x100] sm:$0xff] }
 0x53b   :  { %4710 = vmatmul.msk.f32.gmra.mxu1 %vm2597_vm12, %v10668_v44  ;;  %v9023_v11 = vpop.f32.mrf.mxu3  ;;  %4715 = vmatmul.msk.f32.gmra.mxu2 %vm2607_vm10, %v10668_v44  ;;  %vm9029_vm12 = vmand %vm11433_vm6, %vm2534_vm5  ;;  %vm11439_vm5 = vcmp.eq.s32.totalorder %v11378_v3, %v11438_v2  ;;  %v5292_v31 = vld [vmem:[#allocation2 + $0x180] sm:$0xff]  ;;  %vm11442_vm6 = vcmp.eq.s32.totalorder %v11023_v47, %v7906_v12  ;;  %v5296_v12 = vld [vmem:[#allocation2 + $0x2c8] sm:$0xff] }
 0x53c   :  { %3127 = vmatpush.msra.mxu1 %v5284_v23  ;;  %3053 = vmatpush.msrb.mxu2 %v5285_v28  ;;  %vm2608_vm10 = vmand %vm9014_vm7, %vm11437_vm14  ;;  %v5293_v7 = vld [vmem:[#allocation2 + $0x2e0] sm:$0xff]  ;;  %v11461_v16 = vld [vmem:[#allocation75_spill] sm:$0xff] }
 0x53d   :  { %3082 = vmatpush.msrb.mxu3 %v5286_v32  ;;  %vm2606_vm3 = vmand %vm9029_vm12, %vm11439_vm5  ;;  %v11458_v61 = vld [vmem:[#allocation18_spill] sm:$0xff]  ;;  %v11463_v8 = vld [vmem:[#allocation71_spill] sm:$0xff] }
 0x53e   :  { %3128 = vmatpush.msra.mxu1 %v5287_v13  ;;  %3054 = vmatpush.msrb.mxu2 %v5288_v60  ;;  %vm2923_vm14 = vmand %vm8569_vm1, %vm11442_vm6  ;;  %v5301_v32 = vld [vmem:[#allocation2 + $0x2a0] sm:$0xff]  ;;  %v11464_v13 = vld [vmem:[#allocation131_spill] sm:$0xff] }
 0x53f   :  { %3083 = vmatpush.msrb.mxu3 %v5289_v9  ;;  %4736 = vmatmul.msk.f32.vlgmr.msrb.gmra.mxu0 %vm2914_vm4, %v10668_v44  ;;  %vm11441_vm4 = vcmp.eq.s32.totalorder %v11269_v52, %v11440_v43  ;;  %v2397_v30 = vpop.f32.mrf.mxu0  ;;  %v11465_v60 = vld [vmem:[#allocation173_spill] sm:$0xff]  ;;  %v11468_v51 = vld [vmem:[#allocation122_spill] sm:$0xff]  ;;  %v5303_v2 = vld [vmem:[#allocation2 + $0x290] sm:$0xff] }
 0x540   :  { %3129 = vmatpush.msra.mxu1 %v5290_v22  ;;  %3055 = vmatpush.msrb.mxu2 %v5291_v58  ;;  %vm2912_vm9 = vmand %vm8505_vm13, %vm11441_vm4  ;;  %vm11443_vm13 = vcmp.eq.s32.totalorder %v11037_v55, %v7865_v54  ;;  %v5297_v54 = vld [vmem:[#allocation2 + $0x2c0] sm:$0xff]  ;;  %v5302_v9 = vld [vmem:[#allocation2 + $0x298] sm:$0xff] }
 0x541   :  { %3084 = vmatpush.msrb.mxu3 %v5292_v31  ;;  %v2310_v14 = vpop.f32.mrf.mxu1  ;;  %v11469_v22 = vld [vmem:[#allocation78_spill] sm:$0xff]  ;;  %v11472_v58 = vld [vmem:[#allocation121_spill] sm:$0xff]  ;;  %v11474_v31 = vld [vmem:[#allocation135_spill] sm:$0xff] }
 0x542   :  { %3156 = vmatpush.msra.mxu2 %v8412_v35  ;;  %4719 = vmatmul.msk.f32.gmra.mxu3 %vm2608_vm10, %v10668_v44  ;;  %v2339_v50 = vpop.f32.mrf.mxu2  ;;  %v5294_v35 = vld [vmem:[#allocation2 + $0x2d8] sm:$0xff]  ;;  %v2311_v39 = vadd.f32 %v2310_v14, %v2282_v20  ;;  %vm2913_vm10 = vmand %vm8460_vm2, %vm11443_vm13  ;;  %v11479_v43 = vld [vmem:[#allocation74_spill] sm:$0xff] }
 0x543   :  { %3130 = vmatpush.msra.mxu1 %v5293_v7  ;;  %3185 = vmatpush.msra.mxu3 %v8471_v59  ;;  %v11475_v20 = vld [vmem:[#allocation49_spill] sm:$0xff]  ;;  %v11477_v7 = vld [vmem:[#allocation72_spill] sm:$0xff] }
 0x544   :  { %4711 = vmatmul.msk.f32.gmra.mxu1 %vm2606_vm3, %v10668_v44  ;;  %3157 = vmatpush.msra.mxu2 %v8433_v15  ;;  %v2340_v59 = vadd.f32 %v2339_v50, %v2311_v39  ;;  %vm11449_vm3 = vnez %v11286_v18  ;;  %v11455_v18 = vld [vmem:[#allocation50_spill] sm:$0xff]  ;;  %v11481_v39 = vld [vmem:[#allocation172_spill] sm:$0xff]  ;;  %v11541_v15 = vld [vmem:[#allocation95_spill] sm:$0xff] }
 0x545   :  { %3131 = vmatpush.msra.mxu1 %v5294_v35  ;;  %3186 = vmatpush.msra.mxu3 %v8496_v29  ;;  %v2368_v19 = vpop.f32.mrf.mxu3  ;;  %v11444_v29 = vld [vmem:[#allocation158_spill] sm:$0xff]  ;;  %vm11456_vm13 = vnez %v11455_v18 }
 0x546   :  { %4728 = vmatmul.msk.f32.vlgmr.msrb.gmra.mxu2 %vm2912_vm9, %v10668_v44  ;;  %v2369_v46 = vadd.f32 %v2368_v19, %v2340_v59  ;;  %vm11445_vm1 = vcmp.eq.s32.totalorder %v6106_v0, %v11444_v29  ;;  %vm11451_vm9 = vnez %v11309_v40  ;;  %v11457_v40 = vld [vmem:[#allocation111_spill] sm:$0xff]  ;;  %v11480_v35 = vld [vmem:[#allocation118_spill] sm:$0xff]  ;;  %v11487_v29 = vld [vmem:[#allocation188_spill] sm:$0xff] }
 0x547   :  { %3132 = vmatpush.msra.mxu1 %v5295_v42  ;;  %3158 = vmatpush.msra.mxu2 %v8452_v24  ;;  %vm2911_vm5 = vmand %vm7763_vm11, %vm11445_vm1  ;;  %v9082_v57 = vpop.f32.mrf.mxu0  ;;  %v5298_v24 = vld [vmem:[#allocation2 + $0x2b8] sm:$0xff]  ;;  %vm11450_vm11 = vcmp.eq.s32.totalorder %v11023_v47, %v7980_v38  ;;  %v11483_v42 = vld [vmem:[#allocation39_spill] sm:$0xff] }
 0x548   :  { %3187 = vmatpush.msra.mxu3 %v8526_v6  ;;  %4737 = vmatmul.msk.f32.gmra.mxu0 %vm2923_vm14, %v10668_v44  ;;  %v9080_v6 = vadd.f32 %v2397_v30, %v2369_v46  ;;  %vm2932_vm6 = vmand %vm11451_vm9, %vm11450_vm11  ;;  %vm11470_vm9 = vcmp.eq.s32.totalorder %v11023_v47, %v11469_v22  ;;  %v5305_v59 = vld [vmem:[#allocation2 + $0x280] sm:$0xff] }
 0x549   :  { %3133 = vmatpush.msra.mxu1 %v5296_v12  ;;  %3159 = vmatpush.msra.mxu2 %v8484_v4  ;;  %v5299_v4 = vld [vmem:[#allocation2 + $0x2b0] sm:$0xff]  ;;  %v11485_v46 = vld [vmem:[#allocation133_spill] sm:$0xff]  ;;  %v11498_v18 = vld [vmem:[#allocation82_spill] sm:$0xff] }
 0x54a   :  { %3188 = vmatpush.msra.mxu3 %v8544_v1  ;;  %v11447_v1 = vld [vmem:[#allocation166_spill] sm:$0xff] }
 0x54b   :  { %4732 = vmatmul.msk.f32.vlgmr.msrb.gmra.mxu3 %vm2913_vm10, %v10668_v44  ;;  %3134 = vmatpush.msra.mxu1 %v5297_v54  ;;  %vm11448_vm2 = vcmp.eq.s32.totalorder %v11269_v52, %v11447_v1  ;;  %v11490_v1 = vld [vmem:[#allocation123_spill] sm:$0xff] }
 0x54c   :  { %3160 = vmatpush.msra.mxu2 %v8499_v41  ;;  %3189 = vmatpush.msra.mxu3 %v8561_v36  ;;  %vm2921_vm4 = vmand %vm11449_vm3, %vm11448_vm2  ;;  %v9101_v41 = vpop.f32.mrf.mxu1  ;;  %v11452_v36 = vld [vmem:[#allocation128_spill] sm:$0xff]  ;;  %vm11466_vm3 = vcmp.eq.s32.totalorder %v11269_v52, %v11465_v60 }
 0x54d   :  { %4724 = vmatmul.msk.f32.vlgmr.msrb.gmra.mxu1 %vm2911_vm5, %v10668_v44  ;;  %v9110_v38 = vpop.f32.mrf.mxu2  ;;  %vm11462_vm5 = vnez %v11461_v16  ;;  %v11504_v16 = vld [vmem:[#allocation183_spill] sm:$0xff] }
 0x54e   :  { %3135 = vmatpush.msra.mxu1 %v5298_v24  ;;  %3161 = vmatpush.msra.mxu2 %v8523_v37  ;;  %v11453_v37 = vld [vmem:[#allocation22_spill] sm:$0xff]  ;;  %v11491_v24 = vld [vmem:[#allocation145_spill] sm:$0xff] }
 0x54f   :  { %3190 = vmatpush.msra.mxu3 %v8581_v63  ;;  %4729 = vmatmul.msk.f32.gmra.mxu2 %vm2921_vm4, %v10668_v44  ;;  %vm11454_vm14 = vcmp.eq.s32.totalorder %v11037_v55, %v11453_v37  ;;  %v5300_v63 = vld [vmem:[#allocation2 + $0x2a8] sm:$0xff]  ;;  %v9119_v23 = vpop.f32.mrf.mxu3  ;;  %v2691_v28 = vpop.f32.mrf.mxu0  ;;  %vm11467_vm4 = vnez %v11313_v62  ;;  %v11473_v62 = vld [vmem:[#allocation116_spill] sm:$0xff] }
 0x550   :  { %3136 = vmatpush.msra.mxu1 %v5299_v4  ;;  %3162 = vmatpush.msra.mxu2 %v8538_v27  ;;  %vm2922_vm10 = vmand %vm11456_vm13, %vm11454_vm14  ;;  %v11459_v27 = vld [vmem:[#allocation165_spill] sm:$0xff]  ;;  %vm11476_vm13 = vcmp.eq.s32.totalorder %v11037_v55, %v11475_v20  ;;  %v11492_v4 = vld [vmem:[#allocation87_spill] sm:$0xff] }
 0x551   :  { %3191 = vmatpush.msra.mxu3 %v11452_v36  ;;  %4738 = vmatmul.msk.f32.gmra.mxu0 %vm2932_vm6, %v10668_v44  ;;  %vm11460_vm1 = vcmp.eq.s32.totalorder %v6106_v0, %v11459_v27  ;;  %vm2930_vm11 = vmand %vm11467_vm4, %vm11466_vm3  ;;  %vm11471_vm6 = vnez %v11341_v26  ;;  %v5304_v26 = vld [vmem:[#allocation2 + $0x288] sm:$0xff]  ;;  %vm11488_vm4 = vcmp.eq.s32.totalorder %v11269_v52, %v11487_v29  ;;  %v11503_v27 = vld [vmem:[#allocation148_spill] sm:$0xff] }
 0x552   :  { %3137 = vmatpush.msra.mxu1 %v5300_v63  ;;  %3163 = vmatpush.msra.mxu2 %v11457_v40  ;;  %vm2920_vm2 = vmand %vm11462_vm5, %vm11460_vm1  ;;  %vm11482_vm5 = vcmp.eq.s32.totalorder %v6106_v0, %v11481_v39  ;;  %v11494_v36 = vld [vmem:[#allocation179_spill] sm:$0xff]  ;;  %v11496_v37 = vld [vmem:[#allocation138_spill] sm:$0xff] }
 0x553   :  { %3192 = vmatpush.msra.mxu3 %v11458_v61  ;;  %vm2941_vm14 = vmand %vm11471_vm6, %vm11470_vm9  ;;  %vm11493_vm9 = vcmp.eq.s32.totalorder %v7037_v45, %v11492_v4  ;;  %vm11495_vm6 = vnez %v11494_v36  ;;  %v11497_v52 = vld [vmem:[#allocation147_spill] sm:$0xff]  ;;  %v11500_v63 = vld [vmem:[#allocation17_spill] sm:$0xff] }
 0x554   :  { %4733 = vmatmul.msk.f32.gmra.mxu3 %vm2922_vm10, %v10668_v44  ;;  %3138 = vmatpush.msra.mxu1 %v5301_v32  ;;  %vm11478_vm10 = vnez %v11477_v7  ;;  %v11502_v61 = vld [vmem:[#allocation141_spill] sm:$0xff]  ;;  %v11524_v20 = vld [vmem:[#allocation152_spill] sm:$0xff] }
 0x555   :  { %3164 = vmatpush.msra.mxu2 %v11463_v8  ;;  %3193 = vmatpush.msra.mxu3 %v11464_v13  ;;  %vm2931_vm1 = vmand %vm11478_vm10, %vm11476_vm13  ;;  %vm11501_vm13 = vnez %v11500_v63  ;;  %v11508_v13 = vld [vmem:[#allocation94_spill] sm:$0xff]  ;;  %v11530_v39 = vld [vmem:[#allocation25_spill] sm:$0xff] }
 0x556   :  { %4725 = vmatmul.msk.f32.gmra.mxu1 %vm2920_vm2, %v10668_v44  ;;  %vm11484_vm2 = vnez %v11483_v42  ;;  %v11550_v4 = vld [vmem:[#allocation44_spill] sm:$0xff] }
 0x557   :  { %3139 = vmatpush.msra.mxu1 %v5302_v9  ;;  %3165 = vmatpush.msra.mxu2 %v11468_v51  ;;  %v2420_v47 = vpop.f32.mrf.mxu1  ;;  %v9148_v50 = vpop.f32.mrf.mxu0  ;;  %vm2929_vm3 = vmand %vm11484_vm2, %vm11482_vm5  ;;  %v11513_v9 = vld [vmem:[#allocation91_spill] sm:$0xff]  ;;  %v11515_v51 = vld [vmem:[#allocation134_spill] sm:$0xff] }
 0x558   :  { %3194 = vmatpush.msra.mxu3 %v11472_v58  ;;  %4730 = vmatmul.msk.f32.gmra.mxu2 %vm2930_vm11, %v10668_v44  ;;  %v2421_v30 = vadd.f32 %v2420_v47, %v8980_v25  ;;  %v2449_v14 = vpop.f32.mrf.mxu2  ;;  %v11486_v25 = vld [vmem:[#allocation117_spill] sm:$0xff]  ;;  %vm2939_vm11 = vmand %vm8770_vm0, %vm11488_vm4  ;;  %vm11499_vm0 = vcmp.eq.s32.totalorder %v11037_v55, %v11498_v18 }
 0x559   :  { %3140 = vmatpush.msra.mxu1 %v5303_v2  ;;  %3166 = vmatpush.msra.mxu2 %v11473_v62  ;;  %vm2940_vm10 = vmand %vm11501_vm13, %vm11499_vm0  ;;  %v11517_v58 = vld [vmem:[#allocation45_spill] sm:$0xff]  ;;  %v11518_v2 = vld [vmem:[#allocation36_spill] sm:$0xff] }
 0x55a   :  { %3195 = vmatpush.msra.mxu3 %v11474_v31  ;;  %4739 = vmatmul.msk.f32.gmra.mxu0 %vm2941_vm14, %v10668_v44  ;;  %v9157_v19 = vadd.f32 %v2449_v14, %v2421_v30  ;;  %vm2918_vm14 = vmand %vm11495_vm6, %vm11493_vm9  ;;  %vm11514_vm9 = vcmp.eq.s32.totalorder %v7025_v53, %v11513_v9  ;;  %vm11516_vm6 = vnez %v11515_v51  ;;  %vm11519_vm0 = vcmp.eq.s32.totalorder %v11517_v58, %v11518_v2  ;;  %v11520_v62 = vld [vmem:[#allocation85_spill] sm:$0xff]  ;;  %v11522_v31 = vld [vmem:[#allocation156_spill] sm:$0xff] }
 0x55b   :  { %3141 = vmatpush.msra.mxu1 %v5304_v26  ;;  %3167 = vmatpush.msra.mxu2 %v11479_v43  ;;  %v2662_v12 = vpop.f32.mrf.mxu3  ;;  %vm11521_vm13 = vnez %v11520_v62  ;;  %v11526_v43 = vld [vmem:[#allocation30_spill] sm:$0xff]  ;;  %v11559_v9 = vld [vmem:[#allocation181_spill] sm:$0xff] }
 0x55c   :  { %3196 = vmatpush.msra.mxu3 %v11480_v35  ;;  %v2692_v54 = vadd.f32 %v2691_v28, %v2662_v12  ;;  %v11506_v28 = vld [vmem:[#allocation76_spill] sm:$0xff]  ;;  %v11560_v62 = vld [vmem:[#allocation53_spill] sm:$0xff] }
 0x55d   :  { %4734 = vmatmul.msk.f32.gmra.mxu3 %vm2931_vm1, %v10668_v44  ;;  %3142 = vmatpush.msra.mxu1 %v5305_v59  ;;  %vm11505_vm1 = vcmp.eq.s32.totalorder %v6106_v0, %v11504_v16  ;;  %vm11507_vm5 = vnez %v11506_v28  ;;  %v11511_v0 = vld [vmem:[#allocation127_spill] sm:$0xff]  ;;  %v11528_v35 = vld [vmem:[#allocation140_spill] sm:$0xff]  ;;  %v11557_v16 = vld [vmem:[#allocation174_spill] sm:$0xff] }
 0x55e   :  { %3168 = vmatpush.msra.mxu2 %v11485_v46  ;;  %3197 = vmatpush.msra.mxu3 %v11486_v25  ;;  %vm2938_vm2 = vmand %vm11507_vm5, %vm11505_vm1  ;;  %vm11525_vm1 = vnez %v11524_v20  ;;  %v11532_v59 = vld [vmem:[#allocation55_spill] sm:$0xff]  ;;  %v11536_v12 = vld [vmem:[#allocation164_spill] sm:$0xff] }
 0x55f   :  { %4726 = vmatmul.msk.f32.gmra.mxu1 %vm2929_vm3, %v10668_v44  ;;  %v2697_v40 = vpop.f32.mrf.mxu0  ;;  %vm11509_vm3 = vcmp.eq.s32.totalorder %v7037_v45, %v11508_v13  ;;  %v11539_v25 = vld [vmem:[#allocation67_spill] sm:$0xff]  ;;  %v11558_v28 = vld [vmem:[#allocation178_spill] sm:$0xff] }
 0x560   :  { %3169 = vmatpush.msra.mxu2 %v11490_v1  ;;  %3198 = vmatpush.msra.mxu3 %v11491_v24  ;;  %vm2927_vm4 = vmand %vm8872_vm8, %vm11509_vm3  ;;  %v11544_v1 = vld [vmem:[#allocation81_spill] sm:$0xff]  ;;  %v11548_v24 = vld [vmem:[#allocation170_spill] sm:$0xff]  ;;  %v1842_v13 = vadd.f32 %v11558_v28, %v11557_v16 }
 0x561   :  { %4731 = vmatmul.msk.f32.gmra.mxu2 %vm2939_vm11, %v10668_v44  ;;  %v9190_v32 = vpop.f32.mrf.mxu1  ;;  %vm11512_vm11 = vnez %v11511_v0  ;;  %vm2915_vm8 = vmand %vm11521_vm13, %vm11519_vm0  ;;  %vm11537_vm0 = vcmp.eq.s32.totalorder %v11378_v3, %v11536_v12  ;;  %vm11538_vm13 = vnez %v11419_v48  ;;  %v11561_v20 = vld [vmem:[#allocation126_spill] sm:$0xff]  ;;  %v11565_v12 = vld [vmem:[#allocation92_spill] sm:$0xff] }
 0x562   :  { %3170 = vmatpush.msra.mxu2 %v11496_v37  ;;  %3199 = vmatpush.msra.mxu3 %v11497_v52  ;;  %v9193_v55 = vpop.f32.mrf.mxu2  ;;  %v11553_v52 = vld [vmem:[#allocation80_spill] sm:$0xff]  ;;  %v1871_v51 = vadd.f32 %v11559_v9, %v1842_v13 }
 0x563   :  { %4752 = vmatmul.msk.f32.vlgmr.msra.gmra.mxu0 %vm2918_vm14, %v10668_v44  ;;  %vm2917_vm14 = vmand %vm11516_vm6, %vm11514_vm9  ;;  %vm11533_vm6 = vcmp.eq.s32.totalorder %v11517_v58, %v11532_v59  ;;  %v11564_v59 = vld [vmem:[#allocation47_spill] sm:$0xff] }
 0x564   :  { %3171 = vmatpush.msra.mxu2 %v11502_v61  ;;  %3200 = vmatpush.msra.mxu3 %v11503_v27 }
 0x565   :  { %4735 = vmatmul.msk.f32.gmra.mxu3 %vm2940_vm10, %v10668_v44  ;;  %v9196_v8 = vpop.f32.mrf.mxu3  ;;  %vm11523_vm10 = vcmp.eq.s32.totalorder %v11378_v3, %v11522_v31  ;;  %v1900_v31 = vadd.f32 %v11560_v62, %v1871_v51 }
 0x566   :  { %vm2925_vm5 = vmand %vm11525_vm1, %vm11523_vm10  ;;  %vm11540_vm10 = vcmp.eq.s32.totalorder %v7037_v45, %v11539_v25 }
 0x567   :  { %4727 = vmatmul.msk.f32.gmra.mxu1 %vm2938_vm2, %v10668_v44  ;;  %v9212_v22 = vpop.f32.mrf.mxu0  ;;  %vm11527_vm2 = vcmp.eq.s32.totalorder %v7037_v45, %v11526_v43  ;;  %vm2945_vm1 = vmand %vm9014_vm7, %vm11540_vm10  ;;  %v11546_v45 = vld [vmem:[#allocation62_spill] sm:$0xff] }
 0x568   :  { %vm2936_vm3 = vmand %vm8943_vm15, %vm11527_vm2  ;;  %vm11535_vm15 = vnez %v11534_v56  ;;  %vm11543_vm2 = vnez %v11403_v10 }
 0x569   :  { %4744 = vmatmul.msk.f32.vlgmr.msra.gmra.mxu2 %vm11512_vm11, %v10668_v44  ;;  %vm11531_vm11 = vnez %v11530_v39 }
 0x56b   :  { %4753 = vmatmul.msk.f32.gmra.mxu0 %vm2927_vm4, %v10668_v44  ;;  %v2426_v7 = vpop.f32.mrf.mxu1  ;;  %vm11529_vm4 = vcmp.eq.s32.totalorder %v7025_v53, %v11528_v35 }
 0x56c   :  { %v2427_v47 = vadd.f32 %v2426_v7, %v9080_v6  ;;  %v2455_v26 = vpop.f32.mrf.mxu2  ;;  %vm2926_vm9 = vmand %vm11531_vm11, %vm11529_vm4  ;;  %vm11545_vm4 = vcmp.eq.s32.totalorder %v11517_v58, %v11544_v1  ;;  %vm11547_vm11 = vnez %v11546_v45  ;;  %v1929_v7 = vadd.f32 %v11561_v20, %v1900_v31  ;;  %v11570_v31 = vld [vmem:[#allocation61_spill] sm:$0xff] }
 0x56d   :  { %4748 = vmatmul.msk.f32.vlgmr.msra.gmra.mxu3 %vm2917_vm14, %v10668_v44  ;;  %vm2924_vm14 = vmand %vm11535_vm15, %vm11533_vm6  ;;  %vm11551_vm15 = vcmp.eq.s32.totalorder %v7025_v53, %v11550_v4 }
 0x56e   :  { %v9233_v30 = vadd.f32 %v2455_v26, %v2427_v47  ;;  %vm2933_vm7 = vmand %vm11547_vm11, %vm11545_vm4 }
 0x56f   :  { %4740 = vmatmul.msk.f32.vlgmr.msra.gmra.mxu1 %vm2915_vm8, %v10668_v44  ;;  %v2668_v14 = vpop.f32.mrf.mxu3  ;;  %v2807_v6 = vpop.f32.mrf.mxu0  ;;  %vm2934_vm8 = vmand %vm11538_vm13, %vm11537_vm0  ;;  %vm11554_vm13 = vcmp.eq.s32.totalorder %v11517_v58, %v11553_v52 }
 0x570   :  { %v9240_v42 = vadd.f32 %v2697_v40, %v2668_v14  ;;  %v11562_v14 = vld [vmem:[#allocation83_spill] sm:$0xff] }
 0x571   :  { %4745 = vmatmul.msk.f32.gmra.mxu2 %vm2925_vm5, %v10668_v44  ;;  %vm11542_vm5 = vcmp.eq.s32.totalorder %v7025_v53, %v11541_v15  ;;  %v1958_v35 = vadd.f32 %v11562_v14, %v1929_v7  ;;  %v11566_v15 = vld [vmem:[#allocation65_spill] sm:$0xff] }
 0x572   :  { %v11571_v14 = vld [vmem:[#allocation137_spill] sm:$0xff] }
 0x573   :  { %4754 = vmatmul.msk.f32.gmra.mxu0 %vm2936_vm3, %v10668_v44  ;;  %vm2935_vm3 = vmand %vm11543_vm2, %vm11542_vm5  ;;  %v1987_v25 = vadd.f32 %v11565_v12, %v1958_v35 }
 0x575   :  { %4749 = vmatmul.msk.f32.gmra.mxu3 %vm2926_vm9, %v10668_v44  ;;  %v9255_v46 = vpop.f32.mrf.mxu1  ;;  %vm11549_vm9 = vcmp.eq.s32.totalorder %v11378_v3, %v11548_v24  ;;  %v11555_v3 = vld [vmem:[#allocation98_spill] sm:$0xff]  ;;  %v2016_v1 = vadd.f32 %v11566_v15, %v1987_v25 }
 0x576   :  { %v9263_v29 = vpop.f32.mrf.mxu2  ;;  %vm2943_vm6 = vmand %vm9029_vm12, %vm11549_vm9  ;;  %vm11598_vm12 = vcmask 261120  }
 0x577   :  { %4741 = vmatmul.msk.f32.gmra.mxu1 %vm2924_vm14, %v10668_v44  ;;  %v9271_v48 = vpop.f32.mrf.mxu0  ;;  %vm11552_vm14 = vnez %v11424_v33 }
 0x578   :  { %vm2944_vm0 = vmand %vm11552_vm14, %vm11551_vm15 }
 0x579   :  { %4746 = vmatmul.msk.f32.gmra.mxu2 %vm2934_vm8, %v10668_v44  ;;  %v2671_v17 = vpop.f32.mrf.mxu3  ;;  %vm11556_vm8 = vnez %v11555_v3 }
 0x57a   :  { %vm2942_vm10 = vmand %vm11556_vm8, %vm11554_vm13 }
 0x57b   :  { %4755 = vmatmul.msk.f32.gmra.mxu0 %vm2945_vm1, %v10668_v44  ;;  %vm11599_vm1 = vmmov %vm11598_vm12 }
 0x57c   :  { %vm11600_vm5 = vmmov %vm11599_vm1 }
 0x57d   :  { %4750 = vmatmul.msk.f32.gmra.mxu3 %vm2935_vm3, %v10668_v44  ;;  %vm11602_vm2 = vmmov %vm11599_vm1 }
 0x57e   :  { %vm11603_vm3 = vmmov %vm11599_vm1 }
 0x57f   :  { %4742 = vmatmul.msk.f32.gmra.mxu1 %vm2933_vm7, %v10668_v44  ;;  %v2720_v10 = vpop.f32.mrf.mxu1  ;;  %v2813_v18 = vpop.f32.mrf.mxu0  ;;  %vm11604_vm4 = vmmov %vm11599_vm1 }
 0x580   :  { %v2721_v36 = vadd.f32 %v2720_v10, %v2692_v54  ;;  %v2749_v37 = vpop.f32.mrf.mxu2  ;;  %v11567_v10 = vld [vmem:[#allocation119_spill] sm:$0xff]  ;;  %vm11605_vm11 = vmmov %vm11599_vm1 }
 0x581   :  { %4747 = vmatmul.msk.f32.gmra.mxu2 %vm2943_vm6, %v10668_v44  ;;  %vm11606_vm7 = vmmov %vm11599_vm1 }
 0x582   :  { %v2750_v34 = vadd.f32 %v2749_v37, %v2721_v36  ;;  %v2778_v63 = vpop.f32.mrf.mxu3  ;;  %v11568_v37 = vld [vmem:[#allocation41_spill] sm:$0xff]  ;;  %vm11607_vm9 = vmmov %vm11599_vm1 }
 0x583   :  { %v2045_v52 = vadd.f32 %v11568_v37, %v2016_v1  ;;  %vm11608_vm6 = vmmov %vm11599_vm1 }
 0x584   :  { %v2779_v40 = vadd.f32 %v2778_v63, %v2750_v34  ;;  %v11569_v63 = vld [vmem:[#allocation59_spill] sm:$0xff]  ;;  %vm11609_vm15 = vmmov %vm11599_vm1 }
 0x585   :  { %4751 = vmatmul.msk.f32.gmra.mxu3 %vm2944_vm0, %v10668_v44  ;;  %v2461_v16 = vmax.f32 %v2045_v52, %v9157_v19  ;;  %vm11610_vm14 = vmmov %vm11599_vm1 }
 0x586   :  { %v2808_v53 = vadd.f32 %v2807_v6, %v2779_v40  ;;  %v11563_v6 = vld [vmem:[#allocation114_spill] sm:$0xff]  ;;  %vm11611_vm0 = vmmov %vm11599_vm1 }
 0x587   :  { %4743 = vmatmul.msk.f32.gmra.mxu1 %vm2942_vm10, %v10668_v44  ;;  %v2816_v27 = vpop.f32.mrf.mxu0  ;;  %v1848_v56 = vadd.f32 %v11564_v59, %v11563_v6  ;;  %v2701_v6 = vadd.f32 %v9212_v22, %v2671_v17  ;;  %vm11612_vm13 = vmmov %vm11611_vm0 }
 0x588   :  { %v9298_v61 = vpop.f32.mrf.mxu1  ;;  %vm11613_vm8 = vmmov %vm11611_vm0 }
 0x589   :  { %v9300_v33 = vpop.f32.mrf.mxu2  ;;  %v1877_v4 = vadd.f32 %v11567_v10, %v1848_v56  ;;  %v11572_v56 = vld [vmem:[#allocation68_spill] sm:$0xff]  ;;  %vm11614_vm10 = vmmov %vm11611_vm0 }
 0x58b   :  { %v1906_v40 = vadd.f32 %v11569_v63, %v1877_v4  ;;  %v11574_v4 = vld [vmem:[#allocation101_spill] sm:$0xff] }
 0x58c   :  { %v9302_v54 = vpop.f32.mrf.mxu3 }
 0x58d   :  { %v1935_v20 = vadd.f32 %v11570_v31, %v1906_v40 }
 0x58f   :  { %v9307_v2 = vpop.f32.mrf.mxu0  ;;  %v1964_v35 = vadd.f32 %v11571_v14, %v1935_v20 }
 0x591   :  { %v1993_v12 = vadd.f32 %v11572_v56, %v1964_v35 }
 0x592   :  { %v2726_v60 = vpop.f32.mrf.mxu1 }
 0x593   :  { %v2755_v0 = vpop.f32.mrf.mxu2  ;;  %v2727_v9 = vadd.f32 %v2726_v60, %v9240_v42  ;;  %v11573_v60 = vld [vmem:[#allocation115_spill] sm:$0xff] }
 0x594   :  { %v2022_v15 = vadd.f32 %v11573_v60, %v1993_v12  ;;  %v11577_v60 = vld [vmem:[#allocation19_spill] sm:$0xff] }
 0x595   :  { %v2784_v58 = vpop.f32.mrf.mxu3 }
 0x59a   :  { %v2729_v47 = vpop.f32.mrf.mxu1 }
 0x59b   :  { %v2730_v25 = vadd.f32 %v2729_v47, %v2701_v6  ;;  %v11575_v6 = vld [vmem:[#allocation185_spill] sm:$0xff] }
 0x59c   :  { %v2758_v26 = vpop.f32.mrf.mxu2 }
 0x5a0   :  { %v2787_v43 = vpop.f32.mrf.mxu3  ;;  %v9312_v39 = vpop.f32.mrf.mxu0 }
 0x5a4   :  { %v2865_v45 = vpop.f32.mrf.mxu2 }
 0x5a6   :  { %v2836_v24 = vpop.f32.mrf.mxu1 }
 0x5a7   :  { %v2837_v36 = vadd.f32 %v2836_v24, %v2808_v53  ;;  %v2756_v53 = vadd.f32 %v2755_v0, %v2727_v9 }
 0x5a8   :  { %v2894_v34 = vpop.f32.mrf.mxu3 }
 0x5a9   :  { %v2866_v3 = vadd.f32 %v2865_v45, %v2837_v36  ;;  %v2785_v59 = vadd.f32 %v2784_v58, %v2756_v53  ;;  %v2759_v45 = vadd.f32 %v2758_v26, %v2730_v25  ;;  %v2051_v36 = vadd.f32 %v11574_v4, %v2022_v15  ;;  %v11578_v15 = vld [vmem:[#allocation56_spill] sm:$0xff] }
 0x5aa   :  { %v9322_v13 = vpop.f32.mrf.mxu0 }
 0x5ab   :  { %v2895_v28 = vadd.f32 %v2894_v34, %v2866_v3  ;;  %v2814_v1 = vadd.f32 %v2813_v18, %v2785_v59  ;;  %v2788_v37 = vadd.f32 %v2787_v43, %v2759_v45  ;;  %v2463_v17 = vmax.f32 %v2051_v36, %v9233_v30  ;;  %v11576_v59 = vld [vmem:[#allocation21_spill] sm:$0xff] }
 0x5ac   :  { %v9327_v62 = vpop.f32.mrf.mxu2  ;;  %v1845_v56 = vadd.f32 %v11576_v59, %v11575_v6  ;;  %v5034_v36 = vld [vmem:[%s10199_s5 + $0x8] sm:$0xff] }
 0x5ad   :  { %v9325_v51 = vmax.f32 %v2461_v16, %v2895_v28  ;;  %v2817_v3 = vadd.f32 %v2816_v27, %v2788_v37  ;;  %3289 = vmatpush.bf16.msrb.mxu0 %v5034_v36  ;;  %5083 = vmatpush.bf16.msrb.mxu1 %v5034_v36 }
 0x5af   :  { %v9330_v7 = vpop.f32.mrf.mxu1 }
 0x5b3   :  { %v9334_v19 = vpop.f32.mrf.mxu3  ;;  %v9337_v42 = vpop.f32.mrf.mxu0 }
 0x5b5   :  { %v2871_v24 = vpop.f32.mrf.mxu2 }
 0x5b8   :  { %v2842_v0 = vpop.f32.mrf.mxu1 }
 0x5b9   :  { %v2843_v10 = vadd.f32 %v2842_v0, %v2814_v1  ;;  %v2250_v1 = vadd.f32 %v11578_v15, %v11577_v60 }
 0x5bb   :  { %v2872_v52 = vadd.f32 %v2871_v24, %v2843_v10  ;;  %v11579_v24 = vld [vmem:[#allocation192_spill] sm:$0xff]  ;;  %v2695_v10 = vadd.f32 %v9148_v50, %v9196_v8  ;;  %v11581_v50 = vld [vmem:[#allocation57_spill] sm:$0xff] }
 0x5bc   :  { %v2900_v22 = vpop.f32.mrf.mxu3  ;;  %v3115_v47 = vpop.f32.mrf.mxu0  ;;  %v1874_v0 = vadd.f32 %v11579_v24, %v1845_v56  ;;  %v11582_v56 = vld [vmem:[#allocation26_spill] sm:$0xff]  ;;  %v11583_v24 = vld [vmem:[#allocation23_spill] sm:$0xff] }
 0x5bd   :  { %v2901_v58 = vadd.f32 %v2900_v22, %v2872_v52  ;;  %v11580_v22 = vld [vmem:[#allocation20_spill] sm:$0xff] }
 0x5be   :  { %v2874_v40 = vpop.f32.mrf.mxu2  ;;  %v1903_v8 = vadd.f32 %v11581_v50, %v1874_v0  ;;  %v11584_v0 = vld [vmem:[#allocation79_spill] sm:$0xff] }
 0x5bf   :  { %v9342_v34 = vmax.f32 %v2463_v17, %v2901_v58  ;;  %v2279_v17 = vadd.f32 %v11580_v22, %v2250_v1  ;;  %v2724_v58 = vadd.f32 %v9298_v61, %v2695_v10  ;;  %v1851_v10 = vadd.f32 %v11584_v0, %v11583_v24 }
 0x5c0   :  { %v1932_v60 = vadd.f32 %v11582_v56, %v1903_v8 }
 0x5c1   :  { %v2845_v63 = vpop.f32.mrf.mxu1  ;;  %v2753_v61 = vadd.f32 %v9300_v33, %v2724_v58  ;;  %v5035_v33 = vld [vmem:[%s10199_s5 + $0x10] sm:$0xff] }
 0x5c2   :  { %v2846_v16 = vadd.f32 %v2845_v63, %v2817_v3  ;;  %v5038_v3 = vld [vmem:[%s10199_s5 + $0x28] sm:$0xff]  ;;  %v5036_v63 = vld [vmem:[%s10199_s5 + $0x18] sm:$0xff] }
 0x5c3   :  { %3370 = vmatpush.bf16.msrb.mxu3 %v5038_v3  ;;  %3330 = vmatpush.bf16.msrb.mxu2 %v5036_v63 }
 0x5c4   :  { %v9344_v18 = vadd.f32 %v2874_v40, %v2846_v16  ;;  %v2308_v40 = vadd.f32 %v8998_v5, %v2279_v17  ;;  %v5037_v5 = vld [vmem:[%s10199_s5 + $0x20] sm:$0xff] }
 0x5c5   :  { %v9346_v26 = vpop.f32.mrf.mxu3  ;;  %v9348_v31 = vpop.f32.mrf.mxu0 }
 0x5c7   :  { %3371 = vmatpush.bf16.msrb.mxu3 %v5037_v5  ;;  %3331 = vmatpush.bf16.msrb.mxu2 %v5035_v33 }
 0x5c9   :  { %v3057_v28 = vpop.f32.mrf.mxu2 }
 0x5ca   :  { %v3028_v9 = vpop.f32.mrf.mxu1 }
 0x5cb   :  { %v3029_v45 = vadd.f32 %v3028_v9, %v9307_v2  ;;  %v5033_v2 = vld [vmem:[%s10199_s5] sm:$0xff]  ;;  %v2337_v9 = vadd.f32 %v9000_v49, %v2308_v40 }
 0x5cc   :  { %3290 = vmatpush.bf16.msrb.mxu0 %v5033_v2  ;;  %5084 = vmatpush.bf16.msrb.mxu1 %v5033_v2  ;;  %v11586_v2 = vld [vmem:[#allocation104_spill] sm:$0xff] }
 0x5cd   :  { %v3058_v4 = vadd.f32 %v3057_v28, %v3029_v45 }
 0x5ce   :  { %v3086_v43 = vpop.f32.mrf.mxu3  ;;  %v9350_v30 = vpop.f32.mrf.mxu0 }
 0x5cf   :  { %v3087_v16 = vadd.f32 %v3086_v43, %v3058_v4  ;;  %v2782_v43 = vadd.f32 %v9302_v54, %v2753_v61  ;;  %v11585_v4 = vld [vmem:[#allocation29_spill] sm:$0xff]  ;;  %v11589_v61 = vld [vmem:[#allocation46_spill] sm:$0xff] }
 0x5d0   :  { %v1961_v36 = vadd.f32 %v11585_v4, %v1932_v60 }
 0x5d1   :  { %v3116_v15 = vadd.f32 %v3115_v47, %v3087_v16  ;;  %v2811_v22 = vadd.f32 %v9271_v48, %v2782_v43  ;;  %v11587_v47 = vld [vmem:[#allocation151_spill] sm:$0xff]  ;;  %v1880_v16 = vadd.f32 %v11589_v61, %v1851_v10 }
 0x5d2   :  { %v3060_v20 = vpop.f32.mrf.mxu2  ;;  %v1990_v54 = vadd.f32 %v11586_v2, %v1961_v36 }
 0x5d3   :  { %v3031_v53 = vpop.f32.mrf.mxu1 }
 0x5d4   :  { %v3032_v6 = vadd.f32 %v3031_v53, %v9312_v39  ;;  %v2366_v39 = vadd.f32 %v9023_v11, %v2337_v9  ;;  %v2840_v11 = vadd.f32 %v9330_v7, %v2811_v22  ;;  %v11590_v9 = vld [vmem:[#allocation109_spill] sm:$0xff]  ;;  %v11591_v7 = vld [vmem:[#allocation184_spill] sm:$0xff] }
 0x5d6   :  { %v3061_v1 = vadd.f32 %v3060_v20, %v3032_v6  ;;  %v11588_v20 = vld [vmem:[#allocation168_spill] sm:$0xff]  ;;  %v2395_v3 = vadd.f32 %v9008_v21, %v2366_v39  ;;  %v2019_v6 = vadd.f32 %v11590_v9, %v1990_v54 }
 0x5d7   :  { %v3089_v27 = vpop.f32.mrf.mxu3  ;;  %v9354_v12 = vpop.f32.mrf.mxu0  ;;  %v2256_v50 = vadd.f32 %v11588_v20, %v11587_v47  ;;  %v5040_v21 = vld [vmem:[%s10199_s5 + $0x38] sm:$0xff] }
 0x5d8   :  { %v3090_v17 = vadd.f32 %v3089_v27, %v3061_v1  ;;  %v2424_v48 = vadd.f32 %v9190_v32, %v2395_v3  ;;  %v2869_v27 = vadd.f32 %v9327_v62, %v2840_v11  ;;  %3410 = vmatpush.bf16.msra.mxu0 %v5040_v21  ;;  %v5039_v32 = vld [vmem:[%s10199_s5 + $0x30] sm:$0xff]  ;;  %v5042_v62 = vld [vmem:[%s10199_s5 + $0x48] sm:$0xff] }
 0x5d9   :  { %v2285_v33 = vadd.f32 %v11591_v7, %v2256_v50  ;;  %3450 = vmatpush.bf16.msra.mxu1 %v5042_v62  ;;  %v11595_v50 = vld [vmem:[#allocation89_spill] sm:$0xff] }
 0x5da   :  { %v3119_v56 = vadd.f32 %v9348_v31, %v3090_v17  ;;  %v2453_v43 = vadd.f32 %v9193_v55, %v2424_v48  ;;  %v11592_v31 = vld [vmem:[#allocation86_spill] sm:$0xff]  ;;  %v11597_v48 = vld [vmem:[#allocation107_spill] sm:$0xff] }
 0x5db   :  { %v3063_v14 = vpop.f32.mrf.mxu2 }
 0x5dc   :  { %v3034_v35 = vpop.f32.mrf.mxu1  ;;  %3411 = vmatpush.bf16.msra.mxu0 %v5039_v32  ;;  %v5047_v32 = vld [vmem:[%s10199_s5 + $0x70] sm:$0xff] }
 0x5dd   :  { %v3035_v63 = vadd.f32 %v3034_v35, %v9322_v13 }
 0x5df   :  { %v3064_v60 = vadd.f32 %v3063_v14, %v3035_v63  ;;  %v1909_v14 = vadd.f32 %v11592_v31, %v1880_v16 }
 0x5e0   :  { %v9356_v25 = vpop.f32.mrf.mxu3  ;;  %v3231_v59 = vpop.f32.mrf.mxu0 }
 0x5e1   :  { %v3093_v55 = vadd.f32 %v9356_v25, %v3064_v60 }
 0x5e4   :  { %v9367_v37 = vpop.f32.mrf.mxu1  ;;  %v9369_v52 = vpop.f32.mrf.mxu2 }
 0x5e5   :  { %v3038_v4 = vadd.f32 %v9367_v37, %v9337_v42 }
 0x5e8   :  { %v9385_v28 = vpop.f32.mrf.mxu3  ;;  %v3234_v5 = vpop.f32.mrf.mxu0 }
 0x5ec   :  { %v3144_v49 = vpop.f32.mrf.mxu1  ;;  %v3173_v45 = vpop.f32.mrf.mxu2 }
 0x5ed   :  { %v3145_v53 = vadd.f32 %v3144_v49, %v3116_v15  ;;  %v2314_v49 = vadd.f32 %v9101_v41, %v2285_v33  ;;  %v9436_v41 = vld [vmem:[%s10198_s4] ss:$0 sm:$0xff] }
 0x5ef   :  { %v3174_v58 = vadd.f32 %v3173_v45, %v3145_v53  ;;  %v11593_v45 = vld [vmem:[#allocation97_spill] sm:$0xff]  ;;  %v2898_v53 = vadd.f32 %v9334_v19, %v2869_v27  ;;  %v2343_v24 = vadd.f32 %v9110_v38, %v2314_v49  ;;  %v11594_v19 = vld [vmem:[#allocation96_spill] sm:$0xff]  ;;  %v3067_v38 = vadd.f32 %v9369_v52, %v3038_v4 }
 0x5f0   :  { %v3202_v8 = vpop.f32.mrf.mxu3  ;;  %v2048_v39 = vadd.f32 %v11593_v45, %v2019_v6  ;;  %v1938_v25 = vadd.f32 %v11594_v19, %v1909_v14  ;;  %v3237_v3 = vpop.f32.mrf.mxu0  ;;  %v5045_v14 = vld [vmem:[%s10199_s5 + $0x60] sm:$0xff] }
 0x5f1   :  { %v3203_v40 = vadd.f32 %v3202_v8, %v3174_v58  ;;  %v3122_v58 = vadd.f32 %v9350_v30, %v3093_v55  ;;  %v2372_v42 = vadd.f32 %v9119_v23, %v2343_v24  ;;  %v3096_v11 = vadd.f32 %v9385_v28, %v3067_v38  ;;  %v11596_v30 = vld [vmem:[#allocation42_spill] sm:$0xff] }
 0x5f2   :  { %v2462_v10 = vmax.f32 %v2048_v39, %v2453_v43  ;;  %v1967_v8 = vadd.f32 %v11595_v50, %v1938_v25 }
 0x5f3   :  { %v3232_v15 = vadd.f32 %v3231_v59, %v3203_v40  ;;  %v2401_v16 = vadd.f32 %v9082_v57, %v2372_v42  ;;  %v3125_v60 = vadd.f32 %v9354_v12, %v3096_v11  ;;  %v5041_v57 = vld [vmem:[%s10199_s5 + $0x40] sm:$0xff]  ;;  %v5046_v12 = vld [vmem:[%s10199_s5 + $0x68] sm:$0xff] }
 0x5f4   :  { %v3147_v13 = vpop.f32.mrf.mxu1  ;;  %v3176_v35 = vpop.f32.mrf.mxu2  ;;  %v2907_v17 = vmax.f32 %v2462_v10, %v2898_v53  ;;  %v1996_v61 = vadd.f32 %v11596_v30, %v1967_v8  ;;  %3451 = vmatpush.bf16.msra.mxu1 %v5041_v57  ;;  %3530 = vmatpush.bf16.msra.mxu3 %v5046_v12 }
 0x5f5   :  { %v3148_v1 = vadd.f32 %v3147_v13, %v3119_v56  ;;  %v3243_v36 = vmax.f32 %v9325_v51, %v3232_v15  ;;  %v2430_v56 = vadd.f32 %v9255_v46, %v2401_v16  ;;  %v5048_v46 = vld [vmem:[%s10199_s5 + $0x78] sm:$0xff]  ;;  %v2904_v15 = vadd.f32 %v9346_v26, %v9344_v18  ;;  %v5043_v18 = vld [vmem:[%s10199_s5 + $0x50] sm:$0xff] }
 0x5f6   :  { %v2025_v27 = vadd.f32 %v11597_v48, %v1996_v61 }
 0x5f7   :  { %v3177_v59 = vadd.f32 %v3176_v35, %v3148_v1  ;;  %v3251_v51 = vadd.f32 %v9436_v41, %v3243_v36  ;;  %v2459_v7 = vadd.f32 %v9263_v29, %v2430_v56  ;;  %v5044_v29 = vld [vmem:[%s10199_s5 + $0x58] sm:$0xff]  ;;  %v5049_v36 = vld [vmem:[%s10199_s5 + $0x80] sm:$0xff] }
 0x5f8   :  { %v3205_v0 = vpop.f32.mrf.mxu3  ;;  %v11601_v35 = vld [vmem:[#allocation120_spill] sm:$0xff]  ;;  %v3240_v31 = vpop.f32.mrf.mxu0  ;;  %3490 = vmatpush.bf16.msra.mxu2 %v5044_v29  ;;  %3531 = vmatpush.bf16.msra.mxu3 %v5045_v14 }
 0x5f9   :  { %v3206_v22 = vadd.f32 %v3205_v0, %v3177_v59  ;;  %v3255_v9 = vmax.f32 %v3251_v51, 0.0  ;;  %v2054_v43 = vadd.f32 %v11601_v35, %v2025_v27 }
 0x5fb   :  { %v3235_v2 = vadd.f32 %v3234_v5, %v3206_v22  ;;  %v2464_v49 = vmax.f32 %v2054_v43, %v2459_v7 }
 0x5fc   :  { %v3150_v54 = vpop.f32.mrf.mxu1  ;;  %v3179_v47 = vpop.f32.mrf.mxu2  ;;  %3491 = vmatpush.bf16.msra.mxu2 %v5043_v18  ;;  %v11619_v18 = vmov 0  }
 0x5fd   :  { %v3244_v37 = vmax.f32 %v2907_v17, %v3235_v2  ;;  %v3151_v20 = vadd.f32 %v3150_v54, %v3122_v58  ;;  %v2909_v26 = vmax.f32 %v2464_v49, %v2904_v15  ;;  %v11617_v15 = vld [vmem:[#allocation6_spill] sm:$0xff] }
 0x5ff   :  { %v3252_v63 = vadd.f32 %v9436_v41, %v3244_v37  ;;  %v3180_v40 = vadd.f32 %v3179_v47, %v3151_v20 }
 0x600   :  { %v3208_v52 = vpop.f32.mrf.mxu3 }
 0x601   :  { %v3256_v6 = vmax.f32 %v3252_v63, 0.0  ;;  %v3209_v23 = vadd.f32 %v3208_v52, %v3180_v40 }
 0x603   :  { %v3259_v5 = vpack.c.bf16 %v3256_v6, %v3255_v9  ;;  %v3238_v33 = vadd.f32 %v3237_v3, %v3209_v23 }
 0x604   :  { %v3153_v21 = vpop.f32.mrf.mxu1  ;;  %v3182_v28 = vpop.f32.mrf.mxu2 }
 0x605   :  { %4764 = vmatmul.msk.bf16.vlgmr.msrb.gmra.mxu0 %vm11598_vm12, %v3259_v5  ;;  %v3154_v13 = vadd.f32 %v3153_v21, %v3125_v60  ;;  %4792 = vmatmul.msk.bf16.vlgmr.msrb.gmra.mxu3 %vm11599_vm1, %v3259_v5  ;;  %v3245_v45 = vmax.f32 %v9342_v34, %v3238_v33  ;;  %v5050_v34 = vld [vmem:[%s10199_s5 + $0x88] sm:$0xff]  ;;  %vm11615_vm12 = vmmov %vm11611_vm0 }
 0x606   :  { %4778 = vmatmul.msk.bf16.vlgmr.msrb.gmra.mxu2 %vm11600_vm5, %v3259_v5  ;;  %3570 = vmatpush.bf16.msrb.mxu0 %v5048_v46  ;;  %vm11616_vm1 = vmmov %vm11611_vm0  ;;  %vm3302_vm5 = vcmask 523264  }
 0x607   :  { %v3183_v1 = vadd.f32 %v3182_v28, %v3154_v13  ;;  %v3253_v55 = vadd.f32 %v9436_v41, %v3245_v45 }
 0x608   :  { %v3211_v62 = vpop.f32.mrf.mxu3 }
 0x609   :  { %v3212_v39 = vadd.f32 %v3211_v62, %v3183_v1  ;;  %v3257_v0 = vmax.f32 %v3253_v55, 0.0  ;;  %v3663_v1 = vshra.s32 %v11617_v15, 5 }
 0x60a   :  { %3571 = vmatpush.bf16.msrb.mxu0 %v5047_v32  ;;  %v11618_v32 = vld [vmem:[#allocation7_spill] sm:$0xff] }
 0x60b   :  { %v3241_v53 = vadd.f32 %v3240_v31, %v3212_v39  ;;  %v3700_v62 = vshra.s32 %v11618_v32, 1 }
 0x60d   :  { %v3246_v59 = vmax.f32 %v2909_v26, %v3241_v53  ;;  %v3701_v14 = vshra.s32 %v3700_v62, 1  ;;  %v3666_v53 = vand.u32 31, %v11617_v15 }
 0x60f   :  { %v3254_v24 = vadd.f32 %v9436_v41, %v3246_v59  ;;  %v9606_v59 = vmul.u32 2, %v3701_v14 }
 0x611   :  { %v3258_v10 = vmax.f32 %v3254_v24, 0.0 }
 0x613   :  { %v3260_v4 = vpack.c.bf16 %v3258_v10, %v3257_v0  ;;  %v3702_v10 = vand.u32 1, %v3700_v62 }
 0x615   :  { %4806 = vmatmul.msk.bf16.vlgmr.msra.gmra.mxu0 %vm11602_vm2, %v3259_v5  ;;  %4765 = vmatmul.msk.bf16.vlgmr.msrb.gmra.mxu1 %vm11603_vm3, %v3260_v4  ;;  %vm3672_vm2 = vcmp.ge.s32.totalorder %v3663_v1, 3  ;;  %vm3669_vm3 = vcmp.ge.s32.totalorder %v3663_v1, 6 }
 0x616   :  { %4793 = vmatmul.msk.bf16.gmra.mxu3 %vm11604_vm4, %v3260_v4  ;;  %4779 = vmatmul.msk.bf16.gmra.mxu2 %vm11605_vm11, %v3260_v4  ;;  %v3675_v26 = vsel %vm3672_vm2, 1, %v11619_v18 }
 0x617   :  { %3610 = vmatpush.bf16.msrb.mxu1 %v5050_v34  ;;  %v9604_v55 = vsel %vm3669_vm3, 2, %v3675_v26  ;;  %v9617_v34 = vand.u32 15, %v3666_v53 }
 0x618   :  { %v3681_v0 = vmul.u32 3, %v9604_v55 }
 0x61b   :  { %3611 = vmatpush.bf16.msrb.mxu1 %v5049_v36  ;;  %v9620_v36 = vand.u32 1, %v11618_v32 }
 0x625   :  { %4807 = vmatmul.msk.bf16.gmra.mxu0 %vm11606_vm7, %v3260_v4  ;;  %4820 = vmatmul.msk.bf16.vlgmr.msra.gmra.mxu1 %vm11607_vm9, %v3259_v5 }
 0x626   :  { %4848 = vmatmul.msk.bf16.vlgmr.msra.gmra.mxu3 %vm11608_vm6, %v3259_v5  ;;  %4834 = vmatmul.msk.bf16.vlgmr.msra.gmra.mxu2 %vm11609_vm15, %v3259_v5 }
 0x635   :  { %4862 = vmatmul.msk.bf16.vlgmr.msrb.gmra.mxu0 %vm11610_vm14, %v3259_v5  ;;  %4821 = vmatmul.msk.bf16.gmra.mxu1 %vm11611_vm0, %v3260_v4 }
 0x636   :  { %4849 = vmatmul.msk.bf16.gmra.mxu3 %vm11612_vm13, %v3260_v4  ;;  %4835 = vmatmul.msk.bf16.gmra.mxu2 %vm11613_vm8, %v3260_v4 }
 0x645   :  { %4863 = vmatmul.msk.bf16.gmra.mxu0 %vm11614_vm10, %v3260_v4  ;;  %4876 = vmatmul.msk.bf16.vlgmr.msrb.gmra.mxu1 %vm11615_vm12, %v3259_v5 }
 0x655   :  { %4877 = vmatmul.msk.bf16.gmra.mxu1 %vm11616_vm1, %v3260_v4  ;;  %v9615_v4 = vshra.s32 %v3666_v53, 4 }
 0x657   :  { %vm3703_vm4 = vcmp.eq.s32.totalorder %v9620_v36, %v9615_v4 }
 0x682   :  { %v3292_v41 = vpop.f32.mrf.mxu0 }
 0x683   :  { %3303 = vst.msk [vmem:[#allocation3] sm:$0xff] %vm3302_vm5, %v3292_v41  ;;  %v9623_v41 = vadd.s32 4294967295, %v9606_v59 }
 0x688   :  { %v3373_v22 = vpop.f32.mrf.mxu3 }
 0x689   :  { %3383 = vst.msk [vmem:[#allocation3 + $0x40] sm:$0xff] %vm3302_vm5, %v3373_v22  ;;  %v3333_v19 = vpop.f32.mrf.mxu2 }
 0x68a   :  { %v3294_v25 = vpop.f32.mrf.mxu0  ;;  %3343 = vst.msk [vmem:[#allocation3 + $0x20] sm:$0xff] %vm3302_vm5, %v3333_v19  ;;  %v3684_v19 = vsub.s32 %v3663_v1, %v3681_v0 }
 0x68b   :  { %3304 = vst.msk [vmem:[#allocation3 + $0x8] sm:$0xff] %vm3302_vm5, %v3294_v25  ;;  %v9628_v25 = vmul.u32 2, %v3702_v10 }
 0x690   :  { %v3375_v17 = vpop.f32.mrf.mxu3  ;;  %v9565_v33 = vld [vmem:[#allocation3 + $0x40] sm:$0xff] }
 0x691   :  { %3384 = vst.msk [vmem:[#allocation3 + $0x48] sm:$0xff] %vm3302_vm5, %v3375_v17  ;;  %v3335_v58 = vpop.f32.mrf.mxu2  ;;  %v9591_v31 = vld [vmem:[#allocation3 + $0x20] sm:$0xff]  ;;  %v10624_v17 = vshra.s32 %v9617_v34, 2 }
 0x692   :  { %v3413_v38 = vpop.f32.mrf.mxu0  ;;  %v3297_v2 = vpop.f32.mrf.mxu1  ;;  %3344 = vst.msk [vmem:[#allocation3 + $0x28] sm:$0xff] %vm3302_vm5, %v3335_v58  ;;  %v9625_v22 = vld [vmem:[#allocation3 + $0x8] sm:$0xff]  ;;  %v3696_v58 = vand.u32 3, %v9617_v34 }
 0x693   :  { %3423 = vst.msk [vmem:[#allocation3 + $0x60] sm:$0xff] %vm3302_vm5, %v3413_v38  ;;  %v3708_v38 = vadd.s32 %v9623_v41, %v9604_v55 }
 0x694   :  { %3305 = vst.msk [vmem:[#allocation3 + $0x10] sm:$0xff] %vm3302_vm5, %v3297_v2  ;;  %v9638_v2 = vld [vmem:[#allocation3] sm:$0xff] }
 0x695   :  { %vm3711_vm11 = vcmp.eq.s32.totalorder %v10624_v17, %v3708_v38 }
 0x696   :  { %vm9655_vm7 = vmand %vm3703_vm4, %vm3711_vm11 }
 0x698   :  { %v9560_v7 = vld [vmem:[#allocation3 + $0x48] sm:$0xff] }
 0x699   :  { %v3378_v54 = vpop.f32.mrf.mxu3  ;;  %v3338_v47 = vpop.f32.mrf.mxu2  ;;  %v9584_v43 = vld [vmem:[#allocation3 + $0x28] sm:$0xff] }
 0x69a   :  { %v3415_v42 = vpop.f32.mrf.mxu0  ;;  %v3299_v51 = vpop.f32.mrf.mxu1  ;;  %3385 = vst.msk [vmem:[#allocation3 + $0x50] sm:$0xff] %vm3302_vm5, %v3378_v54  ;;  %v9541_v48 = vld [vmem:[#allocation3 + $0x60] sm:$0xff]  ;;  %v3794_v54 = vadd.s32 %v9628_v25, %v3684_v19 }
 0x69b   :  { %3424 = vst.msk [vmem:[#allocation3 + $0x68] sm:$0xff] %vm3302_vm5, %v3415_v42  ;;  %v9609_v24 = vld [vmem:[#allocation3 + $0x10] sm:$0xff] }
 0x69c   :  { %3306 = vst.msk [vmem:[#allocation3 + $0x18] sm:$0xff] %vm3302_vm5, %v3299_v51  ;;  %vm9659_vm9 = vcmp.eq.s32.totalorder %v3696_v58, %v3794_v54 }
 0x69d   :  { %3345 = vst.msk [vmem:[#allocation3 + $0x30] sm:$0xff] %vm3302_vm5, %v3338_v47  ;;  %v9647_v47 = vadd.s32 4294967295, %v9628_v25  ;;  %vm3800_vm6 = vmand %vm9655_vm7, %vm9659_vm9 }
 0x6a1   :  { %v3380_v37 = vpop.f32.mrf.mxu3  ;;  %v3340_v20 = vpop.f32.mrf.mxu2  ;;  %v9554_v28 = vld [vmem:[#allocation3 + $0x50] sm:$0xff] }
 0x6a2   :  { %v3418_v50 = vpop.f32.mrf.mxu0  ;;  %v3453_v8 = vpop.f32.mrf.mxu1  ;;  %3386 = vst.msk [vmem:[#allocation3 + $0x58] sm:$0xff] %vm3302_vm5, %v3380_v37  ;;  %v9536_v23 = vld [vmem:[#allocation3 + $0x68] sm:$0xff] }
 0x6a3   :  { %3425 = vst.msk [vmem:[#allocation3 + $0x70] sm:$0xff] %vm3302_vm5, %v3418_v50  ;;  %v9596_v45 = vld [vmem:[#allocation3 + $0x18] sm:$0xff]  ;;  %v3719_v50 = vadd.s32 %v9647_v47, %v3684_v19 }
 0x6a4   :  { %3463 = vst.msk [vmem:[#allocation3 + $0x80] sm:$0xff] %vm3302_vm5, %v3453_v8  ;;  %v9578_v35 = vld [vmem:[#allocation3 + $0x30] sm:$0xff] }
 0x6a5   :  { %3346 = vst.msk [vmem:[#allocation3 + $0x38] sm:$0xff] %vm3302_vm5, %v3340_v20  ;;  %vm9677_vm15 = vcmp.eq.s32.totalorder %v3696_v58, %v3719_v50 }
 0x6a6   :  { %vm3725_vm14 = vmand %vm9655_vm7, %vm9677_vm15 }
 0x6a9   :  { %v3533_v3 = vpop.f32.mrf.mxu3  ;;  %v3493_v11 = vpop.f32.mrf.mxu2  ;;  %v9546_v5 = vld [vmem:[#allocation3 + $0x58] sm:$0xff] }
 0x6aa   :  { %v3420_v63 = vpop.f32.mrf.mxu0  ;;  %v3455_v40 = vpop.f32.mrf.mxu1  ;;  %3543 = vst.msk [vmem:[#allocation3 + $0xc0] sm:$0xff] %vm3302_vm5, %v3533_v3  ;;  %v9530_v6 = vld [vmem:[#allocation3 + $0x70] sm:$0xff] }
 0x6ab   :  { %3426 = vst.msk [vmem:[#allocation3 + $0x78] sm:$0xff] %vm3302_vm5, %v3420_v63  ;;  %v9817_v15 = vld [vmem:[#allocation3 + $0x80] sm:$0xff] }
 0x6ac   :  { %3464 = vst.msk [vmem:[#allocation3 + $0x88] sm:$0xff] %vm3302_vm5, %v3455_v40  ;;  %v9570_v12 = vld [vmem:[#allocation3 + $0x38] sm:$0xff] }
 0x6ad   :  { %3503 = vst.msk [vmem:[#allocation3 + $0xa0] sm:$0xff] %vm3302_vm5, %v3493_v11  ;;  %v11626_v11 = vld [vmem:[#allocation8_spill] sm:$0xff] }
 0x6ae   :  { %v3664_v63 = vshra.s32 %v11626_v11, 5 }
 0x6b0   :  { %vm3673_vm0 = vcmp.ge.s32.totalorder %v3664_v63, 3  ;;  %vm3670_vm13 = vcmp.ge.s32.totalorder %v3664_v63, 6 }
 0x6b1   :  { %v3535_v30 = vpop.f32.mrf.mxu3  ;;  %v3495_v61 = vpop.f32.mrf.mxu2 }
 0x6b2   :  { %v3573_v52 = vpop.f32.mrf.mxu0  ;;  %v9523_v16 = vld [vmem:[#allocation3 + $0x78] sm:$0xff]  ;;  %v3458_v9 = vpop.f32.mrf.mxu1  ;;  %3544 = vst.msk [vmem:[#allocation3 + $0xc8] sm:$0xff] %vm3302_vm5, %v3535_v30 }
 0x6b3   :  { %3583 = vst.msk [vmem:[#allocation3 + $0xe0] sm:$0xff] %vm3302_vm5, %v3573_v52  ;;  %3734 = vmatpush.msrb.mxu2 %v9523_v16  ;;  %3888 = vmatpush.msra.mxu0 %v9523_v16 }
 0x6b4   :  { %3465 = vst.msk [vmem:[#allocation3 + $0x90] sm:$0xff] %vm3302_vm5, %v3458_v9  ;;  %3809 = vmatpush.msra.mxu1 %v9523_v16 }
 0x6b5   :  { %3735 = vmatpush.msrb.mxu2 %v9530_v6  ;;  %3889 = vmatpush.msra.mxu0 %v9530_v6  ;;  %3504 = vst.msk [vmem:[#allocation3 + $0xa8] sm:$0xff] %vm3302_vm5, %v3495_v61 }
 0x6b6   :  { %3810 = vmatpush.msra.mxu1 %v9530_v6 }
 0x6b7   :  { %3736 = vmatpush.msrb.mxu2 %v9536_v23  ;;  %3890 = vmatpush.msra.mxu0 %v9536_v23 }
 0x6b8   :  { %3811 = vmatpush.msra.mxu1 %v9536_v23 }
 0x6b9   :  { %3737 = vmatpush.msrb.mxu2 %v9541_v48  ;;  %3891 = vmatpush.msra.mxu0 %v9541_v48  ;;  %v3538_v27 = vpop.f32.mrf.mxu3  ;;  %v3498_v56 = vpop.f32.mrf.mxu2 }
 0x6ba   :  { %v3575_v60 = vpop.f32.mrf.mxu0  ;;  %v3460_v21 = vpop.f32.mrf.mxu1  ;;  %3545 = vst.msk [vmem:[#allocation3 + $0xd0] sm:$0xff] %vm3302_vm5, %v3538_v27  ;;  %3812 = vmatpush.msra.mxu1 %v9541_v48  ;;  %v9691_v30 = vld [vmem:[#allocation3 + $0xe0] sm:$0xff]  ;;  %v3676_v27 = vsel %vm3673_vm0, 1, %v11619_v18 }
 0x6bb   :  { %3584 = vst.msk [vmem:[#allocation3 + $0xe8] sm:$0xff] %vm3302_vm5, %v3575_v60  ;;  %3738 = vmatpush.msrb.mxu2 %v9546_v5  ;;  %3892 = vmatpush.msra.mxu0 %v9546_v5 }
 0x6bc   :  { %3466 = vst.msk [vmem:[#allocation3 + $0x98] sm:$0xff] %vm3302_vm5, %v3460_v21  ;;  %3813 = vmatpush.msra.mxu1 %v9546_v5  ;;  %v9712_v21 = vld [vmem:[#allocation3 + $0xc8] sm:$0xff] }
 0x6bd   :  { %3739 = vmatpush.msrb.mxu2 %v9554_v28  ;;  %3893 = vmatpush.msra.mxu0 %v9554_v28  ;;  %3505 = vst.msk [vmem:[#allocation3 + $0xb0] sm:$0xff] %vm3302_vm5, %v3498_v56  ;;  %v11627_v56 = vld [vmem:[#allocation9_spill] sm:$0xff]  ;;  %v9746_v53 = vld [vmem:[#allocation3 + $0xa8] sm:$0xff] }
 0x6be   :  { %3814 = vmatpush.msra.mxu1 %v9554_v28  ;;  %v9708_v60 = vshra.s32 %v11627_v56, 5 }
 0x6bf   :  { %3740 = vmatpush.msrb.mxu2 %v9560_v7  ;;  %3894 = vmatpush.msra.mxu0 %v9560_v7 }
 0x6c0   :  { %3815 = vmatpush.msra.mxu1 %v9560_v7  ;;  %vm3674_vm8 = vcmp.ge.s32.totalorder %v9708_v60, 3  ;;  %vm3671_vm10 = vcmp.ge.s32.totalorder %v9708_v60, 6 }
 0x6c1   :  { %3741 = vmatpush.msrb.mxu2 %v9565_v33  ;;  %3895 = vmatpush.msra.mxu0 %v9565_v33  ;;  %v3540_v13 = vpop.f32.mrf.mxu3  ;;  %v3500_v57 = vpop.f32.mrf.mxu2  ;;  %v9703_v9 = vld [vmem:[#allocation3 + $0xd0] sm:$0xff] }
 0x6c2   :  { %v3578_v46 = vpop.f32.mrf.mxu0  ;;  %v3613_v29 = vpop.f32.mrf.mxu1  ;;  %3546 = vst.msk [vmem:[#allocation3 + $0xd8] sm:$0xff] %vm3302_vm5, %v3540_v13  ;;  %3816 = vmatpush.msra.mxu1 %v9565_v33  ;;  %v9682_v40 = vld [vmem:[#allocation3 + $0xe8] sm:$0xff]  ;;  %v3667_v13 = vand.u32 31, %v11626_v11 }
 0x6c3   :  { %3585 = vst.msk [vmem:[#allocation3 + $0xf0] sm:$0xff] %vm3302_vm5, %v3578_v46  ;;  %3742 = vmatpush.msrb.mxu2 %v9570_v12  ;;  %3896 = vmatpush.msra.mxu0 %v9570_v12  ;;  %v9720_v46 = vld [vmem:[#allocation3 + $0xc0] sm:$0xff]  ;;  %v9771_v11 = vld [vmem:[#allocation3 + $0x98] sm:$0xff] }
 0x6c4   :  { %3623 = vst.msk [vmem:[#allocation3 + $0x100] sm:$0xff] %vm3302_vm5, %v3613_v29  ;;  %3817 = vmatpush.msra.mxu1 %v9570_v12  ;;  %v9734_v14 = vand.u32 15, %v3667_v13  ;;  %v9757_v58 = vshra.s32 %v3667_v13, 4  ;;  %v9786_v13 = vld [vmem:[#allocation3 + $0x90] sm:$0xff] }
 0x6c5   :  { %3743 = vmatpush.msrb.mxu2 %v9578_v35  ;;  %3897 = vmatpush.msra.mxu0 %v9578_v35  ;;  %3506 = vst.msk [vmem:[#allocation3 + $0xb8] sm:$0xff] %vm3302_vm5, %v3500_v57  ;;  %v9718_v57 = vsel %vm3670_vm13, 2, %v3676_v27 }
 0x6c6   :  { %3818 = vmatpush.msra.mxu1 %v9578_v35  ;;  %v3682_v62 = vmul.u32 3, %v9718_v57  ;;  %v10623_v38 = vshra.s32 %v9734_v14, 2  ;;  %v3709_v54 = vadd.s32 %v9623_v41, %v9718_v57  ;;  %vm3704_vm12 = vcmp.eq.s32.totalorder %v9620_v36, %v9757_v58 }
 0x6c7   :  { %3744 = vmatpush.msrb.mxu2 %v9584_v43  ;;  %3898 = vmatpush.msra.mxu0 %v9584_v43 }
 0x6c8   :  { %3819 = vmatpush.msra.mxu1 %v9584_v43  ;;  %v3685_v0 = vsub.s32 %v3664_v63, %v3682_v62  ;;  %v3697_v63 = vand.u32 3, %v9734_v14  ;;  %vm3712_vm1 = vcmp.eq.s32.totalorder %v10623_v38, %v3709_v54 }
 0x6c9   :  { %3745 = vmatpush.msrb.mxu2 %v9591_v31  ;;  %3899 = vmatpush.msra.mxu0 %v9591_v31  ;;  %v9697_v61 = vld [vmem:[#allocation3 + $0xd8] sm:$0xff] }
 0x6ca   :  { %v3580_v49 = vpop.f32.mrf.mxu0  ;;  %v3615_v39 = vpop.f32.mrf.mxu1  ;;  %3820 = vmatpush.msra.mxu1 %v9591_v31  ;;  %v9671_v8 = vld [vmem:[#allocation3 + $0xf0] sm:$0xff] }
 0x6cb   :  { %3586 = vst.msk [vmem:[#allocation3 + $0xf8] sm:$0xff] %vm3302_vm5, %v3580_v49  ;;  %3746 = vmatpush.msrb.mxu2 %v9596_v45  ;;  %3900 = vmatpush.msra.mxu0 %v9596_v45  ;;  %v3677_v49 = vsel %vm3674_vm8, 1, %v11619_v18  ;;  %v3668_v18 = vand.u32 31, %v11627_v56  ;;  %v9768_v37 = vld [vmem:[#allocation3 + $0x100] sm:$0xff]  ;;  %v3795_v56 = vadd.s32 %v9628_v25, %v3685_v0 }
 0x6cc   :  { %3624 = vst.msk [vmem:[#allocation3 + $0x108] sm:$0xff] %vm3302_vm5, %v3615_v39  ;;  %3821 = vmatpush.msra.mxu1 %v9596_v45  ;;  %v9726_v29 = vld [vmem:[#allocation3 + $0xb8] sm:$0xff]  ;;  %v9738_v39 = vld [vmem:[#allocation3 + $0xb0] sm:$0xff]  ;;  %v9751_v10 = vsel %vm3671_vm10, 2, %v3677_v49  ;;  %v9793_v49 = vld [vmem:[#allocation3 + $0x88] sm:$0xff] }
 0x6cd   :  { %3747 = vmatpush.msrb.mxu2 %v9609_v24  ;;  %3901 = vmatpush.msra.mxu0 %v9609_v24  ;;  %v3683_v50 = vmul.u32 3, %v9751_v10  ;;  %v9777_v27 = vand.u32 15, %v3668_v18  ;;  %v3689_v38 = vshra.s32 %v3668_v18, 4  ;;  %vm9813_vm3 = vcmp.eq.s32.totalorder %v3697_v63, %v3795_v56 }
 0x6ce   :  { %3822 = vmatpush.msra.mxu1 %v9609_v24 }
 0x6cf   :  { %3748 = vmatpush.msrb.mxu2 %v9625_v22  ;;  %3902 = vmatpush.msra.mxu0 %v9625_v22  ;;  %v3686_v62 = vsub.s32 %v9708_v60, %v3683_v50  ;;  %v3695_v60 = vshra.s32 %v9777_v27, 2  ;;  %v3710_v50 = vadd.s32 %v9623_v41, %v9751_v10  ;;  %v3698_v41 = vand.u32 3, %v9777_v27  ;;  %v5065_v27 = vld [vmem:[%s10201_s7 + $0x74] sm:$0xf] }
 0x6d0   :  { %3823 = vmatpush.msra.mxu1 %v9625_v22  ;;  %vm3705_vm7 = vcmp.eq.s32.totalorder %v9620_v36, %v3689_v38  ;;  %v4112_v38 = vadd.s32 6, %v11618_v32 }
 0x6d1   :  { %3749 = vmatpush.msrb.mxu2 %v9638_v2  ;;  %3903 = vmatpush.msra.mxu0 %v9638_v2  ;;  %v3721_v18 = vadd.s32 %v9647_v47, %v3686_v62 }
 0x6d2   :  { %v9649_v42 = vld [vmem:[#allocation3 + $0xf8] sm:$0xff]  ;;  %v3618_v51 = vpop.f32.mrf.mxu1  ;;  %3824 = vmatpush.msra.mxu1 %v9638_v2  ;;  %4878 = vmatmul.msk.f32.vlgmr.msrb.gmra.mxu2 %vm3725_vm14, %v10668_v44 }
 0x6d3   :  { %3754 = vmatpush.msrb.mxu3 %v9649_v42  ;;  %3829 = vmatpush.msra.mxu2 %v9649_v42  ;;  %3625 = vst.msk [vmem:[#allocation3 + $0x110] sm:$0xff] %vm3302_vm5, %v3618_v51  ;;  %v9755_v19 = vld [vmem:[#allocation3 + $0x108] sm:$0xff]  ;;  %v9762_v51 = vld [vmem:[#allocation3 + $0xa0] sm:$0xff]  ;;  %vm9847_vm13 = vcmp.eq.s32.totalorder %v3698_v41, %v3721_v18  ;;  %v4944_v18 = vld [vmem:[%s10201_s7 + $0x60] sm:$0xf] }
 0x6d4   :  { %3978 = vmatpush.msrb.mxu0 %v9649_v42  ;;  %4881 = vmatmul.msk.f32.vlgmr.msra.gmra.mxu1 %vm3800_vm6, %v10668_v44  ;;  %vm3713_vm6 = vcmp.eq.s32.totalorder %v3695_v60, %v3710_v50 }
 0x6d5   :  { %3755 = vmatpush.msrb.mxu3 %v9671_v8  ;;  %3830 = vmatpush.msra.mxu2 %v9671_v8  ;;  %vm9843_vm0 = vmand %vm3705_vm7, %vm3713_vm6 }
 0x6d6   :  { %3979 = vmatpush.msrb.mxu0 %v9671_v8  ;;  %vm3727_vm8 = vmand %vm9843_vm0, %vm9847_vm13 }
 0x6d7   :  { %3756 = vmatpush.msrb.mxu3 %v9682_v40  ;;  %3831 = vmatpush.msra.mxu2 %v9682_v40 }
 0x6d8   :  { %3980 = vmatpush.msrb.mxu0 %v9682_v40 }
 0x6d9   :  { %3757 = vmatpush.msrb.mxu3 %v9691_v30  ;;  %3832 = vmatpush.msra.mxu2 %v9691_v30 }
 0x6da   :  { %3981 = vmatpush.msrb.mxu0 %v9691_v30  ;;  %v3620_v52 = vpop.f32.mrf.mxu1  ;;  %v9744_v26 = vld [vmem:[#allocation3 + $0x110] sm:$0xff] }
 0x6db   :  { %3758 = vmatpush.msrb.mxu3 %v9697_v61  ;;  %3833 = vmatpush.msra.mxu2 %v9697_v61  ;;  %3626 = vst.msk [vmem:[#allocation3 + $0x118] sm:$0xff] %vm3302_vm5, %v3620_v52  ;;  %v3720_v52 = vadd.s32 %v9647_v47, %v3685_v0  ;;  %vm9800_vm5 = vmand %vm3704_vm12, %vm3712_vm1  ;;  %vm11640_vm1 = vcmask 261120   ;;  %v4946_v0 = vld [vmem:[%s10201_s7 + $0x68] sm:$0xf0]  ;;  %v4936_v47 = vld [vmem:[%s10201_s7 + $0x50] sm:$0xf] }
 0x6dc   :  { %3982 = vmatpush.msrb.mxu0 %v9697_v61  ;;  %vm3801_vm14 = vmand %vm9800_vm5, %vm9813_vm3 }
 0x6dd   :  { %3759 = vmatpush.msrb.mxu3 %v9703_v9  ;;  %3834 = vmatpush.msra.mxu2 %v9703_v9  ;;  %vm9804_vm2 = vcmp.eq.s32.totalorder %v3697_v63, %v3720_v52  ;;  %v5309_v63 = vmov 0.0   ;;  %v5066_v52 = vld [vmem:[%s10201_s7 + $0x74] sm:$0xf0] }
 0x6de   :  { %3983 = vmatpush.msrb.mxu0 %v9703_v9  ;;  %vm3726_vm11 = vmand %vm9800_vm5, %vm9804_vm2 }
 0x6df   :  { %3760 = vmatpush.msrb.mxu3 %v9712_v21  ;;  %3835 = vmatpush.msra.mxu2 %v9712_v21 }
 0x6e0   :  { %3984 = vmatpush.msrb.mxu0 %v9712_v21 }
 0x6e1   :  { %3761 = vmatpush.msrb.mxu3 %v9720_v46  ;;  %3836 = vmatpush.msra.mxu2 %v9720_v46 }
 0x6e2   :  { %3985 = vmatpush.msrb.mxu0 %v9720_v46  ;;  %v9729_v1 = vld [vmem:[#allocation3 + $0x118] sm:$0xff] }
 0x6e3   :  { %3762 = vmatpush.msrb.mxu3 %v9726_v29  ;;  %3837 = vmatpush.msra.mxu2 %v9726_v29 }
 0x6e4   :  { %3986 = vmatpush.msrb.mxu0 %v9726_v29  ;;  %3940 = vmatpush.msrb.mxu1 %v9729_v1 }
 0x6e5   :  { %3763 = vmatpush.msrb.mxu3 %v9738_v39  ;;  %3838 = vmatpush.msra.mxu2 %v9738_v39 }
 0x6e6   :  { %3987 = vmatpush.msrb.mxu0 %v9738_v39  ;;  %3941 = vmatpush.msrb.mxu1 %v9744_v26 }
 0x6e7   :  { %3764 = vmatpush.msrb.mxu3 %v9746_v53  ;;  %3839 = vmatpush.msra.mxu2 %v9746_v53 }
 0x6e8   :  { %3988 = vmatpush.msrb.mxu0 %v9746_v53  ;;  %3942 = vmatpush.msrb.mxu1 %v9755_v19 }
 0x6e9   :  { %3765 = vmatpush.msrb.mxu3 %v9762_v51  ;;  %3840 = vmatpush.msra.mxu2 %v9762_v51 }
 0x6ea   :  { %3989 = vmatpush.msrb.mxu0 %v9762_v51  ;;  %3943 = vmatpush.msrb.mxu1 %v9768_v37 }
 0x6eb   :  { %3766 = vmatpush.msrb.mxu3 %v9771_v11  ;;  %3841 = vmatpush.msra.mxu2 %v9771_v11 }
 0x6ec   :  { %3990 = vmatpush.msrb.mxu0 %v9771_v11  ;;  %4010 = vmatpush.msra.mxu1 %v9729_v1 }
 0x6ed   :  { %3767 = vmatpush.msrb.mxu3 %v9786_v13  ;;  %3842 = vmatpush.msra.mxu2 %v9786_v13 }
 0x6ee   :  { %3991 = vmatpush.msrb.mxu0 %v9786_v13  ;;  %4011 = vmatpush.msra.mxu1 %v9744_v26 }
 0x6ef   :  { %3768 = vmatpush.msrb.mxu3 %v9793_v49  ;;  %3843 = vmatpush.msra.mxu2 %v9793_v49 }
 0x6f0   :  { %3992 = vmatpush.msrb.mxu0 %v9793_v49  ;;  %4012 = vmatpush.msra.mxu1 %v9755_v19 }
 0x6f1   :  { %3769 = vmatpush.msrb.mxu3 %v9817_v15  ;;  %3844 = vmatpush.msra.mxu2 %v9817_v15 }
 0x6f2   :  { %3993 = vmatpush.msrb.mxu0 %v9817_v15  ;;  %4013 = vmatpush.msra.mxu1 %v9768_v37 }
 0x6f3   :  { %3786 = vmatpush.msra.mxu3 %v9729_v1  ;;  %3958 = vmatpush.msrb.mxu2 %v9523_v16  ;;  %v5064_v16 = vld [vmem:[%s10201_s7 + $0x64] sm:$0xf0] }
 0x6f4   :  { %4879 = vmatmul.msk.f32.vlgmr.msrb.gmra.mxu3 %vm3726_vm11, %v10668_v44  ;;  %4882 = vmatmul.msk.f32.vlgmr.msra.gmra.mxu2 %vm3801_vm14, %v10668_v44 }
 0x6f5   :  { %3787 = vmatpush.msra.mxu3 %v9744_v26  ;;  %3959 = vmatpush.msrb.mxu2 %v9530_v6  ;;  %v3796_v6 = vadd.s32 %v9628_v25, %v3686_v62  ;;  %v3872_v25 = vadd.s32 %v9606_v59, %v9751_v10  ;;  %v5063_v62 = vld [vmem:[%s10201_s7 + $0x64] sm:$0xf] }
 0x6f6   :  { %v4949_v54 = vor.u32 %v5063_v62, %v4946_v0  ;;  %v5073_v62 = vld [vmem:[%s10201_s7 + $0xb4] sm:$0xf]  ;;  %v4906_v0 = vld [vmem:[%s10201_s7 + $0x18] sm:$0xf0] }
 0x6f7   :  { %3788 = vmatpush.msra.mxu3 %v9755_v19  ;;  %3960 = vmatpush.msrb.mxu2 %v9536_v23  ;;  %v3730_v23 = vsel %vm3727_vm8, 1.0, %v5309_v63  ;;  %vm9867_vm10 = vcmp.eq.s32.totalorder %v3698_v41, %v3796_v6 }
 0x6f8   :  { %vm3802_vm5 = vmand %vm9843_vm0, %vm9867_vm10  ;;  %vm3875_vm0 = vcmp.eq.s32.totalorder %v3695_v60, %v3872_v25 }
 0x6f9   :  { %3789 = vmatpush.msra.mxu3 %v9768_v37  ;;  %3961 = vmatpush.msrb.mxu2 %v9541_v48  ;;  %vm9909_vm8 = vmand %vm3705_vm7, %vm3875_vm0  ;;  %v5016_v48 = vld [vmem:[%s10201_s7 + $0xf0] sm:$0xf] }
 0x6fb   :  { %3861 = vmatpush.msrb.mxu3 %v9729_v1  ;;  %3962 = vmatpush.msrb.mxu2 %v9546_v5  ;;  %v3870_v5 = vadd.s32 %v9606_v59, %v9604_v55  ;;  %v5092_v1 = vld [vmem:[%s10200_s6] ss:$0 sm:$0xff]  ;;  %v5081_v55 = vld [vmem:[%s10201_s7 + $0xf4] sm:$0xf] }
 0x6fc   :  { %4880 = vmatmul.msk.f32.vlgmr.msra.gmra.mxu3 %vm11640_vm1, %v3730_v23  ;;  %v5062_v23 = vld [vmem:[%s10201_s7 + $0x54] sm:$0xf0] }
 0x6fd   :  { %3862 = vmatpush.msrb.mxu3 %v9744_v26  ;;  %3963 = vmatpush.msrb.mxu2 %v9554_v28  ;;  %v11641_v28 = vshra.s32 %v9617_v34, 2 }
 0x6ff   :  { %3863 = vmatpush.msrb.mxu3 %v9755_v19  ;;  %3964 = vmatpush.msrb.mxu2 %v9560_v7  ;;  %vm3873_vm11 = vcmp.eq.s32.totalorder %v11641_v28, %v3870_v5  ;;  %v3871_v7 = vadd.s32 %v9606_v59, %v9718_v57  ;;  %v11644_v59 = vshra.s32 %v9734_v14, 2  ;;  %v4053_v14 = vadd.s32 2, %v11618_v32  ;;  %v5082_v5 = vld [vmem:[%s10201_s7 + $0xf4] sm:$0xf0]  ;;  %v5061_v28 = vld [vmem:[%s10201_s7 + $0x54] sm:$0xf] }
 0x700   :  { %vm9891_vm6 = vmand %vm3703_vm4, %vm3873_vm11  ;;  %v5017_v25 = vor.u32 %v5082_v5, %v5016_v48  ;;  %v5052_v48 = vld [vmem:[%s10201_s7 + $0x4] sm:$0xf0]  ;;  %v5051_v5 = vld [vmem:[%s10201_s7 + $0x4] sm:$0xf] }
 0x701   :  { %3864 = vmatpush.msrb.mxu3 %v9768_v37  ;;  %3965 = vmatpush.msrb.mxu2 %v9565_v33  ;;  %vm3879_vm14 = vmand %vm9891_vm6, %vm9677_vm15  ;;  %v3805_v33 = vsel %vm3802_vm5, 1.0, %v5309_v63  ;;  %vm3874_vm4 = vcmp.eq.s32.totalorder %v11644_v59, %v3871_v7  ;;  %v4938_v7 = vld [vmem:[%s10201_s7 + $0x58] sm:$0xf0] }
 0x702   :  { %4884 = vmatmul.msk.f32.vlgmr.msra.gmra.mxu0 %vm3879_vm14, %v10668_v44  ;;  %vm3881_vm15 = vmand %vm9909_vm8, %vm9847_vm13  ;;  %v4941_v59 = vor.u32 %v5061_v28, %v4938_v7  ;;  %v4968_v7 = vld [vmem:[%s10201_s7 + $0x90] sm:$0xf] }
 0x703   :  { %3908 = vmatpush.msra.mxu3 %v9649_v42  ;;  %3966 = vmatpush.msrb.mxu2 %v9570_v12  ;;  %vm9923_vm5 = vmand %vm3704_vm12, %vm3874_vm4  ;;  %v3884_v4 = vsel %vm3881_vm15, 1.0, %v5309_v63  ;;  %vm4051_vm4 = vcmask 517120   ;;  %v5018_v12 = vld [vmem:[%s10201_s7 + $0xf8] sm:$0xf0]  ;;  %vm4412_vm15 = vcmask 1041408  }
 0x704   :  { %4883 = vmatmul.msk.f32.vlgmr.msrb.gmra.mxu3 %vm11640_vm1, %v3805_v33  ;;  %vm3950_vm7 = vmand %vm9923_vm5, %vm9813_vm3  ;;  %v4937_v33 = vor.u32 %v5062_v23, %v4936_v47  ;;  %v4978_v47 = vld [vmem:[%s10201_s7 + $0xa8] sm:$0xf0]  ;;  %v4896_v23 = vld [vmem:[%s10201_s7] sm:$0xf] }
 0x705   :  { %3909 = vmatpush.msra.mxu3 %v9671_v8  ;;  %3967 = vmatpush.msrb.mxu2 %v9578_v35  ;;  %vm11649_vm13 = vmmov %vm11640_vm1  ;;  %v5008_v35 = vld [vmem:[%s10201_s7 + $0xe0] sm:$0xf] }
 0x706   :  { %4886 = vmatmul.msk.f32.vlgmr.msrb.gmra.mxu1 %vm11649_vm13, %v3884_v4  ;;  %vm3951_vm12 = vmand %vm9909_vm8, %vm9867_vm10  ;;  %v5021_v4 = vor.u32 %v5081_v55, %v5018_v12  ;;  %v5070_v55 = vld [vmem:[%s10201_s7 + $0x94] sm:$0xf0]  ;;  %v4970_v12 = vld [vmem:[%s10201_s7 + $0x98] sm:$0xf0]  ;;  %vm4083_vm8 = vcmask 1041920  }
 0x707   :  { %3910 = vmatpush.msra.mxu3 %v9682_v40  ;;  %3968 = vmatpush.msrb.mxu2 %v9584_v43  ;;  %vm3949_vm3 = vmand %vm9891_vm6, %vm9659_vm9  ;;  %v3954_v43 = vsel %vm3951_vm12, 1.0, %v5309_v63  ;;  %vm4027_vm6 = vcmask 64512  }
 0x708   :  { %vm11650_vm10 = vmmov %vm11640_vm1  ;;  %4389 = vmatpush.bf16.msra.mxu0 %v5021_v4  ;;  %v5068_v4 = vld [vmem:[%s10201_s7 + $0x84] sm:$0xf0] }
 0x709   :  { %3911 = vmatpush.msra.mxu3 %v9691_v30  ;;  %3969 = vmatpush.msrb.mxu2 %v9591_v31  ;;  %vm3880_vm9 = vmand %vm9923_vm5, %vm9804_vm2 }
 0x70a   :  { %4888 = vmatmul.msk.f32.vlgmr.msrb.gmra.mxu0 %vm3950_vm7, %v10668_v44  ;;  %vm4442_vm7 = vcmask 1024  }
 0x70b   :  { %3912 = vmatpush.msra.mxu3 %v9697_v61  ;;  %3970 = vmatpush.msrb.mxu2 %v9596_v45 }
 0x70d   :  { %3913 = vmatpush.msra.mxu3 %v9703_v9  ;;  %3971 = vmatpush.msrb.mxu2 %v9609_v24 }
 0x70e   :  { %4889 = vmatmul.msk.f32.vlgmr.msra.gmra.mxu1 %vm11650_vm10, %v3954_v43  ;;  %v5080_v43 = vld [vmem:[%s10201_s7 + $0xe4] sm:$0xf0] }
 0x70f   :  { %3914 = vmatpush.msra.mxu3 %v9712_v21  ;;  %3972 = vmatpush.msrb.mxu2 %v9625_v22 }
 0x711   :  { %3915 = vmatpush.msra.mxu3 %v9720_v46  ;;  %3973 = vmatpush.msrb.mxu2 %v9638_v2 }
 0x712   :  { %4887 = vmatmul.msk.f32.vlgmr.msrb.gmra.mxu2 %vm3949_vm3, %v10668_v44 }
 0x713   :  { %3916 = vmatpush.msra.mxu3 %v9726_v29 }
 0x715   :  { %3917 = vmatpush.msra.mxu3 %v9738_v39 }
 0x717   :  { %3918 = vmatpush.msra.mxu3 %v9746_v53  ;;  %v11651_v53 = vld [vmem:[#allocation6_spill] sm:$0xff] }
 0x718   :  { %vm4054_vm2 = vcmp.eq.s32.totalorder %v11651_v53, %v4053_v14  ;;  %vm4025_vm11 = vcmp.eq.s32.totalorder %v11651_v53, %v11618_v32  ;;  %vm4113_vm14 = vcmp.eq.s32.totalorder %v11651_v53, %v4112_v38  ;;  %v5058_v14 = vld [vmem:[%s10201_s7 + $0x34] sm:$0xf0]  ;;  %v5055_v38 = vld [vmem:[%s10201_s7 + $0x24] sm:$0xf] }
 0x719   :  { %3919 = vmatpush.msra.mxu3 %v9762_v51  ;;  %v4055_v19 = vsel %vm4054_vm2, 1.0, %v5309_v63  ;;  %v4026_v58 = vsel %vm4025_vm11, 1.0, %v5309_v63  ;;  %v4085_v51 = vadd.s32 4, %v11618_v32  ;;  %v4114_v37 = vsel %vm4113_vm14, 1.0, %v5309_v63  ;;  %v4952_v32 = vld [vmem:[%s10201_s7 + $0x70] sm:$0xf] }
 0x71a   :  { %v4953_v56 = vor.u32 %v5066_v52, %v4952_v32 }
 0x71b   :  { %3920 = vmatpush.msra.mxu3 %v9771_v11  ;;  %vm4086_vm0 = vcmp.eq.s32.totalorder %v11651_v53, %v4085_v51  ;;  %v4922_v53 = vld [vmem:[%s10201_s7 + $0x38] sm:$0xf0]  ;;  %v4914_v51 = vld [vmem:[%s10201_s7 + $0x28] sm:$0xf0] }
 0x71c   :  { %v4087_v11 = vsel %vm4086_vm0, 1.0, %v5309_v63  ;;  %v4945_v63 = vor.u32 %v5064_v16, %v4944_v18  ;;  %v4917_v52 = vor.u32 %v5055_v38, %v4914_v51  ;;  %v5071_v16 = vld [vmem:[%s10201_s7 + $0xa4] sm:$0xf] }
 0x71d   :  { %3921 = vmatpush.msra.mxu3 %v9786_v13  ;;  %v4954_v13 = vld [vmem:[%s10201_s7 + $0x78] sm:$0xf0]  ;;  %v4981_v28 = vor.u32 %v5071_v16, %v4978_v47 }
 0x71f   :  { %3922 = vmatpush.msra.mxu3 %v9793_v49  ;;  %v4957_v49 = vor.u32 %v5065_v27, %v4954_v13  ;;  %v4904_v27 = vld [vmem:[%s10201_s7 + $0x10] sm:$0xf] }
 0x721   :  { %3923 = vmatpush.msra.mxu3 %v9817_v15  ;;  %4376 = vmatpush.bf16.msra.mxu2 %v4957_v49  ;;  %v5053_v49 = vld [vmem:[%s10201_s7 + $0x14] sm:$0xf] }
 0x722   :  { %4885 = vmatmul.msk.f32.vlgmr.msra.gmra.mxu3 %vm3880_vm9, %v10668_v44 }
 0x725   :  { %4377 = vmatpush.bf16.msra.mxu2 %v4949_v54  ;;  %v4986_v54 = vld [vmem:[%s10201_s7 + $0xb8] sm:$0xf0] }
 0x729   :  { %4378 = vmatpush.bf16.msra.mxu2 %v4941_v59  ;;  %v5069_v59 = vld [vmem:[%s10201_s7 + $0x94] sm:$0xf] }
 0x751   :  { %v3826_v34 = vpop.f32.mrf.mxu1 }
 0x755   :  { %v3751_v45 = vpop.f32.mrf.mxu2 }
 0x777   :  { %v3771_v31 = vpop.f32.mrf.mxu3  ;;  %v3846_v22 = vpop.f32.mrf.mxu2 }
 0x778   :  { %v3847_v42 = vadd.f32 %v3846_v22, %v3826_v34  ;;  %v3772_v3 = vadd.f32 %v3771_v31, %v3751_v45  ;;  %v5059_v31 = vld [vmem:[%s10201_s7 + $0x44] sm:$0xf]  ;;  %v4930_v45 = vld [vmem:[%s10201_s7 + $0x48] sm:$0xf0] }
 0x779   :  { %v4933_v34 = vor.u32 %v5059_v31, %v4930_v45  ;;  %v5010_v22 = vld [vmem:[%s10201_s7 + $0xe8] sm:$0xf0]  ;;  %v4973_v45 = vor.u32 %v5069_v59, %v4970_v12 }
 0x77b   :  { %4379 = vmatpush.bf16.msra.mxu2 %v4933_v34  ;;  %v5067_v34 = vld [vmem:[%s10201_s7 + $0x84] sm:$0xf] }
 0x77f   :  { %v3791_v24 = vpop.f32.mrf.mxu3  ;;  %v3905_v36 = vpop.f32.mrf.mxu0 }
 0x780   :  { %v3792_v21 = vadd.f32 %v3791_v24, %v3772_v3  ;;  %v5009_v24 = vor.u32 %v5080_v43, %v5008_v35  ;;  %v5002_v3 = vld [vmem:[%s10201_s7 + $0xd8] sm:$0xf0]  ;;  %v4960_v35 = vld [vmem:[%s10201_s7 + $0x80] sm:$0xf]  ;;  %v4897_v43 = vor.u32 %v5052_v48, %v4896_v23 }
 0x783   :  { %v3945_v17 = vpop.f32.mrf.mxu1 }
 0x787   :  { %v3866_v2 = vpop.f32.mrf.mxu3  ;;  %v3995_v8 = vpop.f32.mrf.mxu0 }
 0x788   :  { %v3867_v40 = vadd.f32 %v3866_v2, %v3847_v42  ;;  %v5000_v2 = vld [vmem:[%s10201_s7 + $0xd0] sm:$0xf]  ;;  %v5078_v42 = vld [vmem:[%s10201_s7 + $0xd4] sm:$0xf0] }
 0x78a   :  { %v3869_v57 = vmax.f32 %v3792_v21, %v3867_v40 }
 0x78b   :  { %v4015_v9 = vpop.f32.mrf.mxu1 }
 0x795   :  { %v3975_v20 = vpop.f32.mrf.mxu2 }
 0x796   :  { %v3996_v30 = vadd.f32 %v3995_v8, %v3975_v20  ;;  %v5077_v20 = vld [vmem:[%s10201_s7 + $0xd4] sm:$0xf]  ;;  %v5001_v8 = vor.u32 %v5078_v42, %v5000_v2 }
 0x797   :  { %v5005_v40 = vor.u32 %v5077_v20, %v5002_v3 }
 0x798   :  { %v4016_v46 = vadd.f32 %v4015_v9, %v3996_v30  ;;  %v4928_v30 = vld [vmem:[%s10201_s7 + $0x40] sm:$0xf] }
 0x799   :  { %v4992_v9 = vld [vmem:[%s10201_s7 + $0xc0] sm:$0xf] }
 0x7a5   :  { %v3925_v61 = vpop.f32.mrf.mxu3 }
 0x7a6   :  { %v3926_v15 = vadd.f32 %v3925_v61, %v3905_v36  ;;  %v5079_v36 = vld [vmem:[%s10201_s7 + $0xe4] sm:$0xf]  ;;  %v5060_v61 = vld [vmem:[%s10201_s7 + $0x44] sm:$0xf0] }
 0x7a7   :  { %v4929_v21 = vor.u32 %v5060_v61, %v4928_v30  ;;  %v16_v30 = vstv %s10202_s10  ;;  %v4184_v61 = vld [vmem:[%s10203_s8] sm:$0x3] }
 0x7a8   :  { %v3946_v44 = vadd.f32 %v3945_v17, %v3926_v15  ;;  %v5013_v17 = vor.u32 %v5079_v36, %v5010_v22  ;;  %v5076_v15 = vld [vmem:[%s10201_s7 + $0xc4] sm:$0xf0]  ;;  %v4962_v36 = vld [vmem:[%s10201_s7 + $0x88] sm:$0xf0]  ;;  %17 = vst [vmem:[#allocation5] sm:$0x1] %v16_v30 }
 0x7aa   :  { %v3948_v29 = vmax.f32 %v3869_v57, %v3946_v44  ;;  %4390 = vmatpush.bf16.msra.mxu0 %v5013_v17  ;;  %v5075_v57 = vld [vmem:[%s10201_s7 + $0xc4] sm:$0xf]  ;;  %v4994_v44 = vld [vmem:[%s10201_s7 + $0xc8] sm:$0xf0]  ;;  %v4965_v17 = vor.u32 %v5067_v34, %v4962_v36 }
 0x7ac   :  { %v4018_v39 = vmax.f32 %v3948_v29, %v4016_v46  ;;  %v4993_v46 = vor.u32 %v5076_v15, %v4992_v9  ;;  %v4997_v29 = vor.u32 %v5075_v57, %v4994_v44  ;;  %v4186_v15 = vperm.slane %v4184_v61, 0 }
 0x7ad   :  { %v4187_v57 = vperm.slane %v4184_v61, 1 }
 0x7ae   :  { %v4023_v26 = vadd.f32 %v5092_v1, %v4018_v39  ;;  %4391 = vmatpush.bf16.msra.mxu0 %v5005_v40  ;;  %v4920_v1 = vld [vmem:[%s10201_s7 + $0x30] sm:$0xf]  ;;  %v5057_v39 = vld [vmem:[%s10201_s7 + $0x34] sm:$0xf] }
 0x7b0   :  { %v4024_v10 = vmax.f32 %v4023_v26, 0.0  ;;  %v4921_v26 = vor.u32 %v5058_v14, %v4920_v1 }
 0x7b2   :  { %4046 = vmatpush.msrb.mxu3 %v4024_v10  ;;  %4074 = vmatpush.msrb.mxu1 %v4024_v10 }
 0x7b3   :  { %4891 = vmatmul.msk.f32.vlgmr.msrb.gmra.mxu1 %vm4027_vm6, %v4055_v19  ;;  %4890 = vmatmul.msk.f32.vlgmr.msrb.gmra.mxu3 %vm4027_vm6, %v4026_v58  ;;  %v5056_v19 = vld [vmem:[%s10201_s7 + $0x24] sm:$0xf0]  ;;  %v4925_v58 = vor.u32 %v5057_v39, %v4922_v53 }
 0x7b4   :  { %4106 = vmatpush.msra.mxu3 %v4024_v10  ;;  %4133 = vmatpush.msra.mxu1 %v4024_v10  ;;  %v4912_v10 = vld [vmem:[%s10201_s7 + $0x20] sm:$0xf] }
 0x7b5   :  { %4392 = vmatpush.bf16.msra.mxu0 %v4997_v29  ;;  %4380 = vmatpush.bf16.msra.mxu2 %v4925_v58  ;;  %v4913_v32 = vor.u32 %v5056_v19, %v4912_v10  ;;  %v4404_v29 = vld [vmem:[%s10204_s9] sm:$0x3] }
 0x7b6   :  { %4350 = vmatpush.bf16.msrb.mxu3 %v4953_v56  ;;  %4363 = vmatpush.bf16.msrb.mxu1 %v5017_v25  ;;  %v5054_v56 = vld [vmem:[%s10201_s7 + $0x14] sm:$0xf0]  ;;  %v4898_v25 = vld [vmem:[%s10201_s7 + $0x8] sm:$0xf0]  ;;  %v4406_v53 = vperm.slane %v4404_v29, 0  ;;  %v4407_v10 = vperm.slane %v4404_v29, 1 }
 0x7b7   :  { %v4901_v31 = vor.u32 %v5051_v5, %v4898_v25 }
 0x7b9   :  { %4381 = vmatpush.bf16.msra.mxu2 %v4917_v52 }
 0x7ba   :  { %4351 = vmatpush.bf16.msrb.mxu3 %v4945_v63  ;;  %4364 = vmatpush.bf16.msrb.mxu1 %v5009_v24  ;;  %v4909_v63 = vor.u32 %v5053_v49, %v4906_v0  ;;  %v4961_v24 = vor.u32 %v5068_v4, %v4960_v35 }
 0x7bb   :  { %4893 = vmatmul.msk.f32.vlgmr.msra.gmra.mxu1 %vm4027_vm6, %v4114_v37  ;;  %4892 = vmatmul.msk.f32.vlgmr.msra.gmra.mxu3 %vm4027_vm6, %v4087_v11  ;;  %v4984_v37 = vld [vmem:[%s10201_s7 + $0xb0] sm:$0xf]  ;;  %v5074_v11 = vld [vmem:[%s10201_s7 + $0xb4] sm:$0xf0] }
 0x7bc   :  { %v4985_v13 = vor.u32 %v5074_v11, %v4984_v37 }
 0x7bd   :  { %4382 = vmatpush.bf16.msra.mxu2 %v4909_v63 }
 0x7be   :  { %4352 = vmatpush.bf16.msrb.mxu3 %v4937_v33  ;;  %4365 = vmatpush.bf16.msrb.mxu1 %v5001_v8  ;;  %v4969_v33 = vor.u32 %v5070_v55, %v4968_v7 }
 0x7c1   :  { %4383 = vmatpush.bf16.msra.mxu2 %v4901_v31 }
 0x7c2   :  { %4353 = vmatpush.bf16.msrb.mxu3 %v4929_v21  ;;  %4366 = vmatpush.bf16.msrb.mxu1 %v4993_v46 }
 0x7c6   :  { %4354 = vmatpush.bf16.msrb.mxu3 %v4921_v26  ;;  %4367 = vmatpush.bf16.msrb.mxu1 %v4985_v13 }
 0x7ca   :  { %4355 = vmatpush.bf16.msrb.mxu3 %v4913_v32 }
 0x830   :  { %v4076_v60 = vpop.f32.mrf.mxu1 }
 0x831   :  { %4080 = vrot.lane.b32.xlu0 %v4076_v60, %s5310_s30  ;;  %v4989_v60 = vor.u32 %v5073_v62, %v4986_v54  ;;  %v5093_v62 = vld [vmem:[#allocation5] ss:$0 sm:$0xff] }
 0x833   :  { %4393 = vmatpush.bf16.msra.mxu0 %v4989_v60 }
 0x836   :  { %v4048_v50 = vpop.f32.mrf.mxu3 }
 0x837   :  { %4052 = vst.msk [vmem:[#allocation4] sm:$0x3] %vm4051_vm4, %v4048_v50  ;;  %v4976_v50 = vld [vmem:[%s10201_s7 + $0xa0] sm:$0xf]  ;;  %4394 = vmatpush.bf16.msra.mxu0 %v4981_v28 }
 0x838   :  { %v4135_v41 = vpop.f32.mrf.mxu1 }
 0x839   :  { %4139 = vrot.lane.b32.xlu0 %v4135_v41, %s5310_s30  ;;  %v5072_v41 = vld [vmem:[%s10201_s7 + $0xa4] sm:$0xf0] }
 0x83a   :  { %v4977_v18 = vor.u32 %v5072_v41, %v4976_v50 }
 0x83b   :  { %4395 = vmatpush.bf16.msra.mxu0 %v4973_v45 }
 0x83c   :  { %4368 = vmatpush.bf16.msrb.mxu1 %v4977_v18 }
 0x83e   :  { %v4108_v6 = vpop.f32.mrf.mxu3 }
 0x83f   :  { %4111 = vst.msk [vmem:[#allocation4 + $0x2] sm:$0x3] %vm4051_vm4, %v4108_v6  ;;  %v4905_v6 = vor.u32 %v5054_v56, %v4904_v27  ;;  %4396 = vmatpush.bf16.msra.mxu0 %v4965_v17 }
 0x840   :  { %4369 = vmatpush.bf16.msrb.mxu1 %v4969_v33 }
 0x841   :  { %4356 = vmatpush.bf16.msrb.mxu3 %v4905_v6 }
 0x844   :  { %4370 = vmatpush.bf16.msrb.mxu1 %v4961_v24 }
 0x845   :  { %4357 = vmatpush.bf16.msrb.mxu3 %v4897_v43 }
 0x8a3   :  { %v4081_v22 = vpop.permute.xlu0 %4080 }
 0x8a4   :  { %4084 = vst.msk [vmem:[#allocation4] sm:$0x3] %vm4083_vm8, %v4081_v22 }
 0x8ab   :  { %v4140_v2 = vpop.permute.xlu0 %4139 }
 0x8ac   :  { %4142 = vst.msk [vmem:[#allocation4 + $0x2] sm:$0x3] %vm4083_vm8, %v4140_v2 }
 0x8b3   :  { %v4143_v42 = vld [vmem:[#allocation4] sm:$0xf] }
 0x8b4   :  { %4145 = vst [vmem:[#allocation1] ss:$4 sm:$0xff] %v4143_v42 }
 0x8bb   :  { %v4146_v20 = vld.sshfl [vmem:[#allocation1] sm:$0xff pattern:$0x73625140]  ;;  %v4147_v8 = vld.sshfl [vmem:[#allocation1 + $0x8] sm:$0xff pattern:$0x73625140] }
 0x8bc   :  { %v4150_v3 = vpack.c.bf16 %v4146_v20, %v4146_v20  ;;  %v4151_v40 = vpack.c.bf16 %v4147_v8, %v4147_v8 }
 0x8be   :  { %4358 = vmatmul.bf16.vlgmr.msrb.gmra.mxu3 %v4150_v3  ;;  %4384 = vmatmul.bf16.vlgmr.msra.gmra.mxu2 %v4150_v3 }
 0x8bf   :  { %4371 = vmatmul.bf16.vlgmr.msrb.gmra.mxu1 %v4151_v40  ;;  %4397 = vmatmul.bf16.vlgmr.msra.gmra.mxu0 %v4151_v40 }
 0x93c   :  { %v4372_v9 = vpop.f32.mrf.mxu1  ;;  %v4398_v21 = vpop.f32.mrf.mxu0 }
 0x941   :  { %v4359_v44 = vpop.f32.mrf.mxu3  ;;  %v4385_v46 = vpop.f32.mrf.mxu2 }
 0x942   :  { %v4360_v1 = vadd.f32 %v4359_v44, %v4186_v15  ;;  %v4386_v14 = vadd.f32 %v4385_v46, %v4187_v57 }
 0x944   :  { %v4373_v39 = vadd.f32 %v4372_v9, %v4360_v1  ;;  %v4399_v26 = vadd.f32 %v4398_v21, %v4386_v14  ;;  %v4374_v19 = vpop.f32.mrf.mxu1  ;;  %v4400_v58 = vpop.f32.mrf.mxu0 }
 0x946   :  { %v4402_v38 = vmax.f32 %v4373_v39, 0.0  ;;  %v4403_v51 = vmax.f32 %v4399_v26, 0.0 }
 0x948   :  { %v4410_v37 = vmul.f32 %v4406_v53, %v4402_v38  ;;  %v4411_v11 = vmul.f32 %v4407_v10, %v4403_v51 }
 0x949   :  { %v4361_v32 = vpop.f32.mrf.mxu3  ;;  %v4387_v52 = vpop.f32.mrf.mxu2 }
 0x94a   :  { %v4413_v27 = vsel %vm4412_vm15, %v4410_v37, 0.0  ;;  %v4414_v56 = vsel %vm4412_vm15, %v4411_v11, 0.0 }
 0x94b   :  { %v4415_v13 = vadd.f32 %v4414_v56, %v4413_v27 }
 0x94d   :  { %4416 = vadd.xlane.f32.xlu1 %v4415_v13 }
 0x9c0   :  { %v4417_v49 = vpop.xlane.xlu1 %4416 }
 0x9c1   :  { %v4422_v0 = vadd.f32 %v5093_v62, %v4417_v49 }
 0x9c3   :  { %v4423_v54 = vsub.f32 0.0, %v4422_v0 }
 0x9c5   :  { %v4424_v60 = vmul.f32 1.442695, %v4423_v54 }
 0x9c7   :  { %5094 = vpow2.f32 %v4424_v60 }
 0x9cd   :  { %v5095_v50 = vpop.eup %5094 }
 0x9ce   :  { %v4426_v41 = vadd.f32 1.0, %v5095_v50 }
 0x9d0   :  { %5096 = vrcp.f32 %v4426_v41  ;;  %v4438_v6 = vand.u32 2147483648, %v4426_v41  ;;  %v4436_v23 = vand.u32 2147483647, %v4426_v41  ;;  %vm4432_vm5 = vweird.f32 %v4426_v41 }
 0x9d2   :  { %v4439_v5 = vor.u32 1.1754944e-38, %v4438_v6  ;;  %vm4437_vm12 = vcmp.eq.f32.partialorder %v4436_v23, 8.507059e+37 }
 0x9d6   :  { %v5097_v18 = vpop.eup %5096 }
 0x9d7   :  { %v4428_v16 = vmul.f32 %v5097_v18, %v4426_v41  ;;  %vm4433_vm1 = vweird.f32 %v5097_v18 }
 0x9d8   :  { %vm4434_vm13 = vmor %vm4432_vm5, %vm4433_vm1 }
 0x9d9   :  { %v4429_v47 = vsub.f32 1.0, %v4428_v16 }
 0x9db   :  { %v4430_v63 = vmul.f32 %v5097_v18, %v4429_v47 }
 0x9dd   :  { %v4431_v48 = vadd.f32 %v5097_v18, %v4430_v63 }
 0x9df   :  { %v4435_v25 = vsel %vm4434_vm13, %v5097_v18, %v4431_v48 }
 0x9e0   :  { %v4440_v28 = vsel %vm4437_vm12, %v4439_v5, %v4435_v25 }
 0x9e1   :  { %4443 = vst.msk [vmem:[%s10205_s11] sm:$0x3] %vm4442_vm7, %v4440_v28 }

</bundles_post_ra>
